<compile_context>
chip_gen: v5e
topology: v5e:2x2
jax: 0.10.0
libtpu: 0.0.40
codegen_flags: <defaults>
</compile_context>

<pallas_src>
import jax
import jax.numpy as jnp
from jax import lax
from jax.experimental import pallas as pl
from jax.experimental.pallas import tpu as pltpu


_LANES = 128  # pad channels up to a multiple of the lane width / MXU dim


def _make_basic_block_kernel(H, W, Cp, TH):
    """Fused BasicBlock forward for one (batch, TH-row) output tile."""
    assert H % TH == 0
    KH = 3 * Cp          # per-kh-group contraction depth
    M2 = TH * W          # output rows of this tile, flattened

    def kernel(x_ref, w1_ref, b1_ref, w2_ref, b2_ref, out_ref,
               xpad_ref, col_ref):
        r = pl.program_id(1)
        nr = pl.num_programs(1)
        R0 = r * TH
        if TH % 8 == 0:
            R0 = pl.multiple_of(R0, 8)

        # ---- stage x rows [R0-2, R0+TH+2) into the haloed scratch; rows that
        #      fall outside the image stay zero (== the conv's padding=1).
        zrow = jnp.zeros((2, W + 2, Cp), xpad_ref.dtype)
        zcol = jnp.zeros((TH + 4, 1, Cp), xpad_ref.dtype)
        xpad_ref[0:2, :, :] = zrow
        xpad_ref[TH + 2:TH + 4, :, :] = zrow
        xpad_ref[:, 0:1, :] = zcol
        xpad_ref[:, W + 1:W + 2, :] = zcol
        xpad_ref[2:TH + 2, 1:W + 1, :] = x_ref[0, pl.ds(R0, TH), :, :]

        @pl.when(r > 0)
        def _():
            xpad_ref[0:2, 1:W + 1, :] = x_ref[0, pl.ds(R0 - 2, 2), :, :]

        @pl.when(r < nr - 1)
        def _():
            xpad_ref[TH + 2:TH + 4, 1:W + 1, :] = x_ref[0, pl.ds(R0 + TH, 2), :, :]

        def conv3x3(rows_out, w_ref, shift):
            # kh-grouped im2col: 3 matmuls with contraction 3*Cp each (bf16
            # inputs, f32 accumulation); col buffer is 3x smaller than full 9x.
            m = rows_out * W
            acc = None
            for kh in range(3):
                for kw in range(3):
                    col_ref[0:m, kw * Cp:(kw + 1) * Cp] = (
                        xpad_ref[kh:kh + rows_out, kw:kw + W, :].reshape(m, Cp))
                part = jnp.dot(col_ref[0:m, :], w_ref[kh * KH:(kh + 1) * KH, :],
                               preferred_element_type=jnp.float32)
                acc = part if acc is None else acc + part
            return acc + shift

        # ---- conv1 (BN1 scale folded into w1) + BN1 shift + ReLU, over TH+2
        #      rows (1-row y1 halo for conv2), in f32.
        y1 = jnp.maximum(conv3x3(TH + 2, w1_ref, b1_ref[0, :]), 0.0)

        # ---- restage y1 (bf16) into the same scratch for conv2.  conv2 only
        #      reads rows 0..TH+1, so the stale x halo rows below are unused.
        xpad_ref[0:TH + 2, 1:W + 1, :] = (
            y1.astype(xpad_ref.dtype).reshape(TH + 2, W, Cp))

        # conv2 zero-pads y1 at the true image boundary -> zero those halo rows.
        @pl.when(r == 0)
        def _():
            xpad_ref[0:1, :, :] = jnp.zeros((1, W + 2, Cp), xpad_ref.dtype)

        @pl.when(r == nr - 1)
        def _():
            xpad_ref[TH + 1:TH + 2, :, :] = jnp.zeros((1, W + 2, Cp), xpad_ref.dtype)

        # ---- conv2 + BN2 shift + residual (from the resident x block) + ReLU.
        res = x_ref[0, pl.ds(R0, TH), :, :].astype(jnp.float32).reshape(M2, Cp)
        y2 = conv3x3(TH, w2_ref, b2_ref[0, :]) + res
        out_ref[...] = jnp.maximum(y2, 0.0).astype(out_ref.dtype).reshape(1, TH, W, Cp)

    return kernel


def _fold_bn(gamma, beta, mean, var, eps=1e-5):
    scale = gamma * lax.rsqrt(var + eps)
    shift = beta - mean * scale
    return scale, shift


def prepare_block_params(params, C, Cp):
    """Fold BN scales into conv weights; pad channels; im2col layout; bf16 cast.

    Call once per block and cache the result (kept out of the per-call path)."""
    def prep(w_oihw, scale):
        w = jnp.transpose(w_oihw, (2, 3, 1, 0)).astype(jnp.float32)  # (3,3,Cin,Cout)
        w = w * scale[None, None, None, :]                            # fold BN scale
        wp = jnp.zeros((3, 3, Cp, Cp), jnp.float32).at[:, :, :C, :C].set(w)
        return wp.reshape(9 * Cp, Cp).astype(jnp.bfloat16)            # im2col layout

    s1, b1 = _fold_bn(params["bn1_gamma"], params["bn1_beta"],
                      params["bn1_mean"], params["bn1_var"])
    s2, b2 = _fold_bn(params["bn2_gamma"], params["bn2_beta"],
                      params["bn2_mean"], params["bn2_var"])
    w1 = prep(params["conv1_w"], s1)
    w2 = prep(params["conv2_w"], s2)
    b1p = jnp.zeros((1, Cp), jnp.float32).at[0, :C].set(b1)
    b2p = jnp.zeros((1, Cp), jnp.float32).at[0, :C].set(b2)
    return w1, b1p, w2, b2p


@jax.jit
def basic_block_forward_nhwc(x_nhwc, w1, b1, w2, b2):
    """Core forward. x_nhwc: (N, H, W, Cp) bf16, Cp % 128 == 0. Returns bf16."""
    N, H, W, Cp = x_nhwc.shape
    TH = 8 if H % 8 == 0 else H          # row-tile height (falls back to whole H)

    # VMEM budget derived from the actual tile sizes (per-generation: capped at
    # v7x's 64 MiB physical; v5e/v6e have 128 MiB so the cap is conservative).
    est = (2 * H * W * Cp * 2                  # x block, double-buffered bf16
           + 2 * 2 * 9 * Cp * Cp * 2           # conv1/conv2 weights, double-buffered
           + 2 * 2 * Cp * 4                    # BN shifts
           + 2 * TH * W * Cp * 2               # output block, double-buffered bf16
           + (TH + 4) * (W + 2) * Cp * 2       # haloed staging scratch
           + (TH + 2) * W * 3 * Cp * 2         # kh-group im2col scratch
           + 4 * (TH + 2) * W * Cp * 4)        # f32 matmul accumulators / temps
    vmem_limit = min(max(int(est * 1.5) + (2 << 20), 32 << 20), 64 << 20)

    kernel = _make_basic_block_kernel(H, W, Cp, TH)
    return pl.pallas_call(
        kernel,
        out_shape=jax.ShapeDtypeStruct((N, H, W, Cp), jnp.bfloat16),
        grid_spec=pltpu.PrefetchScalarGridSpec(
            num_scalar_prefetch=0,
            grid=(N, H // TH),
            in_specs=[
                # x: full image per batch element, resident across the row axis
                # (also supplies the conv halo rows and the residual).
                pl.BlockSpec((1, H, W, Cp), lambda n, r: (n, 0, 0, 0)),
                pl.BlockSpec((9 * Cp, Cp),  lambda n, r: (0, 0)),   # w1 (BN1 folded)
                pl.BlockSpec((1, Cp),       lambda n, r: (0, 0)),   # bn1 shift
                pl.BlockSpec((9 * Cp, Cp),  lambda n, r: (0, 0)),   # w2 (BN2 folded)
                pl.BlockSpec((1, Cp),       lambda n, r: (0, 0)),   # bn2 shift
            ],
            out_specs=pl.BlockSpec((1, TH, W, Cp), lambda n, r: (n, r, 0, 0)),
            scratch_shapes=[
                pltpu.VMEM((TH + 4, W + 2, Cp), jnp.bfloat16),      # haloed staging
                pltpu.VMEM(((TH + 2) * W, 3 * Cp), jnp.bfloat16),   # kh-group im2col
            ],
        ),
        compiler_params=pltpu.CompilerParams(
            dimension_semantics=("parallel", "arbitrary"),
            vmem_limit_bytes=vmem_limit,
        ),
    )(x_nhwc, w1, b1, w2, b2)


def basic_block_forward(x_nchw, params):
    """PyTorch-convention wrapper: NCHW float32 in/out.

    For chained blocks, keep activations NHWC + channel-padded bf16 and call
    basic_block_forward_nhwc directly with cached prepare_block_params output."""
    x_nchw = x_nchw.astype(jnp.float32)
    N, C, H, W = x_nchw.shape
    Cp = -(-C // _LANES) * _LANES

    prepped = prepare_block_params(params, C, Cp)   # cache this across calls

    x = jnp.transpose(x_nchw, (0, 2, 3, 1))                        # -> NHWC
    if Cp != C:
        x = jnp.pad(x, ((0, 0), (0, 0), (0, 0), (0, Cp - C)))      # lane-pad channels
    out_nhwc = basic_block_forward_nhwc(x.astype(jnp.bfloat16), *prepped)

    out_nhwc = out_nhwc[..., :C].astype(jnp.float32)               # drop pad, f32
    return jnp.transpose(out_nhwc, (0, 3, 1, 2))                   # back to NCHW


# ---------------------------------------------------------------------------
# References for correctness checks.
# ---------------------------------------------------------------------------
def _ref_forward(x, params):
    """Pure-f32 reference matching the PyTorch module (eval mode), NCHW."""
    def conv3x3(x, w):
        return lax.conv_general_dilated(
            x, w, window_strides=(1, 1), padding=((1, 1), (1, 1)),
            dimension_numbers=("NCHW", "OIHW", "NCHW"))

    def bn(x, g, b, m, v, eps=1e-5):
        g = g[None, :, None, None]; b = b[None, :, None, None]
        m = m[None, :, None, None]; v = v[None, :, None, None]
        return (x - m) * lax.rsqrt(v + eps) * g + b

    out = conv3x3(x, params["conv1_w"])
    out = jnp.maximum(bn(out, params["bn1_gamma"], params["bn1_beta"],
                         params["bn1_mean"], params["bn1_var"]), 0.0)
    out = conv3x3(out, params["conv2_w"])
    out = bn(out, params["bn2_gamma"], params["bn2_beta"],
             params["bn2_mean"], params["bn2_var"])
    return jnp.maximum(out + x, 0.0)


def _matched_ref_forward(x_nchw, params):
    """Reference with the same bf16-input / f32-accumulate / bf16-output
    precision as the kernel."""
    N, C, H, W = x_nchw.shape
    Cp = -(-C // _LANES) * _LANES
    x = jnp.transpose(x_nchw, (0, 2, 3, 1)).astype(jnp.float32)
    if Cp != C:
        x = jnp.pad(x, ((0, 0), (0, 0), (0, 0), (0, Cp - C)))
    x = x.astype(jnp.bfloat16)
    w1, b1, w2, b2 = prepare_block_params(params, C, Cp)

    def conv(xb, wmat):
        return lax.conv_general_dilated(
            xb, wmat.reshape(3, 3, Cp, Cp), window_strides=(1, 1),
            padding=((1, 1), (1, 1)),
            dimension_numbers=("NHWC", "HWIO", "NHWC"),
            preferred_element_type=jnp.float32)

    y1 = jnp.maximum(conv(x, w1) + b1[0], 0.0)
    y2 = conv(y1.astype(jnp.bfloat16), w2) + b2[0] + x.astype(jnp.float32)
    out = jnp.maximum(y2, 0.0).astype(jnp.bfloat16).astype(jnp.float32)[..., :C]
    return jnp.transpose(out, (0, 3, 1, 2))


def _init_params(key, planes):
    ks = jax.random.split(key, 8)
    return {
        "conv1_w":  0.1 * jax.random.normal(ks[0], (planes, planes, 3, 3), jnp.float32),
        "conv2_w":  0.1 * jax.random.normal(ks[1], (planes, planes, 3, 3), jnp.float32),
        "bn1_gamma": 1.0 + 0.1 * jax.random.normal(ks[2], (planes,), jnp.float32),
        "bn1_beta":  0.1 * jax.random.normal(ks[3], (planes,), jnp.float32),
        "bn1_mean":  0.1 * jax.random.normal(ks[4], (planes,), jnp.float32),
        "bn1_var":   jax.random.uniform(ks[5], (planes,), jnp.float32, 0.5, 1.5),
        "bn2_gamma": 1.0 + 0.1 * jax.random.normal(ks[6], (planes,), jnp.float32),
        "bn2_beta":  0.1 * jax.random.normal(ks[7], (planes,), jnp.float32),
        "bn2_mean":  jnp.zeros((planes,), jnp.float32) + 0.05,
        "bn2_var":   jnp.ones((planes,), jnp.float32) * 0.9,
    }


if __name__ == "__main__":
    key = jax.random.PRNGKey(0)
    k_x, k_p = jax.random.split(key)

    N, C, H, W = 2, 4, 16, 16          # inplanes == planes == 4, stride=1
    x = jax.random.normal(k_x, (N, C, H, W), jnp.float32)
    params = _init_params(k_p, C)

    out = jax.block_until_ready(basic_block_forward(x, params))
    assert out.shape == (N, C, H, W)

    # Same bf16-MXU-input / f32-accumulate / bf16-output precision as the kernel.
    matched = _matched_ref_forward(x, params)
    assert jnp.allclose(out, matched, atol=2e-2, rtol=2e-2), \
        "mismatch vs matched-precision reference"

    # Full-f32 PyTorch-module semantics; tolerance covers bf16 rounding.
    ref = _ref_forward(x, params)
    assert jnp.allclose(out, ref, atol=6e-2, rtol=6e-2), "mismatch vs f32 reference"

    print("KERNEL_OK")
</pallas_src>

<mosaic_0001>
module attributes {stable_mosaic.version = 11 : i64} {
  func.func @kernel(%arg0: i32, %arg1: i32, %arg2: memref<1x16x16x128xbf16, #tpu.memory_space<vmem>>, %arg3: memref<1152x128xbf16, #tpu.memory_space<vmem>>, %arg4: memref<1x128xf32, #tpu.memory_space<vmem>>, %arg5: memref<1152x128xbf16, #tpu.memory_space<vmem>>, %arg6: memref<1x128xf32, #tpu.memory_space<vmem>>, %arg7: memref<1x8x16x128xbf16, #tpu.memory_space<vmem>>, %arg8: memref<12x18x128xbf16, #tpu.memory_space<vmem>>, %arg9: memref<160x384xbf16, #tpu.memory_space<vmem>>) attributes {dimension_semantics = [#tpu.dimension_semantics<parallel>, #tpu.dimension_semantics<arbitrary>], iteration_bounds = array<i64: 2, 2>, scalar_prefetch = 0 : i64, scratch_operands = 2 : i64, tpu.core_type = #tpu.core_type<tc>, window_params = [{transform_indices = @transform_0, window_bounds = array<i64: 1, 16, 16, 128>}, {pipeline_mode = #tpu.pipeline_mode<synchronous>, transform_indices = @transform_1, window_bounds = array<i64: 1152, 128>}, {pipeline_mode = #tpu.pipeline_mode<synchronous>, transform_indices = @transform_2, window_bounds = array<i64: 1, 128>}, {pipeline_mode = #tpu.pipeline_mode<synchronous>, transform_indices = @transform_3, window_bounds = array<i64: 1152, 128>}, {pipeline_mode = #tpu.pipeline_mode<synchronous>, transform_indices = @transform_4, window_bounds = array<i64: 1, 128>}, {transform_indices = @transform_5, window_bounds = array<i64: 1, 8, 16, 128>}]} {
    %c8_i32 = arith.constant 8 : i32
    %0 = arith.muli %arg1, %c8_i32 : i32
    %1 = tpu.assume_multiple %0, 8 : i32
    %cst = arith.constant 0.000000e+00 : bf16
    %2 = vector.broadcast %cst : bf16 to vector<2x18x128xbf16>
    %cst_0 = arith.constant 0.000000e+00 : bf16
    %3 = vector.broadcast %cst_0 : bf16 to vector<12x1x128xbf16>
    %c0 = arith.constant 0 : index
    %c0_1 = arith.constant 0 : index
    %c0_2 = arith.constant 0 : index
    %4 = vector.load %arg8[%c0, %c0_1, %c0_2] : memref<12x18x128xbf16, #tpu.memory_space<vmem>>, vector<2x18x128xbf16>
    tpu.vector_store %arg8[%c0, %c0_1, %c0_2], %2 {strides = array<i32>} : memref<12x18x128xbf16, #tpu.memory_space<vmem>>, vector<2x18x128xbf16>,
    %c10 = arith.constant 10 : index
    %c0_3 = arith.constant 0 : index
    %c0_4 = arith.constant 0 : index
    %5 = vector.load %arg8[%c10, %c0_3, %c0_4] : memref<12x18x128xbf16, #tpu.memory_space<vmem>>, vector<2x18x128xbf16>
    tpu.vector_store %arg8[%c10, %c0_3, %c0_4], %2 {strides = array<i32>} : memref<12x18x128xbf16, #tpu.memory_space<vmem>>, vector<2x18x128xbf16>,
    %c0_5 = arith.constant 0 : index
    %c0_6 = arith.constant 0 : index
    %c0_7 = arith.constant 0 : index
    %6 = vector.load %arg8[%c0_5, %c0_6, %c0_7] : memref<12x18x128xbf16, #tpu.memory_space<vmem>>, vector<12x1x128xbf16>
    tpu.vector_store %arg8[%c0_5, %c0_6, %c0_7], %3 {strides = array<i32>} : memref<12x18x128xbf16, #tpu.memory_space<vmem>>, vector<12x1x128xbf16>,
    %c0_8 = arith.constant 0 : index
    %c17 = arith.constant 17 : index
    %c0_9 = arith.constant 0 : index
    %7 = vector.load %arg8[%c0_8, %c17, %c0_9] : memref<12x18x128xbf16, #tpu.memory_space<vmem>>, vector<12x1x128xbf16>
    tpu.vector_store %arg8[%c0_8, %c17, %c0_9], %3 {strides = array<i32>} : memref<12x18x128xbf16, #tpu.memory_space<vmem>>, vector<12x1x128xbf16>,
    %c0_10 = arith.constant 0 : index
    %8 = arith.index_cast %1 : i32 to index
    %c0_11 = arith.constant 0 : index
    %c0_12 = arith.constant 0 : index
    %9 = vector.load %arg2[%c0_10, %8, %c0_11, %c0_12] : memref<1x16x16x128xbf16, #tpu.memory_space<vmem>>, vector<1x8x16x128xbf16>
    %10 = vector.shape_cast %9 : vector<1x8x16x128xbf16> to vector<8x16x128xbf16>
    %c2 = arith.constant 2 : index
    %c1 = arith.constant 1 : index
    %c0_13 = arith.constant 0 : index
    %11 = vector.load %arg8[%c2, %c1, %c0_13] : memref<12x18x128xbf16, #tpu.memory_space<vmem>>, vector<8x16x128xbf16>
    tpu.vector_store %arg8[%c2, %c1, %c0_13], %10 {strides = array<i32>} : memref<12x18x128xbf16, #tpu.memory_space<vmem>>, vector<8x16x128xbf16>,
    %c0_i32 = arith.constant 0 : i32
    %12 = arith.cmpi sgt, %arg1, %c0_i32 : i32
    %13 = arith.extui %12 : i1 to i32
    %c0_i32_14 = arith.constant 0 : i32
    %14 = arith.cmpi ne, %13, %c0_i32_14 : i32
    scf.if %14 {
      %c2_i32 = arith.constant 2 : i32
      %126 = arith.subi %1, %c2_i32 : i32
      %c0_152 = arith.constant 0 : index
      %127 = arith.index_cast %126 : i32 to index
      %c0_153 = arith.constant 0 : index
      %c0_154 = arith.constant 0 : index
      %128 = vector.load %arg2[%c0_152, %127, %c0_153, %c0_154] : memref<1x16x16x128xbf16, #tpu.memory_space<vmem>>, vector<1x2x16x128xbf16>
      %129 = vector.shape_cast %128 : vector<1x2x16x128xbf16> to vector<2x16x128xbf16>
      %c0_155 = arith.constant 0 : index
      %c1_156 = arith.constant 1 : index
      %c0_157 = arith.constant 0 : index
      %130 = vector.load %arg8[%c0_155, %c1_156, %c0_157] : memref<12x18x128xbf16, #tpu.memory_space<vmem>>, vector<2x16x128xbf16>
      tpu.vector_store %arg8[%c0_155, %c1_156, %c0_157], %129 {strides = array<i32>} : memref<12x18x128xbf16, #tpu.memory_space<vmem>>, vector<2x16x128xbf16>,
    } else {
    }
    %c1_i32 = arith.constant 1 : i32
    %15 = arith.cmpi slt, %arg1, %c1_i32 : i32
    %16 = arith.extui %15 : i1 to i32
    %c0_i32_15 = arith.constant 0 : i32
    %17 = arith.cmpi ne, %16, %c0_i32_15 : i32
    scf.if %17 {
      %c8_i32_152 = arith.constant 8 : i32
      %126 = arith.addi %1, %c8_i32_152 : i32
      %c0_153 = arith.constant 0 : index
      %127 = arith.index_cast %126 : i32 to index
      %c0_154 = arith.constant 0 : index
      %c0_155 = arith.constant 0 : index
      %128 = vector.load %arg2[%c0_153, %127, %c0_154, %c0_155] : memref<1x16x16x128xbf16, #tpu.memory_space<vmem>>, vector<1x2x16x128xbf16>
      %129 = vector.shape_cast %128 : vector<1x2x16x128xbf16> to vector<2x16x128xbf16>
      %c10_156 = arith.constant 10 : index
      %c1_157 = arith.constant 1 : index
      %c0_158 = arith.constant 0 : index
      %130 = vector.load %arg8[%c10_156, %c1_157, %c0_158] : memref<12x18x128xbf16, #tpu.memory_space<vmem>>, vector<2x16x128xbf16>
      tpu.vector_store %arg8[%c10_156, %c1_157, %c0_158], %129 {strides = array<i32>} : memref<12x18x128xbf16, #tpu.memory_space<vmem>>, vector<2x16x128xbf16>,
    } else {
    }
    %c0_16 = arith.constant 0 : index
    %c0_17 = arith.constant 0 : index
    %18 = vector.load %arg4[%c0_16, %c0_17] : memref<1x128xf32, #tpu.memory_space<vmem>>, vector<1x128xf32>
    %19 = vector.shape_cast %18 : vector<1x128xf32> to vector<128xf32>
    %c0_18 = arith.constant 0 : index
    %c0_19 = arith.constant 0 : index
    %c0_20 = arith.constant 0 : index
    %20 = vector.load %arg8[%c0_18, %c0_19, %c0_20] : memref<12x18x128xbf16, #tpu.memory_space<vmem>>, vector<10x16x128xbf16>
    %21 = vector.shape_cast %20 : vector<10x16x128xbf16> to vector<160x128xbf16>
    %c0_21 = arith.constant 0 : index
    %c0_22 = arith.constant 0 : index
    %22 = vector.load %arg9[%c0_21, %c0_22] : memref<160x384xbf16, #tpu.memory_space<vmem>>, vector<160x128xbf16>
    tpu.vector_store %arg9[%c0_21, %c0_22], %21 {strides = array<i32>} : memref<160x384xbf16, #tpu.memory_space<vmem>>, vector<160x128xbf16>,
    %c0_23 = arith.constant 0 : index
    %c1_24 = arith.constant 1 : index
    %c0_25 = arith.constant 0 : index
    %23 = vector.load %arg8[%c0_23, %c1_24, %c0_25] : memref<12x18x128xbf16, #tpu.memory_space<vmem>>, vector<10x16x128xbf16>
    %24 = vector.shape_cast %23 : vector<10x16x128xbf16> to vector<160x128xbf16>
    %c0_26 = arith.constant 0 : index
    %c128 = arith.constant 128 : index
    %25 = vector.load %arg9[%c0_26, %c128] : memref<160x384xbf16, #tpu.memory_space<vmem>>, vector<160x128xbf16>
    tpu.vector_store %arg9[%c0_26, %c128], %24 {strides = array<i32>} : memref<160x384xbf16, #tpu.memory_space<vmem>>, vector<160x128xbf16>,
    %c0_27 = arith.constant 0 : index
    %c2_28 = arith.constant 2 : index
    %c0_29 = arith.constant 0 : index
    %26 = vector.load %arg8[%c0_27, %c2_28, %c0_29] : memref<12x18x128xbf16, #tpu.memory_space<vmem>>, vector<10x16x128xbf16>
    %27 = vector.shape_cast %26 : vector<10x16x128xbf16> to vector<160x128xbf16>
    %c0_30 = arith.constant 0 : index
    %c256 = arith.constant 256 : index
    %28 = vector.load %arg9[%c0_30, %c256] : memref<160x384xbf16, #tpu.memory_space<vmem>>, vector<160x128xbf16>
    tpu.vector_store %arg9[%c0_30, %c256], %27 {strides = array<i32>} : memref<160x384xbf16, #tpu.memory_space<vmem>>, vector<160x128xbf16>,
    %c0_31 = arith.constant 0 : index
    %c0_32 = arith.constant 0 : index
    %29 = vector.load %arg9[%c0_31, %c0_32] : memref<160x384xbf16, #tpu.memory_space<vmem>>, vector<160x384xbf16>
    %c0_33 = arith.constant 0 : index
    %c0_34 = arith.constant 0 : index
    %30 = vector.load %arg3[%c0_33, %c0_34] : memref<1152x128xbf16, #tpu.memory_space<vmem>>, vector<384x128xbf16>
    %cst_35 = arith.constant dense<0.000000e+00> : vector<160x128xf32>
    %31 = tpu.matmul %29, %30, %cst_35 {dimension_numbers = #tpu.dot_dimension_numbers<[1], [0], [0], [1], [0, 0, 1, 1], [], []>} : vector<160x384xbf16>, vector<384x128xbf16>, vector<160x128xf32> -> vector<160x128xf32>
    %c1_36 = arith.constant 1 : index
    %c0_37 = arith.constant 0 : index
    %c0_38 = arith.constant 0 : index
    %32 = vector.load %arg8[%c1_36, %c0_37, %c0_38] : memref<12x18x128xbf16, #tpu.memory_space<vmem>>, vector<10x16x128xbf16>
    %33 = vector.shape_cast %32 : vector<10x16x128xbf16> to vector<160x128xbf16>
    %c0_39 = arith.constant 0 : index
    %c0_40 = arith.constant 0 : index
    %34 = vector.load %arg9[%c0_39, %c0_40] : memref<160x384xbf16, #tpu.memory_space<vmem>>, vector<160x128xbf16>
    tpu.vector_store %arg9[%c0_39, %c0_40], %33 {strides = array<i32>} : memref<160x384xbf16, #tpu.memory_space<vmem>>, vector<160x128xbf16>,
    %c1_41 = arith.constant 1 : index
    %c1_42 = arith.constant 1 : index
    %c0_43 = arith.constant 0 : index
    %35 = vector.load %arg8[%c1_41, %c1_42, %c0_43] : memref<12x18x128xbf16, #tpu.memory_space<vmem>>, vector<10x16x128xbf16>
    %36 = vector.shape_cast %35 : vector<10x16x128xbf16> to vector<160x128xbf16>
    %c0_44 = arith.constant 0 : index
    %c128_45 = arith.constant 128 : index
    %37 = vector.load %arg9[%c0_44, %c128_45] : memref<160x384xbf16, #tpu.memory_space<vmem>>, vector<160x128xbf16>
    tpu.vector_store %arg9[%c0_44, %c128_45], %36 {strides = array<i32>} : memref<160x384xbf16, #tpu.memory_space<vmem>>, vector<160x128xbf16>,
    %c1_46 = arith.constant 1 : index
    %c2_47 = arith.constant 2 : index
    %c0_48 = arith.constant 0 : index
    %38 = vector.load %arg8[%c1_46, %c2_47, %c0_48] : memref<12x18x128xbf16, #tpu.memory_space<vmem>>, vector<10x16x128xbf16>
    %39 = vector.shape_cast %38 : vector<10x16x128xbf16> to vector<160x128xbf16>
    %c0_49 = arith.constant 0 : index
    %c256_50 = arith.constant 256 : index
    %40 = vector.load %arg9[%c0_49, %c256_50] : memref<160x384xbf16, #tpu.memory_space<vmem>>, vector<160x128xbf16>
    tpu.vector_store %arg9[%c0_49, %c256_50], %39 {strides = array<i32>} : memref<160x384xbf16, #tpu.memory_space<vmem>>, vector<160x128xbf16>,
    %c0_51 = arith.constant 0 : index
    %c0_52 = arith.constant 0 : index
    %41 = vector.load %arg9[%c0_51, %c0_52] : memref<160x384xbf16, #tpu.memory_space<vmem>>, vector<160x384xbf16>
    %c384 = arith.constant 384 : index
    %c0_53 = arith.constant 0 : index
    %42 = vector.load %arg3[%c384, %c0_53] : memref<1152x128xbf16, #tpu.memory_space<vmem>>, vector<384x128xbf16>
    %cst_54 = arith.constant dense<0.000000e+00> : vector<160x128xf32>
    %43 = tpu.matmul %41, %42, %cst_54 {dimension_numbers = #tpu.dot_dimension_numbers<[1], [0], [0], [1], [0, 0, 1, 1], [], []>} : vector<160x384xbf16>, vector<384x128xbf16>, vector<160x128xf32> -> vector<160x128xf32>
    %44 = arith.addf %31, %43 : vector<160x128xf32>
    %c2_55 = arith.constant 2 : index
    %c0_56 = arith.constant 0 : index
    %c0_57 = arith.constant 0 : index
    %45 = vector.load %arg8[%c2_55, %c0_56, %c0_57] : memref<12x18x128xbf16, #tpu.memory_space<vmem>>, vector<10x16x128xbf16>
    %46 = vector.shape_cast %45 : vector<10x16x128xbf16> to vector<160x128xbf16>
    %c0_58 = arith.constant 0 : index
    %c0_59 = arith.constant 0 : index
    %47 = vector.load %arg9[%c0_58, %c0_59] : memref<160x384xbf16, #tpu.memory_space<vmem>>, vector<160x128xbf16>
    tpu.vector_store %arg9[%c0_58, %c0_59], %46 {strides = array<i32>} : memref<160x384xbf16, #tpu.memory_space<vmem>>, vector<160x128xbf16>,
    %c2_60 = arith.constant 2 : index
    %c1_61 = arith.constant 1 : index
    %c0_62 = arith.constant 0 : index
    %48 = vector.load %arg8[%c2_60, %c1_61, %c0_62] : memref<12x18x128xbf16, #tpu.memory_space<vmem>>, vector<10x16x128xbf16>
    %49 = vector.shape_cast %48 : vector<10x16x128xbf16> to vector<160x128xbf16>
    %c0_63 = arith.constant 0 : index
    %c128_64 = arith.constant 128 : index
    %50 = vector.load %arg9[%c0_63, %c128_64] : memref<160x384xbf16, #tpu.memory_space<vmem>>, vector<160x128xbf16>
    tpu.vector_store %arg9[%c0_63, %c128_64], %49 {strides = array<i32>} : memref<160x384xbf16, #tpu.memory_space<vmem>>, vector<160x128xbf16>,
    %c2_65 = arith.constant 2 : index
    %c2_66 = arith.constant 2 : index
    %c0_67 = arith.constant 0 : index
    %51 = vector.load %arg8[%c2_65, %c2_66, %c0_67] : memref<12x18x128xbf16, #tpu.memory_space<vmem>>, vector<10x16x128xbf16>
    %52 = vector.shape_cast %51 : vector<10x16x128xbf16> to vector<160x128xbf16>
    %c0_68 = arith.constant 0 : index
    %c256_69 = arith.constant 256 : index
    %53 = vector.load %arg9[%c0_68, %c256_69] : memref<160x384xbf16, #tpu.memory_space<vmem>>, vector<160x128xbf16>
    tpu.vector_store %arg9[%c0_68, %c256_69], %52 {strides = array<i32>} : memref<160x384xbf16, #tpu.memory_space<vmem>>, vector<160x128xbf16>,
    %c0_70 = arith.constant 0 : index
    %c0_71 = arith.constant 0 : index
    %54 = vector.load %arg9[%c0_70, %c0_71] : memref<160x384xbf16, #tpu.memory_space<vmem>>, vector<160x384xbf16>
    %c768 = arith.constant 768 : index
    %c0_72 = arith.constant 0 : index
    %55 = vector.load %arg3[%c768, %c0_72] : memref<1152x128xbf16, #tpu.memory_space<vmem>>, vector<384x128xbf16>
    %cst_73 = arith.constant dense<0.000000e+00> : vector<160x128xf32>
    %56 = tpu.matmul %54, %55, %cst_73 {dimension_numbers = #tpu.dot_dimension_numbers<[1], [0], [0], [1], [0, 0, 1, 1], [], []>} : vector<160x384xbf16>, vector<384x128xbf16>, vector<160x128xf32> -> vector<160x128xf32>
    %57 = arith.addf %44, %56 : vector<160x128xf32>
    %58 = vector.shape_cast %19 : vector<128xf32> to vector<1x128xf32>
    %59 = vector.broadcast %58 : vector<1x128xf32> to vector<160x128xf32>
    %60 = arith.addf %57, %59 : vector<160x128xf32>
    %cst_74 = arith.constant 0.000000e+00 : f32
    %61 = vector.broadcast %cst_74 : f32 to vector<160x128xf32>
    %62 = arith.maximumf %60, %61 : vector<160x128xf32>
    %63 = arith.truncf %62 : vector<160x128xf32> to vector<160x128xbf16>
    %64 = vector.shape_cast %63 : vector<160x128xbf16> to vector<10x16x128xbf16>
    %c0_75 = arith.constant 0 : index
    %c1_76 = arith.constant 1 : index
    %c0_77 = arith.constant 0 : index
    %65 = vector.load %arg8[%c0_75, %c1_76, %c0_77] : memref<12x18x128xbf16, #tpu.memory_space<vmem>>, vector<10x16x128xbf16>
    tpu.vector_store %arg8[%c0_75, %c1_76, %c0_77], %64 {strides = array<i32>} : memref<12x18x128xbf16, #tpu.memory_space<vmem>>, vector<10x16x128xbf16>,
    %c0_i32_78 = arith.constant 0 : i32
    %66 = arith.cmpi eq, %arg1, %c0_i32_78 : i32
    %67 = arith.extui %66 : i1 to i32
    %c0_i32_79 = arith.constant 0 : i32
    %68 = arith.cmpi ne, %67, %c0_i32_79 : i32
    scf.if %68 {
      %cst_152 = arith.constant 0.000000e+00 : bf16
      %126 = vector.broadcast %cst_152 : bf16 to vector<1x18x128xbf16>
      %c0_153 = arith.constant 0 : index
      %c0_154 = arith.constant 0 : index
      %c0_155 = arith.constant 0 : index
      %127 = vector.load %arg8[%c0_153, %c0_154, %c0_155] : memref<12x18x128xbf16, #tpu.memory_space<vmem>>, vector<1x18x128xbf16>
      tpu.vector_store %arg8[%c0_153, %c0_154, %c0_155], %126 {strides = array<i32>} : memref<12x18x128xbf16, #tpu.memory_space<vmem>>, vector<1x18x128xbf16>,
    } else {
    }
    %c1_i32_80 = arith.constant 1 : i32
    %69 = arith.cmpi eq, %arg1, %c1_i32_80 : i32
    %70 = arith.extui %69 : i1 to i32
    %c0_i32_81 = arith.constant 0 : i32
    %71 = arith.cmpi ne, %70, %c0_i32_81 : i32
    scf.if %71 {
      %cst_152 = arith.constant 0.000000e+00 : bf16
      %126 = vector.broadcast %cst_152 : bf16 to vector<1x18x128xbf16>
      %c9 = arith.constant 9 : index
      %c0_153 = arith.constant 0 : index
      %c0_154 = arith.constant 0 : index
      %127 = vector.load %arg8[%c9, %c0_153, %c0_154] : memref<12x18x128xbf16, #tpu.memory_space<vmem>>, vector<1x18x128xbf16>
      tpu.vector_store %arg8[%c9, %c0_153, %c0_154], %126 {strides = array<i32>} : memref<12x18x128xbf16, #tpu.memory_space<vmem>>, vector<1x18x128xbf16>,
    } else {
    }
    %c0_82 = arith.constant 0 : index
    %72 = arith.index_cast %1 : i32 to index
    %c0_83 = arith.constant 0 : index
    %c0_84 = arith.constant 0 : index
    %73 = vector.load %arg2[%c0_82, %72, %c0_83, %c0_84] : memref<1x16x16x128xbf16, #tpu.memory_space<vmem>>, vector<1x8x16x128xbf16>
    %74 = vector.shape_cast %73 : vector<1x8x16x128xbf16> to vector<8x16x128xbf16>
    %75 = arith.extf %74 : vector<8x16x128xbf16> to vector<8x16x128xf32>
    %76 = vector.shape_cast %75 : vector<8x16x128xf32> to vector<128x128xf32>
    %c0_85 = arith.constant 0 : index
    %c0_86 = arith.constant 0 : index
    %77 = vector.load %arg6[%c0_85, %c0_86] : memref<1x128xf32, #tpu.memory_space<vmem>>, vector<1x128xf32>
    %78 = vector.shape_cast %77 : vector<1x128xf32> to vector<128xf32>
    %c0_87 = arith.constant 0 : index
    %c0_88 = arith.constant 0 : index
    %c0_89 = arith.constant 0 : index
    %79 = vector.load %arg8[%c0_87, %c0_88, %c0_89] : memref<12x18x128xbf16, #tpu.memory_space<vmem>>, vector<8x16x128xbf16>
    %80 = vector.shape_cast %79 : vector<8x16x128xbf16> to vector<128x128xbf16>
    %c0_90 = arith.constant 0 : index
    %c0_91 = arith.constant 0 : index
    %81 = vector.load %arg9[%c0_90, %c0_91] : memref<160x384xbf16, #tpu.memory_space<vmem>>, vector<128x128xbf16>
    tpu.vector_store %arg9[%c0_90, %c0_91], %80 {strides = array<i32>} : memref<160x384xbf16, #tpu.memory_space<vmem>>, vector<128x128xbf16>,
    %c0_92 = arith.constant 0 : index
    %c1_93 = arith.constant 1 : index
    %c0_94 = arith.constant 0 : index
    %82 = vector.load %arg8[%c0_92, %c1_93, %c0_94] : memref<12x18x128xbf16, #tpu.memory_space<vmem>>, vector<8x16x128xbf16>
    %83 = vector.shape_cast %82 : vector<8x16x128xbf16> to vector<128x128xbf16>
    %c0_95 = arith.constant 0 : index
    %c128_96 = arith.constant 128 : index
    %84 = vector.load %arg9[%c0_95, %c128_96] : memref<160x384xbf16, #tpu.memory_space<vmem>>, vector<128x128xbf16>
    tpu.vector_store %arg9[%c0_95, %c128_96], %83 {strides = array<i32>} : memref<160x384xbf16, #tpu.memory_space<vmem>>, vector<128x128xbf16>,
    %c0_97 = arith.constant 0 : index
    %c2_98 = arith.constant 2 : index
    %c0_99 = arith.constant 0 : index
    %85 = vector.load %arg8[%c0_97, %c2_98, %c0_99] : memref<12x18x128xbf16, #tpu.memory_space<vmem>>, vector<8x16x128xbf16>
    %86 = vector.shape_cast %85 : vector<8x16x128xbf16> to vector<128x128xbf16>
    %c0_100 = arith.constant 0 : index
    %c256_101 = arith.constant 256 : index
    %87 = vector.load %arg9[%c0_100, %c256_101] : memref<160x384xbf16, #tpu.memory_space<vmem>>, vector<128x128xbf16>
    tpu.vector_store %arg9[%c0_100, %c256_101], %86 {strides = array<i32>} : memref<160x384xbf16, #tpu.memory_space<vmem>>, vector<128x128xbf16>,
    %c0_102 = arith.constant 0 : index
    %c0_103 = arith.constant 0 : index
    %88 = vector.load %arg9[%c0_102, %c0_103] : memref<160x384xbf16, #tpu.memory_space<vmem>>, vector<128x384xbf16>
    %c0_104 = arith.constant 0 : index
    %c0_105 = arith.constant 0 : index
    %89 = vector.load %arg5[%c0_104, %c0_105] : memref<1152x128xbf16, #tpu.memory_space<vmem>>, vector<384x128xbf16>
    %cst_106 = arith.constant dense<0.000000e+00> : vector<128x128xf32>
    %90 = tpu.matmul %88, %89, %cst_106 {dimension_numbers = #tpu.dot_dimension_numbers<[1], [0], [0], [1], [0, 0, 1, 1], [], []>} : vector<128x384xbf16>, vector<384x128xbf16>, vector<128x128xf32> -> vector<128x128xf32>
    %c1_107 = arith.constant 1 : index
    %c0_108 = arith.constant 0 : index
    %c0_109 = arith.constant 0 : index
    %91 = vector.load %arg8[%c1_107, %c0_108, %c0_109] : memref<12x18x128xbf16, #tpu.memory_space<vmem>>, vector<8x16x128xbf16>
    %92 = vector.shape_cast %91 : vector<8x16x128xbf16> to vector<128x128xbf16>
    %c0_110 = arith.constant 0 : index
    %c0_111 = arith.constant 0 : index
    %93 = vector.load %arg9[%c0_110, %c0_111] : memref<160x384xbf16, #tpu.memory_space<vmem>>, vector<128x128xbf16>
    tpu.vector_store %arg9[%c0_110, %c0_111], %92 {strides = array<i32>} : memref<160x384xbf16, #tpu.memory_space<vmem>>, vector<128x128xbf16>,
    %c1_112 = arith.constant 1 : index
    %c1_113 = arith.constant 1 : index
    %c0_114 = arith.constant 0 : index
    %94 = vector.load %arg8[%c1_112, %c1_113, %c0_114] : memref<12x18x128xbf16, #tpu.memory_space<vmem>>, vector<8x16x128xbf16>
    %95 = vector.shape_cast %94 : vector<8x16x128xbf16> to vector<128x128xbf16>
    %c0_115 = arith.constant 0 : index
    %c128_116 = arith.constant 128 : index
    %96 = vector.load %arg9[%c0_115, %c128_116] : memref<160x384xbf16, #tpu.memory_space<vmem>>, vector<128x128xbf16>
    tpu.vector_store %arg9[%c0_115, %c128_116], %95 {strides = array<i32>} : memref<160x384xbf16, #tpu.memory_space<vmem>>, vector<128x128xbf16>,
    %c1_117 = arith.constant 1 : index
    %c2_118 = arith.constant 2 : index
    %c0_119 = arith.constant 0 : index
    %97 = vector.load %arg8[%c1_117, %c2_118, %c0_119] : memref<12x18x128xbf16, #tpu.memory_space<vmem>>, vector<8x16x128xbf16>
    %98 = vector.shape_cast %97 : vector<8x16x128xbf16> to vector<128x128xbf16>
    %c0_120 = arith.constant 0 : index
    %c256_121 = arith.constant 256 : index
    %99 = vector.load %arg9[%c0_120, %c256_121] : memref<160x384xbf16, #tpu.memory_space<vmem>>, vector<128x128xbf16>
    tpu.vector_store %arg9[%c0_120, %c256_121], %98 {strides = array<i32>} : memref<160x384xbf16, #tpu.memory_space<vmem>>, vector<128x128xbf16>,
    %c0_122 = arith.constant 0 : index
    %c0_123 = arith.constant 0 : index
    %100 = vector.load %arg9[%c0_122, %c0_123] : memref<160x384xbf16, #tpu.memory_space<vmem>>, vector<128x384xbf16>
    %c384_124 = arith.constant 384 : index
    %c0_125 = arith.constant 0 : index
    %101 = vector.load %arg5[%c384_124, %c0_125] : memref<1152x128xbf16, #tpu.memory_space<vmem>>, vector<384x128xbf16>
    %cst_126 = arith.constant dense<0.000000e+00> : vector<128x128xf32>
    %102 = tpu.matmul %100, %101, %cst_126 {dimension_numbers = #tpu.dot_dimension_numbers<[1], [0], [0], [1], [0, 0, 1, 1], [], []>} : vector<128x384xbf16>, vector<384x128xbf16>, vector<128x128xf32> -> vector<128x128xf32>
    %103 = arith.addf %90, %102 : vector<128x128xf32>
    %c2_127 = arith.constant 2 : index
    %c0_128 = arith.constant 0 : index
    %c0_129 = arith.constant 0 : index
    %104 = vector.load %arg8[%c2_127, %c0_128, %c0_129] : memref<12x18x128xbf16, #tpu.memory_space<vmem>>, vector<8x16x128xbf16>
    %105 = vector.shape_cast %104 : vector<8x16x128xbf16> to vector<128x128xbf16>
    %c0_130 = arith.constant 0 : index
    %c0_131 = arith.constant 0 : index
    %106 = vector.load %arg9[%c0_130, %c0_131] : memref<160x384xbf16, #tpu.memory_space<vmem>>, vector<128x128xbf16>
    tpu.vector_store %arg9[%c0_130, %c0_131], %105 {strides = array<i32>} : memref<160x384xbf16, #tpu.memory_space<vmem>>, vector<128x128xbf16>,
    %c2_132 = arith.constant 2 : index
    %c1_133 = arith.constant 1 : index
    %c0_134 = arith.constant 0 : index
    %107 = vector.load %arg8[%c2_132, %c1_133, %c0_134] : memref<12x18x128xbf16, #tpu.memory_space<vmem>>, vector<8x16x128xbf16>
    %108 = vector.shape_cast %107 : vector<8x16x128xbf16> to vector<128x128xbf16>
    %c0_135 = arith.constant 0 : index
    %c128_136 = arith.constant 128 : index
    %109 = vector.load %arg9[%c0_135, %c128_136] : memref<160x384xbf16, #tpu.memory_space<vmem>>, vector<128x128xbf16>
    tpu.vector_store %arg9[%c0_135, %c128_136], %108 {strides = array<i32>} : memref<160x384xbf16, #tpu.memory_space<vmem>>, vector<128x128xbf16>,
    %c2_137 = arith.constant 2 : index
    %c2_138 = arith.constant 2 : index
    %c0_139 = arith.constant 0 : index
    %110 = vector.load %arg8[%c2_137, %c2_138, %c0_139] : memref<12x18x128xbf16, #tpu.memory_space<vmem>>, vector<8x16x128xbf16>
    %111 = vector.shape_cast %110 : vector<8x16x128xbf16> to vector<128x128xbf16>
    %c0_140 = arith.constant 0 : index
    %c256_141 = arith.constant 256 : index
    %112 = vector.load %arg9[%c0_140, %c256_141] : memref<160x384xbf16, #tpu.memory_space<vmem>>, vector<128x128xbf16>
    tpu.vector_store %arg9[%c0_140, %c256_141], %111 {strides = array<i32>} : memref<160x384xbf16, #tpu.memory_space<vmem>>, vector<128x128xbf16>,
    %c0_142 = arith.constant 0 : index
    %c0_143 = arith.constant 0 : index
    %113 = vector.load %arg9[%c0_142, %c0_143] : memref<160x384xbf16, #tpu.memory_space<vmem>>, vector<128x384xbf16>
    %c768_144 = arith.constant 768 : index
    %c0_145 = arith.constant 0 : index
    %114 = vector.load %arg5[%c768_144, %c0_145] : memref<1152x128xbf16, #tpu.memory_space<vmem>>, vector<384x128xbf16>
    %cst_146 = arith.constant dense<0.000000e+00> : vector<128x128xf32>
    %115 = tpu.matmul %113, %114, %cst_146 {dimension_numbers = #tpu.dot_dimension_numbers<[1], [0], [0], [1], [0, 0, 1, 1], [], []>} : vector<128x384xbf16>, vector<384x128xbf16>, vector<128x128xf32> -> vector<128x128xf32>
    %116 = arith.addf %103, %115 : vector<128x128xf32>
    %117 = vector.shape_cast %78 : vector<128xf32> to vector<1x128xf32>
    %118 = vector.broadcast %117 : vector<1x128xf32> to vector<128x128xf32>
    %119 = arith.addf %116, %118 : vector<128x128xf32>
    %120 = arith.addf %119, %76 : vector<128x128xf32>
    %cst_147 = arith.constant 0.000000e+00 : f32
    %121 = vector.broadcast %cst_147 : f32 to vector<128x128xf32>
    %122 = arith.maximumf %120, %121 : vector<128x128xf32>
    %123 = arith.truncf %122 : vector<128x128xf32> to vector<128x128xbf16>
    %124 = vector.shape_cast %123 : vector<128x128xbf16> to vector<1x8x16x128xbf16>
    %c0_148 = arith.constant 0 : index
    %c0_149 = arith.constant 0 : index
    %c0_150 = arith.constant 0 : index
    %c0_151 = arith.constant 0 : index
    %125 = vector.load %arg7[%c0_148, %c0_149, %c0_150, %c0_151] : memref<1x8x16x128xbf16, #tpu.memory_space<vmem>>, vector<1x8x16x128xbf16>
    tpu.vector_store %arg7[%c0_148, %c0_149, %c0_150, %c0_151], %124 {strides = array<i32>} : memref<1x8x16x128xbf16, #tpu.memory_space<vmem>>, vector<1x8x16x128xbf16>,
    return
  }
  func.func @transform_0(%arg0: i32, %arg1: i32) -> (i32, i32, i32, i32) {
    %c0_i32 = arith.constant 0 : i32
    %c0_i32_0 = arith.constant 0 : i32
    %c0_i32_1 = arith.constant 0 : i32
    %c0_i32_2 = arith.constant 0 : i32
    return %arg0, %c0_i32, %c0_i32_0, %c0_i32_1 : i32, i32, i32, i32
  }
  func.func @transform_1(%arg0: i32, %arg1: i32) -> (i32, i32) {
    %c0_i32 = arith.constant 0 : i32
    %c0_i32_0 = arith.constant 0 : i32
    %c0_i32_1 = arith.constant 0 : i32
    return %c0_i32, %c0_i32_0 : i32, i32
  }
  func.func @transform_2(%arg0: i32, %arg1: i32) -> (i32, i32) {
    %c0_i32 = arith.constant 0 : i32
    %c0_i32_0 = arith.constant 0 : i32
    %c0_i32_1 = arith.constant 0 : i32
    return %c0_i32, %c0_i32_0 : i32, i32
  }
  func.func @transform_3(%arg0: i32, %arg1: i32) -> (i32, i32) {
    %c0_i32 = arith.constant 0 : i32
    %c0_i32_0 = arith.constant 0 : i32
    %c0_i32_1 = arith.constant 0 : i32
    return %c0_i32, %c0_i32_0 : i32, i32
  }
  func.func @transform_4(%arg0: i32, %arg1: i32) -> (i32, i32) {
    %c0_i32 = arith.constant 0 : i32
    %c0_i32_0 = arith.constant 0 : i32
    %c0_i32_1 = arith.constant 0 : i32
    return %c0_i32, %c0_i32_0 : i32, i32
  }
  func.func @transform_5(%arg0: i32, %arg1: i32) -> (i32, i32, i32, i32) {
    %c0_i32 = arith.constant 0 : i32
    %c0_i32_0 = arith.constant 0 : i32
    %c0_i32_1 = arith.constant 0 : i32
    return %arg0, %arg1, %c0_i32, %c0_i32_0 : i32, i32, i32, i32
  }
}

</mosaic_0001>

<bundles_post_ra>
// kernel: basic_block_forward_nhwc.1
= control target key start
LH: loop header
LB: loop body
LE: loop exit
PB: predicated region body
PF: predicated region fallthrough
CT: control target
= control target key end

     0   :  { %s11254_s0 = inlined_call_operand.hbm [shape: bf16[2,16,16,128], index: 0, kind: input, shape index: {}]   ;;  %s11255_s1 = inlined_call_operand.hbm [shape: bf16[1152,128], index: 1, kind: input, shape index: {}]   ;;  %s11256_s2 = inlined_call_operand.vmem [shape: f32[1,128], index: 2, kind: input, shape index: {}]   ;;  %s11257_s3 = inlined_call_operand.hbm [shape: bf16[1152,128], index: 3, kind: input, shape index: {}]   ;;  %s11258_s4 = inlined_call_operand.vmem [shape: f32[1,128], index: 4, kind: input, shape index: {}]   ;;  %s11259_s5 = inlined_call_operand.hbm [shape: bf16[2,16,16,128], index: 5, kind: output, shape index: {}]  }
   0x1   :  { %11280 = sst [smem:[#allocation45_spill]] %s11255_s1 }
   0x2   :  { %11281 = sst [smem:[#allocation46_spill]] %s11257_s3 }
   0x3   :  { %11282 = sst [smem:[#allocation47_spill]] %s11259_s5 }
   0x4   :  { %10 = vsyncpa [#allocation5], 0 }
   0x5   :  { %12 = vsyncpa [#allocation5 + $0x1], 0 }
   0x6   :  { %13 = vsyncpa [#allocation8], 0 }
   0x7   :  { %14 = vsyncpa [#allocation6], 0 }
   0x8   :  { %16 = vsyncpa [#allocation6 + $0x1], 0  ;;  %s9528_s18 = smov 0   ;;  %s9530_s19 = smov 0  }
   0x9   :  { %s9532_s20 = smov 0   ;;  %s9534_s21 = smov 0  }
   0xa   :  { %s9536_s22 = smov 0   ;;  %s9538_s23 = smov 0  }
   0xb   :  { %s9540_s24 = smov 0   ;;  %s9542_s25 = smov 0  }
   0xc   :  { %s9544_s26 = smov 0   ;;  %s9546_s27 = smov 0  }
   0xd   :  { %s9548_s28 = smov 0  }
   0xe LB: > { %11283 = sst [smem:[#allocation14_spill]] %s9447_s18  ;;  %s7410_s29 = sadd.s32 4294967295, %s9487_s28   ;;  %s9487_s28 = sphi %s9548_s28, %s22_s28   ;;  %s9483_s27 = sphi %s9546_s27, %s11400_s27   ;;  %s9479_s26 = sphi %s9544_s26, %s11391_s26   ;;  %s9475_s25 = sphi %s9542_s25, %s11399_s25   ;;  %s9471_s24 = sphi %s9540_s24, %s11390_s24   ;;  %s9467_s23 = sphi %s9538_s23, %s11398_s23   ;;  %s9463_s22 = sphi %s9536_s22, %s11397_s22   ;;  %s9459_s21 = sphi %s9534_s21, %s11396_s21   ;;  %s9455_s20 = sphi %s9532_s20, %s11395_s20   ;;  %s9451_s19 = sphi %s9530_s19, %s11394_s19   ;;  %s9447_s18 = sphi %s9528_s18, %s11393_s18  }
   0xf   : > { %11284 = sst [smem:[#allocation15_spill]] %s9475_s25  ;;  %s7411_s30 = sadd.s32 4294967294, %s9487_s28  }
  0x10   : > { %11285 = sst [smem:[#allocation16_spill]] %s9479_s26  ;;  %p54_p0 = scmp.ne.s32.totalorder %s9463_s22, %s9459_s21 }
  0x11   : > { %p9584_p1 = scmp.eq.s32.totalorder %s7410_s29, 0  ;;  %p163_p2 = scmp.ne.s32.totalorder %s9455_s20, %s9451_s19 }
  0x12   : > { %p164_p3 = scmp.eq.s32.totalorder %s7410_s29, 3  ;;  %p169_p5 = scmp.ne.s32.totalorder %s9451_s19, %s9447_s18 }
  0x13   : > { %p9592_p4 = por %p9584_p1, %p54_p0  ;;  %p170_p7 = scmp.eq.s32.totalorder %s7411_s30, 3 }
  0x14   : > { %p9598_p6 = por %p164_p3, %p163_p2  ;;  %p7412_p8 = scmp.ge.s32.totalorder %s9487_s28, 1 }
  0x15   : > { %p177_p9 = scmp.lt.s32.totalorder %s9487_s28, 5  ;;  %p9604_p10 = por %p170_p7, %p169_p5 }
  0x16   : > { %s11288_s8 = scalar_select %p9598_p6, 1, 0 }
  0x17   : > { %s11290_s9 = scalar_select %p9604_p10, 1, 0 }
  0x18   : > { %11289 = sst [smem:[#allocation17_spill]] %s11288_s8  ;;  %p9608_p11 = pnand %p7412_p8, %p177_p9 }
  0x19   : > { %11291 = sst [smem:[#allocation18_spill]] %s11290_s9  ;;  %s9489_s14 = smov [#allocation7]  }
  0x1a   : > { %s11293_s1 = sld [smem:[#allocation45_spill]]  ;;  %p9151_p12 = pneg %p9608_p11 }
  0x1b   : > { %s190_s15 = sshll.u32 %s9489_s14, 4  ;;  %s11294_s3 = sld [smem:[#allocation46_spill]]  ;;  %s191_s15 = int_to_ptr.vmem [resolvable:$true] %s190_s15 }
  0x1c   : > { %p9152_p13 = pnand %p9151_p12, %p9584_p1  ;;  %s11260_s29 = smov 64  }
  0x1d   : > { %s11261_s30 = smov 4   ;;  %s9492_s11 = smov [#allocation9]  }
  0x1e   : > { %s207_s12 = sshll.u32 %s9492_s11, 4  ;;  %s31_s14 = sadd.s32 1, %s9479_s26  ;;  %s208_s12 = int_to_ptr.vmem [resolvable:$true] %s207_s12 }
  0x1f   : > { %p32_p0 = scmp.ge.s32.totalorder %s31_s14, 2  ;;  %s34_s16 = sadd.s32 1, %s9483_s27 }
  0x20   : > { %s188_s13 = sshll.u32 %s11293_s1, 4  ;;  %p48_p2 = scmp.ne.s32.totalorder %s9467_s23, %s9463_s22  ;;  %s189_s13 = int_to_ptr.hbm [resolvable:$true] %s188_s13 }
  0x21   : > { %s205_s21 = sshll.u32 %s11294_s3, 4  ;;  %s11402_s14 = smov (%p32_p0, %s31_s14), 0  ;;  %s206_s21 = int_to_ptr.hbm [resolvable:$true] %s205_s21 }
  0x22   : > { %9154 = dma.hbm_to_vmem [thread:$0]  (!%p9152_p13), %s189_s13, 9216, %s191_s15, [#allocation8], %s11260_s29, %s11260_s29, %s11261_s30  }
  0x23   : > { %9157 = dma.hbm_to_vmem [thread:$0]  (!%p9152_p13), %s206_s21, 9216, %s208_s12, [#allocation8], %s11260_s29, %s11260_s29, %s11261_s30  }
  0x24   : > { %11295 = sst [smem:[#allocation19_spill]] %s11402_s14  ;;  %s11404_s16 = smov (!%p32_p0, %s34_s16), %s9483_s27 }
  0x25   : > { %s41_s13 = sadd.s32 1, %s9467_s23  ;;  %p49_p3 = scmp.eq.s32.totalorder %s9487_s28, 0 }
  0x26   : > { %p36_p5 = scmp.ge.s32.totalorder %s11404_s16, 2  ;;  %s149_s15 = ssub.s32 %s9479_s26, %s11402_s14 }
  0x27   : > { %p9639_p7 = por %p49_p3, %p48_p2  ;;  %s153_s21 = sadd.s32 1, %s9455_s20 }
  0x28   : > { %s11406_s16 = smov (%p36_p5, %s11404_s16), 0  ;;  %p9168_p8 = scmp.lt.s32.totalorder %s9487_s28, 4 }
  0x29   : > { %11297 = sst [smem:[#allocation20_spill]] %s11406_s16  ;;  %s224_s11 = sand.u32 1, %s9467_s23  }
  0x2a   : > { %s38_s12 = ssub.s32 %s9483_s27, %s11406_s16  ;;  %s8725_s29 = sshll.u32 %s9483_s27, 7 }
  0x2b   : > { %p39_p9 = scmp.eq.s32.totalorder %s38_s12, 0  ;;  %s150_s30 = sor.u32 %s149_s15, %s38_s12 }
  0x2c   : > { %p151_p12 = scmp.eq.s32.totalorder %s150_s30, 0  ;;  %s7416_s1 = sshll.u32 %s224_s11, 7 }
  0x2d   : > { %s9652_s3 = scalar_select %p39_p9, %s9467_s23, %s41_s13  }
  0x2e   : > { %s9655_s14 = scalar_select %p151_p12, %s9455_s20, %s153_s21  }
  0x2f   : > { %s233_s18 = scalar_lea.hbm %s11254_s0, %s8725_s29  ;;  %s228_s5 = scalar_lea.vmem [#allocation4], %s7416_s1 }
  0x30   : > { %s234_s8 = sshll.u32 %s233_s18, 4  ;;  %s236_s25 = sshll.u32 %s228_s5, 4  ;;  %s235_s8 = int_to_ptr.hbm [resolvable:$true] %s234_s8  ;;  %s237_s25 = int_to_ptr.vmem [resolvable:$true] %s236_s25 }
  0x31   : > { %p9159_p13 = pnand %p9168_p8, %p9639_p7  ;;  %s225_s16 = scalar_lea.sflag [#allocation5], %s224_s11 }
  0x32   : > { %s11298_s15 = smov 4   ;;  %s11299_s30 = smov 64  }
  0x33   : > { %9161 = dma.hbm_to_vmem [thread:$0]  (!%p9159_p13), %s235_s8, 2048, %s237_s25, %s225_s16, %s11299_s30, %s11299_s30, %s11298_s15  }
  0x34   : > { %248 = sbr.rel (%p9608_p11) target bundleno = 1603 (0x643), region = 40 }
  0x39   : > { %s250_s26 = sand.u32 1, %s9463_s22  }
  0x3a   : > { %s9670_s9 = sshll.u32 %s250_s26, 7  ;;  %s251_s1 = scalar_lea.sflag [#allocation5], %s250_s26 }
  0x3b   : > { %s254_s5 = scalar_lea.vmem [#allocation4], %s9670_s9 }
  0x3c   : > { %9434 = dma.done.wait (%p9592_p4), %s251_s1, 2048  }
  0x3d   : > { %9436 = vsyncadd (%p9592_p4), %s251_s1, 4294965248 }
  0x3e   : > { %9438 = dma.done.wait (%p9584_p1), [#allocation8], 18432  }
  0x3f   : > { %9440 = vsyncadd (%p9584_p1), [#allocation8], 4294948864  ;;  %s289_s18 = sand.u32 1, %s9451_s19   ;;  %s7424_s25 = sshll.u32 %s9471_s24, 3  ;;  %v9493_v0 = vmov 0   ;;  %vm308_vm0 = vcmask 1040384  }
  0x40   : > { %s9685_s8 = sshll.u32 %s289_s18, 6  ;;  %295 = vst [vmem:[#allocation2] sm:$0xf] %v9493_v0  ;;  %vm309_vm1 = vsmask.f32 256  ;;  %v11300_v1 = vmov 0 }
  0x41   : > { %296 = vst [vmem:[#allocation2 + $0x4] sm:$0xf] %v9493_v0  ;;  %vm9689_vm2 = vmand %vm308_vm0, %vm309_vm1  ;;  %v317_v2 = vld [vmem:[#allocation2 + $0x18] sm:$0x1]  ;;  %v320_v3 = vld [vmem:[#allocation2 + $0x24] sm:$0x1] }
  0x42   : > { %297 = vst [vmem:[#allocation2 + $0x8] sm:$0x1] %v9493_v0  ;;  %v11301_v1 = vsel %vm9689_vm2, 4294967295, %v11300_v1  ;;  %v323_v4 = vld [vmem:[#allocation2 + $0x30] sm:$0x1]  ;;  %v318_v5 = vsel %vm9689_vm2, 0, %v317_v2 }
  0x43   : > { %298 = vst [vmem:[#allocation2 + $0xc] sm:$0xf] %v9493_v0  ;;  %v326_v6 = vld [vmem:[#allocation2 + $0x3c] sm:$0x1]  ;;  %v329_v7 = vld [vmem:[#allocation2 + $0x48] sm:$0x1] }
  0x44   : > { %299 = vst [vmem:[#allocation2 + $0x10] sm:$0xf] %v9493_v0  ;;  %v321_v8 = vsel %vm9689_vm2, 0, %v320_v3  ;;  %v324_v9 = vsel %vm9689_vm2, 0, %v323_v4  ;;  %vm347_vm3 = vsmask.f32 7938 }
  0x45   : > { %300 = vst [vmem:[#allocation2 + $0x14] sm:$0x1] %v9493_v0  ;;  %v332_v10 = vld [vmem:[#allocation2 + $0x54] sm:$0x1]  ;;  %v335_v11 = vld [vmem:[#allocation2 + $0x60] sm:$0x1]  ;;  %vm9705_vm4 = vmand %vm308_vm0, %vm347_vm3 }
  0x46   : > { %11302 = vst [vmem:[#allocation21_spill] sm:$0xff] %v11301_v1  ;;  %v327_v12 = vsel %vm9689_vm2, 0, %v326_v6  ;;  %v330_v13 = vsel %vm9689_vm2, 0, %v329_v7  ;;  %v338_v14 = vld [vmem:[#allocation2 + $0x6c] sm:$0x1]  ;;  %v333_v17 = vsel %vm9689_vm2, 0, %v332_v10 }
  0x47   : > { %302 = vst [vmem:[#allocation2 + $0x78] sm:$0xf] %v9493_v0  ;;  %v355_v16 = vld [vmem:[#allocation2 + $0x20] sm:$0x1]  ;;  %v336_v18 = vsel %vm9689_vm2, 0, %v335_v11  ;;  %v339_v21 = vsel %vm9689_vm2, 0, %v338_v14 }
  0x48   : > { %303 = vst [vmem:[#allocation2 + $0x7c] sm:$0xf] %v9493_v0  ;;  %v358_v19 = vld [vmem:[#allocation2 + $0x2c] sm:$0x1]  ;;  %v361_v20 = vld [vmem:[#allocation2 + $0x38] sm:$0x1] }
  0x49   : > { %304 = vst [vmem:[#allocation2 + $0x80] sm:$0x1] %v9493_v0  ;;  %v356_v22 = vsel %vm9705_vm4, 0, %v355_v16  ;;  %v364_v23 = vld [vmem:[#allocation2 + $0x44] sm:$0x1]  ;;  %v359_v25 = vsel %vm9705_vm4, 0, %v358_v19 }
  0x4a   : > { %305 = vst [vmem:[#allocation2 + $0x84] sm:$0xf] %v9493_v0  ;;  %v367_v24 = vld [vmem:[#allocation2 + $0x50] sm:$0x1]  ;;  %v362_v26 = vsel %vm9705_vm4, 0, %v361_v20  ;;  %v365_v29 = vsel %vm9705_vm4, 0, %v364_v23 }
  0x4b   : > { %306 = vst [vmem:[#allocation2 + $0x88] sm:$0xf] %v9493_v0  ;;  %v370_v27 = vld [vmem:[#allocation2 + $0x5c] sm:$0x1]  ;;  %v373_v28 = vld [vmem:[#allocation2 + $0x68] sm:$0x1] }
  0x4c   : > { %307 = vst [vmem:[#allocation2 + $0x8c] sm:$0x1] %v9493_v0  ;;  %v368_v30 = vsel %vm9705_vm4, 0, %v367_v24  ;;  %v376_v31 = vld [vmem:[#allocation2 + $0x74] sm:$0x1]  ;;  %v371_v33 = vsel %vm9705_vm4, 0, %v370_v27 }
  0x4d   : > { %319 = vst [vmem:[#allocation2 + $0x18] sm:$0x1] %v318_v5  ;;  %v311_v32 = vld [vmem:[#allocation2] sm:$0x1]  ;;  %v374_v34 = vsel %vm9705_vm4, 0, %v373_v28  ;;  %s8727_s6 = sshll.u32 %s9471_s24, 6 }
  0x4e   : > { %322 = vst [vmem:[#allocation2 + $0x24] sm:$0x1] %v321_v8  ;;  %v314_v35 = vld [vmem:[#allocation2 + $0xc] sm:$0x1]  ;;  %v341_v36 = vld [vmem:[#allocation2 + $0x78] sm:$0x1]  ;;  %s9740_s7 = scalar_lea.vmem %s254_s5, %s8727_s6 [#allocation4] }
  0x4f   : > { %325 = vst [vmem:[#allocation2 + $0x30] sm:$0x1] %v324_v9  ;;  %v377_v37 = vsel %vm9705_vm4, 0, %v376_v31  ;;  %v312_v38 = vsel %vm9689_vm2, 0, %v311_v32  ;;  %v349_v40 = vld [vmem:[#allocation2 + $0x8] sm:$0x1] }
  0x50   : > { %328 = vst [vmem:[#allocation2 + $0x3c] sm:$0x1] %v327_v12  ;;  %v315_v41 = vsel %vm9689_vm2, 0, %v314_v35  ;;  %v342_v42 = vsel %vm9689_vm2, 0, %v341_v36  ;;  %vm567_vm5 = vcmask 1043456   ;;  %v350_v46 = vsel %vm9705_vm4, 0, %v349_v40 }
  0x51   : > { %331 = vst [vmem:[#allocation2 + $0x48] sm:$0x1] %v330_v13  ;;  %v344_v39 = vld [vmem:[#allocation2 + $0x84] sm:$0x1]  ;;  %v352_v43 = vld [vmem:[#allocation2 + $0x14] sm:$0x1]  ;;  %vm9756_vm7 = vmand %vm567_vm5, %vm347_vm3 }
  0x52   : > { %334 = vst [vmem:[#allocation2 + $0x54] sm:$0x1] %v333_v17  ;;  %v379_v44 = vld [vmem:[#allocation2 + $0x80] sm:$0x1]  ;;  %v345_v45 = vsel %vm9689_vm2, 0, %v344_v39  ;;  %v353_v49 = vsel %vm9705_vm4, 0, %v352_v43 }
  0x53   : > { %337 = vst [vmem:[#allocation2 + $0x60] sm:$0x1] %v336_v18  ;;  %vm404_vm6 = vsmask.f32 4368  ;;  %v382_v47 = vld [vmem:[#allocation2 + $0x8c] sm:$0x1] }
  0x54   : > { %340 = vst [vmem:[#allocation2 + $0x6c] sm:$0x1] %v339_v21  ;;  %v388_v48 = vld [vmem:[%s9740_s7] sm:$0xf]  ;;  %v380_v50 = vsel %vm9705_vm4, 0, %v379_v44  ;;  %v383_v55 = vsel %vm9705_vm4, 0, %v382_v47  ;;  %vm9763_vm8 = vmor %vm309_vm1, %vm404_vm6 }
  0x55   : > { %357 = vst [vmem:[#allocation2 + $0x20] sm:$0x1] %v356_v22  ;;  %v407_v51 = vshrl.u32 %v388_v48, 16  ;;  %v410_v52 = vshll.u32 %v388_v48, 16  ;;  %v569_v53 = vld [vmem:[#allocation2 + $0x18] sm:$0xf] }
  0x56   : > { %360 = vst [vmem:[#allocation2 + $0x2c] sm:$0x1] %v359_v25  ;;  %v389_v54 = vld [vmem:[%s9740_s7 + $0x4] sm:$0xf]  ;;  %v11305_v59 = vmov 0  ;;  %v11308_v3 = vmov 0 }
  0x57   : > { %363 = vst [vmem:[#allocation2 + $0x38] sm:$0x1] %v362_v26  ;;  %v409_v56 = vrot.slane %v407_v51, 7  ;;  %v415_v57 = vshrl.u32 %v389_v54, 16  ;;  %v418_v58 = vshll.u32 %v389_v54, 16  ;;  %v11306_v59 = vsel %vm9756_vm7, 4294967295, %v11305_v59 }
  0x58   : > { %366 = vst [vmem:[#allocation2 + $0x44] sm:$0x1] %v365_v29  ;;  %v390_v61 = vld [vmem:[%s9740_s7 + $0x8] sm:$0xf]  ;;  %v11309_v3 = vsel %vm9763_vm8, 4294967295, %v11308_v3  ;;  %s9829_s10 = scalar_lea.vmem [#allocation10], %s9685_s8 }
  0x59   : > { %369 = vst [vmem:[#allocation2 + $0x50] sm:$0x1] %v368_v30  ;;  %v412_v62 = vor.u32 %v410_v52, %v409_v56  ;;  %v413_v63 = vrot.slane %v409_v56, 4  ;;  %v417_v0 = vrot.slane %v415_v57, 7  ;;  %v424_v2 = vshrl.u32 %v390_v61, 16  ;;  %p7427_p1 = scmp.le.s32.totalorder %s9471_s24, 0 }
  0x5a   : > { %372 = vst [vmem:[#allocation2 + $0x5c] sm:$0x1] %v371_v33  ;;  %v427_v4 = vshll.u32 %v390_v61, 16  ;;  %v391_v5 = vld [vmem:[%s9740_s7 + $0xc] sm:$0xf]  ;;  %s7428_s29 = sadd.s32 (!%p7427_p1), 4294967294, %s7424_s25 }
  0x5b   : > { %375 = vst [vmem:[#allocation2 + $0x68] sm:$0x1] %v374_v34  ;;  %v570_v6 = vsel %vm9756_vm7, %v412_v62, %v569_v53  ;;  %v420_v7 = vor.u32 %v418_v58, %v417_v0  ;;  %v422_v8 = vrot.slane %v417_v0, 4  ;;  %v426_v9 = vrot.slane %v424_v2, 7  ;;  %v576_v10 = vld [vmem:[#allocation2 + $0x24] sm:$0xf] }
  0x5c   : > { %378 = vst [vmem:[#allocation2 + $0x74] sm:$0x1] %v377_v37  ;;  %v573_v60 = vld [vmem:[#allocation2 + $0x20] sm:$0x1]  ;;  %v392_v11 = vld [vmem:[%s9740_s7 + $0x10] sm:$0xf] }
  0x5d   : > { %313 = vst [vmem:[#allocation2] sm:$0x1] %v312_v38  ;;  %v432_v12 = vshrl.u32 %v391_v5, 16  ;;  %v435_v13 = vshll.u32 %v391_v5, 16  ;;  %v441_v14 = vshrl.u32 %v392_v11, 16  ;;  %v444_v15 = vshll.u32 %v392_v11, 16 }
  0x5e   : > { %316 = vst [vmem:[#allocation2 + $0xc] sm:$0x1] %v315_v41  ;;  %v421_v16 = vsel %vm9763_vm8, %v413_v63, %v420_v7  ;;  %v574_v17 = vsel %vm9689_vm2, %v422_v8, %v573_v60  ;;  %v429_v18 = vor.u32 %v427_v4, %v426_v9  ;;  %v580_v19 = vld [vmem:[#allocation2 + $0x2c] sm:$0x1]  ;;  %v583_v20 = vld [vmem:[#allocation2 + $0x30] sm:$0xf] }
  0x5f   : > { %343 = vst [vmem:[#allocation2 + $0x78] sm:$0x1] %v342_v42  ;;  %v393_v21 = vld [vmem:[%s9740_s7 + $0x14] sm:$0xf]  ;;  %v430_v22 = vrot.slane %v426_v9, 4  ;;  %v434_v23 = vrot.slane %v432_v12, 7 }
  0x60   : > { %346 = vst [vmem:[#allocation2 + $0x84] sm:$0x1] %v345_v45  ;;  %v443_v24 = vrot.slane %v441_v14, 7  ;;  %v449_v25 = vshrl.u32 %v393_v21, 16  ;;  %v577_v26 = vsel %vm9756_vm7, %v429_v18, %v576_v10  ;;  %v452_v27 = vshll.u32 %v393_v21, 16  ;;  %s8728_s16 = sshll.u32 (!%p7427_p1), %s7428_s29, 3 }
  0x61   : > { %351 = vst [vmem:[#allocation2 + $0x8] sm:$0x1] %v350_v46  ;;  %v394_v28 = vld [vmem:[%s9740_s7 + $0x18] sm:$0xf]  ;;  %v437_v29 = vor.u32 %v435_v13, %v434_v23  ;;  %v439_v30 = vrot.slane %v434_v23, 4  ;;  %s632_s13 = scalar_lea.vmem (!%p7427_p1), %s254_s5, %s8728_s16 [#allocation4] }
  0x62   : > { %354 = vst [vmem:[#allocation2 + $0x14] sm:$0x1] %v353_v49  ;;  %v446_v31 = vor.u32 %v444_v15, %v443_v24  ;;  %v587_v32 = vld [vmem:[#allocation2 + $0x38] sm:$0x1]  ;;  %v447_v33 = vrot.slane %v443_v24, 4  ;;  %v451_v34 = vrot.slane %v449_v25, 7 }
  0x63   : > { %11307 = vst [vmem:[#allocation22_spill] sm:$0xff] %v11306_v59  ;;  %v458_v35 = vshrl.u32 %v394_v28, 16  ;;  %v461_v36 = vshll.u32 %v394_v28, 16  ;;  %v395_v37 = vld [vmem:[%s9740_s7 + $0x1c] sm:$0xf]  ;;  %v438_v38 = vsel %vm9763_vm8, %v430_v22, %v437_v29  ;;  %v581_v39 = vsel %vm9689_vm2, %v439_v30, %v580_v19 }
  0x64   : > { %381 = vst [vmem:[#allocation2 + $0x80] sm:$0x1] %v380_v50  ;;  %v584_v40 = vsel %vm9756_vm7, %v446_v31, %v583_v20  ;;  %v590_v41 = vld [vmem:[#allocation2 + $0x3c] sm:$0xf]  ;;  %v466_v42 = vshrl.u32 %v395_v37, 16  ;;  %v454_v44 = vor.u32 %v452_v27, %v451_v34  ;;  %v456_v45 = vrot.slane %v451_v34, 4 }
  0x65   : > { %384 = vst [vmem:[#allocation2 + $0x8c] sm:$0x1] %v383_v55  ;;  %v396_v43 = vld [vmem:[%s9740_s7 + $0x20] sm:$0xf]  ;;  %v460_v46 = vrot.slane %v458_v35, 7  ;;  %v469_v47 = vshll.u32 %v395_v37, 16 }
  0x66   : > { %11310 = vst [vmem:[#allocation23_spill] sm:$0xff] %v11309_v3  ;;  %v468_v48 = vrot.slane %v466_v42, 7  ;;  %v475_v49 = vshrl.u32 %v396_v43, 16  ;;  %v478_v50 = vshll.u32 %v396_v43, 16  ;;  %v455_v51 = vsel %vm9763_vm8, %v447_v33, %v454_v44  ;;  %v594_v55 = vld [vmem:[#allocation2 + $0x44] sm:$0x1] }
  0x67   : > { %571 = vst [vmem:[#allocation2 + $0x18] sm:$0xf] %v570_v6  ;;  %v588_v52 = vsel %vm9689_vm2, %v456_v45, %v587_v32  ;;  %v463_v53 = vor.u32 %v461_v36, %v460_v46  ;;  %v464_v54 = vrot.slane %v460_v46, 4  ;;  %v397_v60 = vld [vmem:[%s9740_s7 + $0x24] sm:$0xf] }
  0x68   : > { %572 = vst [vmem:[#allocation2 + $0x1c] sm:$0xf] %v421_v16  ;;  %v471_v56 = vor.u32 %v469_v47, %v468_v48  ;;  %v473_v57 = vrot.slane %v468_v48, 4  ;;  %v477_v58 = vrot.slane %v475_v49, 7  ;;  %v597_v62 = vld [vmem:[#allocation2 + $0x48] sm:$0xf] }
  0x69   : > { %575 = vst [vmem:[#allocation2 + $0x20] sm:$0x1] %v574_v17  ;;  %v591_v61 = vsel %vm9756_vm7, %v463_v53, %v590_v41  ;;  %v483_v63 = vshrl.u32 %v397_v60, 16  ;;  %v486_v0 = vshll.u32 %v397_v60, 16  ;;  %v398_v6 = vld [vmem:[%s9740_s7 + $0x28] sm:$0xf] }
  0x6a   : > { %578 = vst [vmem:[#allocation2 + $0x24] sm:$0xf] %v577_v26  ;;  %v472_v2 = vsel %vm9763_vm8, %v464_v54, %v471_v56  ;;  %v595_v4 = vsel %vm9689_vm2, %v473_v57, %v594_v55  ;;  %v480_v5 = vor.u32 %v478_v50, %v477_v58  ;;  %v481_v7 = vrot.slane %v477_v58, 4  ;;  %v601_v12 = vld [vmem:[#allocation2 + $0x50] sm:$0x1] }
  0x6b   : > { %579 = vst [vmem:[#allocation2 + $0x28] sm:$0xf] %v438_v38  ;;  %v485_v8 = vrot.slane %v483_v63, 7  ;;  %v492_v9 = vshrl.u32 %v398_v6, 16  ;;  %v495_v10 = vshll.u32 %v398_v6, 16 }
  0x6c   : > { %582 = vst [vmem:[#allocation2 + $0x2c] sm:$0x1] %v581_v39  ;;  %v598_v11 = vsel %vm9756_vm7, %v480_v5, %v597_v62  ;;  %v399_v13 = vld [vmem:[%s9740_s7 + $0x2c] sm:$0xf]  ;;  %v604_v18 = vld [vmem:[#allocation2 + $0x54] sm:$0xf] }
  0x6d   : > { %585 = vst [vmem:[#allocation2 + $0x30] sm:$0xf] %v584_v40  ;;  %v488_v14 = vor.u32 %v486_v0, %v485_v8  ;;  %v490_v15 = vrot.slane %v485_v8, 4  ;;  %v494_v16 = vrot.slane %v492_v9, 7  ;;  %v500_v17 = vshrl.u32 %v399_v13, 16 }
  0x6e   : > { %586 = vst [vmem:[#allocation2 + $0x34] sm:$0xf] %v455_v51  ;;  %v503_v19 = vshll.u32 %v399_v13, 16  ;;  %v400_v20 = vld [vmem:[%s9740_s7 + $0x30] sm:$0xf] }
  0x6f   : > { %589 = vst [vmem:[#allocation2 + $0x38] sm:$0x1] %v588_v52  ;;  %v489_v21 = vsel %vm9763_vm8, %v481_v7, %v488_v14  ;;  %v602_v22 = vsel %vm9689_vm2, %v490_v15, %v601_v12  ;;  %v497_v23 = vor.u32 %v495_v10, %v494_v16  ;;  %v498_v24 = vrot.slane %v494_v16, 4  ;;  %v401_v25 = vld [vmem:[%s9740_s7 + $0x34] sm:$0xf] }
  0x70   : > { %592 = vst [vmem:[#allocation2 + $0x3c] sm:$0xf] %v591_v61  ;;  %v502_v26 = vrot.slane %v500_v17, 7  ;;  %v509_v27 = vshrl.u32 %v400_v20, 16  ;;  %v512_v28 = vshll.u32 %v400_v20, 16  ;;  %v517_v29 = vshrl.u32 %v401_v25, 16 }
  0x71   : > { %593 = vst [vmem:[#allocation2 + $0x40] sm:$0xf] %v472_v2  ;;  %v605_v30 = vsel %vm9756_vm7, %v497_v23, %v604_v18  ;;  %v608_v31 = vld [vmem:[#allocation2 + $0x5c] sm:$0x1]  ;;  %v520_v32 = vshll.u32 %v401_v25, 16 }
  0x72   : > { %596 = vst [vmem:[#allocation2 + $0x44] sm:$0x1] %v595_v4  ;;  %v505_v33 = vor.u32 %v503_v19, %v502_v26  ;;  %v507_v34 = vrot.slane %v502_v26, 4  ;;  %v511_v35 = vrot.slane %v509_v27, 7  ;;  %v519_v36 = vrot.slane %v517_v29, 7 }
  0x73   : > { %599 = vst [vmem:[#allocation2 + $0x48] sm:$0xf] %v598_v11  ;;  %v611_v37 = vld [vmem:[#allocation2 + $0x60] sm:$0xf]  ;;  %v402_v38 = vld [vmem:[%s9740_s7 + $0x38] sm:$0xf] }
  0x74   : > { %600 = vst [vmem:[#allocation2 + $0x4c] sm:$0xf] %v489_v21  ;;  %v403_v39 = vld [vmem:[%s9740_s7 + $0x3c] sm:$0xf]  ;;  %v506_v40 = vsel %vm9763_vm8, %v498_v24, %v505_v33  ;;  %v609_v41 = vsel %vm9689_vm2, %v507_v34, %v608_v31  ;;  %v514_v42 = vor.u32 %v512_v28, %v511_v35  ;;  %v515_v43 = vrot.slane %v511_v35, 4 }
  0x75   : > { %603 = vst [vmem:[#allocation2 + $0x50] sm:$0x1] %v602_v22  ;;  %v615_v44 = vld [vmem:[#allocation2 + $0x68] sm:$0x1]  ;;  %v522_v45 = vor.u32 %v520_v32, %v519_v36  ;;  %v524_v46 = vrot.slane %v519_v36, 4  ;;  %v526_v47 = vshrl.u32 %v402_v38, 16 }
  0x76   : > { %606 = vst [vmem:[#allocation2 + $0x54] sm:$0xf] %v605_v30  ;;  %v529_v48 = vshll.u32 %v402_v38, 16  ;;  %v612_v49 = vsel %vm9756_vm7, %v514_v42, %v611_v37  ;;  %v534_v50 = vshrl.u32 %v403_v39, 16  ;;  %v537_v51 = vshll.u32 %v403_v39, 16 }
  0x77   : > { %607 = vst [vmem:[#allocation2 + $0x58] sm:$0xf] %v506_v40  ;;  %v523_v52 = vsel %vm9763_vm8, %v515_v43, %v522_v45  ;;  %v616_v53 = vsel %vm9689_vm2, %v524_v46, %v615_v44  ;;  %v528_v54 = vrot.slane %v526_v47, 7  ;;  %v618_v55 = vld [vmem:[#allocation2 + $0x6c] sm:$0xf] }
  0x78   : > { %610 = vst [vmem:[#allocation2 + $0x5c] sm:$0x1] %v609_v41  ;;  %v536_v56 = vrot.slane %v534_v50, 7  ;;  %v622_v60 = vld [vmem:[#allocation2 + $0x74] sm:$0x1] }
  0x79   : > { %613 = vst [vmem:[#allocation2 + $0x60] sm:$0xf] %v612_v49  ;;  %v531_v57 = vor.u32 %v529_v48, %v528_v54  ;;  %v532_v58 = vrot.slane %v528_v54, 4 }
  0x7a   : > { %614 = vst [vmem:[#allocation2 + $0x64] sm:$0xf] %v523_v52  ;;  %v539_v61 = vor.u32 %v537_v51, %v536_v56  ;;  %v541_v62 = vrot.slane %v536_v56, 4  ;;  %628 = sbr.rel (%p7427_p1) target bundleno = 141 (0x8d), region = 56 }
  0x7b   : > { %617 = vst [vmem:[#allocation2 + $0x68] sm:$0x1] %v616_v53  ;;  %v619_v63 = vsel %vm9756_vm7, %v531_v57, %v618_v55 }
  0x7c   : > { %620 = vst [vmem:[#allocation2 + $0x6c] sm:$0xf] %v619_v63  ;;  %v540_v0 = vsel %vm9763_vm8, %v532_v58, %v539_v61  ;;  %v623_v2 = vsel %vm9689_vm2, %v541_v62, %v622_v60 }
  0x7d   : > { %621 = vst [vmem:[#allocation2 + $0x70] sm:$0xf] %v540_v0 }
  0x7e   : > { %624 = vst [vmem:[#allocation2 + $0x74] sm:$0x1] %v623_v2 }
  0x7f   : > { %v633_v4 = vld [vmem:[%s632_s13] sm:$0xf]  ;;  %v634_v5 = vld [vmem:[%s632_s13 + $0x4] sm:$0xf]  ;;  %v635_v6 = vld [vmem:[%s632_s13 + $0x8] sm:$0xf] }
  0x80   : > { %v638_v7 = vshrl.u32 %v633_v4, 16  ;;  %v641_v8 = vshll.u32 %v633_v4, 16  ;;  %v646_v9 = vshrl.u32 %v634_v5, 16  ;;  %v649_v10 = vshll.u32 %v634_v5, 16  ;;  %v636_v11 = vld [vmem:[%s632_s13 + $0xc] sm:$0xf] }
  0x81   : > { %v655_v12 = vshrl.u32 %v635_v6, 16  ;;  %v658_v13 = vshll.u32 %v635_v6, 16  ;;  %v663_v14 = vshrl.u32 %v636_v11, 16  ;;  %v666_v15 = vshll.u32 %v636_v11, 16  ;;  %v677_v18 = vld [vmem:[#allocation2] sm:$0xf] }
  0x82   : > { %v640_v16 = vrot.slane %v638_v7, 7  ;;  %v648_v17 = vrot.slane %v646_v9, 7  ;;  %v681_v19 = vld [vmem:[#allocation2 + $0x8] sm:$0x1]  ;;  %v684_v26 = vld [vmem:[#allocation2 + $0xc] sm:$0xf] }
  0x83   : > { %v657_v20 = vrot.slane %v655_v12, 7  ;;  %v665_v21 = vrot.slane %v663_v14, 7  ;;  %v688_v34 = vld [vmem:[#allocation2 + $0x14] sm:$0x1] }
  0x84   : > { %v643_v22 = vor.u32 %v641_v8, %v640_v16  ;;  %v644_v23 = vrot.slane %v640_v16, 4  ;;  %v651_v24 = vor.u32 %v649_v10, %v648_v17  ;;  %v653_v25 = vrot.slane %v648_v17, 4 }
  0x85   : > { %v660_v27 = vor.u32 %v658_v13, %v657_v20  ;;  %v661_v28 = vrot.slane %v657_v20, 4  ;;  %v668_v29 = vor.u32 %v666_v15, %v665_v21  ;;  %v670_v30 = vrot.slane %v665_v21, 4 }
  0x86   : > { %v678_v31 = vsel %vm9756_vm7, %v643_v22, %v677_v18  ;;  %v652_v32 = vsel %vm9763_vm8, %v644_v23, %v651_v24  ;;  %v682_v33 = vsel %vm9689_vm2, %v653_v25, %v681_v19 }
  0x87   : > { %679 = vst [vmem:[#allocation2] sm:$0xf] %v678_v31  ;;  %v685_v35 = vsel %vm9756_vm7, %v660_v27, %v684_v26  ;;  %v669_v36 = vsel %vm9763_vm8, %v661_v28, %v668_v29  ;;  %v689_v37 = vsel %vm9689_vm2, %v670_v30, %v688_v34 }
  0x88   : > { %680 = vst [vmem:[#allocation2 + $0x4] sm:$0xf] %v652_v32 }
  0x89   : > { %683 = vst [vmem:[#allocation2 + $0x8] sm:$0x1] %v682_v33 }
  0x8a   : > { %686 = vst [vmem:[#allocation2 + $0xc] sm:$0xf] %v685_v35 }
  0x8b   : > { %687 = vst [vmem:[#allocation2 + $0x10] sm:$0xf] %v669_v36 }
  0x8c   : > { %690 = vst [vmem:[#allocation2 + $0x14] sm:$0x1] %v689_v37 }
  0x8d PF: > { %p7431_p4 = scmp.ge.s32.totalorder %s9471_s24, 1 }
  0x8f   : > { %694 = sbr.rel (%p7431_p4) target bundleno = 162 (0xa2), region = 60 }
  0x94   : > { %v7434_v38 = vld [vmem:[%s9740_s7 + $0x40] sm:$0xf]  ;;  %v7435_v39 = vld [vmem:[%s9740_s7 + $0x44] sm:$0xf]  ;;  %v7436_v44 = vld [vmem:[%s9740_s7 + $0x48] sm:$0xf] }
  0x95   : > { %v704_v40 = vshrl.u32 %v7434_v38, 16  ;;  %v707_v41 = vshll.u32 %v7434_v38, 16  ;;  %v712_v42 = vshrl.u32 %v7435_v39, 16  ;;  %v715_v43 = vshll.u32 %v7435_v39, 16  ;;  %v7437_v45 = vld [vmem:[%s9740_s7 + $0x4c] sm:$0xf] }
  0x96   : > { %v743_v47 = vld [vmem:[#allocation2 + $0x78] sm:$0xf]  ;;  %v721_v49 = vshrl.u32 %v7436_v44, 16  ;;  %v747_v50 = vld [vmem:[#allocation2 + $0x80] sm:$0x1]  ;;  %v724_v51 = vshll.u32 %v7436_v44, 16 }
  0x97   : > { %v706_v46 = vrot.slane %v704_v40, 7  ;;  %v714_v48 = vrot.slane %v712_v42, 7  ;;  %v729_v52 = vshrl.u32 %v7437_v45, 16  ;;  %v732_v53 = vshll.u32 %v7437_v45, 16  ;;  %v750_v0 = vld [vmem:[#allocation2 + $0x84] sm:$0xf] }
  0x98   : > { %v723_v58 = vrot.slane %v721_v49, 7  ;;  %v754_v2 = vld [vmem:[#allocation2 + $0x8c] sm:$0x1] }
  0x99   : > { %v709_v54 = vor.u32 %v707_v41, %v706_v46  ;;  %v710_v55 = vrot.slane %v706_v46, 4  ;;  %v717_v56 = vor.u32 %v715_v43, %v714_v48  ;;  %v719_v57 = vrot.slane %v714_v48, 4 }
  0x9a   : > { %v731_v60 = vrot.slane %v729_v52, 7  ;;  %v726_v4 = vor.u32 %v724_v51, %v723_v58  ;;  %v727_v5 = vrot.slane %v723_v58, 4 }
  0x9b   : > { %v744_v61 = vsel %vm9756_vm7, %v709_v54, %v743_v47  ;;  %v718_v62 = vsel %vm9763_vm8, %v710_v55, %v717_v56  ;;  %v748_v63 = vsel %vm9689_vm2, %v719_v57, %v747_v50 }
  0x9c   : > { %745 = vst [vmem:[#allocation2 + $0x78] sm:$0xf] %v744_v61  ;;  %v734_v6 = vor.u32 %v732_v53, %v731_v60  ;;  %v736_v7 = vrot.slane %v731_v60, 4  ;;  %v751_v8 = vsel %vm9756_vm7, %v726_v4, %v750_v0 }
  0x9d   : > { %746 = vst [vmem:[#allocation2 + $0x7c] sm:$0xf] %v718_v62 }
  0x9e   : > { %749 = vst [vmem:[#allocation2 + $0x80] sm:$0x1] %v748_v63  ;;  %v735_v9 = vsel %vm9763_vm8, %v727_v5, %v734_v6  ;;  %v755_v10 = vsel %vm9689_vm2, %v736_v7, %v754_v2 }
  0x9f   : > { %752 = vst [vmem:[#allocation2 + $0x84] sm:$0xf] %v751_v8 }
  0xa0   : > { %753 = vst [vmem:[#allocation2 + $0x88] sm:$0xf] %v735_v9 }
  0xa1   : > { %756 = vst [vmem:[#allocation2 + $0x8c] sm:$0x1] %v755_v10 }
  0xa2 PF: > { %v8821_v11 = vld [vmem:[#allocation7 + $0xf8] sm:$0xff]  ;;  %v8820_v13 = vld [vmem:[#allocation7 + $0xf0] sm:$0xff]  ;;  %v758_v15 = vld [vmem:[#allocation2] sm:$0xf]  ;;  %vm828_vm9 = vsmask.f32 3328 }
  0xa3   : > { %v8829_v12 = vld [vmem:[#allocation7 + $0x138] sm:$0xff]  ;;  %2285 = vmatpush.bf16.msra.mxu0 %v8821_v11  ;;  %v8828_v14 = vld [vmem:[#allocation7 + $0x130] sm:$0xff]  ;;  %v759_v16 = vld [vmem:[#allocation2 + $0x4] sm:$0xf]  ;;  %778 = vst [vmem:[#allocation3] sm:$0xf] %v758_v15 }
  0xa4   : > { %2344 = vmatpush.bf16.msra.mxu1 %v8829_v12  ;;  %9123 = vmatpush.bf16.msra.mxu3 %v8829_v12  ;;  %v8819_v17 = vld [vmem:[#allocation7 + $0xe8] sm:$0xff]  ;;  %779 = vst [vmem:[#allocation3 + $0xc] sm:$0xf] %v759_v16  ;;  %vm829_vm10 = vsmask.f32 7440  ;;  %v8818_v19 = vld [vmem:[#allocation7 + $0xe0] sm:$0xff] }
  0xa5   : > { %v8827_v18 = vld [vmem:[#allocation7 + $0x128] sm:$0xff]  ;;  %v8826_v20 = vld [vmem:[#allocation7 + $0x120] sm:$0xff]  ;;  %v1414_v31 = vld [vmem:[#allocation2 + $0x10] sm:$0xf]  ;;  %v11311_v53 = vmov 0  ;;  %vm1171_vm12 = vcmask 1042432  }
  0xa6   : > { %v798_v21 = vld [vmem:[#allocation2] sm:$0xf]  ;;  %v799_v22 = vld [vmem:[#allocation2 + $0x4] sm:$0xf]  ;;  %v800_v23 = vld [vmem:[#allocation2 + $0x8] sm:$0x1] }
  0xa7   : > { %2286 = vmatpush.bf16.msra.mxu0 %v8820_v13  ;;  %v1373_v24 = vld [vmem:[#allocation2 + $0xc] sm:$0xf]  ;;  %v832_v25 = vshrl.u32 %v798_v21, 16  ;;  %v835_v26 = vshll.u32 %v798_v21, 16  ;;  %v841_v27 = vshll.u32 %v799_v22, 16  ;;  %v845_v28 = vshrl.u32 %v799_v22, 16  ;;  %vm9871_vm11 = vmor %vm828_vm9, %vm829_vm10 }
  0xa8   : > { %2345 = vmatpush.bf16.msra.mxu1 %v8828_v14  ;;  %9124 = vmatpush.bf16.msra.mxu3 %v8828_v14  ;;  %v1413_v29 = vld [vmem:[#allocation2 + $0xc] sm:$0xf]  ;;  %v851_v30 = vshll.u32 %v800_v23, 16  ;;  %v1415_v32 = vld [vmem:[#allocation2 + $0x14] sm:$0x1]  ;;  %v8817_v39 = vld [vmem:[#allocation7 + $0xd8] sm:$0xff] }
  0xa9   : > { %v1444_v33 = vshrl.u32 %v1413_v29, 16  ;;  %v1374_v34 = vld [vmem:[#allocation2 + $0x10] sm:$0xf]  ;;  %v834_v35 = vrot.slane %v832_v25, 4  ;;  %v837_v36 = vrot.slane %v835_v26, 5  ;;  %v843_v37 = vrot.slane %v841_v27, 5 }
  0xaa   : > { %v847_v38 = vrot.slane %v845_v28, 4  ;;  %v8825_v40 = vld [vmem:[#allocation7 + $0x118] sm:$0xff]  ;;  %v853_v41 = vrot.slane %v851_v30, 5  ;;  %v1447_v43 = vshll.u32 %v1413_v29, 16  ;;  %v1453_v44 = vshll.u32 %v1414_v31, 16  ;;  %v8816_v61 = vld [vmem:[#allocation7 + $0xd0] sm:$0xff] }
  0xab   : > { %2287 = vmatpush.bf16.msra.mxu0 %v8819_v17  ;;  %v1446_v42 = vrot.slane %v1444_v33, 4  ;;  %v2983_v45 = vld [vmem:[#allocation2 + $0x18] sm:$0xf]  ;;  %v9865_v46 = vld [vmem:[#allocation3] sm:$0xf]  ;;  %v838_v47 = vor.u32 %v837_v36, %v834_v35  ;;  %v1457_v49 = vshrl.u32 %v1414_v31, 16 }
  0xac   : > { %2346 = vmatpush.bf16.msra.mxu1 %v8827_v18  ;;  %9125 = vmatpush.bf16.msra.mxu3 %v8827_v18  ;;  %v848_v48 = vor.u32 %v847_v38, %v843_v37  ;;  %v1463_v50 = vshll.u32 %v1415_v32, 16  ;;  %v2984_v51 = vld [vmem:[#allocation2 + $0x1c] sm:$0xf]  ;;  %1393 = vst [vmem:[#allocation3] sm:$0xf] %v1373_v24  ;;  %v11312_v53 = vsel %vm9871_vm11, 4294967295, %v11311_v53 }
  0xad   : > { %v9867_v52 = vld [vmem:[#allocation3 + $0x8] sm:$0xf0]  ;;  %11313 = vst [vmem:[#allocation24_spill] sm:$0xff] %v11312_v53  ;;  %v1449_v54 = vrot.slane %v1447_v43, 5  ;;  %v9875_v55 = vrot.slane %v1453_v44, 5  ;;  %v839_v57 = vrot.slane %v838_v47, 4 }
  0xae   : > { %v2985_v56 = vld [vmem:[#allocation2 + $0x20] sm:$0x1]  ;;  %1394 = vst [vmem:[#allocation3 + $0xc] sm:$0xf] %v1374_v34  ;;  %v849_v58 = vrot.slane %v848_v48, 4  ;;  %v1459_v60 = vrot.slane %v1457_v49, 4 }
  0xaf   : > { %2288 = vmatpush.bf16.msra.mxu0 %v8818_v19  ;;  %v1450_v62 = vor.u32 %v1449_v54, %v1446_v42  ;;  %v3014_v63 = vshrl.u32 %v2983_v45, 16  ;;  %v3017_v0 = vshll.u32 %v2983_v45, 16  ;;  %v3023_v2 = vshll.u32 %v2984_v51, 16  ;;  %v819_v4 = vld [vmem:[#allocation2 + $0x54] sm:$0xf]  ;;  %v8815_v22 = vld [vmem:[#allocation7 + $0xc8] sm:$0xff] }
  0xb0   : > { %2347 = vmatpush.bf16.msra.mxu1 %v8826_v20  ;;  %9126 = vmatpush.bf16.msra.mxu3 %v8826_v20  ;;  %v8824_v5 = vld [vmem:[#allocation7 + $0x110] sm:$0xff]  ;;  %v2943_v6 = vld [vmem:[#allocation2 + $0x18] sm:$0xf]  ;;  %v844_v7 = vsel %vm9871_vm11, %v839_v57, %v843_v37  ;;  %v854_v8 = vsel %vm9871_vm11, %v849_v58, %v853_v41  ;;  %v1460_v9 = vor.u32 %v1459_v60, %v9875_v55  ;;  %v3027_v10 = vshrl.u32 %v2984_v51, 16  ;;  %v2944_v12 = vld [vmem:[#allocation2 + $0x1c] sm:$0xf] }
  0xb1   : > { %v820_v11 = vld [vmem:[#allocation2 + $0x58] sm:$0xf]  ;;  %1091 = vst [vmem:[#allocation3 + $0x4] sm:$0xf] %v844_v7  ;;  %v1465_v13 = vrot.slane %v1463_v50, 5  ;;  %v3016_v14 = vrot.slane %v3014_v63, 4 }
  0xb2   : > { %v3019_v15 = vrot.slane %v3017_v0, 5  ;;  %v9882_v16 = vrot.slane %v3023_v2, 5  ;;  %1092 = vst [vmem:[#allocation3 + $0x10] sm:$0xf] %v854_v8  ;;  %v1451_v17 = vrot.slane %v1450_v62, 4  ;;  %v3029_v18 = vrot.slane %v3027_v10, 4 }
  0xb3   : > { %2289 = vmatpush.bf16.msra.mxu0 %v8817_v39  ;;  %v3033_v19 = vshll.u32 %v2985_v56, 16  ;;  %v821_v20 = vld [vmem:[#allocation2 + $0x5c] sm:$0x1]  ;;  %v1000_v21 = vshrl.u32 %v819_v4, 16  ;;  %v1461_v23 = vrot.slane %v1460_v9, 4  ;;  %v1003_v25 = vshll.u32 %v819_v4, 16 }
  0xb4   : > { %2348 = vmatpush.bf16.msra.mxu1 %v8825_v40  ;;  %9127 = vmatpush.bf16.msra.mxu3 %v8825_v40  ;;  %v3020_v24 = vor.u32 %v3019_v15, %v3016_v14  ;;  %v1009_v26 = vshll.u32 %v820_v11, 16  ;;  %v1434_v27 = vld [vmem:[#allocation2 + $0x60] sm:$0xf]  ;;  %v8823_v28 = vld [vmem:[#allocation7 + $0x108] sm:$0xff]  ;;  %v9884_v29 = vld [vmem:[#allocation3] sm:$0xf]  ;;  %v3030_v30 = vor.u32 %v3029_v18, %v9882_v16  ;;  %v1456_v36 = vsel %vm9871_vm11, %v1451_v17, %v9875_v55 }
  0xb5   : > { %v1002_v31 = vrot.slane %v1000_v21, 4  ;;  %v1435_v32 = vld [vmem:[#allocation2 + $0x64] sm:$0xf]  ;;  %v9887_v33 = vld [vmem:[#allocation3 + $0x8] sm:$0xf0]  ;;  %v9889_v34 = vrot.slane %v3033_v19, 5  ;;  %v1466_v44 = vsel %vm9871_vm11, %v1461_v23, %v1465_v13 }
  0xb6   : > { %2963 = vst [vmem:[#allocation3] sm:$0xf] %v2943_v6  ;;  %v1005_v35 = vrot.slane %v1003_v25, 5  ;;  %v9894_v37 = vrot.slane %v3020_v24, 4  ;;  %v1011_v38 = vrot.slane %v1009_v26, 5  ;;  %v1013_v39 = vshrl.u32 %v820_v11, 16 }
  0xb7   : > { %2290 = vmatpush.bf16.msra.mxu0 %v8816_v61  ;;  %2964 = vst [vmem:[#allocation3 + $0xc] sm:$0xf] %v2944_v12  ;;  %v1436_v40 = vld [vmem:[#allocation2 + $0x68] sm:$0x1]  ;;  %v8837_v41 = vld [vmem:[#allocation7 + $0x178] sm:$0xff]  ;;  %v8814_v42 = vld [vmem:[#allocation7 + $0xc0] sm:$0xff]  ;;  %v7461_v58 = vor.u32 %v9887_v33, %v9884_v29 }
  0xb8   : > { %2349 = vmatpush.bf16.msra.mxu1 %v8824_v5  ;;  %9128 = vmatpush.bf16.msra.mxu3 %v8824_v5  ;;  %v8822_v43 = vld [vmem:[#allocation7 + $0x100] sm:$0xff]  ;;  %v1006_v45 = vor.u32 %v1005_v35, %v1002_v31  ;;  %v1019_v47 = vshll.u32 %v821_v20, 16  ;;  %v1612_v48 = vshrl.u32 %v1434_v27, 16  ;;  %v3004_v49 = vld [vmem:[#allocation2 + $0x6c] sm:$0xf]  ;;  %v3031_v54 = vrot.slane %v3030_v30, 4 }
  0xb9   : > { %v3005_v50 = vld [vmem:[#allocation2 + $0x70] sm:$0xf]  ;;  %v9898_v51 = vld [vmem:[#allocation3 + $0x4] sm:$0xf]  ;;  %v1015_v55 = vrot.slane %v1013_v39, 4  ;;  %v1615_v56 = vshll.u32 %v1434_v27, 16  ;;  %9131 = vmatpush.bf16.msra.mxu2 %v8837_v41  ;;  %v3026_v14 = vsel %vm9871_vm11, %v9894_v37, %v9882_v16 }
  0xba   : > { %v1621_v57 = vshll.u32 %v1435_v32, 16  ;;  %v9902_v60 = vld [vmem:[#allocation3 + $0xc] sm:$0xf0]  ;;  %1703 = vst [vmem:[#allocation3 + $0x4] sm:$0xf] %v1456_v36  ;;  %v1007_v61 = vrot.slane %v1006_v45, 4  ;;  %v3036_v24 = vsel %vm9871_vm11, %v3031_v54, %v9889_v34 }
  0xbb   : > { %2291 = vmatpush.bf16.msra.mxu0 %v8815_v22  ;;  %v1021_v62 = vrot.slane %v1019_v47, 5  ;;  %1704 = vst [vmem:[#allocation3 + $0x10] sm:$0xf] %v1466_v44  ;;  %v1016_v63 = vor.u32 %v1015_v55, %v1011_v38  ;;  %v1614_v0 = vrot.slane %v1612_v48, 4  ;;  %v1617_v2 = vrot.slane %v1615_v56, 5  ;;  %p8116_p11 = scmp.ne.s32.totalorder %s9471_s24, 0 }
  0xbc   : > { %2350 = vmatpush.bf16.msra.mxu1 %v8823_v28  ;;  %9129 = vmatpush.bf16.msra.mxu3 %v8823_v28  ;;  %v1623_v4 = vrot.slane %v1621_v57, 5  ;;  %v1012_v5 = vsel %vm9871_vm11, %v1007_v61, %v1011_v38  ;;  %v1625_v6 = vshrl.u32 %v1435_v32, 16  ;;  %v1631_v7 = vshll.u32 %v1436_v40, 16  ;;  %v3006_v8 = vld [vmem:[#allocation2 + $0x74] sm:$0x1] }
  0xbd   : > { %v3182_v9 = vshrl.u32 %v3004_v49, 16  ;;  %v1017_v10 = vrot.slane %v1016_v63, 4  ;;  %1105 = vst [vmem:[#allocation3 + $0xac] sm:$0xf] %v1012_v5  ;;  %v1618_v11 = vor.u32 %v1617_v2, %v1614_v0  ;;  %v3185_v12 = vshll.u32 %v3004_v49, 16 }
  0xbe   : > { %v3191_v13 = vshll.u32 %v3005_v50, 16  ;;  %v1627_v15 = vrot.slane %v1625_v6, 4  ;;  %v3195_v18 = vshrl.u32 %v3005_v50, 16  ;;  %v760_v19 = vld [vmem:[#allocation2 + $0xc] sm:$0xf]  ;;  %v1633_v28 = vrot.slane %v1631_v7, 5 }
  0xbf   : > { %2292 = vmatpush.bf16.msra.mxu0 %v8814_v42  ;;  %v3184_v17 = vrot.slane %v3182_v9, 4  ;;  %v1022_v20 = vsel %vm9871_vm11, %v1017_v10, %v1021_v62  ;;  %v1619_v21 = vrot.slane %v1618_v11, 4  ;;  %v3187_v22 = vrot.slane %v3185_v12, 5  ;;  %v761_v26 = vld [vmem:[#allocation2 + $0x10] sm:$0xf] }
  0xc0   : > { %2351 = vmatpush.bf16.msra.mxu1 %v8822_v43  ;;  %9130 = vmatpush.bf16.msra.mxu3 %v8822_v43  ;;  %v9912_v23 = vrot.slane %v3191_v13, 5  ;;  %1106 = vst [vmem:[#allocation3 + $0xb8] sm:$0xf] %v1022_v20  ;;  %v1628_v25 = vor.u32 %v1627_v15, %v1623_v4  ;;  %v3197_v16 = vrot.slane %v3195_v18, 4  ;;  %v3201_v30 = vshll.u32 %v3006_v8, 16 }
  0xc1   : > { %v8784_v27 = vld [vmem:[#allocation3 + $0x4] sm:$0xf]  ;;  %v3188_v29 = vor.u32 %v3187_v22, %v3184_v17  ;;  %780 = vst [vmem:[#allocation3 + $0x18] sm:$0xf] %v760_v19  ;;  %v1624_v32 = vsel %vm9871_vm11, %v1619_v21, %v1623_v4  ;;  %v1375_v37 = vld [vmem:[#allocation2 + $0x18] sm:$0xf] }
  0xc2   : > { %2293 = vmatmul.bf16.vlgmr.msra.gmra.mxu0 %v7461_v58  ;;  %v7462_v31 = vld [vmem:[#allocation3 + $0xc] sm:$0xf0]  ;;  %3273 = vst [vmem:[#allocation3 + $0x4] sm:$0xf] %v3026_v14  ;;  %v1629_v33 = vrot.slane %v1628_v25, 4  ;;  %v3198_v34 = vor.u32 %v3197_v16, %v9912_v23  ;;  %v3203_v40 = vrot.slane %v3201_v30, 5 }
  0xc3   : > { %2403 = vmatpush.bf16.msrb.mxu0 %v8837_v41  ;;  %v7465_v35 = vor.u32 %v8784_v27, %v7462_v31  ;;  %3274 = vst [vmem:[#allocation3 + $0x10] sm:$0xf] %v3036_v24  ;;  %v3189_v39 = vrot.slane %v3188_v29, 4  ;;  %v801_v41 = vld [vmem:[#allocation2 + $0xc] sm:$0xf]  ;;  %vm1172_vm13 = vcmask 1046532  }
  0xc4   : > { %v9920_v36 = vld [vmem:[#allocation3 + $0xac] sm:$0xf]  ;;  %781 = vst [vmem:[#allocation3 + $0x24] sm:$0xf] %v761_v26  ;;  %v1634_v38 = vsel %vm9871_vm11, %v1629_v33, %v1633_v28  ;;  %v802_v42 = vld [vmem:[#allocation2 + $0x10] sm:$0xf]  ;;  %vm10014_vm14 = vmor %vm1171_vm12, %vm1172_vm13 }
  0xc5   : > { %11314 = vst [vmem:[#allocation25_spill] sm:$0xff] %v9920_v36  ;;  %2352 = vmatmul.bf16.vlgmr.msra.gmra.mxu1 %v7465_v35  ;;  %v803_v43 = vld [vmem:[#allocation2 + $0x14] sm:$0x1]  ;;  %v856_v44 = vshrl.u32 %v801_v41, 16  ;;  %v859_v45 = vshll.u32 %v801_v41, 16  ;;  %v3199_v48 = vrot.slane %v3198_v34, 4  ;;  %v3194_v0 = vsel %vm9871_vm11, %v3189_v39, %v9912_v23 }
  0xc6   : > { %1717 = vst [vmem:[#allocation3 + $0xac] sm:$0xf] %v1624_v32  ;;  %v1376_v49 = vld [vmem:[#allocation2 + $0x1c] sm:$0xf]  ;;  %v865_v50 = vshll.u32 %v802_v42, 16  ;;  %v869_v54 = vshrl.u32 %v802_v42, 16 }
  0xc7   : > { %v9924_v47 = vld [vmem:[#allocation3 + $0xb4] sm:$0xf0]  ;;  %v875_v55 = vshll.u32 %v803_v43, 16  ;;  %v858_v57 = vrot.slane %v856_v44, 4  ;;  %v861_v58 = vrot.slane %v859_v45, 5  ;;  %v3204_v13 = vsel %vm9871_vm11, %v3199_v48, %v3203_v40  ;;  %v8836_v44 = vld [vmem:[#allocation7 + $0x170] sm:$0xff] }
  0xc8   : > { %11315 = vst [vmem:[#allocation26_spill] sm:$0xff] %v9924_v47  ;;  %v9926_v56 = vld [vmem:[#allocation3 + $0x18] sm:$0xf]  ;;  %v867_v61 = vrot.slane %v865_v50, 5  ;;  %v871_v62 = vrot.slane %v869_v54, 4  ;;  %v8767_v54 = vld [vmem:[#allocation7 + $0x38] sm:$0xff]  ;;  %9132 = vmatpush.bf16.msra.mxu2 %v8836_v44  ;;  %2404 = vmatpush.bf16.msrb.mxu0 %v8836_v44 }
  0xc9   : > { %1718 = vst [vmem:[#allocation3 + $0xb8] sm:$0xf] %v1634_v38  ;;  %v877_v63 = vrot.slane %v875_v55, 5  ;;  %v862_v2 = vor.u32 %v861_v58, %v858_v57  ;;  %v1416_v4 = vld [vmem:[#allocation2 + $0x18] sm:$0xf]  ;;  %2766 = vmatpush.bf16.msrb.mxu3 %v8767_v54 }
  0xca   : > { %1395 = vst [vmem:[#allocation3 + $0x18] sm:$0xf] %v1375_v37  ;;  %v1417_v5 = vld [vmem:[#allocation2 + $0x1c] sm:$0xf]  ;;  %v1418_v6 = vld [vmem:[#allocation2 + $0x20] sm:$0x1]  ;;  %v872_v8 = vor.u32 %v871_v62, %v867_v61 }
  0xcb   : > { %v9931_v7 = vld [vmem:[#allocation3 + $0x20] sm:$0xf0]  ;;  %v1468_v9 = vshrl.u32 %v1416_v4, 16  ;;  %v1471_v10 = vshll.u32 %v1416_v4, 16  ;;  %v1477_v11 = vshll.u32 %v1417_v5, 16  ;;  %v863_v15 = vrot.slane %v862_v2, 4 }
  0xcc   : > { %1396 = vst [vmem:[#allocation3 + $0x24] sm:$0xf] %v1376_v49  ;;  %v2945_v14 = vld [vmem:[#allocation2 + $0x24] sm:$0xf]  ;;  %v1481_v17 = vshrl.u32 %v1417_v5, 16  ;;  %v873_v18 = vrot.slane %v872_v8, 4 }
  0xcd   : > { %v8805_v12 = vld [vmem:[#allocation3 + $0xac] sm:$0xf]  ;;  %v1470_v19 = vrot.slane %v1468_v9, 4  ;;  %v1473_v20 = vrot.slane %v1471_v10, 5  ;;  %v1479_v21 = vrot.slane %v1477_v11, 5  ;;  %v868_v22 = vsel %vm9871_vm11, %v863_v15, %v867_v61  ;;  %v8835_v62 = vld [vmem:[#allocation7 + $0x168] sm:$0xff] }
  0xce   : > { %3287 = vst [vmem:[#allocation3 + $0xac] sm:$0xf] %v3194_v0  ;;  %v1483_v23 = vrot.slane %v1481_v17, 4  ;;  %v1487_v24 = vshll.u32 %v1418_v6, 16  ;;  %v2986_v25 = vld [vmem:[#allocation2 + $0x24] sm:$0xf]  ;;  %v878_v28 = vsel %vm9871_vm11, %v873_v18, %v877_v63  ;;  %9133 = vmatpush.bf16.msra.mxu2 %v8835_v62  ;;  %2405 = vmatpush.bf16.msrb.mxu0 %v8835_v62 }
  0xcf   : > { %v2987_v16 = vld [vmem:[#allocation2 + $0x28] sm:$0xf]  ;;  %1093 = vst [vmem:[#allocation3 + $0x1c] sm:$0xf] %v868_v22  ;;  %v1474_v29 = vor.u32 %v1473_v20, %v1470_v19  ;;  %v2988_v30 = vld [vmem:[#allocation2 + $0x2c] sm:$0x1] }
  0xd0   : > { %v7546_v26 = vld [vmem:[#allocation3 + $0xb4] sm:$0xf0]  ;;  %v1484_v33 = vor.u32 %v1483_v23, %v1479_v21  ;;  %v1489_v35 = vrot.slane %v1487_v24, 5  ;;  %v3038_v34 = vshrl.u32 %v2986_v25, 16  ;;  %v3041_v38 = vshll.u32 %v2986_v25, 16  ;;  %v8834_v22 = vld [vmem:[#allocation7 + $0x160] sm:$0xff] }
  0xd1   : > { %v2946_v27 = vld [vmem:[#allocation2 + $0x28] sm:$0xf]  ;;  %v7549_v31 = vor.u32 %v8805_v12, %v7546_v26  ;;  %3288 = vst [vmem:[#allocation3 + $0xb8] sm:$0xf] %v3204_v13  ;;  %v1475_v37 = vrot.slane %v1474_v29, 4  ;;  %v3047_v39 = vshll.u32 %v2987_v16, 16 }
  0xd2   : > { %v7472_v32 = vld [vmem:[#allocation3 + $0x18] sm:$0xf]  ;;  %v3051_v40 = vshrl.u32 %v2987_v16, 16  ;;  %1094 = vst [vmem:[#allocation3 + $0x28] sm:$0xf] %v878_v28  ;;  %v1485_v41 = vrot.slane %v1484_v33, 4  ;;  %9134 = vmatpush.bf16.msra.mxu2 %v8834_v22  ;;  %2406 = vmatpush.bf16.msrb.mxu0 %v8834_v22 }
  0xd3   : > { %2965 = vst [vmem:[#allocation3 + $0x18] sm:$0xf] %v2945_v14  ;;  %2387 = vmatmul.bf16.vlgmr.msra.gmra.mxu3 %v7549_v31  ;;  %v3040_v42 = vrot.slane %v3038_v34, 4  ;;  %v3057_v43 = vshll.u32 %v2988_v30, 16  ;;  %v8788_v45 = vld [vmem:[#allocation3 + $0x20] sm:$0xf0]  ;;  %v1480_v57 = vsel %vm9871_vm11, %v1475_v37, %v1479_v21 }
  0xd4   : > { %v3043_v48 = vrot.slane %v3041_v38, 5  ;;  %v9939_v49 = vrot.slane %v3047_v39, 5  ;;  %v3053_v50 = vrot.slane %v3051_v40, 4  ;;  %v7473_v55 = vor.u32 %v8788_v45, %v7472_v32  ;;  %2966 = vst [vmem:[#allocation3 + $0x24] sm:$0xf] %v2946_v27  ;;  %v8766_v12 = vld [vmem:[#allocation7 + $0x30] sm:$0xff] }
  0xd5   : > { %v9943_v58 = vrot.slane %v3057_v43, 5  ;;  %v822_v61 = vld [vmem:[#allocation2 + $0x60] sm:$0xf]  ;;  %v823_v0 = vld [vmem:[#allocation2 + $0x64] sm:$0xf]  ;;  %v1490_v8 = vsel %vm9871_vm11, %v1485_v41, %v1489_v35  ;;  %2767 = vmatpush.bf16.msrb.mxu3 %v8766_v12  ;;  %v8765_v30 = vld [vmem:[#allocation7 + $0x28] sm:$0xff] }
  0xd6   : > { %v3044_v63 = vor.u32 %v3043_v48, %v3040_v42  ;;  %v824_v2 = vld [vmem:[#allocation2 + $0x68] sm:$0x1]  ;;  %v1024_v4 = vshrl.u32 %v822_v61, 16  ;;  %v1027_v5 = vshll.u32 %v822_v61, 16  ;;  %2298 = vmatmul.bf16.gmra.mxu0 %v7473_v55  ;;  %v9945_v6 = vld [vmem:[#allocation3 + $0x1c] sm:$0xf]  ;;  %v3054_v14 = vor.u32 %v3053_v50, %v9939_v49 }
  0xd7   : > { %v1033_v9 = vshll.u32 %v823_v0, 16  ;;  %v1037_v10 = vshrl.u32 %v823_v0, 16  ;;  %v1043_v11 = vshll.u32 %v824_v2, 16  ;;  %1705 = vst [vmem:[#allocation3 + $0x1c] sm:$0xf] %v1480_v57  ;;  %v8833_v37 = vld [vmem:[#allocation7 + $0x158] sm:$0xff] }
  0xd8   : > { %v3045_v13 = vrot.slane %v3044_v63, 4  ;;  %v1026_v15 = vrot.slane %v1024_v4, 4  ;;  %v1029_v17 = vrot.slane %v1027_v5, 5  ;;  %v1437_v21 = vld [vmem:[#allocation2 + $0x6c] sm:$0xf]  ;;  %v3055_v32 = vrot.slane %v3054_v14, 4  ;;  %9135 = vmatpush.bf16.msra.mxu2 %v8833_v37  ;;  %2407 = vmatpush.bf16.msrb.mxu0 %v8833_v37 }
  0xd9   : > { %v1035_v18 = vrot.slane %v1033_v9, 5  ;;  %v1039_v19 = vrot.slane %v1037_v10, 4  ;;  %v1045_v20 = vrot.slane %v1043_v11, 5  ;;  %v9950_v23 = vld [vmem:[#allocation3 + $0x24] sm:$0xf0]  ;;  %v1636_v27 = vshrl.u32 %v1437_v21, 16  ;;  %2768 = vmatpush.bf16.msrb.mxu3 %v8765_v30 }
  0xda   : > { %v1030_v24 = vor.u32 %v1029_v17, %v1026_v15  ;;  %v1438_v25 = vld [vmem:[#allocation2 + $0x70] sm:$0xf]  ;;  %v1439_v16 = vld [vmem:[#allocation2 + $0x74] sm:$0x1]  ;;  %1706 = vst [vmem:[#allocation3 + $0x28] sm:$0xf] %v1490_v8  ;;  %v3050_v31 = vsel %vm9871_vm11, %v3045_v13, %v9939_v49  ;;  %v3060_v63 = vsel %vm9871_vm11, %v3055_v32, %v9943_v58 }
  0xdb   : > { %v1040_v26 = vor.u32 %v1039_v19, %v1035_v18  ;;  %v1639_v28 = vshll.u32 %v1437_v21, 16  ;;  %v1645_v29 = vshll.u32 %v1438_v25, 16  ;;  %v1649_v35 = vshrl.u32 %v1438_v25, 16  ;;  %v3007_v34 = vld [vmem:[#allocation2 + $0x78] sm:$0xf]  ;;  %v8764_v49 = vld [vmem:[#allocation7 + $0x20] sm:$0xff] }
  0xdc   : > { %v1031_v33 = vrot.slane %v1030_v24, 4  ;;  %v1638_v39 = vrot.slane %v1636_v27, 4  ;;  %v3008_v42 = vld [vmem:[#allocation2 + $0x7c] sm:$0xf]  ;;  %v1655_v45 = vshll.u32 %v1439_v16, 16  ;;  %v3206_v50 = vshrl.u32 %v3007_v34, 16 }
  0xdd   : > { %v1041_v38 = vrot.slane %v1040_v26, 4  ;;  %v1641_v40 = vrot.slane %v1639_v28, 5  ;;  %v1647_v41 = vrot.slane %v1645_v29, 5  ;;  %v1651_v44 = vrot.slane %v1649_v35, 4  ;;  %v3009_v48 = vld [vmem:[#allocation2 + $0x80] sm:$0x1]  ;;  %2769 = vmatpush.bf16.msrb.mxu3 %v8764_v49 }
  0xde   : > { %v1036_v43 = vsel %vm9871_vm11, %v1031_v33, %v1035_v18  ;;  %v8787_v54 = vld [vmem:[#allocation3 + $0x1c] sm:$0xf]  ;;  %v3209_v61 = vshll.u32 %v3007_v34, 16  ;;  %v3215_v62 = vshll.u32 %v3008_v42, 16  ;;  %v3208_v2 = vrot.slane %v3206_v50, 4 }
  0xdf   : > { %v1046_v55 = vsel %vm9871_vm11, %v1041_v38, %v1045_v20  ;;  %1107 = vst [vmem:[#allocation3 + $0xc4] sm:$0xf] %v1036_v43  ;;  %v1642_v57 = vor.u32 %v1641_v40, %v1638_v39  ;;  %v1652_v0 = vor.u32 %v1651_v44, %v1647_v41  ;;  %v3219_v4 = vshrl.u32 %v3008_v42, 16  ;;  %v762_v58 = vld [vmem:[#allocation2 + $0x18] sm:$0xf] }
  0xe0   : > { %3275 = vst [vmem:[#allocation3 + $0x1c] sm:$0xf] %v3050_v31  ;;  %v3211_v8 = vrot.slane %v3209_v61, 5  ;;  %v3217_v9 = vrot.slane %v3215_v62, 5  ;;  %v1657_v12 = vrot.slane %v1655_v45, 5  ;;  %v3225_v14 = vshll.u32 %v3009_v48, 16 }
  0xe1   : > { %1108 = vst [vmem:[#allocation3 + $0xd0] sm:$0xf] %v1046_v55  ;;  %v1643_v5 = vrot.slane %v1642_v57, 4  ;;  %v7474_v10 = vld [vmem:[#allocation3 + $0x24] sm:$0xf0]  ;;  %v1653_v11 = vrot.slane %v1652_v0, 4 }
  0xe2   : > { %v3221_v13 = vrot.slane %v3219_v4, 4  ;;  %v7477_v15 = vor.u32 %v8787_v54, %v7474_v10  ;;  %3276 = vst [vmem:[#allocation3 + $0x28] sm:$0xf] %v3060_v63  ;;  %v3212_v17 = vor.u32 %v3211_v8, %v3208_v2  ;;  %v763_v18 = vld [vmem:[#allocation2 + $0x1c] sm:$0xf]  ;;  %v3227_v25 = vrot.slane %v3225_v14, 5 }
  0xe3   : > { %v1648_v19 = vsel %vm9871_vm11, %v1643_v5, %v1647_v41  ;;  %782 = vst [vmem:[#allocation3 + $0x30] sm:$0xf] %v762_v58  ;;  %v1658_v22 = vsel %vm9871_vm11, %v1653_v11, %v1657_v12  ;;  %v1377_v16 = vld [vmem:[#allocation2 + $0x24] sm:$0xf]  ;;  %v804_v26 = vld [vmem:[#allocation2 + $0x18] sm:$0xf] }
  0xe4   : > { %2357 = vmatmul.bf16.gmra.mxu1 %v7477_v15  ;;  %v3222_v20 = vor.u32 %v3221_v13, %v3217_v9  ;;  %783 = vst [vmem:[#allocation3 + $0x3c] sm:$0xf] %v763_v18  ;;  %v3213_v24 = vrot.slane %v3212_v17, 4  ;;  %v805_v27 = vld [vmem:[#allocation2 + $0x1c] sm:$0xf]  ;;  %v880_v31 = vshrl.u32 %v804_v26, 16 }
  0xe5   : > { %v1378_v29 = vld [vmem:[#allocation2 + $0x28] sm:$0xf]  ;;  %v806_v30 = vld [vmem:[#allocation2 + $0x20] sm:$0x1]  ;;  %v883_v32 = vshll.u32 %v804_v26, 16  ;;  %v889_v35 = vshll.u32 %v805_v27, 16 }
  0xe6   : > { %v9964_v21 = vld [vmem:[#allocation3 + $0xc4] sm:$0xf]  ;;  %v3223_v33 = vrot.slane %v3222_v20, 4  ;;  %v893_v34 = vshrl.u32 %v805_v27, 16  ;;  %v899_v37 = vshll.u32 %v806_v30, 16  ;;  %v882_v38 = vrot.slane %v880_v31, 4 }
  0xe7   : > { %11316 = vst [vmem:[#allocation27_spill] sm:$0xff] %v9964_v21  ;;  %v885_v39 = vrot.slane %v883_v32, 5  ;;  %v1419_v40 = vld [vmem:[#allocation2 + $0x24] sm:$0xf]  ;;  %v1420_v41 = vld [vmem:[#allocation2 + $0x28] sm:$0xf]  ;;  %v3218_v50 = vsel %vm9871_vm11, %v3213_v24, %v3217_v9 }
  0xe8   : > { %1719 = vst [vmem:[#allocation3 + $0xc4] sm:$0xf] %v1648_v19  ;;  %v9968_v28 = vld [vmem:[#allocation3 + $0xcc] sm:$0xf0]  ;;  %v891_v43 = vrot.slane %v889_v35, 5  ;;  %v895_v44 = vrot.slane %v893_v34, 4  ;;  %v3228_v2 = vsel %vm9871_vm11, %v3223_v33, %v3227_v25 }
  0xe9   : > { %11317 = vst [vmem:[#allocation28_spill] sm:$0xff] %v9968_v28  ;;  %v901_v45 = vrot.slane %v899_v37, 5  ;;  %v1492_v48 = vshrl.u32 %v1419_v40, 16  ;;  %v886_v54 = vor.u32 %v885_v39, %v882_v38  ;;  %v1421_v55 = vld [vmem:[#allocation2 + $0x2c] sm:$0x1]  ;;  %v1495_v62 = vshll.u32 %v1419_v40, 16 }
  0xea   : > { %1720 = vst [vmem:[#allocation3 + $0xd0] sm:$0xf] %v1658_v22  ;;  %v9970_v42 = vld [vmem:[#allocation3 + $0x30] sm:$0xf]  ;;  %v896_v57 = vor.u32 %v895_v44, %v891_v43  ;;  %v1501_v63 = vshll.u32 %v1420_v41, 16  ;;  %v1505_v5 = vshrl.u32 %v1420_v41, 16 }
  0xeb   : > { %v9974_v49 = vld [vmem:[#allocation3 + $0x38] sm:$0xf0]  ;;  %1397 = vst [vmem:[#allocation3 + $0x30] sm:$0xf] %v1377_v16  ;;  %v1494_v61 = vrot.slane %v1492_v48, 4  ;;  %v887_v4 = vrot.slane %v886_v54, 4 }
  0xec   : > { %1398 = vst [vmem:[#allocation3 + $0x3c] sm:$0xf] %v1378_v29  ;;  %v1511_v8 = vshll.u32 %v1421_v55, 16  ;;  %v2947_v10 = vld [vmem:[#allocation2 + $0x30] sm:$0xf]  ;;  %v897_v9 = vrot.slane %v896_v57, 4 }
  0xed   : > { %v1497_v11 = vrot.slane %v1495_v62, 5  ;;  %v9978_v12 = vrot.slane %v1501_v63, 5  ;;  %v2948_v14 = vld [vmem:[#allocation2 + $0x34] sm:$0xf]  ;;  %v892_v15 = vsel %vm9871_vm11, %v887_v4, %v891_v43  ;;  %v1507_v17 = vrot.slane %v1505_v5, 4 }
  0xee   : > { %v9982_v58 = vrot.slane %v1511_v8, 5  ;;  %v2989_v18 = vld [vmem:[#allocation2 + $0x30] sm:$0xf]  ;;  %v902_v20 = vsel %vm9871_vm11, %v897_v9, %v901_v45  ;;  %v2990_v24 = vld [vmem:[#allocation2 + $0x34] sm:$0xf]  ;;  %v8831_v9 = vld [vmem:[#allocation7 + $0x148] sm:$0xff] }
  0xef   : > { %v8808_v0 = vld [vmem:[#allocation3 + $0xc4] sm:$0xf]  ;;  %v1498_v22 = vor.u32 %v1497_v11, %v1494_v61  ;;  %v2991_v25 = vld [vmem:[#allocation2 + $0x38] sm:$0x1]  ;;  %1095 = vst [vmem:[#allocation3 + $0x34] sm:$0xf] %v892_v15  ;;  %v1508_v16 = vor.u32 %v1507_v17, %v9978_v12 }
  0xf0   : > { %3289 = vst [vmem:[#allocation3 + $0xc4] sm:$0xf] %v3218_v50  ;;  %v3062_v26 = vshrl.u32 %v2989_v18, 16  ;;  %v3065_v27 = vshll.u32 %v2989_v18, 16  ;;  %v3071_v29 = vshll.u32 %v2990_v24, 16  ;;  %v8832_v30 = vld [vmem:[#allocation7 + $0x150] sm:$0xff] }
  0xf1   : > { %v7558_v13 = vld [vmem:[#allocation3 + $0xcc] sm:$0xf0]  ;;  %1096 = vst [vmem:[#allocation3 + $0x40] sm:$0xf] %v902_v20  ;;  %v1499_v32 = vrot.slane %v1498_v22, 4  ;;  %v3075_v33 = vshrl.u32 %v2990_v24, 16  ;;  %9136 = vmatpush.bf16.msra.mxu2 %v8832_v30  ;;  %2408 = vmatpush.bf16.msrb.mxu0 %v8832_v30 }
  0xf2   : > { %v7561_v19 = vor.u32 %v8808_v0, %v7558_v13  ;;  %3290 = vst [vmem:[#allocation3 + $0xd0] sm:$0xf] %v3228_v2  ;;  %v7484_v31 = vld [vmem:[#allocation3 + $0x30] sm:$0xf]  ;;  %v1509_v34 = vrot.slane %v1508_v16, 4  ;;  %v3064_v37 = vrot.slane %v3062_v26, 4 }
  0xf3   : > { %v8791_v35 = vld [vmem:[#allocation3 + $0x38] sm:$0xf0]  ;;  %2967 = vst [vmem:[#allocation3 + $0x30] sm:$0xf] %v2947_v10  ;;  %v3067_v39 = vrot.slane %v3065_v27, 5  ;;  %v9987_v40 = vrot.slane %v3071_v29, 5  ;;  %v1504_v43 = vsel %vm9871_vm11, %v1499_v32, %v9978_v12 }
  0xf4   : > { %2392 = vmatmul.bf16.gmra.mxu3 %v7561_v19  ;;  %v7485_v38 = vor.u32 %v8791_v35, %v7484_v31  ;;  %2968 = vst [vmem:[#allocation3 + $0x3c] sm:$0xf] %v2948_v14  ;;  %v825_v41 = vld [vmem:[#allocation2 + $0x6c] sm:$0xf]  ;;  %v1514_v44 = vsel %vm9871_vm11, %v1509_v34, %v9982_v58  ;;  %v3077_v45 = vrot.slane %v3075_v33, 4  ;;  %v3081_v48 = vshll.u32 %v2991_v25, 16 }
  0xf5   : > { %v826_v50 = vld [vmem:[#allocation2 + $0x70] sm:$0xf]  ;;  %v827_v54 = vld [vmem:[#allocation2 + $0x74] sm:$0x1]  ;;  %v3068_v55 = vor.u32 %v3067_v39, %v3064_v37  ;;  %v1048_v57 = vshrl.u32 %v825_v41, 16  ;;  %v1051_v61 = vshll.u32 %v825_v41, 16  ;;  %9137 = vmatpush.bf16.msra.mxu2 %v8831_v9  ;;  %2409 = vmatpush.bf16.msrb.mxu0 %v8831_v9 }
  0xf6   : > { %2303 = vmatmul.bf16.gmra.mxu0 %v7485_v38  ;;  %v1057_v62 = vshll.u32 %v826_v50, 16  ;;  %v1440_v63 = vld [vmem:[#allocation2 + $0x78] sm:$0xf]  ;;  %v3078_v2 = vor.u32 %v3077_v45, %v9987_v40  ;;  %v9996_v4 = vrot.slane %v3081_v48, 5  ;;  %v1061_v5 = vshrl.u32 %v826_v50, 16  ;;  %v8762_v41 = vld [vmem:[#allocation7 + $0x10] sm:$0xff] }
  0xf7   : > { %v8763_v0 = vld [vmem:[#allocation7 + $0x18] sm:$0xff]  ;;  %v1067_v8 = vshll.u32 %v827_v54, 16  ;;  %v9998_v11 = vld [vmem:[#allocation3 + $0x34] sm:$0xf]  ;;  %v3069_v12 = vrot.slane %v3068_v55, 4  ;;  %v1050_v13 = vrot.slane %v1048_v57, 4 }
  0xf8   : > { %v1441_v10 = vld [vmem:[#allocation2 + $0x7c] sm:$0xf]  ;;  %v1053_v14 = vrot.slane %v1051_v61, 5  ;;  %v1059_v15 = vrot.slane %v1057_v62, 5  ;;  %2770 = vmatpush.bf16.msrb.mxu3 %v8763_v0  ;;  %v10000_v17 = vld [vmem:[#allocation3 + $0x3c] sm:$0xf0] }
  0xf9   : > { %1707 = vst [vmem:[#allocation3 + $0x34] sm:$0xf] %v1504_v43  ;;  %v3079_v58 = vrot.slane %v3078_v2, 4  ;;  %v1063_v18 = vrot.slane %v1061_v5, 4  ;;  %v3074_v19 = vsel %vm9871_vm11, %v3069_v12, %v9987_v40  ;;  %v1069_v22 = vrot.slane %v1067_v8, 5  ;;  %v8830_v43 = vld [vmem:[#allocation7 + $0x140] sm:$0xff] }
  0xfa   : > { %1708 = vst [vmem:[#allocation3 + $0x40] sm:$0xf] %v1514_v44  ;;  %v1054_v20 = vor.u32 %v1053_v14, %v1050_v13  ;;  %v1442_v24 = vld [vmem:[#allocation2 + $0x80] sm:$0x1]  ;;  %v1660_v25 = vshrl.u32 %v1440_v63, 16  ;;  %v1663_v27 = vshll.u32 %v1440_v63, 16  ;;  %9138 = vmatpush.bf16.msra.mxu2 %v8830_v43  ;;  %2410 = vmatpush.bf16.msrb.mxu0 %v8830_v43 }
  0xfb   : > { %v3084_v16 = vsel %vm9871_vm11, %v3079_v58, %v9996_v4  ;;  %v1064_v26 = vor.u32 %v1063_v18, %v1059_v15  ;;  %v1669_v29 = vshll.u32 %v1441_v10, 16  ;;  %v3010_v30 = vld [vmem:[#allocation2 + $0x84] sm:$0xf]  ;;  %v1673_v33 = vshrl.u32 %v1441_v10, 16  ;;  %v3011_v34 = vld [vmem:[#allocation2 + $0x88] sm:$0xf] }
  0xfc   : > { %v1055_v31 = vrot.slane %v1054_v20, 4  ;;  %v1662_v32 = vrot.slane %v1660_v25, 4  ;;  %v1679_v35 = vshll.u32 %v1442_v24, 16  ;;  %v1665_v38 = vrot.slane %v1663_v27, 5  ;;  %v8761_v54 = vld [vmem:[#allocation7 + $0x8] sm:$0xff]  ;;  %2771 = vmatpush.bf16.msrb.mxu3 %v8762_v41 }
  0xfd   : > { %v1065_v37 = vrot.slane %v1064_v26, 4  ;;  %v1671_v39 = vrot.slane %v1669_v29, 5  ;;  %v3230_v40 = vshrl.u32 %v3010_v30, 16  ;;  %v1675_v45 = vrot.slane %v1673_v33, 4  ;;  %v1120_v55 = vld [vmem:[#allocation2 + $0x24] sm:$0xe] }
  0xfe   : > { %v1060_v44 = vsel %vm9871_vm11, %v1055_v31, %v1059_v15  ;;  %v1681_v48 = vrot.slane %v1679_v35, 5  ;;  %v3233_v50 = vshll.u32 %v3010_v30, 16  ;;  %v1666_v61 = vor.u32 %v1665_v38, %v1662_v32  ;;  %v3012_v62 = vld [vmem:[#allocation2 + $0x8c] sm:$0x1]  ;;  %v1121_v2 = vld [vmem:[#allocation2 + $0x28] sm:$0xf] }
  0xff   : > { %v1070_v57 = vsel %vm9871_vm11, %v1065_v37, %v1069_v22  ;;  %1109 = vst [vmem:[#allocation3 + $0xdc] sm:$0xf] %v1060_v44  ;;  %v3232_v63 = vrot.slane %v3230_v40, 4  ;;  %v3239_v0 = vshll.u32 %v3011_v34, 16  ;;  %v1676_v5 = vor.u32 %v1675_v45, %v1671_v39  ;;  %v1122_v18 = vld [vmem:[#allocation2 + $0x2c] sm:$0x1] }
 0x100   : > { %v8790_v4 = vld [vmem:[#allocation3 + $0x34] sm:$0xf]  ;;  %1110 = vst [vmem:[#allocation3 + $0xe8] sm:$0xf] %v1070_v57  ;;  %v3235_v8 = vrot.slane %v3233_v50, 5  ;;  %v3243_v10 = vshrl.u32 %v3011_v34, 16  ;;  %2772 = vmatpush.bf16.msrb.mxu3 %v8761_v54 }
 0x101   : > { %v7486_v9 = vld [vmem:[#allocation3 + $0x3c] sm:$0xf0]  ;;  %3277 = vst [vmem:[#allocation3 + $0x34] sm:$0xf] %v3074_v19  ;;  %v1667_v12 = vrot.slane %v1666_v61, 4  ;;  %v3241_v13 = vrot.slane %v3239_v0, 5 }
 0x102   : > { %v7489_v14 = vor.u32 %v8790_v4, %v7486_v9  ;;  %3278 = vst [vmem:[#allocation3 + $0x40] sm:$0xf] %v3084_v16  ;;  %v1677_v15 = vrot.slane %v1676_v5, 4  ;;  %v3245_v58 = vrot.slane %v3243_v10, 4  ;;  %v11318_v20 = vmov 0  ;;  %v8760_v26 = vld [vmem:[#allocation7] sm:$0xff] }
 0x103   : > { %v11319_v20 = vsel %vm10014_vm14, 4294967295, %v11318_v20  ;;  %v3236_v22 = vor.u32 %v3235_v8, %v3232_v63  ;;  %v7441_v24 = vrot.slane %v1120_v55, 9  ;;  %v1197_v25 = vrot.slane %v1121_v2, 5  ;;  %v1732_v30 = vld [vmem:[#allocation2 + $0x30] sm:$0xe] }
 0x104   : > { %11320 = vst [vmem:[#allocation29_spill] sm:$0xff] %v11319_v20  ;;  %2362 = vmatmul.bf16.gmra.mxu1 %v7489_v14  ;;  %v1672_v19 = vsel %vm9871_vm11, %v1667_v12, %v1671_v39  ;;  %v3246_v27 = vor.u32 %v3245_v58, %v3241_v13  ;;  %v3249_v16 = vshll.u32 %v3012_v62, 16  ;;  %v1200_v29 = vrot.slane %v1122_v18, 5  ;;  %v1733_v31 = vld [vmem:[#allocation2 + $0x34] sm:$0xf]  ;;  %2773 = vmatpush.bf16.msrb.mxu3 %v8760_v26  ;;  %v8891_v20 = vld [vmem:[#allocation7 + $0x238] sm:$0xff] }
 0x105   : > { %v1682_v32 = vsel %vm9871_vm11, %v1677_v15, %v1681_v48  ;;  %v1198_v33 = vsel %vm10014_vm14, %v7441_v24, %v1197_v25  ;;  %v1199_v35 = vrot.slane %v1197_v25, 4  ;;  %v1734_v34 = vld [vmem:[#allocation2 + $0x38] sm:$0x1]  ;;  %v1806_v38 = vrot.slane %v1733_v31, 5  ;;  %v3302_v48 = vld [vmem:[#allocation2 + $0x3c] sm:$0xe] }
 0x106   : > { %v10024_v37 = vld [vmem:[#allocation3 + $0xdc] sm:$0xf]  ;;  %1270 = vst [vmem:[#allocation3 + $0x50] sm:$0xf] %v1198_v33  ;;  %v3237_v39 = vrot.slane %v3236_v22, 4  ;;  %v7451_v43 = vrot.slane %v1732_v30, 9 }
 0x107   : > { %11321 = vst [vmem:[#allocation30_spill] sm:$0xff] %v10024_v37  ;;  %v10026_v40 = vld [vmem:[#allocation3 + $0xe4] sm:$0xf0]  ;;  %v1201_v41 = vsel %vm10014_vm14, %v1199_v35, %v1200_v29  ;;  %v3247_v44 = vrot.slane %v3246_v27, 4  ;;  %v3251_v45 = vrot.slane %v3249_v16, 5  ;;  %v1808_v50 = vrot.slane %v1806_v38, 4 }
 0x108   : > { %11322 = vst [vmem:[#allocation31_spill] sm:$0xff] %v10026_v40  ;;  %v1809_v54 = vrot.slane %v1734_v34, 5  ;;  %v3303_v55 = vld [vmem:[#allocation2 + $0x40] sm:$0xf]  ;;  %v3304_v57 = vld [vmem:[#allocation2 + $0x44] sm:$0x1]  ;;  %v1807_v63 = vsel %vm10014_vm14, %v7451_v43, %v1806_v38  ;;  %v3242_v0 = vsel %vm9871_vm11, %v3237_v39, %v3241_v13 }
 0x109   : > { %1721 = vst [vmem:[#allocation3 + $0xdc] sm:$0xf] %v1672_v19  ;;  %v764_v61 = vld [vmem:[#allocation2 + $0x24] sm:$0xf]  ;;  %v765_v62 = vld [vmem:[#allocation2 + $0x28] sm:$0xf]  ;;  %v3252_v4 = vsel %vm9871_vm11, %v3247_v44, %v3251_v45 }
 0x10a   : > { %1722 = vst [vmem:[#allocation3 + $0xe8] sm:$0xf] %v1682_v32  ;;  %v7893_v2 = vrot.slane %v3302_v48, 9  ;;  %v3376_v8 = vrot.slane %v3303_v55, 5  ;;  %v3379_v10 = vrot.slane %v3304_v57, 5  ;;  %v1810_v14 = vsel %vm10014_vm14, %v1808_v50, %v1809_v54 }
 0x10b   : > { %1271 = vst [vmem:[#allocation3 + $0x5c] sm:$0xf] %v1201_v41  ;;  %v807_v9 = vld [vmem:[#allocation2 + $0x24] sm:$0xf]  ;;  %v1379_v15 = vld [vmem:[#allocation2 + $0x30] sm:$0xf] }
 0x10c   : > { %784 = vst [vmem:[#allocation3 + $0x48] sm:$0xf] %v764_v61  ;;  %v808_v58 = vld [vmem:[#allocation2 + $0x28] sm:$0xf]  ;;  %v1380_v13 = vld [vmem:[#allocation2 + $0x34] sm:$0xf]  ;;  %v3377_v34 = vsel %vm10014_vm14, %v7893_v2, %v3376_v8 }
 0x10d   : > { %785 = vst [vmem:[#allocation3 + $0x54] sm:$0xf] %v765_v62  ;;  %v10036_v5 = vld [vmem:[#allocation3 + $0x50] sm:$0xf]  ;;  %v809_v22 = vld [vmem:[#allocation2 + $0x2c] sm:$0x1] }
 0x10e   : > { %1879 = vst [vmem:[#allocation3 + $0x50] sm:$0xf] %v1807_v63  ;;  %v904_v26 = vshrl.u32 %v807_v9, 16  ;;  %v907_v19 = vshll.u32 %v807_v9, 16  ;;  %v3378_v27 = vrot.slane %v3376_v8, 4  ;;  %v913_v16 = vshll.u32 %v808_v58, 16 }
 0x10f   : > { %v917_v29 = vshrl.u32 %v808_v58, 16  ;;  %v923_v30 = vshll.u32 %v809_v22, 16  ;;  %v1422_v35 = vld [vmem:[#allocation2 + $0x30] sm:$0xf]  ;;  %v1423_v44 = vld [vmem:[#allocation2 + $0x34] sm:$0xf] }
 0x110   : > { %v8811_v12 = vld [vmem:[#allocation3 + $0xdc] sm:$0xf]  ;;  %v906_v32 = vrot.slane %v904_v26, 4  ;;  %v909_v33 = vrot.slane %v907_v19, 5  ;;  %v915_v39 = vrot.slane %v913_v16, 5  ;;  %v1516_v45 = vshrl.u32 %v1422_v35, 16 }
 0x111   : > { %v7570_v18 = vld [vmem:[#allocation3 + $0xe4] sm:$0xf0]  ;;  %3291 = vst [vmem:[#allocation3 + $0xdc] sm:$0xf] %v3242_v0  ;;  %v919_v41 = vrot.slane %v917_v29, 4  ;;  %v3380_v50 = vsel %vm10014_vm14, %v3378_v27, %v3379_v10  ;;  %v1519_v57 = vshll.u32 %v1422_v35, 16 }
 0x112   : > { %v7573_v24 = vor.u32 %v8811_v12, %v7570_v18  ;;  %3292 = vst [vmem:[#allocation3 + $0xe8] sm:$0xf] %v3252_v4  ;;  %v10040_v25 = vld [vmem:[#allocation3 + $0x58] sm:$0xf0]  ;;  %v910_v43 = vor.u32 %v909_v33, %v906_v32  ;;  %v1424_v55 = vld [vmem:[#allocation2 + $0x38] sm:$0x1] }
 0x113   : > { %1880 = vst [vmem:[#allocation3 + $0x5c] sm:$0xf] %v1810_v14  ;;  %v10042_v31 = vld [vmem:[#allocation3 + $0x48] sm:$0xf]  ;;  %v920_v54 = vor.u32 %v919_v41, %v915_v39  ;;  %v1525_v61 = vshll.u32 %v1423_v44, 16  ;;  %v925_v0 = vrot.slane %v923_v30, 5 }
 0x114   : > { %2397 = vmatmul.bf16.gmra.mxu3 %v7573_v24  ;;  %v10046_v38 = vld [vmem:[#allocation3 + $0x50] sm:$0xf0]  ;;  %1399 = vst [vmem:[#allocation3 + $0x48] sm:$0xf] %v1379_v15  ;;  %v2949_v62 = vld [vmem:[#allocation2 + $0x3c] sm:$0xf] }
 0x115   : > { %1400 = vst [vmem:[#allocation3 + $0x54] sm:$0xf] %v1380_v13  ;;  %v7504_v48 = vld [vmem:[#allocation3 + $0x50] sm:$0xf]  ;;  %v911_v63 = vrot.slane %v910_v43, 4  ;;  %v1518_v2 = vrot.slane %v1516_v45, 4 }
 0x116   : > { %3449 = vst [vmem:[#allocation3 + $0x50] sm:$0xf] %v3377_v34  ;;  %v1529_v4 = vshrl.u32 %v1423_v44, 16  ;;  %v921_v8 = vrot.slane %v920_v54, 4  ;;  %v1521_v9 = vrot.slane %v1519_v57, 5  ;;  %v1527_v12 = vrot.slane %v1525_v61, 5 }
 0x117   : > { %v2992_v14 = vld [vmem:[#allocation2 + $0x3c] sm:$0xf]  ;;  %v916_v58 = vsel %vm9871_vm11, %v911_v63, %v915_v39  ;;  %v1535_v10 = vshll.u32 %v1424_v55, 16  ;;  %v2993_v13 = vld [vmem:[#allocation2 + $0x40] sm:$0xf]  ;;  %v7677_v57 = vor.u32 %v9867_v52, %v9865_v46 }
 0x118   : > { %v1531_v18 = vrot.slane %v1529_v4, 4  ;;  %v2950_v24 = vld [vmem:[#allocation2 + $0x40] sm:$0xf]  ;;  %v1522_v26 = vor.u32 %v1521_v9, %v1518_v2  ;;  %v3086_v19 = vshrl.u32 %v2992_v14, 16  ;;  %v926_v16 = vsel %vm9871_vm11, %v921_v8, %v925_v0  ;;  %1097 = vst [vmem:[#allocation3 + $0x4c] sm:$0xf] %v916_v58 }
 0x119   : > { %v3089_v30 = vshll.u32 %v2992_v14, 16  ;;  %v3095_v32 = vshll.u32 %v2993_v13, 16  ;;  %v1537_v41 = vrot.slane %v1535_v10, 5  ;;  %v2994_v43 = vld [vmem:[#allocation2 + $0x44] sm:$0x1] }
 0x11a   : > { %v8795_v15 = vld [vmem:[#allocation3 + $0x58] sm:$0xf0]  ;;  %v1532_v29 = vor.u32 %v1531_v18, %v1527_v12  ;;  %v1523_v35 = vrot.slane %v1522_v26, 4  ;;  %v3088_v34 = vrot.slane %v3086_v19, 4  ;;  %1098 = vst [vmem:[#allocation3 + $0x58] sm:$0xf] %v926_v16 }
 0x11b   : > { %v7505_v22 = vor.u32 %v8795_v15, %v7504_v48  ;;  %3450 = vst [vmem:[#allocation3 + $0x5c] sm:$0xf] %v3380_v50  ;;  %v7496_v27 = vld [vmem:[#allocation3 + $0x48] sm:$0xf]  ;;  %v3091_v44 = vrot.slane %v3089_v30, 5  ;;  %v3099_v48 = vshrl.u32 %v2993_v13, 16 }
 0x11c   : > { %v8794_v33 = vld [vmem:[#allocation3 + $0x50] sm:$0xf0]  ;;  %2969 = vst [vmem:[#allocation3 + $0x48] sm:$0xf] %v2949_v62  ;;  %v1533_v45 = vrot.slane %v1532_v29, 4  ;;  %v3097_v55 = vrot.slane %v3095_v32, 5  ;;  %v1528_v0 = vsel %vm9871_vm11, %v1523_v35, %v1527_v12 }
 0x11d   : > { %2426 = vmatmul.bf16.vlgmr.msra.gmra.mxu2 %v7505_v22  ;;  %v7497_v39 = vor.u32 %v8794_v33, %v7496_v27  ;;  %2970 = vst [vmem:[#allocation3 + $0x54] sm:$0xf] %v2950_v24  ;;  %v1123_v50 = vld [vmem:[#allocation2 + $0x30] sm:$0xe]  ;;  %v3092_v54 = vor.u32 %v3091_v44, %v3088_v34  ;;  %v1124_v61 = vld [vmem:[#allocation2 + $0x34] sm:$0xf] }
 0x11e   : > { %v1125_v63 = vld [vmem:[#allocation2 + $0x38] sm:$0x1]  ;;  %v7442_v62 = vrot.slane %v1123_v50, 9  ;;  %v3101_v2 = vrot.slane %v3099_v48, 4  ;;  %v1204_v4 = vrot.slane %v1124_v61, 5  ;;  %v3105_v18 = vshll.u32 %v2994_v43, 16 }
 0x11f   : > { %2308 = vmatmul.bf16.gmra.mxu0 %v7497_v39  ;;  %v1207_v8 = vrot.slane %v1125_v63, 5  ;;  %v1735_v9 = vld [vmem:[#allocation2 + $0x3c] sm:$0xe]  ;;  %v1736_v14 = vld [vmem:[#allocation2 + $0x40] sm:$0xf]  ;;  %v1538_v52 = vsel %vm9871_vm11, %v1533_v45, %v1537_v41  ;;  %v3093_v22 = vrot.slane %v3092_v54, 4 }
 0x120   : > { %v1737_v15 = vld [vmem:[#allocation2 + $0x44] sm:$0x1]  ;;  %v10058_v58 = vld [vmem:[#allocation3 + $0x4c] sm:$0xf]  ;;  %v1205_v10 = vsel %vm10014_vm14, %v7442_v62, %v1204_v4  ;;  %v1206_v13 = vrot.slane %v1204_v4, 4  ;;  %v1813_v46 = vrot.slane %v1736_v14, 5  ;;  %v3102_v12 = vor.u32 %v3101_v2, %v3097_v55 }
 0x121   : > { %1709 = vst [vmem:[#allocation3 + $0x4c] sm:$0xf] %v1528_v0  ;;  %v7452_v24 = vrot.slane %v1735_v9, 9  ;;  %v3305_v26 = vld [vmem:[#allocation2 + $0x48] sm:$0xe]  ;;  %v1816_v16 = vrot.slane %v1737_v15, 5  ;;  %v3098_v41 = vsel %vm9871_vm11, %v3093_v22, %v3097_v55 }
 0x122   : > { %v1208_v19 = vsel %vm10014_vm14, %v1206_v13, %v1207_v8  ;;  %1272 = vst [vmem:[#allocation3 + $0x68] sm:$0xf] %v1205_v10  ;;  %v1815_v27 = vrot.slane %v1813_v46, 4  ;;  %v3306_v29 = vld [vmem:[#allocation2 + $0x4c] sm:$0xf]  ;;  %v3103_v34 = vrot.slane %v3102_v12, 4 }
 0x123   : > { %v10066_v30 = vld [vmem:[#allocation3 + $0x54] sm:$0xf0]  ;;  %1273 = vst [vmem:[#allocation3 + $0x74] sm:$0xf] %v1208_v19  ;;  %v3307_v32 = vld [vmem:[#allocation2 + $0x50] sm:$0x1]  ;;  %v1814_v44 = vsel %vm10014_vm14, %v7452_v24, %v1813_v46 }
 0x124   : > { %2774 = vmatmul.bf16.vlgmr.msrb.gmra.mxu3 %v7677_v57  ;;  %1710 = vst [vmem:[#allocation3 + $0x58] sm:$0xf] %v1538_v52  ;;  %v766_v33 = vld [vmem:[#allocation2 + $0x30] sm:$0xf]  ;;  %v767_v35 = vld [vmem:[#allocation2 + $0x34] sm:$0xf]  ;;  %v1817_v61 = vsel %vm10014_vm14, %v1815_v27, %v1816_v16 }
 0x125   : > { %v3107_v39 = vrot.slane %v3105_v18, 5  ;;  %786 = vst [vmem:[#allocation3 + $0x60] sm:$0xf] %v766_v33  ;;  %v7894_v43 = vrot.slane %v3305_v26, 9  ;;  %v3383_v45 = vrot.slane %v3306_v29, 5  ;;  %v3386_v48 = vrot.slane %v3307_v32, 5 }
 0x126   : > { %787 = vst [vmem:[#allocation3 + $0x6c] sm:$0xf] %v767_v35  ;;  %v810_v50 = vld [vmem:[#allocation2 + $0x30] sm:$0xf]  ;;  %v811_v54 = vld [vmem:[#allocation2 + $0x34] sm:$0xf]  ;;  %v7689_v32 = vor.u32 %v9931_v7, %v9926_v56 }
 0x127   : > { %v1381_v63 = vld [vmem:[#allocation2 + $0x3c] sm:$0xf]  ;;  %v812_v62 = vld [vmem:[#allocation2 + $0x38] sm:$0x1]  ;;  %v928_v0 = vshrl.u32 %v810_v50, 16  ;;  %v931_v2 = vshll.u32 %v810_v50, 16  ;;  %v3108_v55 = vsel %vm9871_vm11, %v3103_v34, %v3107_v39  ;;  %v3384_v33 = vsel %vm10014_vm14, %v7894_v43, %v3383_v45 }
 0x128   : > { %v8793_v57 = vld [vmem:[#allocation3 + $0x4c] sm:$0xf]  ;;  %v1382_v8 = vld [vmem:[#allocation2 + $0x40] sm:$0xf]  ;;  %v937_v9 = vshll.u32 %v811_v54, 16  ;;  %v941_v14 = vshrl.u32 %v811_v54, 16 }
 0x129   : > { %3279 = vst [vmem:[#allocation3 + $0x4c] sm:$0xf] %v3098_v41  ;;  %v10076_v4 = vld [vmem:[#allocation3 + $0x68] sm:$0xf]  ;;  %v930_v18 = vrot.slane %v928_v0, 4  ;;  %v933_v10 = vrot.slane %v931_v2, 5 }
 0x12a   : > { %v10078_v15 = vld [vmem:[#allocation3 + $0x70] sm:$0xf0]  ;;  %1881 = vst [vmem:[#allocation3 + $0x68] sm:$0xf] %v1814_v44  ;;  %v939_v46 = vrot.slane %v937_v9, 5  ;;  %v943_v52 = vrot.slane %v941_v14, 4 }
 0x12b   : > { %v7498_v13 = vld [vmem:[#allocation3 + $0x54] sm:$0xf0]  ;;  %1882 = vst [vmem:[#allocation3 + $0x74] sm:$0xf] %v1817_v61  ;;  %v3385_v12 = vrot.slane %v3383_v45, 4  ;;  %v934_v26 = vor.u32 %v933_v10, %v930_v18  ;;  %v947_v19 = vshll.u32 %v812_v62, 16 }
 0x12c   : > { %v7501_v22 = vor.u32 %v8793_v57, %v7498_v13  ;;  %3280 = vst [vmem:[#allocation3 + $0x58] sm:$0xf] %v3108_v55  ;;  %v10080_v24 = vld [vmem:[#allocation3 + $0x60] sm:$0xf]  ;;  %v944_v16 = vor.u32 %v943_v52, %v939_v46  ;;  %v1425_v29 = vld [vmem:[#allocation2 + $0x3c] sm:$0xf] }
 0x12d   : > { %v10082_v27 = vld [vmem:[#allocation3 + $0x68] sm:$0xf0]  ;;  %1401 = vst [vmem:[#allocation3 + $0x60] sm:$0xf] %v1381_v63  ;;  %v935_v35 = vrot.slane %v934_v26, 4  ;;  %v949_v34 = vrot.slane %v947_v19, 5  ;;  %v3387_v61 = vsel %vm10014_vm14, %v3385_v12, %v3386_v48 }
 0x12e   : > { %2367 = vmatmul.bf16.gmra.mxu1 %v7501_v22  ;;  %1402 = vst [vmem:[#allocation3 + $0x6c] sm:$0xf] %v1382_v8  ;;  %v1426_v39 = vld [vmem:[#allocation2 + $0x40] sm:$0xf]  ;;  %v945_v41 = vrot.slane %v944_v16, 4  ;;  %v1540_v50 = vshrl.u32 %v1425_v29, 16 }
 0x12f   : > { %v1427_v44 = vld [vmem:[#allocation2 + $0x44] sm:$0x1]  ;;  %v1543_v54 = vshll.u32 %v1425_v29, 16  ;;  %v1549_v57 = vshll.u32 %v1426_v39, 16  ;;  %v2951_v63 = vld [vmem:[#allocation2 + $0x48] sm:$0xf]  ;;  %v940_v56 = vsel %vm9871_vm11, %v935_v35, %v939_v46 }
 0x130   : > { %v1553_v7 = vshrl.u32 %v1426_v39, 16  ;;  %v1559_v62 = vshll.u32 %v1427_v44, 16  ;;  %v2995_v0 = vld [vmem:[#allocation2 + $0x48] sm:$0xf]  ;;  %v2996_v43 = vld [vmem:[#allocation2 + $0x4c] sm:$0xf]  ;;  %v950_v2 = vsel %vm9871_vm11, %v945_v41, %v949_v34 }
 0x131   : > { %v7516_v45 = vld [vmem:[#allocation3 + $0x68] sm:$0xf]  ;;  %1099 = vst [vmem:[#allocation3 + $0x64] sm:$0xf] %v940_v56  ;;  %v1542_v55 = vrot.slane %v1540_v50, 4  ;;  %v1545_v8 = vrot.slane %v1543_v54, 5 }
 0x132   : > { %v8798_v9 = vld [vmem:[#allocation3 + $0x70] sm:$0xf0]  ;;  %3451 = vst [vmem:[#allocation3 + $0x68] sm:$0xf] %v3384_v33  ;;  %v1551_v14 = vrot.slane %v1549_v57, 5  ;;  %v1555_v48 = vrot.slane %v1553_v7, 4 }
 0x133   : > { %v7517_v18 = vor.u32 %v8798_v9, %v7516_v45  ;;  %3452 = vst [vmem:[#allocation3 + $0x74] sm:$0xf] %v3387_v61  ;;  %v2952_v10 = vld [vmem:[#allocation2 + $0x4c] sm:$0xf]  ;;  %v1546_v13 = vor.u32 %v1545_v8, %v1542_v55  ;;  %v1561_v46 = vrot.slane %v1559_v62, 5  ;;  %v3110_v52 = vshrl.u32 %v2995_v0, 16 }
 0x134   : > { %2779 = vmatmul.bf16.gmra.mxu3 %v7689_v32  ;;  %v7508_v22 = vld [vmem:[#allocation3 + $0x60] sm:$0xf]  ;;  %1100 = vst [vmem:[#allocation3 + $0x70] sm:$0xf] %v950_v2  ;;  %v1556_v12 = vor.u32 %v1555_v48, %v1551_v14  ;;  %v3113_v26 = vshll.u32 %v2995_v0, 16  ;;  %v3119_v19 = vshll.u32 %v2996_v43, 16 }
 0x135   : > { %2431 = vmatmul.bf16.gmra.mxu2 %v7517_v18  ;;  %v8797_v16 = vld [vmem:[#allocation3 + $0x68] sm:$0xf0]  ;;  %2971 = vst [vmem:[#allocation3 + $0x60] sm:$0xf] %v2951_v63  ;;  %v1547_v29 = vrot.slane %v1546_v13, 4  ;;  %v3112_v32 = vrot.slane %v3110_v52, 4 }
 0x136   : > { %v7509_v35 = vor.u32 %v8797_v16, %v7508_v22  ;;  %2972 = vst [vmem:[#allocation3 + $0x6c] sm:$0xf] %v2952_v10  ;;  %v1557_v33 = vrot.slane %v1556_v12, 4  ;;  %v2997_v34 = vld [vmem:[#allocation2 + $0x50] sm:$0x1]  ;;  %v3115_v39 = vrot.slane %v3113_v26, 5 }
 0x137   : > { %v1552_v41 = vsel %vm9871_vm11, %v1547_v29, %v1551_v14  ;;  %v3121_v44 = vrot.slane %v3119_v19, 5  ;;  %v3123_v50 = vshrl.u32 %v2996_v43, 16  ;;  %v1126_v54 = vld [vmem:[#allocation2 + $0x3c] sm:$0xe]  ;;  %v1127_v57 = vld [vmem:[#allocation2 + $0x40] sm:$0xf] }
 0x138   : > { %2313 = vmatmul.bf16.gmra.mxu0 %v7509_v35  ;;  %v10096_v61 = vld [vmem:[#allocation3 + $0x64] sm:$0xf]  ;;  %v3116_v56 = vor.u32 %v3115_v39, %v3112_v32  ;;  %v1128_v7 = vld [vmem:[#allocation2 + $0x44] sm:$0x1]  ;;  %v7443_v63 = vrot.slane %v1126_v54, 9  ;;  %v1211_v62 = vrot.slane %v1127_v57, 5  ;;  %v1562_v0 = vsel %vm9871_vm11, %v1557_v33, %v1561_v46 }
 0x139   : > { %1711 = vst [vmem:[#allocation3 + $0x64] sm:$0xf] %v1552_v41  ;;  %v3125_v45 = vrot.slane %v3123_v50, 4  ;;  %v3129_v2 = vshll.u32 %v2997_v34, 16  ;;  %v1214_v55 = vrot.slane %v1128_v7, 5 }
 0x13a   : > { %v3117_v8 = vrot.slane %v3116_v56, 4  ;;  %v1212_v43 = vsel %vm10014_vm14, %v7443_v63, %v1211_v62  ;;  %v1213_v9 = vrot.slane %v1211_v62, 4  ;;  %v1738_v14 = vld [vmem:[#allocation2 + $0x48] sm:$0xe]  ;;  %v1739_v48 = vld [vmem:[#allocation2 + $0x4c] sm:$0xf] }
 0x13b   : > { %v10102_v18 = vld [vmem:[#allocation3 + $0x6c] sm:$0xf0]  ;;  %v3126_v10 = vor.u32 %v3125_v45, %v3121_v44  ;;  %1274 = vst [vmem:[#allocation3 + $0x80] sm:$0xf] %v1212_v43  ;;  %v1740_v13 = vld [vmem:[#allocation2 + $0x50] sm:$0x1] }
 0x13c   : > { %1712 = vst [vmem:[#allocation3 + $0x70] sm:$0xf] %v1562_v0  ;;  %v1215_v46 = vsel %vm10014_vm14, %v1213_v9, %v1214_v55  ;;  %v7453_v52 = vrot.slane %v1738_v14, 9  ;;  %v1820_v22 = vrot.slane %v1739_v48, 5  ;;  %v3131_v26 = vrot.slane %v3129_v2, 5 }
 0x13d   : > { %v3127_v12 = vrot.slane %v3126_v10, 4  ;;  %1275 = vst [vmem:[#allocation3 + $0x8c] sm:$0xf] %v1215_v46  ;;  %v3309_v19 = vld [vmem:[#allocation2 + $0x58] sm:$0xf]  ;;  %v3122_v16 = vsel %vm9871_vm11, %v3117_v8, %v3121_v44  ;;  %v1823_v32 = vrot.slane %v1740_v13, 5  ;;  %v7701_v44 = vor.u32 %v9974_v49, %v9970_v42 }
 0x13e   : > { %v1822_v29 = vrot.slane %v1820_v22, 4  ;;  %v3308_v35 = vld [vmem:[#allocation2 + $0x54] sm:$0xe]  ;;  %v3390_v33 = vrot.slane %v3309_v19, 5  ;;  %v3310_v34 = vld [vmem:[#allocation2 + $0x5c] sm:$0x1]  ;;  %v1821_v54 = vsel %vm10014_vm14, %v7453_v52, %v1820_v22 }
 0x13f   : > { %v768_v39 = vld [vmem:[#allocation2 + $0x3c] sm:$0xf]  ;;  %v769_v41 = vld [vmem:[#allocation2 + $0x40] sm:$0xf]  ;;  %v3132_v57 = vsel %vm9871_vm11, %v3127_v12, %v3131_v26  ;;  %v7895_v56 = vrot.slane %v3308_v35, 9  ;;  %v3393_v0 = vrot.slane %v3310_v34, 5 }
 0x140   : > { %v8796_v50 = vld [vmem:[#allocation3 + $0x64] sm:$0xf]  ;;  %788 = vst [vmem:[#allocation3 + $0x78] sm:$0xf] %v768_v39  ;;  %v1824_v63 = vsel %vm10014_vm14, %v1822_v29, %v1823_v32  ;;  %v3392_v62 = vrot.slane %v3390_v33, 4 }
 0x141   : > { %3281 = vst [vmem:[#allocation3 + $0x64] sm:$0xf] %v3122_v16  ;;  %v1383_v2 = vld [vmem:[#allocation2 + $0x48] sm:$0xf]  ;;  %v813_v43 = vld [vmem:[#allocation2 + $0x3c] sm:$0xf]  ;;  %v3391_v52 = vsel %vm10014_vm14, %v7895_v56, %v3390_v33 }
 0x142   : > { %v10114_v7 = vld [vmem:[#allocation3 + $0x80] sm:$0xf]  ;;  %789 = vst [vmem:[#allocation3 + $0x84] sm:$0xf] %v769_v41  ;;  %v1384_v9 = vld [vmem:[#allocation2 + $0x4c] sm:$0xf]  ;;  %v3394_v34 = vsel %vm10014_vm14, %v3392_v62, %v3393_v0 }
 0x143   : > { %v7510_v45 = vld [vmem:[#allocation3 + $0x6c] sm:$0xf0]  ;;  %1883 = vst [vmem:[#allocation3 + $0x80] sm:$0xf] %v1821_v54  ;;  %v815_v49 = vld [vmem:[#allocation2 + $0x44] sm:$0x1] }
 0x144   : > { %2784 = vmatmul.bf16.gmra.mxu3 %v7701_v44  ;;  %v7513_v55 = vor.u32 %v8796_v50, %v7510_v45  ;;  %3282 = vst [vmem:[#allocation3 + $0x70] sm:$0xf] %v3132_v57  ;;  %v10118_v8 = vld [vmem:[#allocation3 + $0x88] sm:$0xf0]  ;;  %v814_v42 = vld [vmem:[#allocation2 + $0x40] sm:$0xf] }
 0x145   : > { %1884 = vst [vmem:[#allocation3 + $0x8c] sm:$0xf] %v1824_v63  ;;  %v952_v14 = vshrl.u32 %v813_v43, 16  ;;  %v955_v48 = vshll.u32 %v813_v43, 16  ;;  %v961_v10 = vshll.u32 %v814_v42, 16  ;;  %v965_v13 = vshrl.u32 %v814_v42, 16 }
 0x146   : > { %2372 = vmatmul.bf16.gmra.mxu1 %v7513_v55  ;;  %v1428_v46 = vld [vmem:[#allocation2 + $0x48] sm:$0xf]  ;;  %v971_v12 = vshll.u32 %v815_v49, 16  ;;  %v1429_v26 = vld [vmem:[#allocation2 + $0x4c] sm:$0xf] }
 0x147   : > { %v10122_v22 = vld [vmem:[#allocation3 + $0x78] sm:$0xf]  ;;  %v1564_v19 = vshrl.u32 %v1428_v46, 16  ;;  %v954_v16 = vrot.slane %v952_v14, 4  ;;  %v957_v29 = vrot.slane %v955_v48, 5  ;;  %v963_v32 = vrot.slane %v961_v10, 5 }
 0x148   : > { %1403 = vst [vmem:[#allocation3 + $0x78] sm:$0xf] %v1383_v2  ;;  %v967_v35 = vrot.slane %v965_v13, 4  ;;  %v973_v41 = vrot.slane %v971_v12, 5  ;;  %v1430_v50 = vld [vmem:[#allocation2 + $0x50] sm:$0x1] }
 0x149   : > { %v10126_v39 = vld [vmem:[#allocation3 + $0x80] sm:$0xf0]  ;;  %v1566_v54 = vrot.slane %v1564_v19, 4  ;;  %v958_v33 = vor.u32 %v957_v29, %v954_v16  ;;  %v1567_v44 = vshll.u32 %v1428_v46, 16  ;;  %v1573_v63 = vshll.u32 %v1429_v26, 16 }
 0x14a   : > { %v7528_v57 = vld [vmem:[#allocation3 + $0x80] sm:$0xf]  ;;  %1404 = vst [vmem:[#allocation3 + $0x84] sm:$0xf] %v1384_v9  ;;  %v968_v56 = vor.u32 %v967_v35, %v963_v32  ;;  %v2953_v45 = vld [vmem:[#allocation2 + $0x54] sm:$0xf] }
 0x14b   : > { %3453 = vst [vmem:[#allocation3 + $0x80] sm:$0xf] %v3391_v52  ;;  %v1577_v2 = vshrl.u32 %v1429_v26, 16  ;;  %v1583_v55 = vshll.u32 %v1430_v50, 16  ;;  %v2998_v43 = vld [vmem:[#allocation2 + $0x54] sm:$0xf] }
 0x14c   : > { %v8801_v42 = vld [vmem:[#allocation3 + $0x88] sm:$0xf0]  ;;  %v959_v49 = vrot.slane %v958_v33, 4  ;;  %v969_v14 = vrot.slane %v968_v56, 4  ;;  %v1569_v62 = vrot.slane %v1567_v44, 5  ;;  %v1575_v0 = vrot.slane %v1573_v63, 5 }
 0x14d   : > { %v7529_v48 = vor.u32 %v8801_v42, %v7528_v57  ;;  %3454 = vst [vmem:[#allocation3 + $0x8c] sm:$0xf] %v3394_v34  ;;  %v2954_v10 = vld [vmem:[#allocation2 + $0x58] sm:$0xf]  ;;  %v1579_v13 = vrot.slane %v1577_v2, 4  ;;  %v1585_v12 = vrot.slane %v1583_v55, 5 }
 0x14e   : > { %v2999_v9 = vld [vmem:[#allocation2 + $0x58] sm:$0xf]  ;;  %v964_v46 = vsel %vm9871_vm11, %v959_v49, %v963_v32  ;;  %v974_v52 = vsel %vm9871_vm11, %v969_v14, %v973_v41  ;;  %v1570_v26 = vor.u32 %v1569_v62, %v1566_v54  ;;  %v3000_v19 = vld [vmem:[#allocation2 + $0x5c] sm:$0x1]  ;;  %v3134_v16 = vshrl.u32 %v2998_v43, 16 }
 0x14f   : > { %v1129_v29 = vld [vmem:[#allocation2 + $0x48] sm:$0xe]  ;;  %2436 = vmatmul.bf16.gmra.mxu2 %v7529_v48  ;;  %1101 = vst [vmem:[#allocation3 + $0x7c] sm:$0xf] %v964_v46  ;;  %v1580_v50 = vor.u32 %v1579_v13, %v1575_v0  ;;  %v3137_v57 = vshll.u32 %v2998_v43, 16  ;;  %v3143_v34 = vshll.u32 %v2999_v9, 16 }
 0x150   : > { %v7520_v35 = vld [vmem:[#allocation3 + $0x78] sm:$0xf]  ;;  %v1571_v33 = vrot.slane %v1570_v26, 4  ;;  %v3136_v56 = vrot.slane %v3134_v16, 4  ;;  %v3147_v44 = vshrl.u32 %v2999_v9, 16  ;;  %v3153_v63 = vshll.u32 %v3000_v19, 16 }
 0x151   : > { %2973 = vst [vmem:[#allocation3 + $0x78] sm:$0xf] %v2953_v45  ;;  %v8800_v2 = vld [vmem:[#allocation3 + $0x80] sm:$0xf0]  ;;  %v1581_v32 = vrot.slane %v1580_v50, 4  ;;  %v3139_v55 = vrot.slane %v3137_v57, 5 }
 0x152   : > { %1102 = vst [vmem:[#allocation3 + $0x88] sm:$0xf] %v974_v52  ;;  %v7521_v41 = vor.u32 %v8800_v2, %v7520_v35  ;;  %v3145_v54 = vrot.slane %v3143_v34, 5  ;;  %v3149_v42 = vrot.slane %v3147_v44, 4  ;;  %v1130_v49 = vld [vmem:[#allocation2 + $0x4c] sm:$0xf]  ;;  %v1576_v45 = vsel %vm9871_vm11, %v1571_v33, %v1575_v0 }
 0x153   : > { %2974 = vst [vmem:[#allocation3 + $0x84] sm:$0xf] %v2954_v10  ;;  %v3140_v14 = vor.u32 %v3139_v55, %v3136_v56  ;;  %v1131_v62 = vld [vmem:[#allocation2 + $0x50] sm:$0x1]  ;;  %v7444_v48 = vrot.slane %v1129_v29, 9  ;;  %v1218_v9 = vrot.slane %v1130_v49, 5  ;;  %v1586_v52 = vsel %vm9871_vm11, %v1581_v32, %v1585_v12 }
 0x154   : > { %v1741_v13 = vld [vmem:[#allocation2 + $0x54] sm:$0xe]  ;;  %2318 = vmatmul.bf16.gmra.mxu0 %v7521_v41  ;;  %v3150_v43 = vor.u32 %v3149_v42, %v3145_v54  ;;  %v1221_v46 = vrot.slane %v1131_v62, 5  ;;  %v1742_v26 = vld [vmem:[#allocation2 + $0x58] sm:$0xf]  ;;  %v3155_v19 = vrot.slane %v3153_v63, 5  ;;  %v7713_v32 = vor.u32 %v10046_v38, %v10042_v31 }
 0x155   : > { %v3141_v16 = vrot.slane %v3140_v14, 4  ;;  %v1219_v35 = vsel %vm10014_vm14, %v7444_v48, %v1218_v9  ;;  %v1220_v29 = vrot.slane %v1218_v9, 4  ;;  %v1743_v50 = vld [vmem:[#allocation2 + $0x5c] sm:$0x1]  ;;  %v7454_v57 = vrot.slane %v1741_v13, 9 }
 0x156   : > { %v10136_v10 = vld [vmem:[#allocation3 + $0x7c] sm:$0xf]  ;;  %v3151_v34 = vrot.slane %v3150_v43, 4  ;;  %v1827_v0 = vrot.slane %v1742_v26, 5  ;;  %v3311_v33 = vld [vmem:[#allocation2 + $0x60] sm:$0xe]  ;;  %2789 = vmatmul.bf16.gmra.mxu3 %v7713_v32 }
 0x157   : > { %1713 = vst [vmem:[#allocation3 + $0x7c] sm:$0xf] %v1576_v45  ;;  %v1222_v44 = vsel %vm10014_vm14, %v1220_v29, %v1221_v46  ;;  %v3312_v12 = vld [vmem:[#allocation2 + $0x64] sm:$0xf]  ;;  %v770_v63 = vld [vmem:[#allocation2 + $0x48] sm:$0xf]  ;;  %v3146_v49 = vsel %vm9871_vm11, %v3141_v16, %v3145_v54 }
 0x158   : > { %1276 = vst [vmem:[#allocation3 + $0x98] sm:$0xf] %v1219_v35  ;;  %v771_v2 = vld [vmem:[#allocation2 + $0x4c] sm:$0xf]  ;;  %v1829_v55 = vrot.slane %v1827_v0, 4  ;;  %v1830_v41 = vrot.slane %v1743_v50, 5  ;;  %v3156_v13 = vsel %vm9871_vm11, %v3151_v34, %v3155_v19  ;;  %v1828_v31 = vsel %vm10014_vm14, %v7454_v57, %v1827_v0 }
 0x159   : > { %v10140_v56 = vld [vmem:[#allocation3 + $0x84] sm:$0xf0]  ;;  %1277 = vst [vmem:[#allocation3 + $0xa4] sm:$0xf] %v1222_v44  ;;  %v10146_v42 = vld [vmem:[#allocation2 + $0x68] sm:$0x1] }
 0x15a   : > { %1714 = vst [vmem:[#allocation3 + $0x88] sm:$0xf] %v1586_v52  ;;  %v7896_v14 = vrot.slane %v3311_v33, 9  ;;  %v3397_v62 = vrot.slane %v3312_v12, 5  ;;  %v816_v48 = vld [vmem:[#allocation2 + $0x48] sm:$0xf]  ;;  %v1831_v19 = vsel %vm10014_vm14, %v1829_v55, %v1830_v41 }
 0x15b   : > { %790 = vst [vmem:[#allocation3 + $0x90] sm:$0xf] %v770_v63  ;;  %v817_v38 = vld [vmem:[#allocation2 + $0x4c] sm:$0xf]  ;;  %v818_v45 = vld [vmem:[#allocation2 + $0x50] sm:$0x1] }
 0x15c   : > { %791 = vst [vmem:[#allocation3 + $0x9c] sm:$0xf] %v771_v2  ;;  %v976_v43 = vshrl.u32 %v816_v48, 16  ;;  %v979_v9 = vshll.u32 %v816_v48, 16  ;;  %v3400_v26 = vrot.slane %v10146_v42, 5  ;;  %v985_v35 = vshll.u32 %v817_v38, 16 }
 0x15d   : > { %v1385_v52 = vld [vmem:[#allocation2 + $0x54] sm:$0xf]  ;;  %v989_v54 = vshrl.u32 %v817_v38, 16  ;;  %v995_v16 = vshll.u32 %v818_v45, 16  ;;  %v1386_v50 = vld [vmem:[#allocation2 + $0x58] sm:$0xf]  ;;  %v3398_v45 = vsel %vm10014_vm14, %v7896_v14, %v3397_v62 }
 0x15e   : > { %v8799_v46 = vld [vmem:[#allocation3 + $0x7c] sm:$0xf]  ;;  %v978_v34 = vrot.slane %v976_v43, 4  ;;  %v981_v57 = vrot.slane %v979_v9, 5  ;;  %v987_v33 = vrot.slane %v985_v35, 5  ;;  %v3399_v2 = vrot.slane %v3397_v62, 4 }
 0x15f   : > { %3283 = vst [vmem:[#allocation3 + $0x7c] sm:$0xf] %v3146_v49  ;;  %v10155_v29 = vld [vmem:[#allocation3 + $0x98] sm:$0xf]  ;;  %v991_v44 = vrot.slane %v989_v54, 4  ;;  %v997_v42 = vrot.slane %v995_v16, 5 }
 0x160   : > { %1885 = vst [vmem:[#allocation3 + $0x98] sm:$0xf] %v1828_v31  ;;  %v10159_v63 = vld [vmem:[#allocation3 + $0xa0] sm:$0xf0]  ;;  %v982_v32 = vor.u32 %v981_v57, %v978_v34  ;;  %v1432_v43 = vld [vmem:[#allocation2 + $0x58] sm:$0xf]  ;;  %v3401_v62 = vsel %vm10014_vm14, %v3399_v2, %v3400_v26 }
 0x161   : > { %v7522_v0 = vld [vmem:[#allocation3 + $0x84] sm:$0xf0]  ;;  %1886 = vst [vmem:[#allocation3 + $0xa4] sm:$0xf] %v1831_v19  ;;  %v992_v48 = vor.u32 %v991_v44, %v987_v33  ;;  %v1431_v38 = vld [vmem:[#allocation2 + $0x54] sm:$0xf] }
 0x162   : > { %v7525_v12 = vor.u32 %v8799_v46, %v7522_v0  ;;  %3284 = vst [vmem:[#allocation3 + $0x88] sm:$0xf] %v3156_v13  ;;  %v10161_v49 = vld [vmem:[#allocation3 + $0x90] sm:$0xf]  ;;  %v983_v41 = vrot.slane %v982_v32, 4  ;;  %v1588_v31 = vshrl.u32 %v1431_v38, 16 }
 0x163   : > { %v10163_v55 = vld [vmem:[#allocation3 + $0x98] sm:$0xf0]  ;;  %1405 = vst [vmem:[#allocation3 + $0x90] sm:$0xf] %v1385_v52  ;;  %v993_v13 = vrot.slane %v992_v48, 4  ;;  %v1591_v9 = vshll.u32 %v1431_v38, 16 }
 0x164   : > { %2377 = vmatmul.bf16.gmra.mxu1 %v7525_v12  ;;  %1406 = vst [vmem:[#allocation3 + $0x9c] sm:$0xf] %v1386_v50  ;;  %v988_v46 = vsel %vm9871_vm11, %v983_v41, %v987_v33  ;;  %v1433_v35 = vld [vmem:[#allocation2 + $0x5c] sm:$0x1]  ;;  %v1590_v54 = vrot.slane %v1588_v31, 4  ;;  %v1597_v16 = vshll.u32 %v1432_v43, 16 }
 0x165   : > { %v1601_v19 = vshrl.u32 %v1432_v43, 16  ;;  %v2955_v34 = vld [vmem:[#allocation2 + $0x60] sm:$0xf]  ;;  %v998_v52 = vsel %vm9871_vm11, %v993_v13, %v997_v42  ;;  %1103 = vst [vmem:[#allocation3 + $0x94] sm:$0xf] %v988_v46  ;;  %v1593_v57 = vrot.slane %v1591_v9, 5  ;;  %v7725_v42 = vor.u32 %v10082_v27, %v10080_v24 }
 0x166   : > { %v1607_v0 = vshll.u32 %v1433_v35, 16  ;;  %v3001_v44 = vld [vmem:[#allocation2 + $0x60] sm:$0xf]  ;;  %v2956_v50 = vld [vmem:[#allocation2 + $0x64] sm:$0xf]  ;;  %v1599_v12 = vrot.slane %v1597_v16, 5 }
 0x167   : > { %v7540_v14 = vld [vmem:[#allocation3 + $0x98] sm:$0xf]  ;;  %1104 = vst [vmem:[#allocation3 + $0xa0] sm:$0xf] %v998_v52  ;;  %v1603_v33 = vrot.slane %v1601_v19, 4  ;;  %v1594_v32 = vor.u32 %v1593_v57, %v1590_v54  ;;  %v3158_v41 = vshrl.u32 %v3001_v44, 16  ;;  %2794 = vmatmul.bf16.gmra.mxu3 %v7725_v42 }
 0x168   : > { %3455 = vst [vmem:[#allocation3 + $0x98] sm:$0xf] %v3398_v45  ;;  %v1609_v48 = vrot.slane %v1607_v0, 5  ;;  %v3002_v38 = vld [vmem:[#allocation2 + $0x64] sm:$0xf]  ;;  %v3161_v9 = vshll.u32 %v3001_v44, 16 }
 0x169   : > { %v8804_v31 = vld [vmem:[#allocation3 + $0xa0] sm:$0xf0]  ;;  %v1604_v13 = vor.u32 %v1603_v33, %v1599_v12  ;;  %v3003_v43 = vld [vmem:[#allocation2 + $0x68] sm:$0x1]  ;;  %v3167_v46 = vshll.u32 %v3002_v38, 16  ;;  %v1595_v2 = vrot.slane %v1594_v32, 4 }
 0x16a   : > { %v7541_v35 = vor.u32 %v8804_v31, %v7540_v14  ;;  %3456 = vst [vmem:[#allocation3 + $0xa4] sm:$0xf] %v3401_v62  ;;  %v7532_v26 = vld [vmem:[#allocation3 + $0x90] sm:$0xf]  ;;  %v3160_v52 = vrot.slane %v3158_v41, 4  ;;  %v3163_v54 = vrot.slane %v3161_v9, 5 }
 0x16b   : > { %v8803_v16 = vld [vmem:[#allocation3 + $0x98] sm:$0xf0]  ;;  %2975 = vst [vmem:[#allocation3 + $0x90] sm:$0xf] %v2955_v34  ;;  %v1605_v45 = vrot.slane %v1604_v13, 4  ;;  %v1600_v24 = vsel %vm9871_vm11, %v1595_v2, %v1599_v12  ;;  %v3169_v27 = vrot.slane %v3167_v46, 5 }
 0x16c   : > { %2441 = vmatmul.bf16.gmra.mxu2 %v7541_v35  ;;  %v7533_v19 = vor.u32 %v8803_v16, %v7532_v26  ;;  %2976 = vst [vmem:[#allocation3 + $0x9c] sm:$0xf] %v2956_v50  ;;  %v3171_v57 = vshrl.u32 %v3002_v38, 16  ;;  %v1132_v0 = vld [vmem:[#allocation2 + $0x54] sm:$0xe]  ;;  %v3164_v62 = vor.u32 %v3163_v54, %v3160_v52  ;;  %v3177_v33 = vshll.u32 %v3003_v43, 16 }
 0x16d   : > { %v10177_v44 = vld [vmem:[#allocation3 + $0x94] sm:$0xf]  ;;  %v1610_v14 = vsel %vm9871_vm11, %v1605_v45, %v1609_v48  ;;  %v1133_v34 = vld [vmem:[#allocation2 + $0x58] sm:$0xf]  ;;  %v7445_v32 = vrot.slane %v1132_v0, 9 }
 0x16e   : > { %2323 = vmatmul.bf16.gmra.mxu0 %v7533_v19  ;;  %v10181_v41 = vld [vmem:[#allocation3 + $0x9c] sm:$0xf0]  ;;  %1715 = vst [vmem:[#allocation3 + $0x94] sm:$0xf] %v1600_v24  ;;  %v3173_v50 = vrot.slane %v3171_v57, 4  ;;  %v1225_v42 = vrot.slane %v1133_v34, 5 }
 0x16f   : > { %1716 = vst [vmem:[#allocation3 + $0xa0] sm:$0xf] %v1610_v14  ;;  %v3165_v12 = vrot.slane %v3164_v62, 4  ;;  %v3179_v31 = vrot.slane %v3177_v33, 5  ;;  %v1134_v38 = vld [vmem:[#allocation2 + $0x5c] sm:$0x1] }
 0x170   : > { %v3174_v13 = vor.u32 %v3173_v50, %v3169_v27  ;;  %v1226_v9 = vsel %vm10014_vm14, %v7445_v32, %v1225_v42  ;;  %v1227_v46 = vrot.slane %v1225_v42, 4  ;;  %v1228_v48 = vrot.slane %v1134_v38, 5  ;;  %v1744_v35 = vld [vmem:[#allocation2 + $0x60] sm:$0xe]  ;;  %v1745_v43 = vld [vmem:[#allocation2 + $0x64] sm:$0xf]  ;;  %v2294_v32 = vpop.f32.mrf.mxu0  ;;  %v2353_v50 = vpop.f32.mrf.mxu1 }
 0x171   : > { %1278 = vst [vmem:[#allocation3 + $0xb0] sm:$0xf] %v1226_v9  ;;  %v1746_v26 = vld [vmem:[#allocation2 + $0x68] sm:$0x1]  ;;  %v1834_v2 = vrot.slane %v1745_v43, 5  ;;  %v7455_v45 = vrot.slane %v1744_v35, 9  ;;  %v3170_v54 = vsel %vm9871_vm11, %v3165_v12, %v3169_v27  ;;  %v10193_v27 = vadd.f32 %v2353_v50, %v2294_v32 }
 0x172   : > { %v3175_v52 = vrot.slane %v3174_v13, 4  ;;  %v1229_v16 = vsel %vm10014_vm14, %v1227_v46, %v1228_v48  ;;  %v3314_v19 = vld [vmem:[#allocation2 + $0x6c] sm:$0xe]  ;;  %v1837_v0 = vrot.slane %v1746_v26, 5  ;;  %v3315_v14 = vld [vmem:[#allocation2 + $0x70] sm:$0xf] }
 0x173   : > { %1279 = vst [vmem:[#allocation3 + $0xbc] sm:$0xf] %v1229_v16  ;;  %v1836_v57 = vrot.slane %v1834_v2, 4  ;;  %v772_v62 = vld [vmem:[#allocation2 + $0x54] sm:$0xf]  ;;  %v1835_v38 = vsel %vm10014_vm14, %v7455_v45, %v1834_v2  ;;  %v3404_v9 = vrot.slane %v3315_v14, 5  ;;  %v7737_v2 = vor.u32 %v10126_v39, %v10122_v22 }
 0x174   : > { %v3180_v24 = vsel %vm9871_vm11, %v3175_v52, %v3179_v31  ;;  %v773_v34 = vld [vmem:[#allocation2 + $0x58] sm:$0xf]  ;;  %792 = vst [vmem:[#allocation3 + $0xa8] sm:$0xf] %v772_v62  ;;  %v3316_v13 = vld [vmem:[#allocation2 + $0x74] sm:$0x1] }
 0x175   : > { %v8802_v33 = vld [vmem:[#allocation3 + $0x94] sm:$0xf]  ;;  %v7897_v31 = vrot.slane %v3314_v19, 9  ;;  %v1838_v48 = vsel %vm10014_vm14, %v1836_v57, %v1837_v0  ;;  %793 = vst [vmem:[#allocation3 + $0xb4] sm:$0xf] %v773_v34  ;;  %v3407_v19 = vrot.slane %v3316_v13, 5  ;;  %v10203_v57 = vpop.f32.mrf.mxu3 }
 0x176   : > { %v7534_v42 = vld [vmem:[#allocation3 + $0x9c] sm:$0xf0]  ;;  %3285 = vst [vmem:[#allocation3 + $0x94] sm:$0xf] %v3170_v54  ;;  %v1387_v35 = vld [vmem:[#allocation2 + $0x60] sm:$0xf] }
 0x177   : > { %v7537_v12 = vor.u32 %v8802_v33, %v7534_v42  ;;  %3286 = vst [vmem:[#allocation3 + $0xa0] sm:$0xf] %v3180_v24  ;;  %v1135_v43 = vld [vmem:[#allocation2 + $0x60] sm:$0xe]  ;;  %v1136_v26 = vld [vmem:[#allocation2 + $0x64] sm:$0xf]  ;;  %2799 = vmatmul.bf16.gmra.mxu3 %v7737_v2 }
 0x178   : > { %v10195_v46 = vld [vmem:[#allocation3 + $0xb0] sm:$0xf]  ;;  %v1137_v16 = vld [vmem:[#allocation2 + $0x68] sm:$0x1]  ;;  %v7446_v45 = vrot.slane %v1135_v43, 9  ;;  %v1232_v54 = vrot.slane %v1136_v26, 5  ;;  %v10209_v42 = vpop.f32.mrf.mxu0 }
 0x179   : > { %2382 = vmatmul.bf16.gmra.mxu1 %v7537_v12  ;;  %1887 = vst [vmem:[#allocation3 + $0xb0] sm:$0xf] %v1835_v38  ;;  %v1388_v24 = vld [vmem:[#allocation2 + $0x64] sm:$0xf]  ;;  %v1235_v14 = vrot.slane %v1137_v16, 5  ;;  %v3406_v0 = vrot.slane %v3404_v9, 4  ;;  %v10211_v38 = vpop.f32.mrf.mxu1  ;;  %v3405_v12 = vsel %vm10014_vm14, %v7897_v31, %v3404_v9 }
 0x17a   : > { %v10201_v52 = vld [vmem:[#allocation3 + $0xb8] sm:$0xf0]  ;;  %v1233_v34 = vsel %vm10014_vm14, %v7446_v45, %v1232_v54  ;;  %v1234_v22 = vrot.slane %v1232_v54, 4  ;;  %v1748_v39 = vld [vmem:[#allocation2 + $0x70] sm:$0xf]  ;;  %11323 = vst [vmem:[#allocation32_spill] sm:$0xff] %v10209_v42 }
 0x17b   : > { %1888 = vst [vmem:[#allocation3 + $0xbc] sm:$0xf] %v1838_v48  ;;  %v1747_v62 = vld [vmem:[#allocation2 + $0x6c] sm:$0xe]  ;;  %v10205_v33 = vld [vmem:[#allocation3 + $0xa8] sm:$0xf]  ;;  %v3408_v16 = vsel %vm10014_vm14, %v3406_v0, %v3407_v19 }
 0x17c   : > { %1407 = vst [vmem:[#allocation3 + $0xa8] sm:$0xf] %v1387_v35  ;;  %v1749_v32 = vld [vmem:[#allocation2 + $0x74] sm:$0x1]  ;;  %v1841_v50 = vrot.slane %v1748_v39, 5  ;;  %v1236_v13 = vsel %vm10014_vm14, %v1234_v22, %v1235_v14  ;;  %v7456_v48 = vrot.slane %v1747_v62, 9 }
 0x17d   : > { %11324 = vst [vmem:[#allocation33_spill] sm:$0xff] %v10211_v38  ;;  %v10217_v43 = vld [vmem:[#allocation3 + $0xb0] sm:$0xf0]  ;;  %v1844_v2 = vrot.slane %v1749_v32, 5  ;;  %v2957_v45 = vld [vmem:[#allocation2 + $0x6c] sm:$0xf]  ;;  %v10223_v32 = vpop.f32.mrf.mxu3 }
 0x17e   : > { %1280 = vst [vmem:[#allocation3 + $0xc8] sm:$0xf] %v1233_v34  ;;  %v1843_v26 = vrot.slane %v1841_v50, 4  ;;  %v3318_v54 = vld [vmem:[#allocation2 + $0x7c] sm:$0xf]  ;;  %v1842_v22 = vsel %vm10014_vm14, %v7456_v48, %v1841_v50 }
 0x17f   : > { %1281 = vst [vmem:[#allocation3 + $0xd4] sm:$0xf] %v1236_v13  ;;  %v3317_v39 = vld [vmem:[#allocation2 + $0x78] sm:$0xe]  ;;  %v3411_v31 = vrot.slane %v3318_v54, 5 }
 0x180   : > { %v7552_v35 = vld [vmem:[#allocation3 + $0xb0] sm:$0xf]  ;;  %1408 = vst [vmem:[#allocation3 + $0xb4] sm:$0xf] %v1388_v24  ;;  %v2958_v62 = vld [vmem:[#allocation2 + $0x70] sm:$0xf]  ;;  %v1845_v19 = vsel %vm10014_vm14, %v1843_v26, %v1844_v2 }
 0x181   : > { %3457 = vst [vmem:[#allocation3 + $0xb0] sm:$0xf] %v3405_v12  ;;  %v3319_v53 = vld [vmem:[#allocation2 + $0x80] sm:$0x1]  ;;  %v7898_v24 = vrot.slane %v3317_v39, 9  ;;  %v3413_v12 = vrot.slane %v3411_v31, 4 }
 0x182   : > { %v8807_v9 = vld [vmem:[#allocation3 + $0xb8] sm:$0xf0]  ;;  %v774_v14 = vld [vmem:[#allocation2 + $0x60] sm:$0xf]  ;;  %11325 = vst [vmem:[#allocation34_spill] sm:$0xff] %v10223_v32  ;;  %v3414_v54 = vrot.slane %v3319_v53, 5  ;;  %v7749_v53 = vor.u32 %v10163_v55, %v10161_v49 }
 0x183   : > { %v7553_v34 = vor.u32 %v8807_v9, %v7552_v35  ;;  %3458 = vst [vmem:[#allocation3 + $0xbc] sm:$0xf] %v3408_v16  ;;  %v7544_v13 = vld [vmem:[#allocation3 + $0xa8] sm:$0xf]  ;;  %v2299_v35 = vpop.f32.mrf.mxu0  ;;  %v2358_v16 = vpop.f32.mrf.mxu1  ;;  %v775_v50 = vld [vmem:[#allocation2 + $0x64] sm:$0xf] }
 0x184   : > { %794 = vst [vmem:[#allocation3 + $0xc0] sm:$0xf] %v774_v14  ;;  %v10231_v48 = vadd.f32 %v2358_v16, %v2299_v35  ;;  %v1389_v3 = vld [vmem:[#allocation2 + $0x6c] sm:$0xf]  ;;  %v1139_v39 = vld [vmem:[#allocation2 + $0x70] sm:$0xf]  ;;  %v3412_v35 = vsel %vm10014_vm14, %v7898_v24, %v3411_v31 }
 0x185   : > { %2446 = vmatmul.bf16.gmra.mxu2 %v7553_v34  ;;  %2977 = vst [vmem:[#allocation3 + $0xa8] sm:$0xf] %v2957_v45  ;;  %v10227_v0 = vld [vmem:[#allocation3 + $0xc8] sm:$0xf]  ;;  %v1138_v2 = vld [vmem:[#allocation2 + $0x6c] sm:$0xe] }
 0x186   : > { %v10229_v9 = vld [vmem:[#allocation3 + $0xd0] sm:$0xf0]  ;;  %1889 = vst [vmem:[#allocation3 + $0xc8] sm:$0xf] %v1842_v22  ;;  %v1140_v45 = vld [vmem:[#allocation2 + $0x74] sm:$0x1] }
 0x187   : > { %11326 = vst [vmem:[#allocation35_spill] sm:$0xff] %v10229_v9  ;;  %v8806_v1 = vld [vmem:[#allocation3 + $0xb0] sm:$0xf0]  ;;  %v7447_v14 = vrot.slane %v1138_v2, 9  ;;  %v1239_v34 = vrot.slane %v1139_v39, 5  ;;  %v1242_v59 = vrot.slane %v1140_v45, 5  ;;  %2804 = vmatmul.bf16.gmra.mxu3 %v7749_v53 }
 0x188   : > { %1890 = vst [vmem:[#allocation3 + $0xd4] sm:$0xf] %v1845_v19  ;;  %v7545_v26 = vor.u32 %v8806_v1, %v7544_v13  ;;  %v1751_v22 = vld [vmem:[#allocation2 + $0x7c] sm:$0xf]  ;;  %v1750_v13 = vld [vmem:[#allocation2 + $0x78] sm:$0xe]  ;;  %v10241_v19 = vpop.f32.mrf.mxu3 }
 0x189   : > { %2978 = vst [vmem:[#allocation3 + $0xb4] sm:$0xf] %v2958_v62  ;;  %v1240_v1 = vsel %vm10014_vm14, %v7447_v14, %v1239_v34  ;;  %v1241_v62 = vrot.slane %v1239_v34, 4  ;;  %v1390_v49 = vld [vmem:[#allocation2 + $0x70] sm:$0xf]  ;;  %v1848_v24 = vrot.slane %v1751_v22, 5 }
 0x18a   : > { %795 = vst [vmem:[#allocation3 + $0xcc] sm:$0xf] %v775_v50  ;;  %2328 = vmatmul.bf16.gmra.mxu0 %v7545_v26  ;;  %v3415_v50 = vsel %vm10014_vm14, %v3413_v12, %v3414_v54  ;;  %v1752_v55 = vld [vmem:[#allocation2 + $0x80] sm:$0x1]  ;;  %v7457_v14 = vrot.slane %v1750_v13, 9 }
 0x18b   : > { %v10237_v16 = vld [vmem:[#allocation3 + $0xc0] sm:$0xf]  ;;  %v1243_v31 = vsel %vm10014_vm14, %v1241_v62, %v1242_v59  ;;  %1282 = vst [vmem:[#allocation3 + $0xe0] sm:$0xf] %v1240_v1  ;;  %v10247_v2 = vpop.f32.mrf.mxu0  ;;  %v10249_v39 = vpop.f32.mrf.mxu1  ;;  %v2959_v34 = vld [vmem:[#allocation2 + $0x78] sm:$0xf] }
 0x18c   : > { %1409 = vst [vmem:[#allocation3 + $0xc0] sm:$0xf] %v1389_v3  ;;  %v3320_v53 = vld [vmem:[#allocation2 + $0x84] sm:$0xe]  ;;  %v3321_v3 = vld [vmem:[#allocation2 + $0x88] sm:$0xf]  ;;  %v1849_v22 = vsel %vm10014_vm14, %v7457_v14, %v1848_v24 }
 0x18d   : > { %v7564_v26 = vld [vmem:[#allocation3 + $0xc8] sm:$0xf]  ;;  %11327 = vst [vmem:[#allocation36_spill] sm:$0xff] %v10247_v2  ;;  %v1850_v32 = vrot.slane %v1848_v24, 4  ;;  %v1851_v59 = vrot.slane %v1752_v55, 5 }
 0x18e   : > { %11328 = vst [vmem:[#allocation37_spill] sm:$0xff] %v10249_v39  ;;  %v776_v1 = vld [vmem:[#allocation2 + $0x6c] sm:$0xf]  ;;  %v777_v62 = vld [vmem:[#allocation2 + $0x70] sm:$0xf] }
 0x18f   : > { %v8810_v45 = vld [vmem:[#allocation3 + $0xd0] sm:$0xf0]  ;;  %3459 = vst [vmem:[#allocation3 + $0xc8] sm:$0xf] %v3412_v35  ;;  %v3322_v35 = vld [vmem:[#allocation2 + $0x8c] sm:$0x1] }
 0x190   : > { %3460 = vst [vmem:[#allocation3 + $0xd4] sm:$0xf] %v3415_v50  ;;  %v7565_v54 = vor.u32 %v8810_v45, %v7564_v26  ;;  %v10255_v13 = vpop.f32.mrf.mxu3  ;;  %v2960_v50 = vld [vmem:[#allocation2 + $0x7c] sm:$0xf]  ;;  %v3418_v26 = vrot.slane %v3321_v3, 5 }
 0x191   : > { %v10251_v12 = vld [vmem:[#allocation3 + $0xc8] sm:$0xf0]  ;;  %1283 = vst [vmem:[#allocation3 + $0xec] sm:$0xf] %v1243_v31  ;;  %v7899_v31 = vrot.slane %v3320_v53, 9 }
 0x192   : > { %1410 = vst [vmem:[#allocation3 + $0xcc] sm:$0xf] %v1390_v49  ;;  %v10257_v2 = vld [vmem:[#allocation3 + $0xe0] sm:$0xf]  ;;  %v1852_v49 = vsel %vm10014_vm14, %v1850_v32, %v1851_v59  ;;  %v1391_v55 = vld [vmem:[#allocation2 + $0x78] sm:$0xf] }
 0x193   : > { %796 = vst [vmem:[#allocation3 + $0xd8] sm:$0xf] %v776_v1  ;;  %v7556_v39 = vld [vmem:[#allocation3 + $0xc0] sm:$0xf]  ;;  %v2304_v24 = vpop.f32.mrf.mxu0  ;;  %v2363_v45 = vpop.f32.mrf.mxu1  ;;  %v1111_v14 = vld [vmem:[#allocation2] sm:$0xe] }
 0x194   : > { %797 = vst [vmem:[#allocation3 + $0xe4] sm:$0xf] %v777_v62  ;;  %v3421_v1 = vrot.slane %v3322_v35, 5  ;;  %v10261_v37 = vadd.f32 %v2363_v45, %v2304_v24  ;;  %v1112_v62 = vld [vmem:[#allocation2 + $0x4] sm:$0xf]  ;;  %v7438_v38 = vrot.slane %v1111_v14, 9  ;;  %v3419_v45 = vsel %vm10014_vm14, %v7899_v31, %v3418_v26 }
 0x195   : > { %2979 = vst [vmem:[#allocation3 + $0xc0] sm:$0xf] %v2959_v34  ;;  %2451 = vmatmul.bf16.gmra.mxu2 %v7565_v54  ;;  %v1113_v40 = vld [vmem:[#allocation2 + $0x8] sm:$0x1]  ;;  %v1392_v42 = vld [vmem:[#allocation2 + $0x7c] sm:$0xf] }
 0x196   : > { %11329 = vst [vmem:[#allocation38_spill] sm:$0xff] %v10257_v2  ;;  %v1176_v53 = vrot.slane %v1112_v62, 5  ;;  %v1179_v3 = vrot.slane %v1113_v40, 5  ;;  %v1724_v21 = vld [vmem:[#allocation2 + $0x10] sm:$0xf]  ;;  %v3420_v59 = vrot.slane %v3418_v26, 4  ;;  %v7761_v40 = vor.u32 %v10217_v43, %v10205_v33 }
 0x197   : > { %1891 = vst [vmem:[#allocation3 + $0xe0] sm:$0xf] %v1849_v22  ;;  %v1723_v62 = vld [vmem:[#allocation2 + $0xc] sm:$0xe]  ;;  %v2961_v26 = vld [vmem:[#allocation2 + $0x84] sm:$0xf] }
 0x198   : > { %11330 = vst [vmem:[#allocation39_spill] sm:$0xff] %v10261_v37  ;;  %v10263_v34 = vld [vmem:[#allocation3 + $0xe8] sm:$0xf0]  ;;  %v1177_v35 = vsel %vm10014_vm14, %v7438_v38, %v1176_v53  ;;  %v1178_v24 = vrot.slane %v1176_v53, 4  ;;  %v1725_v53 = vld [vmem:[#allocation2 + $0x14] sm:$0x1]  ;;  %2809 = vmatmul.bf16.gmra.mxu3 %v7761_v40  ;;  %v3422_v31 = vsel %vm10014_vm14, %v3420_v59, %v3421_v1 }
 0x199   : > { %11331 = vst [vmem:[#allocation40_spill] sm:$0xff] %v10263_v34  ;;  %v8809_v54 = vld [vmem:[#allocation3 + $0xc8] sm:$0xf0]  ;;  %v2962_v33 = vld [vmem:[#allocation2 + $0x88] sm:$0xf] }
 0x19a   : > { %1892 = vst [vmem:[#allocation3 + $0xec] sm:$0xf] %v1852_v49  ;;  %v7557_v32 = vor.u32 %v8809_v54, %v7556_v39  ;;  %v10265_v22 = vld [vmem:[#allocation3 + $0xd8] sm:$0xf]  ;;  %v1180_v39 = vsel %vm10014_vm14, %v1178_v24, %v1179_v3  ;;  %v10277_v49 = vpop.f32.mrf.mxu3  ;;  %v3293_v54 = vld [vmem:[#allocation2 + $0x18] sm:$0xe] }
 0x19b   : > { %2980 = vst [vmem:[#allocation3 + $0xcc] sm:$0xf] %v2960_v50  ;;  %v10271_v14 = vld [vmem:[#allocation3 + $0xe0] sm:$0xf0]  ;;  %v1785_v50 = vrot.slane %v1724_v21, 5  ;;  %v8775_v43 = vld [vmem:[#allocation7 + $0x78] sm:$0xff]  ;;  %v10281_v24 = vpop.f32.mrf.mxu0  ;;  %v10285_v2 = vpop.f32.mrf.mxu1 }
 0x19c   : > { %1411 = vst [vmem:[#allocation3 + $0xd8] sm:$0xf] %v1391_v55  ;;  %2333 = vmatmul.bf16.gmra.mxu0 %v7557_v32  ;;  %v7448_v55 = vrot.slane %v1723_v62, 9  ;;  %v1788_v21 = vrot.slane %v1725_v53, 5  ;;  %v1114_v28 = vld [vmem:[#allocation2 + $0xc] sm:$0xe] }
 0x19d   : > { %1412 = vst [vmem:[#allocation3 + $0xe4] sm:$0xf] %v1392_v42  ;;  %v3294_v42 = vld [vmem:[#allocation2 + $0x1c] sm:$0xf]  ;;  %v1787_v3 = vrot.slane %v1785_v50, 4  ;;  %2825 = vmatpush.bf16.msra.mxu0 %v8775_v43  ;;  %v7439_v34 = vrot.slane %v1114_v28, 9 }
 0x19e   : > { %v7576_v38 = vld [vmem:[#allocation3 + $0xe0] sm:$0xf]  ;;  %1264 = vst [vmem:[#allocation3 + $0x8] sm:$0xf] %v1177_v35  ;;  %v3295_v62 = vld [vmem:[#allocation2 + $0x20] sm:$0x1] }
 0x19f   : > { %3461 = vst [vmem:[#allocation3 + $0xe0] sm:$0xf] %v3419_v45  ;;  %v8774_v35 = vld [vmem:[#allocation7 + $0x70] sm:$0xff]  ;;  %v1786_v45 = vsel %vm10014_vm14, %v7448_v55, %v1785_v50  ;;  %v1789_v28 = vsel %vm10014_vm14, %v1787_v3, %v1788_v21  ;;  %v8773_v43 = vld [vmem:[#allocation7 + $0x68] sm:$0xff]  ;;  %v3358_v3 = vrot.slane %v3295_v62, 5 }
 0x1a0   : > { %1265 = vst [vmem:[#allocation3 + $0x14] sm:$0xf] %v1180_v39  ;;  %v1115_v40 = vld [vmem:[#allocation2 + $0x10] sm:$0xf]  ;;  %v7890_v39 = vrot.slane %v3293_v54, 9  ;;  %v2427_v62 = vpop.f32.mrf.mxu2 }
 0x1a1   : > { %v8813_v32 = vld [vmem:[#allocation3 + $0xe8] sm:$0xf0]  ;;  %11332 = vst [vmem:[#allocation41_spill] sm:$0xff] %v10281_v24  ;;  %v1116_v37 = vld [vmem:[#allocation2 + $0x14] sm:$0x1]  ;;  %v1183_v36 = vrot.slane %v1115_v40, 5  ;;  %2826 = vmatpush.bf16.msra.mxu0 %v8774_v35 }
 0x1a2   : > { %3462 = vst [vmem:[#allocation3 + $0xec] sm:$0xf] %v3422_v31  ;;  %v7577_v1 = vor.u32 %v8813_v32, %v7576_v38  ;;  %v3355_v24 = vrot.slane %v3294_v42, 5  ;;  %v1186_v47 = vrot.slane %v1116_v37, 5  ;;  %v10291_v38 = vpop.f32.mrf.mxu3  ;;  %v1726_v54 = vld [vmem:[#allocation2 + $0x18] sm:$0xe] }
 0x1a3   : > { %v7568_v59 = vld [vmem:[#allocation3 + $0xd8] sm:$0xf]  ;;  %11333 = vst [vmem:[#allocation42_spill] sm:$0xff] %v10285_v2  ;;  %v1184_v50 = vsel %vm10014_vm14, %v7439_v34, %v1183_v36  ;;  %v1185_v55 = vrot.slane %v1183_v36, 4  ;;  %v1727_v32 = vld [vmem:[#allocation2 + $0x1c] sm:$0xf] }
 0x1a4   : > { %v8812_v53 = vld [vmem:[#allocation3 + $0xe0] sm:$0xf0]  ;;  %2981 = vst [vmem:[#allocation3 + $0xd8] sm:$0xf] %v2961_v26  ;;  %v3357_v42 = vrot.slane %v3355_v24, 4  ;;  %v7449_v21 = vrot.slane %v1726_v54, 9  ;;  %v3356_v9 = vsel %vm10014_vm14, %v7890_v39, %v3355_v24 }
 0x1a5   : > { %2982 = vst [vmem:[#allocation3 + $0xe4] sm:$0xf] %v2962_v33  ;;  %v10287_v31 = vld [vmem:[#allocation3 + $0x8] sm:$0xf]  ;;  %2456 = vmatmul.bf16.gmra.mxu2 %v7577_v1  ;;  %v1187_v37 = vsel %vm10014_vm14, %v1185_v55, %v1186_v47  ;;  %v1728_v33 = vld [vmem:[#allocation2 + $0x20] sm:$0x1]  ;;  %2827 = vmatpush.bf16.msra.mxu0 %v8773_v43  ;;  %v2309_v47 = vpop.f32.mrf.mxu0 }
 0x1a6   : > { %11334 = vst [vmem:[#allocation43_spill] sm:$0xff] %v10291_v38  ;;  %v1792_v40 = vrot.slane %v1727_v32, 5  ;;  %v7569_v38 = vor.u32 %v8812_v53, %v7568_v59  ;;  %v1117_v36 = vld [vmem:[#allocation2 + $0x18] sm:$0xe]  ;;  %v1118_v34 = vld [vmem:[#allocation2 + $0x1c] sm:$0xf]  ;;  %v3359_v54 = vsel %vm10014_vm14, %v3357_v42, %v3358_v3 }
 0x1a7   : > { %1873 = vst [vmem:[#allocation3 + $0x8] sm:$0xf] %v1786_v45  ;;  %v10295_v26 = vld [vmem:[#allocation3 + $0x10] sm:$0xf0]  ;;  %v1795_v45 = vrot.slane %v1728_v33, 5  ;;  %v1190_v2 = vrot.slane %v1118_v34, 5 }
 0x1a8   : > { %1266 = vst [vmem:[#allocation3 + $0x20] sm:$0xf] %v1184_v50  ;;  %v1794_v35 = vrot.slane %v1792_v40, 4  ;;  %v1119_v1 = vld [vmem:[#allocation2 + $0x20] sm:$0x1]  ;;  %v7440_v50 = vrot.slane %v1117_v36, 9  ;;  %v1793_v59 = vsel %vm10014_vm14, %v7449_v21, %v1792_v40 }
 0x1a9   : > { %1874 = vst [vmem:[#allocation3 + $0x14] sm:$0xf] %v1789_v28  ;;  %v7773_v28 = vor.u32 %v10251_v12, %v10237_v16  ;;  %v1192_v53 = vrot.slane %v1190_v2, 4  ;;  %v1193_v55 = vrot.slane %v1119_v1, 5  ;;  %v3297_v24 = vld [vmem:[#allocation2 + $0x28] sm:$0xf] }
 0x1aa   : > { %1267 = vst [vmem:[#allocation3 + $0x2c] sm:$0xf] %v1187_v37  ;;  %v3296_v37 = vld [vmem:[#allocation2 + $0x24] sm:$0xe]  ;;  %v10309_v39 = vpop.f32.mrf.mxu3  ;;  %v1796_v33 = vsel %vm10014_vm14, %v1794_v35, %v1795_v45  ;;  %v3298_v21 = vld [vmem:[#allocation2 + $0x2c] sm:$0x1]  ;;  %v1191_v42 = vsel %vm10014_vm14, %v7440_v50, %v1190_v2 }
 0x1ab   : > { %v2368_v32 = vpop.f32.mrf.mxu1  ;;  %2814 = vmatmul.bf16.gmra.mxu3 %v7773_v28  ;;  %v3362_v40 = vrot.slane %v3297_v24, 5  ;;  %v8772_v34 = vld [vmem:[#allocation7 + $0x60] sm:$0xff]  ;;  %v1194_v1 = vsel %vm10014_vm14, %v1192_v53, %v1193_v55  ;;  %v8783_v35 = vld [vmem:[#allocation7 + $0xb8] sm:$0xff]  ;;  %v8782_v28 = vld [vmem:[#allocation7 + $0xb0] sm:$0xff]  ;;  %1268 = vst [vmem:[#allocation3 + $0x38] sm:$0xf] %v1191_v42 }
 0x1ac   : > { %2338 = vmatmul.bf16.gmra.mxu0 %v7569_v38  ;;  %v2369_v16 = vadd.f32 %v2368_v32, %v2309_v47  ;;  %v3365_v47 = vrot.slane %v3298_v21, 5  ;;  %2884 = vmatpush.bf16.msrb.mxu1 %v8783_v35  ;;  %1269 = vst [vmem:[#allocation3 + $0x44] sm:$0xf] %v1194_v1  ;;  %v1729_v2 = vld [vmem:[#allocation2 + $0x24] sm:$0xe]  ;;  %v8781_v42 = vld [vmem:[#allocation7 + $0xa8] sm:$0xff] }
 0x1ad   : > { %v3364_v45 = vrot.slane %v3362_v40, 4  ;;  %2828 = vmatpush.bf16.msra.mxu0 %v8772_v34  ;;  %v1730_v50 = vld [vmem:[#allocation2 + $0x28] sm:$0xf]  ;;  %v7450_v32 = vrot.slane %v1729_v2, 9  ;;  %v10334_v35 = vpop.f32.mrf.mxu0 }
 0x1ae   : > { %v10305_v43 = vld [vmem:[#allocation3 + $0x8] sm:$0xf]  ;;  %v10317_v3 = vadd.f32 %v2427_v62, %v2369_v16 }
 0x1af   : > { %3443 = vst [vmem:[#allocation3 + $0x8] sm:$0xf] %v3356_v9  ;;  %v10311_v12 = vld [vmem:[#allocation3 + $0x20] sm:$0xf]  ;;  %v7891_v9 = vrot.slane %v3296_v37, 9  ;;  %v1799_v37 = vrot.slane %v1730_v50, 5  ;;  %v3366_v16 = vsel %vm10014_vm14, %v3364_v45, %v3365_v47  ;;  %v10338_v45 = vpop.f32.mrf.mxu2  ;;  %v7785_v50 = vor.u32 %v10271_v14, %v10265_v22 }
 0x1b0   : > { %v8786_v38 = vld [vmem:[#allocation3 + $0x10] sm:$0xf0]  ;;  %1875 = vst [vmem:[#allocation3 + $0x20] sm:$0xf] %v1793_v59  ;;  %v8771_v59 = vld [vmem:[#allocation7 + $0x58] sm:$0xff]  ;;  %2885 = vmatpush.bf16.msrb.mxu1 %v8782_v28 }
 0x1b1   : > { %3444 = vst [vmem:[#allocation3 + $0x14] sm:$0xf] %v3359_v54  ;;  %v10319_v36 = vld [vmem:[#allocation3 + $0x28] sm:$0xf0]  ;;  %v3363_v62 = vsel %vm10014_vm14, %v7891_v9, %v3362_v40  ;;  %v1731_v54 = vld [vmem:[#allocation2 + $0x2c] sm:$0x1]  ;;  %2829 = vmatpush.bf16.msra.mxu0 %v8771_v59  ;;  %v1800_v34 = vsel %vm10014_vm14, %v7450_v32, %v1799_v37  ;;  %v7469_v1 = vor.u32 %v8786_v38, %v10305_v43 }
 0x1b2   : > { %1876 = vst [vmem:[#allocation3 + $0x2c] sm:$0xf] %v1796_v33  ;;  %v10325_v24 = vpop.f32.mrf.mxu3  ;;  %v1802_v53 = vrot.slane %v1731_v54, 5  ;;  %v8770_v33 = vld [vmem:[#allocation7 + $0x50] sm:$0xff]  ;;  %v1801_v21 = vrot.slane %v1799_v37, 4  ;;  %v8780_v59 = vld [vmem:[#allocation7 + $0xa0] sm:$0xff] }
 0x1b3   : > { %v10336_v2 = vld [vmem:[#allocation3 + $0x38] sm:$0xf]  ;;  %11335 = vst [vmem:[#allocation44_spill] sm:$0xff] %v10338_v45  ;;  %v10340_v47 = vld [vmem:[#allocation3 + $0x40] sm:$0xf0]  ;;  %v10342_v28 = vpop.f32.mrf.mxu1  ;;  %v8768_v22 = vld [vmem:[#allocation7 + $0x40] sm:$0xff] }
 0x1b4   : > { %v1803_v9 = vsel %vm10014_vm14, %v1801_v21, %v1802_v53  ;;  %1877 = vst [vmem:[#allocation3 + $0x38] sm:$0xf] %v1800_v34  ;;  %2886 = vmatpush.bf16.msrb.mxu1 %v8781_v42  ;;  %v3299_v43 = vld [vmem:[#allocation2 + $0x30] sm:$0xe]  ;;  %v3300_v38 = vld [vmem:[#allocation2 + $0x34] sm:$0xf] }
 0x1b5   : > { %2830 = vmatpush.bf16.msra.mxu0 %v8770_v33  ;;  %1878 = vst [vmem:[#allocation3 + $0x44] sm:$0xf] %v1803_v9  ;;  %v7892_v32 = vrot.slane %v3299_v43, 9  ;;  %v3369_v37 = vrot.slane %v3300_v38, 5  ;;  %v8779_v33 = vld [vmem:[#allocation7 + $0x98] sm:$0xff]  ;;  %v2314_v43 = vpop.f32.mrf.mxu0 }
 0x1b6   : > { %v8883_v21 = vld [vmem:[#allocation7 + $0x1f8] sm:$0xff] }
 0x1b7   : > { %v7480_v55 = vld [vmem:[#allocation3 + $0x20] sm:$0xf]  ;;  %v3370_v42 = vsel %vm10014_vm14, %v7892_v32, %v3369_v37  ;;  %v3371_v34 = vrot.slane %v3369_v37, 4  ;;  %3914 = vmatpush.bf16.msra.mxu3 %v8883_v21  ;;  %v8777_v37 = vld [vmem:[#allocation7 + $0x88] sm:$0xff]  ;;  %v8776_v21 = vld [vmem:[#allocation7 + $0x80] sm:$0xff] }
 0x1b8   : > { %3445 = vst [vmem:[#allocation3 + $0x20] sm:$0xf] %v3363_v62  ;;  %v3301_v62 = vld [vmem:[#allocation2 + $0x38] sm:$0x1]  ;;  %2887 = vmatpush.bf16.msrb.mxu1 %v8780_v59  ;;  %v2432_v59 = vpop.f32.mrf.mxu2 }
 0x1b9   : > { %v8789_v40 = vld [vmem:[#allocation3 + $0x28] sm:$0xf0]  ;;  %v3372_v53 = vrot.slane %v3301_v62, 5 }
 0x1ba   : > { %3446 = vst [vmem:[#allocation3 + $0x2c] sm:$0xf] %v3366_v16  ;;  %v10346_v54 = vpop.f32.mrf.mxu3  ;;  %v8769_v16 = vld [vmem:[#allocation7 + $0x48] sm:$0xff]  ;;  %v7481_v45 = vor.u32 %v8789_v40, %v7480_v55 }
 0x1bb   : > { %2819 = vmatmul.bf16.gmra.mxu3 %v7785_v50  ;;  %2831 = vmatpush.bf16.msra.mxu0 %v8769_v16  ;;  %v7492_v14 = vld [vmem:[#allocation3 + $0x38] sm:$0xf]  ;;  %v8778_v50 = vld [vmem:[#allocation7 + $0x90] sm:$0xff] }
 0x1bc   : > { %2411 = vmatmul.bf16.vlgmr.msrb.gmra.mxu0 %v7469_v1  ;;  %v8792_v9 = vld [vmem:[#allocation3 + $0x40] sm:$0xf0]  ;;  %v3373_v1 = vsel %vm10014_vm14, %v3371_v34, %v3372_v53  ;;  %3447 = vst [vmem:[#allocation3 + $0x38] sm:$0xf] %v3370_v42  ;;  %2888 = vmatpush.bf16.msrb.mxu1 %v8779_v33  ;;  %v7685_v33 = vor.u32 %v10295_v26, %v10287_v31 }
 0x1bd   : > { %3448 = vst [vmem:[#allocation3 + $0x44] sm:$0xf] %v3373_v1  ;;  %v8882_v42 = vld [vmem:[#allocation7 + $0x1f0] sm:$0xff]  ;;  %v10358_v34 = vpop.f32.mrf.mxu0  ;;  %v7493_v40 = vor.u32 %v8792_v9, %v7492_v14  ;;  %v7681_v14 = vor.u32 %v9898_v51, %v9902_v60 }
 0x1be   : > { %3915 = vmatpush.bf16.msra.mxu3 %v8882_v42 }
 0x1bf   : > { %2832 = vmatpush.bf16.msra.mxu0 %v8768_v22 }
 0x1c0   : > { %2889 = vmatpush.bf16.msrb.mxu1 %v8778_v50  ;;  %v10364_v55 = vpop.f32.mrf.mxu2 }
 0x1c2   : > { %v10352_v62 = vpop.f32.mrf.mxu3 }
 0x1c3   : > { %v2373_v38 = vpop.f32.mrf.mxu1  ;;  %3973 = vmatpush.bf16.msrb.mxu0 %v8891_v20 }
 0x1c4   : > { %v2374_v32 = vadd.f32 %v2373_v38, %v2314_v43  ;;  %2890 = vmatpush.bf16.msrb.mxu1 %v8777_v37  ;;  %v7697_v43 = vor.u32 %v10319_v36, %v10311_v12  ;;  %v8881_v12 = vld [vmem:[#allocation7 + $0x1e8] sm:$0xff] }
 0x1c5   : > { %3916 = vmatpush.bf16.msra.mxu3 %v8881_v12 }
 0x1c6   : > { %v2433_v16 = vadd.f32 %v2432_v59, %v2374_v32 }
 0x1c8   : > { %2891 = vmatpush.bf16.msrb.mxu1 %v8776_v21 }
 0x1ca   : > { %v10354_v53 = vpop.f32.mrf.mxu3 }
 0x1cb   : > { %2892 = vmatmul.bf16.vlgmr.msrb.gmra.mxu1 %v7685_v33  ;;  %v10362_v1 = vpop.f32.mrf.mxu1 }
 0x1cc   : > { %2416 = vmatmul.bf16.gmra.mxu0 %v7481_v45  ;;  %v8890_v45 = vld [vmem:[#allocation7 + $0x230] sm:$0xff] }
 0x1cd   : > { %3974 = vmatpush.bf16.msrb.mxu0 %v8890_v45  ;;  %v8889_v45 = vld [vmem:[#allocation7 + $0x228] sm:$0xff] }
 0x1d1   : > { %v2319_v31 = vpop.f32.mrf.mxu0  ;;  %3975 = vmatpush.bf16.msrb.mxu0 %v8889_v45 }
 0x1d2   : > { %v10360_v22 = vpop.f32.mrf.mxu3  ;;  %v2437_v59 = vpop.f32.mrf.mxu2 }
 0x1d9   : > { %v10375_v9 = vpop.f32.mrf.mxu0 }
 0x1da   : > { %v2790_v26 = vpop.f32.mrf.mxu3  ;;  %v10377_v21 = vpop.f32.mrf.mxu2 }
 0x1db   : > { %v10369_v20 = vadd.f32 %v2790_v26, %v10317_v3  ;;  %2897 = vmatmul.bf16.gmra.mxu1 %v7697_v43  ;;  %v7709_v3 = vor.u32 %v10340_v47, %v10336_v2  ;;  %v8880_v2 = vld [vmem:[#allocation7 + $0x1e0] sm:$0xff]  ;;  %v7721_v47 = vor.u32 %v10040_v25, %v10036_v5 }
 0x1dc   : > { %2421 = vmatmul.bf16.gmra.mxu0 %v7493_v40  ;;  %v8875_v40 = vld [vmem:[#allocation7 + $0x1b8] sm:$0xff]  ;;  %3917 = vmatpush.bf16.msra.mxu3 %v8880_v2 }
 0x1dd   : > { %3855 = vmatpush.bf16.msrb.mxu2 %v8875_v40  ;;  %v7705_v40 = vor.u32 %v9998_v11, %v10000_v17  ;;  %v8879_v2 = vld [vmem:[#allocation7 + $0x1d8] sm:$0xff]  ;;  %v7717_v17 = vor.u32 %v10058_v58, %v10066_v30  ;;  %v8878_v30 = vld [vmem:[#allocation7 + $0x1d0] sm:$0xff] }
 0x1e0   : > { %3918 = vmatpush.bf16.msra.mxu3 %v8879_v2  ;;  %v8871_v2 = vld [vmem:[#allocation7 + $0x198] sm:$0xff] }
 0x1e1   : > { %v2378_v50 = vpop.f32.mrf.mxu1 }
 0x1e2   : > { %v2379_v38 = vadd.f32 %v2378_v50, %v2319_v31  ;;  %v10371_v37 = vpop.f32.mrf.mxu3  ;;  %v7693_v50 = vor.u32 %v9945_v6, %v9950_v23 }
 0x1e4   : > { %v2438_v32 = vadd.f32 %v2437_v59, %v2379_v38  ;;  %3919 = vmatpush.bf16.msra.mxu3 %v8878_v30 }
 0x1e9   : > { %v10379_v36 = vpop.f32.mrf.mxu1 }
 0x1ea   : > { %v2795_v42 = vpop.f32.mrf.mxu3 }
 0x1eb   : > { %v10383_v33 = vadd.f32 %v2795_v42, %v2433_v16  ;;  %2902 = vmatmul.bf16.gmra.mxu1 %v7709_v3  ;;  %v2324_v43 = vpop.f32.mrf.mxu0  ;;  %v8874_v3 = vld [vmem:[#allocation7 + $0x1b0] sm:$0xff]  ;;  %v8888_v42 = vld [vmem:[#allocation7 + $0x220] sm:$0xff] }
 0x1ec   : > { %2833 = vmatmul.bf16.vlgmr.msra.gmra.mxu0 %v7681_v14  ;;  %3856 = vmatpush.bf16.msrb.mxu2 %v8874_v3  ;;  %v8872_v3 = vld [vmem:[#allocation7 + $0x1a0] sm:$0xff] }
 0x1ed   : > { %3976 = vmatpush.bf16.msrb.mxu0 %v8888_v42 }
 0x1ef   : > { %v2442_v51 = vpop.f32.mrf.mxu2 }
 0x1f2   : > { %v10385_v31 = vpop.f32.mrf.mxu3 }
 0x1f3   : > { %v10391_v16 = vpop.f32.mrf.mxu0 }
 0x1f6   : > { %v2383_v60 = vpop.f32.mrf.mxu1 }
 0x1f7   : > { %v2384_v26 = vadd.f32 %v2383_v60, %v2324_v43  ;;  %v10393_v38 = vpop.f32.mrf.mxu2  ;;  %v8873_v43 = vld [vmem:[#allocation7 + $0x1a8] sm:$0xff] }
 0x1f8   : > { %3857 = vmatpush.bf16.msrb.mxu2 %v8873_v43 }
 0x1f9   : > { %v2443_v59 = vadd.f32 %v2442_v51, %v2384_v26 }
 0x1fa   : > { %v2800_v14 = vpop.f32.mrf.mxu3 }
 0x1fb   : > { %v10395_v12 = vadd.f32 %v2800_v14, %v2438_v32  ;;  %2907 = vmatmul.bf16.gmra.mxu1 %v7721_v47  ;;  %v7733_v32 = vor.u32 %v10078_v15, %v10076_v4  ;;  %v8887_v14 = vld [vmem:[#allocation7 + $0x218] sm:$0xff] }
 0x1fc   : > { %2838 = vmatmul.bf16.gmra.mxu0 %v7693_v50  ;;  %3858 = vmatpush.bf16.msrb.mxu2 %v8872_v3  ;;  %v8870_v3 = vld [vmem:[#allocation7 + $0x190] sm:$0xff] }
 0x1fd   : > { %3977 = vmatpush.bf16.msrb.mxu0 %v8887_v14 }
 0x200   : > { %3859 = vmatpush.bf16.msrb.mxu2 %v8871_v2  ;;  %v8838_v2 = vld [vmem:[#allocation3 + $0x4] sm:$0xf] }
 0x202   : > { %v10397_v6 = vpop.f32.mrf.mxu3 }
 0x204   : > { %3860 = vmatpush.bf16.msrb.mxu2 %v8870_v3 }
 0x207   : > { %v2329_v23 = vpop.f32.mrf.mxu0 }
 0x208   : > { %v2389_v5 = vadd.f32 %v10203_v57, %v2329_v23  ;;  %v2447_v25 = vpop.f32.mrf.mxu2 }
 0x20a   : > { %v2448_v45 = vadd.f32 %v2447_v25, %v2389_v5  ;;  %v2805_v51 = vpop.f32.mrf.mxu3 }
 0x20b   : > { %v10406_v26 = vadd.f32 %v2805_v51, %v2443_v59  ;;  %2912 = vmatmul.bf16.gmra.mxu1 %v7733_v32  ;;  %v7745_v59 = vor.u32 %v10118_v8, %v10114_v7 }
 0x20c   : > { %2843 = vmatmul.bf16.gmra.mxu0 %v7705_v40 }
 0x20f   : > { %v10404_v60 = vpop.f32.mrf.mxu0 }
 0x210   : > { %v10408_v50 = vpop.f32.mrf.mxu2 }
 0x212   : > { %v10410_v11 = vpop.f32.mrf.mxu3 }
 0x218   : > { %v2452_v47 = vpop.f32.mrf.mxu2 }
 0x219   : > { %v2334_v57 = vpop.f32.mrf.mxu0 }
 0x21a   : > { %v2394_v4 = vadd.f32 %v10241_v19, %v2334_v57  ;;  %v7729_v19 = vor.u32 %v10096_v61, %v10102_v18  ;;  %v7741_v18 = vor.u32 %v10136_v10, %v10140_v56  ;;  %v8885_v10 = vld [vmem:[#allocation7 + $0x208] sm:$0xff] }
 0x21b   : > { %v2810_v42 = vpop.f32.mrf.mxu3  ;;  %2917 = vmatmul.bf16.gmra.mxu1 %v7745_v59  ;;  %v8869_v56 = vld [vmem:[#allocation7 + $0x188] sm:$0xff] }
 0x21c   : > { %v2453_v15 = vadd.f32 %v2452_v47, %v2394_v4  ;;  %2848 = vmatmul.bf16.gmra.mxu0 %v7717_v17  ;;  %v10417_v5 = vadd.f32 %v2810_v42, %v2448_v45  ;;  %v8886_v17 = vld [vmem:[#allocation7 + $0x210] sm:$0xff]  ;;  %v7757_v45 = vor.u32 %v10159_v63, %v10155_v29  ;;  %v8877_v29 = vld [vmem:[#allocation7 + $0x1c8] sm:$0xff]  ;;  %v7769_v63 = vor.u32 %v10201_v52, %v10195_v46 }
 0x21d   : > { %3978 = vmatpush.bf16.msrb.mxu0 %v8886_v17  ;;  %3920 = vmatpush.bf16.msra.mxu3 %v8877_v29  ;;  %v11336_v46 = vld [vmem:[#allocation35_spill] sm:$0xff] }
 0x21e   : > { %3861 = vmatpush.bf16.msrb.mxu2 %v8869_v56  ;;  %v7781_v52 = vor.u32 %v11336_v46, %v10227_v0  ;;  %v11340_v0 = vld [vmem:[#allocation38_spill] sm:$0xff]  ;;  %v11344_v46 = vld [vmem:[#allocation32_spill] sm:$0xff] }
 0x220   : > { %v2454_v40 = vpop.f32.mrf.mxu2 }
 0x221   : > { %v2336_v23 = vpop.f32.mrf.mxu0  ;;  %3979 = vmatpush.bf16.msrb.mxu0 %v8885_v10 }
 0x222   : > { %v2396_v58 = vadd.f32 %v10255_v13, %v2336_v23 }
 0x223   : > { %v10422_v43 = vpop.f32.mrf.mxu3 }
 0x224   : > { %v2455_v25 = vadd.f32 %v2454_v40, %v2396_v58  ;;  %v8876_v58 = vld [vmem:[#allocation7 + $0x1c0] sm:$0xff] }
 0x225   : > { %3921 = vmatpush.bf16.msra.mxu3 %v8876_v58  ;;  %v8841_v58 = vld [vmem:[#allocation3 + $0x1c] sm:$0xf] }
 0x228   : > { %v2457_v7 = vpop.f32.mrf.mxu2 }
 0x229   : > { %v2339_v32 = vpop.f32.mrf.mxu0 }
 0x22a   : > { %v2399_v8 = vadd.f32 %v10277_v49, %v2339_v32  ;;  %v11337_v32 = vld [vmem:[#allocation26_spill] sm:$0xff] }
 0x22b   : > { %2922 = vmatmul.bf16.gmra.mxu1 %v7757_v45 }
 0x22c   : > { %v2458_v51 = vadd.f32 %v2457_v7, %v2399_v8  ;;  %2853 = vmatmul.bf16.gmra.mxu0 %v7729_v19  ;;  %v8884_v19 = vld [vmem:[#allocation7 + $0x200] sm:$0xff] }
 0x22d   : > { %3980 = vmatpush.bf16.msrb.mxu0 %v8884_v19  ;;  %v11338_v7 = vld [vmem:[#allocation25_spill] sm:$0xff] }
 0x22e   : > { %v2815_v13 = vpop.f32.mrf.mxu3  ;;  %v7765_v8 = vor.u32 %v11338_v7, %v11337_v32  ;;  %v7916_v7 = vld [vmem:[#allocation3 + $0x24] sm:$0xf0] }
 0x22f   : > { %v10429_v61 = vadd.f32 %v2815_v13, %v2453_v15  ;;  %v7904_v13 = vld [vmem:[#allocation3 + $0xc] sm:$0xf0] }
 0x231   : > { %v10427_v57 = vpop.f32.mrf.mxu0 }
 0x236   : > { %v2817_v47 = vpop.f32.mrf.mxu3 }
 0x237   : > { %v10433_v4 = vadd.f32 %v2817_v47, %v2455_v25  ;;  %v8868_v25 = vld [vmem:[#allocation7 + $0x180] sm:$0xff]  ;;  %v11341_v47 = vld [vmem:[#allocation40_spill] sm:$0xff] }
 0x238   : > { %3862 = vmatpush.bf16.msrb.mxu2 %v8868_v25 }
 0x239   : > { %v2412_v49 = vpop.f32.mrf.mxu0 }
 0x23a   : > { %v2413_v14 = vadd.f32 %v2412_v49, %v10193_v27  ;;  %v7753_v27 = vor.u32 %v10177_v44, %v10181_v41  ;;  %v7902_v44 = vld [vmem:[#allocation3] sm:$0xf]  ;;  %v8839_v41 = vld [vmem:[#allocation3 + $0x8] sm:$0xf0]  ;;  %v7793_v49 = vor.u32 %v11341_v47, %v11340_v0  ;;  %v8845_v0 = vld [vmem:[#allocation3 + $0x38] sm:$0xf0] }
 0x23b   : > { %2927 = vmatmul.bf16.gmra.mxu1 %v7769_v63  ;;  %v7903_v45 = vor.u32 %v8839_v41, %v7902_v44  ;;  %v11342_v63 = vld [vmem:[#allocation28_spill] sm:$0xff]  ;;  %v8844_v47 = vld [vmem:[#allocation3 + $0x34] sm:$0xf] }
 0x23c   : > { %2858 = vmatmul.bf16.gmra.mxu0 %v7741_v18  ;;  %v7907_v18 = vor.u32 %v8838_v2, %v7904_v13  ;;  %v2776_v29 = vadd.f32 %v10309_v39, %v2413_v14  ;;  %v11346_v2 = vld [vmem:[#allocation31_spill] sm:$0xff] }
 0x23d   : > { %3863 = vmatmul.bf16.vlgmr.msrb.gmra.mxu2 %v7903_v45 }
 0x23e   : > { %v2820_v59 = vpop.f32.mrf.mxu3  ;;  %3922 = vmatmul.bf16.vlgmr.msra.gmra.mxu3 %v7907_v18  ;;  %v7926_v18 = vld [vmem:[#allocation3 + $0x30] sm:$0xf] }
 0x23f   : > { %v10438_v42 = vadd.f32 %v2820_v59, %v2458_v51  ;;  %v11343_v59 = vld [vmem:[#allocation27_spill] sm:$0xff] }
 0x240   : > { %v7777_v10 = vor.u32 %v11343_v59, %v11342_v63  ;;  %v7927_v59 = vor.u32 %v8845_v0, %v7926_v18  ;;  %v8843_v18 = vld [vmem:[#allocation3 + $0x28] sm:$0xf0] }
 0x241   : > { %v2414_v15 = vpop.f32.mrf.mxu0 }
 0x249   : > { %v2417_v23 = vpop.f32.mrf.mxu0 }
 0x24a   : > { %v2418_v40 = vadd.f32 %v2417_v23, %v10231_v48  ;;  %v11339_v48 = vld [vmem:[#allocation39_spill] sm:$0xff] }
 0x24b   : > { %2932 = vmatmul.bf16.gmra.mxu1 %v7781_v52  ;;  %v8842_v23 = vld [vmem:[#allocation3 + $0x20] sm:$0xf0]  ;;  %v11345_v52 = vld [vmem:[#allocation33_spill] sm:$0xff] }
 0x24c   : > { %2863 = vmatmul.bf16.gmra.mxu0 %v7753_v27  ;;  %v7914_v27 = vld [vmem:[#allocation3 + $0x18] sm:$0xf]  ;;  %v2356_v25 = vadd.f32 %v11345_v52, %v11344_v46  ;;  %v2781_v41 = vadd.f32 %v10346_v54, %v2418_v40 }
 0x24d   : > { %v7915_v32 = vor.u32 %v8842_v23, %v7914_v27  ;;  %v7910_v23 = vld [vmem:[#allocation3 + $0x8] sm:$0xf] }
 0x24f   : > { %3868 = vmatmul.bf16.gmra.mxu2 %v7915_v32  ;;  %v7938_v32 = vld [vmem:[#allocation3 + $0x48] sm:$0xf] }
 0x251   : > { %v2419_v30 = vpop.f32.mrf.mxu0 }
 0x259   : > { %v2422_v51 = vpop.f32.mrf.mxu0 }
 0x25a   : > { %v2423_v17 = vadd.f32 %v2422_v51, %v11339_v48  ;;  %v2415_v51 = vadd.f32 %v2414_v15, %v2356_v25  ;;  %v11347_v48 = vld [vmem:[#allocation30_spill] sm:$0xff] }
 0x25b   : > { %2937 = vmatmul.bf16.gmra.mxu1 %v7793_v49  ;;  %v7789_v45 = vor.u32 %v11347_v48, %v11346_v2  ;;  %v11348_v49 = vld [vmem:[#allocation36_spill] sm:$0xff]  ;;  %v7940_v2 = vld [vmem:[#allocation3 + $0x54] sm:$0xf0] }
 0x25c   : > { %2868 = vmatmul.bf16.gmra.mxu0 %v7765_v8  ;;  %v7919_v8 = vor.u32 %v8841_v58, %v7916_v7  ;;  %v2778_v39 = vadd.f32 %v10325_v24, %v2415_v51  ;;  %v8840_v58 = vld [vmem:[#allocation3 + $0x10] sm:$0xf0]  ;;  %v2786_v46 = vadd.f32 %v10354_v53, %v2423_v17 }
 0x25d   : > { %v7911_v52 = vor.u32 %v8840_v58, %v7910_v23  ;;  %v8848_v7 = vld [vmem:[#allocation3 + $0x50] sm:$0xf0]  ;;  %v7962_v58 = vld [vmem:[#allocation3 + $0x78] sm:$0xf] }
 0x25e   : > { %3927 = vmatmul.bf16.gmra.mxu3 %v7919_v8  ;;  %v8847_v8 = vld [vmem:[#allocation3 + $0x4c] sm:$0xf]  ;;  %v11350_v51 = vld [vmem:[#allocation41_spill] sm:$0xff] }
 0x25f   : > { %3873 = vmatmul.bf16.gmra.mxu2 %v7927_v59 }
 0x261   : > { %v2424_v3 = vpop.f32.mrf.mxu0 }
 0x269   : > { %v2834_v56 = vpop.f32.mrf.mxu0 }
 0x26a   : > { %v10455_v19 = vadd.f32 %v2834_v56, %v2776_v29  ;;  %v11349_v29 = vld [vmem:[#allocation37_spill] sm:$0xff] }
 0x26b   : > { %v2361_v15 = vadd.f32 %v11349_v29, %v11348_v49  ;;  %v7950_v49 = vld [vmem:[#allocation3 + $0x60] sm:$0xf]  ;;  %v8851_v29 = vld [vmem:[#allocation3 + $0x68] sm:$0xf0] }
 0x26c   : > { %2873 = vmatmul.bf16.gmra.mxu0 %v7777_v10  ;;  %v7928_v10 = vld [vmem:[#allocation3 + $0x3c] sm:$0xf0] }
 0x26d   : > { %v7931_v24 = vor.u32 %v8844_v47, %v7928_v10  ;;  %v2420_v56 = vadd.f32 %v2419_v30, %v2361_v15  ;;  %v8850_v15 = vld [vmem:[#allocation3 + $0x64] sm:$0xf]  ;;  %v7951_v10 = vor.u32 %v8851_v29, %v7950_v49 }
 0x26f   : > { %3932 = vmatmul.bf16.gmra.mxu3 %v7931_v24  ;;  %v2783_v54 = vadd.f32 %v10352_v62, %v2420_v56  ;;  %v7943_v62 = vor.u32 %v8847_v8, %v7940_v2  ;;  %v7934_v56 = vld [vmem:[#allocation3 + $0x38] sm:$0xf]  ;;  %v7974_v2 = vld [vmem:[#allocation3 + $0x90] sm:$0xf] }
 0x271   : > { %v2836_v14 = vpop.f32.mrf.mxu0 }
 0x272   : > { %v10458_v44 = vadd.f32 %v2836_v14, %v2778_v39  ;;  %v11351_v39 = vld [vmem:[#allocation42_spill] sm:$0xff] }
 0x273   : > { %v2366_v30 = vadd.f32 %v11351_v39, %v11350_v51  ;;  %v7946_v51 = vld [vmem:[#allocation3 + $0x50] sm:$0xf]  ;;  %v8849_v39 = vld [vmem:[#allocation3 + $0x58] sm:$0xf0] }
 0x275   : > { %v2425_v48 = vadd.f32 %v2424_v3, %v2366_v30  ;;  %v7952_v3 = vld [vmem:[#allocation3 + $0x6c] sm:$0xf0]  ;;  %v7947_v30 = vor.u32 %v8849_v39, %v7946_v51  ;;  %v2459_v51 = vpop.f32.mrf.mxu2 }
 0x276   : > { %v7955_v24 = vor.u32 %v8850_v15, %v7952_v3  ;;  %v7958_v15 = vld [vmem:[#allocation3 + $0x68] sm:$0xf]  ;;  %v2385_v3 = vpop.f32.mrf.mxu1 }
 0x279   : > { %v2839_v13 = vpop.f32.mrf.mxu0 }
 0x27a   : > { %v10465_v63 = vadd.f32 %v2839_v13, %v2781_v41  ;;  %v7939_v41 = vor.u32 %v8848_v7, %v7938_v32  ;;  %v7922_v13 = vld [vmem:[#allocation3 + $0x20] sm:$0xf]  ;;  %v7964_v32 = vld [vmem:[#allocation3 + $0x84] sm:$0xf0] }
 0x27b   : > { %v7923_v0 = vor.u32 %v8843_v18, %v7922_v13  ;;  %v7976_v13 = vld [vmem:[#allocation3 + $0x9c] sm:$0xf0] }
 0x27c   : > { %2878 = vmatmul.bf16.gmra.mxu0 %v7789_v45  ;;  %3878 = vmatmul.bf16.gmra.mxu2 %v7939_v41  ;;  %v2788_v45 = vadd.f32 %v10360_v22, %v2425_v48  ;;  %v8856_v48 = vld [vmem:[#allocation3 + $0x94] sm:$0xf] }
 0x27d   : > { %v7979_v18 = vor.u32 %v8856_v48, %v7976_v13 }
 0x27f   : > { %3937 = vmatmul.bf16.gmra.mxu3 %v7943_v62  ;;  %v8857_v62 = vld [vmem:[#allocation3 + $0x98] sm:$0xf0] }
 0x281   : > { %v2841_v40 = vpop.f32.mrf.mxu0 }
 0x282   : > { %v10468_v27 = vadd.f32 %v2841_v40, %v2783_v54  ;;  %v8846_v54 = vld [vmem:[#allocation3 + $0x40] sm:$0xf0] }
 0x283   : > { %v7935_v40 = vor.u32 %v8846_v54, %v7934_v56  ;;  %v8859_v56 = vld [vmem:[#allocation3 + $0xac] sm:$0xf]  ;;  %v2386_v54 = vadd.f32 %v2385_v3, %v10391_v16  ;;  %v2822_v16 = vpop.f32.mrf.mxu3  ;;  %v8858_v3 = vld [vmem:[#allocation3 + $0xa0] sm:$0xf0] }
 0x289   : > { %v2844_v25 = vpop.f32.mrf.mxu0 }
 0x28a   : > { %v10473_v14 = vadd.f32 %v2844_v25, %v2786_v46  ;;  %v8854_v46 = vld [vmem:[#allocation3 + $0x80] sm:$0xf0] }
 0x28c   : > { %3981 = vmatmul.bf16.vlgmr.msrb.gmra.mxu0 %v7911_v52  ;;  %3883 = vmatmul.bf16.gmra.mxu2 %v7951_v10  ;;  %v8853_v52 = vld [vmem:[#allocation3 + $0x7c] sm:$0xf]  ;;  %v8852_v10 = vld [vmem:[#allocation3 + $0x70] sm:$0xf0] }
 0x28d   : > { %v7967_v7 = vor.u32 %v8853_v52, %v7964_v32  ;;  %v7970_v32 = vld [vmem:[#allocation3 + $0x80] sm:$0xf] }
 0x28f   : > { %3942 = vmatmul.bf16.gmra.mxu3 %v7955_v24  ;;  %v8860_v24 = vld [vmem:[#allocation3 + $0xb0] sm:$0xf0] }
 0x291   : > { %v2846_v53 = vpop.f32.mrf.mxu0 }
 0x292   : > { %v10476_v17 = vadd.f32 %v2846_v53, %v2788_v45  ;;  %v2381_v45 = vadd.f32 %v10379_v36, %v10375_v9  ;;  %v7975_v53 = vor.u32 %v8857_v62, %v7974_v2  ;;  %v7959_v9 = vor.u32 %v8852_v10, %v7958_v15  ;;  %v8862_v2 = vld [vmem:[#allocation3 + $0xc4] sm:$0xf]  ;;  %v11352_v62 = vld [vmem:[#allocation34_spill] sm:$0xff] }
 0x293   : > { %v2391_v48 = vadd.f32 %v11352_v62, %v10404_v60  ;;  %v7982_v60 = vld [vmem:[#allocation3 + $0x98] sm:$0xf] }
 0x295   : > { %v2450_v13 = vadd.f32 %v10408_v50, %v2391_v48 }
 0x299   : > { %v2849_v47 = vpop.f32.mrf.mxu0 }
 0x29a   : > { %v10479_v59 = vadd.f32 %v2849_v47, %v10369_v20  ;;  %v7963_v20 = vor.u32 %v8854_v46, %v7962_v58 }
 0x29c   : > { %3986 = vmatmul.bf16.gmra.mxu0 %v7923_v0  ;;  %3888 = vmatmul.bf16.gmra.mxu2 %v7963_v20  ;;  %v2440_v0 = vadd.f32 %v10377_v21, %v2381_v45  ;;  %v7988_v21 = vld [vmem:[#allocation3 + $0xb4] sm:$0xf0] }
 0x29d   : > { %v7991_v58 = vor.u32 %v8859_v56, %v7988_v21  ;;  %v8866_v56 = vld [vmem:[#allocation3 + $0xe0] sm:$0xf0] }
 0x29e   : > { %v2803_v47 = vadd.f32 %v10397_v6, %v2440_v0  ;;  %v2445_v6 = vadd.f32 %v10393_v38, %v2386_v54  ;;  %v2813_v0 = vadd.f32 %v10422_v43, %v2450_v13  ;;  %v8865_v54 = vld [vmem:[#allocation3 + $0xdc] sm:$0xf]  ;;  %v8012_v43 = vld [vmem:[#allocation3 + $0xe4] sm:$0xf0] }
 0x29f   : > { %3947 = vmatmul.bf16.gmra.mxu3 %v7967_v7  ;;  %v8855_v7 = vld [vmem:[#allocation3 + $0x88] sm:$0xf0] }
 0x2a0   : > { %v2808_v46 = vadd.f32 %v10410_v11, %v2445_v6  ;;  %v7971_v39 = vor.u32 %v8855_v7, %v7970_v32  ;;  %v8000_v11 = vld [vmem:[#allocation3 + $0xcc] sm:$0xf0] }
 0x2a1   : > { %v10481_v22 = vpop.f32.mrf.mxu0 }
 0x2a9   : > { %v2854_v23 = vpop.f32.mrf.mxu0 }
 0x2aa   : > { %v10484_v25 = vadd.f32 %v2854_v23, %v10383_v33 }
 0x2ac   : > { %3991 = vmatmul.bf16.gmra.mxu0 %v7935_v40  ;;  %3893 = vmatmul.bf16.gmra.mxu2 %v7975_v53  ;;  %v8003_v53 = vor.u32 %v8862_v2, %v8000_v11 }
 0x2af   : > { %3952 = vmatmul.bf16.gmra.mxu3 %v7979_v18 }
 0x2b1   : > { %v10486_v8 = vpop.f32.mrf.mxu0 }
 0x2b9   : > { %v2859_v41 = vpop.f32.mrf.mxu0 }
 0x2ba   : > { %v10491_v33 = vadd.f32 %v2859_v41, %v10395_v12  ;;  %v7986_v12 = vld [vmem:[#allocation3 + $0xa8] sm:$0xf]  ;;  %v8863_v41 = vld [vmem:[#allocation3 + $0xc8] sm:$0xf0] }
 0x2bb   : > { %v7987_v23 = vor.u32 %v8860_v24, %v7986_v12  ;;  %v8010_v24 = vld [vmem:[#allocation3 + $0xd8] sm:$0xf] }
 0x2bc   : > { %3996 = vmatmul.bf16.gmra.mxu0 %v7947_v30  ;;  %v7998_v30 = vld [vmem:[#allocation3 + $0xc0] sm:$0xf]  ;;  %v8011_v21 = vor.u32 %v8866_v56, %v8010_v24 }
 0x2bd   : > { %3898 = vmatmul.bf16.gmra.mxu2 %v7987_v23  ;;  %v7999_v38 = vor.u32 %v8863_v41, %v7998_v30 }
 0x2bf   : > { %3957 = vmatmul.bf16.gmra.mxu3 %v7991_v58  ;;  %v8015_v58 = vor.u32 %v8865_v54, %v8012_v43 }
 0x2c0   : > { %v3864_v18 = vpop.f32.mrf.mxu2 }
 0x2c1   : > { %v2861_v49 = vpop.f32.mrf.mxu0 }
 0x2c2   : > { %v10495_v29 = vadd.f32 %v2861_v49, %v2803_v47  ;;  %v2893_v47 = vpop.f32.mrf.mxu1  ;;  %v3923_v49 = vpop.f32.mrf.mxu3 }
 0x2c3   : > { %v2894_v56 = vadd.f32 %v2893_v47, %v10455_v19 }
 0x2c9   : > { %v2864_v36 = vpop.f32.mrf.mxu0 }
 0x2ca   : > { %v10499_v40 = vadd.f32 %v2864_v36, %v10406_v26  ;;  %v3925_v36 = vpop.f32.mrf.mxu3  ;;  %v2895_v23 = vpop.f32.mrf.mxu1 }
 0x2cc   : > { %4001 = vmatmul.bf16.gmra.mxu0 %v7959_v9  ;;  %v3866_v9 = vpop.f32.mrf.mxu2 }
 0x2cd   : > { %3903 = vmatmul.bf16.gmra.mxu2 %v7999_v38 }
 0x2cf   : > { %3962 = vmatmul.bf16.gmra.mxu3 %v8003_v53 }
 0x2d1   : > { %v2866_v52 = vpop.f32.mrf.mxu0 }
 0x2d2   : > { %v10503_v20 = vadd.f32 %v2866_v52, %v2808_v46  ;;  %v2898_v7 = vpop.f32.mrf.mxu1 }
 0x2d4   : > { %v3869_v52 = vpop.f32.mrf.mxu2 }
 0x2d9   : > { %v2869_v26 = vpop.f32.mrf.mxu0 }
 0x2da   : > { %v10508_v45 = vadd.f32 %v2869_v26, %v10417_v5  ;;  %v7983_v5 = vor.u32 %v8858_v3, %v7982_v60  ;;  %v8861_v26 = vld [vmem:[#allocation3 + $0xb8] sm:$0xf0]  ;;  %v2900_v53 = vpop.f32.mrf.mxu1  ;;  %v8864_v60 = vld [vmem:[#allocation3 + $0xd0] sm:$0xf0]  ;;  %v3924_v3 = vadd.f32 %v3923_v49, %v3864_v18  ;;  %v3926_v49 = vadd.f32 %v3925_v36, %v3866_v9  ;;  %v4315_v36 = vld [vmem:[#allocation2] sm:$0xf] }
 0x2dc   : > { %4006 = vmatmul.bf16.gmra.mxu0 %v7971_v39  ;;  %v7994_v39 = vld [vmem:[#allocation3 + $0xb0] sm:$0xf]  ;;  %v3871_v48 = vpop.f32.mrf.mxu2 }
 0x2dd   : > { %3908 = vmatmul.bf16.gmra.mxu2 %v8011_v21  ;;  %v7995_v30 = vor.u32 %v8861_v26, %v7994_v39  ;;  %v2896_v39 = vadd.f32 %v2895_v23, %v10458_v44  ;;  %v2899_v44 = vadd.f32 %v2898_v7, %v10465_v63  ;;  %v4319_v63 = vld [vmem:[#allocation2 + $0x8] sm:$0x1] }
 0x2df   : > { %3967 = vmatmul.bf16.gmra.mxu3 %v8015_v58 }
 0x2e1   : > { %v2871_v15 = vpop.f32.mrf.mxu0  ;;  %v3928_v32 = vpop.f32.mrf.mxu3 }
 0x2e2   : > { %v10512_v10 = vadd.f32 %v2871_v15, %v2813_v0  ;;  %v8006_v15 = vld [vmem:[#allocation3 + $0xc8] sm:$0xf] }
 0x2e9   : > { %v2874_v12 = vpop.f32.mrf.mxu0  ;;  %v3930_v38 = vpop.f32.mrf.mxu3 }
 0x2ea   : > { %v10515_v50 = vadd.f32 %v2874_v12, %v10429_v61  ;;  %v11353_v61 = vld [vmem:[#allocation43_spill] sm:$0xff]  ;;  %v3931_v7 = vadd.f32 %v3930_v38, %v3871_v48 }
 0x2eb   : > { %v2401_v2 = vadd.f32 %v11353_v61, %v10427_v57  ;;  %v10531_v57 = vpop.f32.mrf.mxu1  ;;  %v8018_v61 = vld [vmem:[#allocation3 + $0xe0] sm:$0xf] }
 0x2ec   : > { %4011 = vmatmul.bf16.gmra.mxu0 %v7983_v5  ;;  %v10527_v5 = vpop.f32.mrf.mxu2 }
 0x2ed   : > { %v2460_v11 = vadd.f32 %v2459_v51, %v2401_v2  ;;  %v10537_v51 = vld [vmem:[%s11256_s2] ss:$0 sm:$0xff]  ;;  %v8867_v2 = vld [vmem:[#allocation3 + $0xe8] sm:$0xf0] }
 0x2f1   : > { %v2876_v6 = vpop.f32.mrf.mxu0 }
 0x2f2   : > { %v10518_v46 = vadd.f32 %v2876_v6, %v10433_v4  ;;  %v2823_v4 = vadd.f32 %v2822_v16, %v2460_v11  ;;  %v10529_v12 = vpop.f32.mrf.mxu3 }
 0x2f3   : > { %v10545_v19 = vpop.f32.mrf.mxu1 }
 0x2f4   : > { %v10540_v43 = vpop.f32.mrf.mxu2 }
 0x2f9   : > { %v2879_v41 = vpop.f32.mrf.mxu0 }
 0x2fa   : > { %v10523_v62 = vadd.f32 %v2879_v41, %v10438_v42  ;;  %v8007_v42 = vor.u32 %v8864_v60, %v8006_v15  ;;  %v10542_v58 = vpop.f32.mrf.mxu3 }
 0x2fc   : > { %4016 = vmatmul.bf16.gmra.mxu0 %v7995_v30 }
 0x301   : > { %v2881_v13 = vpop.f32.mrf.mxu0 }
 0x302   : > { %v10525_v0 = vadd.f32 %v2881_v13, %v2823_v4  ;;  %v3929_v13 = vadd.f32 %v3928_v32, %v3869_v52  ;;  %v10555_v52 = vpop.f32.mrf.mxu1 }
 0x309   : > { %v3982_v24 = vpop.f32.mrf.mxu0 }
 0x30a   : > { %v3983_v54 = vadd.f32 %v3982_v24, %v3924_v3  ;;  %v8019_v3 = vor.u32 %v8867_v2, %v8018_v61  ;;  %v2901_v61 = vadd.f32 %v2900_v53, %v10468_v27 }
 0x30c   : > { %v4032_v16 = vadd.f32 %v3983_v54, %v2894_v56  ;;  %4021 = vmatmul.bf16.gmra.mxu0 %v8007_v42 }
 0x30e   : > { %v4055_v18 = vadd.f32 %v10537_v51, %v4032_v16  ;;  %v10551_v16 = vpop.f32.mrf.mxu2 }
 0x310   : > { %v4075_v21 = vmax.f32 %v4055_v18, 0.0  ;;  %v10553_v18 = vpop.f32.mrf.mxu3 }
 0x311   : > { %v3984_v6 = vpop.f32.mrf.mxu0 }
 0x312   : > { %v4095_v47 = vpack.c.bf16 %v4075_v21, %v4075_v21  ;;  %v3985_v26 = vadd.f32 %v3984_v6, %v3926_v49 }
 0x314   : > { %v4116_v30 = vshrl.u32 %v4095_v47, 16  ;;  %v4033_v41 = vadd.f32 %v3985_v26, %v2896_v39  ;;  %v4119_v4 = vshll.u32 %v4095_v47, 16 }
 0x316   : > { %v4118_v11 = vrot.slane %v4116_v30, 7  ;;  %v4056_v9 = vadd.f32 %v10537_v51, %v4033_v41  ;;  %v10563_v48 = vpop.f32.mrf.mxu2 }
 0x318   : > { %v4121_v15 = vor.u32 %v4119_v4, %v4118_v11  ;;  %v4076_v60 = vmax.f32 %v4056_v9, 0.0  ;;  %v4122_v47 = vrot.slane %v4118_v11, 4  ;;  %v10565_v38 = vpop.f32.mrf.mxu3  ;;  %v10567_v11 = vpop.f32.mrf.mxu1 }
 0x319   : > { %v3987_v42 = vpop.f32.mrf.mxu0 }
 0x31a   : > { %v4316_v24 = vsel %vm9756_vm7, %v4121_v15, %v4315_v36  ;;  %v4096_v56 = vpack.c.bf16 %v4076_v60, %v4076_v60  ;;  %v3988_v54 = vadd.f32 %v3987_v42, %v3929_v13 }
 0x31b   : > { %4317 = vst [vmem:[#allocation2] sm:$0xf] %v4316_v24 }
 0x31c   : > { %v4124_v32 = vshrl.u32 %v4096_v56, 16  ;;  %v4034_v49 = vadd.f32 %v3988_v54, %v2899_v44  ;;  %4026 = vmatmul.bf16.gmra.mxu0 %v8019_v3  ;;  %v4127_v6 = vshll.u32 %v4096_v56, 16  ;;  %v3934_v44 = vadd.f32 %v10529_v12, %v10527_v5  ;;  %v4322_v56 = vld [vmem:[#allocation2 + $0xc] sm:$0xf] }
 0x31e   : > { %v4126_v21 = vrot.slane %v4124_v32, 7  ;;  %v4057_v39 = vadd.f32 %v10537_v51, %v4034_v49  ;;  %v10577_v12 = vpop.f32.mrf.mxu2 }
 0x320   : > { %v4129_v26 = vor.u32 %v4127_v6, %v4126_v21  ;;  %v4131_v30 = vrot.slane %v4126_v21, 4  ;;  %v4077_v41 = vmax.f32 %v4057_v39, 0.0  ;;  %v2904_v21 = vadd.f32 %v10531_v57, %v10473_v14  ;;  %v10583_v57 = vpop.f32.mrf.mxu1 }
 0x321   : > { %v3989_v2 = vpop.f32.mrf.mxu0  ;;  %v3936_v14 = vadd.f32 %v10542_v58, %v10540_v43 }
 0x322   : > { %v4130_v13 = vsel %vm9763_vm8, %v4122_v47, %v4129_v26  ;;  %v4320_v36 = vsel %vm9689_vm2, %v4131_v30, %v4319_v63  ;;  %v4097_v15 = vpack.c.bf16 %v4077_v41, %v4077_v41  ;;  %v3990_v60 = vadd.f32 %v3989_v2, %v3931_v7  ;;  %v10579_v41 = vpop.f32.mrf.mxu3 }
 0x323   : > { %4318 = vst [vmem:[#allocation2 + $0x4] sm:$0xf] %v4130_v13 }
 0x324   : > { %4321 = vst [vmem:[#allocation2 + $0x8] sm:$0x1] %v4320_v36  ;;  %v4133_v3 = vshrl.u32 %v4097_v15, 16  ;;  %v4035_v42 = vadd.f32 %v3990_v60, %v2901_v61  ;;  %v4136_v53 = vshll.u32 %v4097_v15, 16  ;;  %v4326_v61 = vld [vmem:[#allocation2 + $0x14] sm:$0x1]  ;;  %v2906_v60 = vadd.f32 %v10545_v19, %v10476_v17 }
 0x325   : > { %v3939_v17 = vadd.f32 %v10553_v18, %v10551_v16 }
 0x326   : > { %v4135_v27 = vrot.slane %v4133_v3, 7  ;;  %v4058_v24 = vadd.f32 %v10537_v51, %v4035_v42 }
 0x328   : > { %v4138_v54 = vor.u32 %v4136_v53, %v4135_v27  ;;  %v4078_v32 = vmax.f32 %v4058_v24, 0.0  ;;  %v4139_v2 = vrot.slane %v4135_v27, 4  ;;  %v2371_v27 = vadd.f32 %v10342_v28, %v10334_v35 }
 0x329   : > { %v3992_v49 = vpop.f32.mrf.mxu0 }
 0x32a   : > { %v4323_v6 = vsel %vm9756_vm7, %v4138_v54, %v4322_v56  ;;  %v4098_v39 = vpack.c.bf16 %v4078_v32, %v4078_v32  ;;  %v3993_v63 = vadd.f32 %v3992_v49, %v3934_v44  ;;  %v4329_v32 = vld [vmem:[#allocation2 + $0x18] sm:$0xf] }
 0x32b   : > { %4324 = vst [vmem:[#allocation2 + $0xc] sm:$0xf] %v4323_v6  ;;  %v3886_v6 = vpop.f32.mrf.mxu2 }
 0x32c   : > { %v4141_v7 = vshrl.u32 %v4098_v39, 16  ;;  %v4036_v47 = vadd.f32 %v3993_v63, %v2904_v21  ;;  %v4144_v30 = vshll.u32 %v4098_v39, 16  ;;  %v3945_v39 = vpop.f32.mrf.mxu3  ;;  %v11357_v63 = vld [vmem:[#allocation44_spill] sm:$0xff] }
 0x32e   : > { %v4143_v26 = vrot.slane %v4141_v7, 7  ;;  %v4059_v5 = vadd.f32 %v10537_v51, %v4036_v47  ;;  %v2430_v7 = vadd.f32 %v11357_v63, %v2371_v27 }
 0x330   : > { %v4146_v13 = vor.u32 %v4144_v30, %v4143_v26  ;;  %v4148_v36 = vrot.slane %v4143_v26, 4  ;;  %v4079_v15 = vmax.f32 %v4059_v5, 0.0  ;;  %v2909_v26 = vadd.f32 %v10555_v52, %v10479_v59  ;;  %v2915_v30 = vpop.f32.mrf.mxu1 }
 0x331   : > { %v3994_v3 = vpop.f32.mrf.mxu0  ;;  %v2793_v16 = vadd.f32 %v10371_v37, %v2430_v7  ;;  %v3941_v59 = vadd.f32 %v10565_v38, %v10563_v48 }
 0x332   : > { %v4147_v42 = vsel %vm9763_vm8, %v4139_v2, %v4146_v13  ;;  %v4327_v53 = vsel %vm9689_vm2, %v4148_v36, %v4326_v61  ;;  %v4099_v44 = vpack.c.bf16 %v4079_v15, %v4079_v15  ;;  %v3995_v24 = vadd.f32 %v3994_v3, %v3936_v14  ;;  %v4333_v15 = vld [vmem:[#allocation2 + $0x20] sm:$0x1] }
 0x333   : > { %4325 = vst [vmem:[#allocation2 + $0x10] sm:$0xf] %v4147_v42  ;;  %v2852_v14 = vadd.f32 %v10481_v22, %v2793_v16 }
 0x334   : > { %4328 = vst [vmem:[#allocation2 + $0x14] sm:$0x1] %v4327_v53  ;;  %v4150_v43 = vshrl.u32 %v4099_v44, 16  ;;  %v4037_v58 = vadd.f32 %v3995_v24, %v2906_v60  ;;  %v4153_v54 = vshll.u32 %v4099_v44, 16  ;;  %v3948_v27 = vpop.f32.mrf.mxu3 }
 0x335   : > { %v2911_v53 = vadd.f32 %v10567_v11, %v2852_v14 }
 0x336   : > { %v4152_v56 = vrot.slane %v4150_v43, 7  ;;  %v4060_v19 = vadd.f32 %v10537_v51, %v4037_v58  ;;  %v3889_v58 = vpop.f32.mrf.mxu2 }
 0x338   : > { %v4155_v49 = vor.u32 %v4153_v54, %v4152_v56  ;;  %v4080_v21 = vmax.f32 %v4060_v19, 0.0  ;;  %v4156_v52 = vrot.slane %v4152_v56, 4  ;;  %v2918_v54 = vpop.f32.mrf.mxu1  ;;  %v2376_v56 = vadd.f32 %v10362_v1, %v10358_v34 }
 0x339   : > { %v3997_v47 = vpop.f32.mrf.mxu0  ;;  %v3944_v19 = vadd.f32 %v10579_v41, %v10577_v12 }
 0x33a   : > { %v4330_v35 = vsel %vm9756_vm7, %v4155_v49, %v4329_v32  ;;  %v4100_v28 = vpack.c.bf16 %v4080_v21, %v4080_v21  ;;  %v3998_v5 = vadd.f32 %v3997_v47, %v3939_v17  ;;  %v4336_v49 = vld [vmem:[#allocation2 + $0x24] sm:$0xf]  ;;  %v2435_v7 = vadd.f32 %v10364_v55, %v2376_v56 }
 0x33b   : > { %4331 = vst [vmem:[#allocation2 + $0x18] sm:$0xf] %v4330_v35 }
 0x33c   : > { %v4158_v18 = vshrl.u32 %v4100_v28, 16  ;;  %v4038_v61 = vadd.f32 %v3998_v5, %v2909_v26  ;;  %v4161_v13 = vshll.u32 %v4100_v28, 16  ;;  %v2914_v26 = vadd.f32 %v10583_v57, %v10484_v25  ;;  %v3950_v16 = vpop.f32.mrf.mxu3  ;;  %v4340_v25 = vld [vmem:[#allocation2 + $0x2c] sm:$0x1] }
 0x33d   : > { %v2798_v28 = vadd.f32 %v10385_v31, %v2435_v7  ;;  %v3946_v57 = vadd.f32 %v3945_v39, %v3886_v6  ;;  %v3949_v39 = vadd.f32 %v3948_v27, %v3889_v58 }
 0x33e   : > { %v4160_v2 = vrot.slane %v4158_v18, 7  ;;  %v4061_v36 = vadd.f32 %v10537_v51, %v4038_v61  ;;  %v3891_v5 = vpop.f32.mrf.mxu2 }
 0x33f   : > { %v2857_v18 = vadd.f32 %v10486_v8, %v2798_v28 }
 0x340   : > { %v4163_v60 = vor.u32 %v4161_v13, %v4160_v2  ;;  %v4165_v3 = vrot.slane %v4160_v2, 4  ;;  %v4081_v42 = vmax.f32 %v4061_v36, 0.0  ;;  %v2920_v61 = vpop.f32.mrf.mxu1 }
 0x341   : > { %v3999_v37 = vpop.f32.mrf.mxu0 }
 0x342   : > { %v4164_v44 = vsel %vm9763_vm8, %v4156_v52, %v4163_v60  ;;  %v4334_v22 = vsel %vm9689_vm2, %v4165_v3, %v4333_v15  ;;  %v4101_v24 = vpack.c.bf16 %v4081_v42, %v4081_v42  ;;  %v4000_v43 = vadd.f32 %v3999_v37, %v3941_v59 }
 0x343   : > { %4332 = vst [vmem:[#allocation2 + $0x1c] sm:$0xf] %v4164_v44  ;;  %v2916_v52 = vadd.f32 %v2915_v30, %v2857_v18 }
 0x344   : > { %4335 = vst [vmem:[#allocation2 + $0x20] sm:$0x1] %v4334_v22  ;;  %v4167_v48 = vshrl.u32 %v4101_v24, 16  ;;  %v4039_v38 = vadd.f32 %v4000_v43, %v2911_v53  ;;  %v4170_v17 = vshll.u32 %v4101_v24, 16  ;;  %v3953_v30 = vpop.f32.mrf.mxu3  ;;  %v4343_v43 = vld [vmem:[#allocation2 + $0x30] sm:$0xf] }
 0x346   : > { %v4169_v11 = vrot.slane %v4167_v48, 7  ;;  %v4062_v32 = vadd.f32 %v10537_v51, %v4039_v38  ;;  %v3894_v24 = vpop.f32.mrf.mxu2 }
 0x348   : > { %v4172_v21 = vor.u32 %v4170_v17, %v4169_v11  ;;  %v4082_v63 = vmax.f32 %v4062_v32, 0.0  ;;  %v4173_v13 = vrot.slane %v4169_v11, 4  ;;  %v2923_v48 = vpop.f32.mrf.mxu1  ;;  %v2919_v17 = vadd.f32 %v2918_v54, %v10491_v33 }
 0x349   : > { %v4002_v47 = vpop.f32.mrf.mxu0  ;;  %v2921_v54 = vadd.f32 %v2920_v61, %v10495_v29  ;;  %v4350_v29 = vld [vmem:[#allocation2 + $0x3c] sm:$0xf] }
 0x34a   : > { %v4337_v35 = vsel %vm9756_vm7, %v4172_v21, %v4336_v49  ;;  %v4102_v34 = vpack.c.bf16 %v4082_v63, %v4082_v63  ;;  %v4003_v1 = vadd.f32 %v4002_v47, %v3944_v19  ;;  %v4347_v47 = vld [vmem:[#allocation2 + $0x38] sm:$0x1] }
 0x34b   : > { %4338 = vst [vmem:[#allocation2 + $0x24] sm:$0xf] %v4337_v35 }
 0x34c   : > { %v4175_v12 = vshrl.u32 %v4102_v34, 16  ;;  %v4040_v41 = vadd.f32 %v4003_v1, %v2914_v26  ;;  %v4178_v14 = vshll.u32 %v4102_v34, 16  ;;  %v3951_v26 = vadd.f32 %v3950_v16, %v3891_v5  ;;  %v3955_v33 = vpop.f32.mrf.mxu3 }
 0x34e   : > { %v4177_v55 = vrot.slane %v4175_v12, 7  ;;  %v4063_v2 = vadd.f32 %v10537_v51, %v4040_v41  ;;  %v3896_v12 = vpop.f32.mrf.mxu2 }
 0x350   : > { %v4180_v36 = vor.u32 %v4178_v14, %v4177_v55  ;;  %v4182_v15 = vrot.slane %v4177_v55, 4  ;;  %v4083_v59 = vmax.f32 %v4063_v2, 0.0  ;;  %v2925_v18 = vpop.f32.mrf.mxu1 }
 0x351   : > { %v4004_v31 = vpop.f32.mrf.mxu0 }
 0x352   : > { %v4181_v60 = vsel %vm9763_vm8, %v4173_v13, %v4180_v36  ;;  %v4341_v3 = vsel %vm9689_vm2, %v4182_v15, %v4340_v25  ;;  %v4103_v8 = vpack.c.bf16 %v4083_v59, %v4083_v59  ;;  %v4005_v42 = vadd.f32 %v4004_v31, %v3946_v57 }
 0x353   : > { %4339 = vst [vmem:[#allocation2 + $0x28] sm:$0xf] %v4181_v60  ;;  %v3954_v36 = vadd.f32 %v3953_v30, %v3894_v24  ;;  %v2924_v31 = vadd.f32 %v2923_v48, %v10499_v40  ;;  %v4354_v30 = vld [vmem:[#allocation2 + $0x44] sm:$0x1] }
 0x354   : > { %4342 = vst [vmem:[#allocation2 + $0x2c] sm:$0x1] %v4341_v3  ;;  %v4184_v53 = vshrl.u32 %v4103_v8, 16  ;;  %v4041_v37 = vadd.f32 %v4005_v42, %v2916_v52  ;;  %v4187_v6 = vshll.u32 %v4103_v8, 16 }
 0x356   : > { %v4186_v44 = vrot.slane %v4184_v53, 7  ;;  %v4064_v22 = vadd.f32 %v10537_v51, %v4041_v37  ;;  %v3899_v42 = vpop.f32.mrf.mxu2  ;;  %v3958_v53 = vpop.f32.mrf.mxu3 }
 0x358   : > { %v4189_v38 = vor.u32 %v4187_v6, %v4186_v44  ;;  %v4084_v56 = vmax.f32 %v4064_v22, 0.0  ;;  %v4190_v35 = vrot.slane %v4186_v44, 4  ;;  %v2928_v37 = vpop.f32.mrf.mxu1 }
 0x359   : > { %v4007_v11 = vpop.f32.mrf.mxu0 }
 0x35a   : > { %v4344_v19 = vsel %vm9756_vm7, %v4189_v38, %v4343_v43  ;;  %v4104_v32 = vpack.c.bf16 %v4084_v56, %v4084_v56  ;;  %v4008_v49 = vadd.f32 %v4007_v11, %v3949_v39  ;;  %v3956_v43 = vadd.f32 %v3955_v33, %v3896_v12 }
 0x35b   : > { %4345 = vst [vmem:[#allocation2 + $0x30] sm:$0xf] %v4344_v19  ;;  %v2926_v11 = vadd.f32 %v2925_v18, %v10503_v20 }
 0x35c   : > { %v4192_v21 = vshrl.u32 %v4104_v32, 16  ;;  %v4042_v63 = vadd.f32 %v4008_v49, %v2919_v17  ;;  %v4195_v27 = vshll.u32 %v4104_v32, 16 }
 0x35e   : > { %v4194_v58 = vrot.slane %v4192_v21, 7  ;;  %v4065_v7 = vadd.f32 %v10537_v51, %v4042_v63 }
 0x360   : > { %v4197_v34 = vor.u32 %v4195_v27, %v4194_v58  ;;  %v4199_v1 = vrot.slane %v4194_v58, 4  ;;  %v4085_v28 = vmax.f32 %v4065_v7, 0.0  ;;  %v3901_v27 = vpop.f32.mrf.mxu2  ;;  %v3960_v7 = vpop.f32.mrf.mxu3 }
 0x361   : > { %v4009_v41 = vpop.f32.mrf.mxu0 }
 0x362   : > { %v4198_v55 = vsel %vm9763_vm8, %v4190_v35, %v4197_v34  ;;  %v4348_v14 = vsel %vm9689_vm2, %v4199_v1, %v4347_v47  ;;  %v4105_v2 = vpack.c.bf16 %v4085_v28, %v4085_v28  ;;  %v4010_v25 = vadd.f32 %v4009_v41, %v3951_v26  ;;  %v2930_v47 = vpop.f32.mrf.mxu1  ;;  %v4357_v1 = vld [vmem:[#allocation2 + $0x48] sm:$0xf] }
 0x363   : > { %4346 = vst [vmem:[#allocation2 + $0x34] sm:$0xf] %v4198_v55  ;;  %v3959_v34 = vadd.f32 %v3958_v53, %v3899_v42 }
 0x364   : > { %4349 = vst [vmem:[#allocation2 + $0x38] sm:$0x1] %v4348_v14  ;;  %v4201_v5 = vshrl.u32 %v4105_v2, 16  ;;  %v4043_v16 = vadd.f32 %v4010_v25, %v2921_v54  ;;  %v4204_v13 = vshll.u32 %v4105_v2, 16  ;;  %v2929_v54 = vadd.f32 %v2928_v37, %v10508_v45 }
 0x366   : > { %v4203_v57 = vrot.slane %v4201_v5, 7  ;;  %v4066_v15 = vadd.f32 %v10537_v51, %v4043_v16 }
 0x368   : > { %v4206_v61 = vor.u32 %v4204_v13, %v4203_v57  ;;  %v4086_v59 = vmax.f32 %v4066_v15, 0.0  ;;  %v4207_v38 = vrot.slane %v4203_v57, 4  ;;  %v3904_v57 = vpop.f32.mrf.mxu2  ;;  %v3963_v13 = vpop.f32.mrf.mxu3  ;;  %v3961_v15 = vadd.f32 %v3960_v7, %v3901_v27  ;;  %v4368_v7 = vld [vmem:[#allocation2 + $0x5c] sm:$0x1] }
 0x369   : > { %v4012_v52 = vpop.f32.mrf.mxu0 }
 0x36a   : > { %v4351_v60 = vsel %vm9756_vm7, %v4206_v61, %v4350_v29  ;;  %v4106_v3 = vpack.c.bf16 %v4086_v59, %v4086_v59  ;;  %v4013_v8 = vadd.f32 %v4012_v52, %v3954_v36  ;;  %v4361_v36 = vld [vmem:[#allocation2 + $0x50] sm:$0x1]  ;;  %v2933_v29 = vpop.f32.mrf.mxu1 }
 0x36b   : > { %4352 = vst [vmem:[#allocation2 + $0x3c] sm:$0xf] %v4351_v60 }
 0x36c   : > { %v4209_v44 = vshrl.u32 %v4106_v3, 16  ;;  %v4044_v6 = vadd.f32 %v4013_v8, %v2924_v31  ;;  %v4212_v22 = vshll.u32 %v4106_v3, 16  ;;  %v2931_v31 = vadd.f32 %v2930_v47, %v10512_v10 }
 0x36e   : > { %v4211_v39 = vrot.slane %v4209_v44, 7  ;;  %v4067_v24 = vadd.f32 %v10537_v51, %v4044_v6 }
 0x370   : > { %v4214_v56 = vor.u32 %v4212_v22, %v4211_v39  ;;  %v4216_v40 = vrot.slane %v4211_v39, 4  ;;  %v4087_v48 = vmax.f32 %v4067_v24, 0.0  ;;  %v3964_v22 = vadd.f32 %v3963_v13, %v3904_v57  ;;  %v4371_v57 = vld [vmem:[#allocation2 + $0x60] sm:$0xf] }
 0x371   : > { %v4014_v17 = vpop.f32.mrf.mxu0 }
 0x372   : > { %v4215_v19 = vsel %vm9763_vm8, %v4207_v38, %v4214_v56  ;;  %v4355_v32 = vsel %vm9689_vm2, %v4216_v40, %v4354_v30  ;;  %v4107_v49 = vpack.c.bf16 %v4087_v48, %v4087_v48  ;;  %v4015_v21 = vadd.f32 %v4014_v17, %v3956_v43  ;;  %v4364_v30 = vld [vmem:[#allocation2 + $0x54] sm:$0xf]  ;;  %v3906_v38 = vpop.f32.mrf.mxu2  ;;  %v3965_v56 = vpop.f32.mrf.mxu3 }
 0x373   : > { %4353 = vst [vmem:[#allocation2 + $0x40] sm:$0xf] %v4215_v19  ;;  %v2934_v48 = vadd.f32 %v2933_v29, %v10515_v50  ;;  %v3966_v47 = vadd.f32 %v3965_v56, %v3906_v38 }
 0x374   : > { %4356 = vst [vmem:[#allocation2 + $0x44] sm:$0x1] %v4355_v32  ;;  %v4218_v63 = vshrl.u32 %v4107_v49, 16  ;;  %v4045_v58 = vadd.f32 %v4015_v21, %v2926_v11  ;;  %v4221_v35 = vshll.u32 %v4107_v49, 16  ;;  %v2935_v11 = vpop.f32.mrf.mxu1 }
 0x375   : > { %v2936_v50 = vadd.f32 %v2935_v11, %v10518_v46 }
 0x376   : > { %v4220_v26 = vrot.slane %v4218_v63, 7  ;;  %v4068_v20 = vadd.f32 %v10537_v51, %v4045_v58 }
 0x378   : > { %v4223_v28 = vor.u32 %v4221_v35, %v4220_v26  ;;  %v4088_v12 = vmax.f32 %v4068_v20, 0.0  ;;  %v4224_v61 = vrot.slane %v4220_v26, 4 }
 0x379   : > { %v4017_v33 = vpop.f32.mrf.mxu0 }
 0x37a   : > { %v4358_v41 = vsel %vm9756_vm7, %v4223_v28, %v4357_v1  ;;  %v4108_v18 = vpack.c.bf16 %v4088_v12, %v4088_v12  ;;  %v4018_v55 = vadd.f32 %v4017_v33, %v3959_v34 }
 0x37b   : > { %4359 = vst [vmem:[#allocation2 + $0x48] sm:$0xf] %v4358_v41  ;;  %v3968_v41 = vpop.f32.mrf.mxu3 }
 0x37c   : > { %v4226_v14 = vshrl.u32 %v4108_v18, 16  ;;  %v4046_v2 = vadd.f32 %v4018_v55, %v2929_v54  ;;  %v4229_v5 = vshll.u32 %v4108_v18, 16  ;;  %v3909_v54 = vpop.f32.mrf.mxu2  ;;  %v2938_v55 = vpop.f32.mrf.mxu1 }
 0x37d   : > { %v2939_v29 = vadd.f32 %v2938_v55, %v10523_v62 }
 0x37e   : > { %v4228_v25 = vrot.slane %v4226_v14, 7  ;;  %v4069_v16 = vadd.f32 %v10537_v51, %v4046_v2 }
 0x380   : > { %v4231_v59 = vor.u32 %v4229_v5, %v4228_v25  ;;  %v4233_v45 = vrot.slane %v4228_v25, 4  ;;  %v4089_v52 = vmax.f32 %v4069_v16, 0.0  ;;  %v3969_v16 = vadd.f32 %v3968_v41, %v3909_v54 }
 0x381   : > { %v4019_v60 = vpop.f32.mrf.mxu0 }
 0x382   : > { %v4232_v3 = vsel %vm9763_vm8, %v4224_v61, %v4231_v59  ;;  %v4362_v8 = vsel %vm9689_vm2, %v4233_v45, %v4361_v36  ;;  %v4109_v42 = vpack.c.bf16 %v4089_v52, %v4089_v52  ;;  %v4020_v53 = vadd.f32 %v4019_v60, %v3961_v15 }
 0x383   : > { %4360 = vst [vmem:[#allocation2 + $0x4c] sm:$0xf] %v4232_v3  ;;  %v3970_v60 = vpop.f32.mrf.mxu3 }
 0x384   : > { %4363 = vst [vmem:[#allocation2 + $0x50] sm:$0x1] %v4362_v8  ;;  %v4235_v37 = vshrl.u32 %v4109_v42, 16  ;;  %v4047_v44 = vadd.f32 %v4020_v53, %v2931_v31  ;;  %v4238_v39 = vshll.u32 %v4109_v42, 16  ;;  %v3911_v31 = vpop.f32.mrf.mxu2  ;;  %v2940_v8 = vpop.f32.mrf.mxu1 }
 0x386   : > { %v4237_v6 = vrot.slane %v4235_v37, 7  ;;  %v4070_v24 = vadd.f32 %v10537_v51, %v4047_v44  ;;  %v4375_v44 = vld [vmem:[#allocation2 + $0x68] sm:$0x1] }
 0x388   : > { %v4240_v10 = vor.u32 %v4238_v39, %v4237_v6  ;;  %v4090_v43 = vmax.f32 %v4070_v24, 0.0  ;;  %v4241_v26 = vrot.slane %v4237_v6, 4  ;;  %v3971_v6 = vadd.f32 %v3970_v60, %v3911_v31 }
 0x389   : > { %v4022_v40 = vpop.f32.mrf.mxu0 }
 0x38a   : > { %v4365_v17 = vsel %vm9756_vm7, %v4240_v10, %v4364_v30  ;;  %v4110_v19 = vpack.c.bf16 %v4090_v43, %v4090_v43  ;;  %v4023_v32 = vadd.f32 %v4022_v40, %v3964_v22  ;;  %v2941_v30 = vadd.f32 %v2940_v8, %v10525_v0 }
 0x38b   : > { %4366 = vst [vmem:[#allocation2 + $0x54] sm:$0xf] %v4365_v17 }
 0x38c   : > { %v4243_v49 = vshrl.u32 %v4110_v19, 16  ;;  %v4048_v21 = vadd.f32 %v4023_v32, %v2934_v48  ;;  %v4246_v58 = vshll.u32 %v4110_v19, 16 }
 0x38e   : > { %v4245_v63 = vrot.slane %v4243_v49, 7  ;;  %v4071_v27 = vadd.f32 %v10537_v51, %v4048_v21  ;;  %v4378_v49 = vld [vmem:[#allocation2 + $0x6c] sm:$0xf] }
 0x390   : > { %v4248_v35 = vor.u32 %v4246_v58, %v4245_v63  ;;  %v4250_v34 = vrot.slane %v4245_v63, 4  ;;  %v4091_v20 = vmax.f32 %v4071_v27, 0.0 }
 0x391   : > { %v4024_v1 = vpop.f32.mrf.mxu0 }
 0x392   : > { %v4249_v28 = vsel %vm9763_vm8, %v4241_v26, %v4248_v35  ;;  %v4369_v12 = vsel %vm9689_vm2, %v4250_v34, %v4368_v7  ;;  %v4111_v33 = vpack.c.bf16 %v4091_v20, %v4091_v20  ;;  %v4025_v18 = vadd.f32 %v4024_v1, %v3966_v47  ;;  %v4382_v26 = vld [vmem:[#allocation2 + $0x74] sm:$0x1] }
 0x393   : > { %4367 = vst [vmem:[#allocation2 + $0x58] sm:$0xf] %v4249_v28 }
 0x394   : > { %4370 = vst [vmem:[#allocation2 + $0x5c] sm:$0x1] %v4369_v12  ;;  %v4252_v14 = vshrl.u32 %v4111_v33, 16  ;;  %v4049_v2 = vadd.f32 %v4025_v18, %v2936_v50  ;;  %v4255_v5 = vshll.u32 %v4111_v33, 16 }
 0x396   : > { %v4254_v25 = vrot.slane %v4252_v14, 7  ;;  %v4072_v46 = vadd.f32 %v10537_v51, %v4049_v2 }
 0x398   : > { %v4257_v13 = vor.u32 %v4255_v5, %v4254_v25  ;;  %v4092_v36 = vmax.f32 %v4072_v46, 0.0  ;;  %v4258_v39 = vrot.slane %v4254_v25, 4 }
 0x399   : > { %v4027_v15 = vpop.f32.mrf.mxu0 }
 0x39a   : > { %v4372_v61 = vsel %vm9756_vm7, %v4257_v13, %v4371_v57  ;;  %v4112_v59 = vpack.c.bf16 %v4092_v36, %v4092_v36  ;;  %v4028_v45 = vadd.f32 %v4027_v15, %v3969_v16 }
 0x39b   : > { %4373 = vst [vmem:[#allocation2 + $0x60] sm:$0xf] %v4372_v61 }
 0x39c   : > { %v4260_v52 = vshrl.u32 %v4112_v59, 16  ;;  %v4050_v3 = vadd.f32 %v4028_v45, %v2939_v29  ;;  %v4263_v53 = vshll.u32 %v4112_v59, 16 }
 0x39e   : > { %v4262_v42 = vrot.slane %v4260_v52, 7  ;;  %v4073_v37 = vadd.f32 %v10537_v51, %v4050_v3 }
 0x3a0   : > { %v4265_v22 = vor.u32 %v4263_v53, %v4262_v42  ;;  %v4267_v62 = vrot.slane %v4262_v42, 4  ;;  %v4093_v24 = vmax.f32 %v4073_v37, 0.0 }
 0x3a1   : > { %v4029_v10 = vpop.f32.mrf.mxu0 }
 0x3a2   : > { %v4266_v43 = vsel %vm9763_vm8, %v4258_v39, %v4265_v22  ;;  %v4376_v38 = vsel %vm9689_vm2, %v4267_v62, %v4375_v44  ;;  %v4113_v56 = vpack.c.bf16 %v4093_v24, %v4093_v24  ;;  %v4030_v40 = vadd.f32 %v4029_v10, %v3971_v6 }
 0x3a3   : > { %4374 = vst [vmem:[#allocation2 + $0x64] sm:$0xf] %v4266_v43 }
 0x3a4   : > { %4377 = vst [vmem:[#allocation2 + $0x68] sm:$0x1] %v4376_v38  ;;  %v4269_v48 = vshrl.u32 %v4113_v56, 16  ;;  %v4051_v11 = vadd.f32 %v4030_v40, %v2941_v30  ;;  %v4272_v19 = vshll.u32 %v4113_v56, 16 }
 0x3a6   : > { %v4271_v17 = vrot.slane %v4269_v48, 7  ;;  %v4074_v32 = vadd.f32 %v10537_v51, %v4051_v11 }
 0x3a8   : > { %v4274_v21 = vor.u32 %v4272_v19, %v4271_v17  ;;  %v4094_v0 = vmax.f32 %v4074_v32, 0.0  ;;  %v4275_v35 = vrot.slane %v4271_v17, 4 }
 0x3aa   : > { %v4379_v63 = vsel %vm9756_vm7, %v4274_v21, %v4378_v49  ;;  %v4114_v58 = vpack.c.bf16 %v4094_v0, %v4094_v0 }
 0x3ab   : > { %4380 = vst [vmem:[#allocation2 + $0x6c] sm:$0xf] %v4379_v63 }
 0x3ac   : > { %v4277_v27 = vshrl.u32 %v4114_v58, 16  ;;  %v4280_v47 = vshll.u32 %v4114_v58, 16 }
 0x3ae   : > { %v4279_v7 = vrot.slane %v4277_v27, 7 }
 0x3b0   : > { %v4282_v34 = vor.u32 %v4280_v47, %v4279_v7  ;;  %v4284_v20 = vrot.slane %v4279_v7, 4  ;;  %4388 = sbr.rel (%p8116_p11) target bundleno = 953 (0x3b9), region = 64 }
 0x3b2   : > { %v4283_v50 = vsel %vm9763_vm8, %v4275_v35, %v4282_v34  ;;  %v4383_v51 = vsel %vm9689_vm2, %v4284_v20, %v4382_v26 }
 0x3b3   : > { %4381 = vst [vmem:[#allocation2 + $0x70] sm:$0xf] %v4283_v50 }
 0x3b4   : > { %4384 = vst [vmem:[#allocation2 + $0x74] sm:$0x1] %v4383_v51 }
 0x3b5   : > { %v9494_v23 = vmov 0  }
 0x3b6   : > { %4389 = vst [vmem:[#allocation2] sm:$0xf] %v9494_v23 }
 0x3b7   : > { %4390 = vst [vmem:[#allocation2 + $0x4] sm:$0xf] %v9494_v23 }
 0x3b8   : > { %4391 = vst [vmem:[#allocation2 + $0x8] sm:$0x1] %v9494_v23 }
 0x3b9 PF: > { %p8117_p0 = scmp.ne.s32.totalorder %s9471_s24, 1 }
 0x3bb   : > { %4395 = sbr.rel (%p8117_p0) target bundleno = 964 (0x3c4), region = 68 }
 0x3c0   : > { %v9495_v1 = vmov 0  }
 0x3c1   : > { %4397 = vst [vmem:[#allocation2 + $0x6c] sm:$0xf] %v9495_v1 }
 0x3c2   : > { %4398 = vst [vmem:[#allocation2 + $0x70] sm:$0xf] %v9495_v1 }
 0x3c3   : > { %4399 = vst [vmem:[#allocation2 + $0x74] sm:$0x1] %v9495_v1 }
 0x3c4 PF: > { %v8971_v4 = vld [vmem:[#allocation9 + $0xf8] sm:$0xff]  ;;  %v8970_v12 = vld [vmem:[#allocation9 + $0xf0] sm:$0xff]  ;;  %v8969_v41 = vld [vmem:[#allocation9 + $0xe8] sm:$0xff]  ;;  %s11384_s15 = sld [smem:[#allocation15_spill]]  ;;  %s9036_s30 = sshll.u32 %s9471_s24, 4 }
 0x3c5   : > { %v8979_v9 = vld [vmem:[#allocation9 + $0x138] sm:$0xff]  ;;  %5697 = vmatpush.bf16.msra.mxu1 %v8971_v4  ;;  %v8978_v33 = vld [vmem:[#allocation9 + $0x130] sm:$0xff]  ;;  %v8977_v18 = vld [vmem:[#allocation9 + $0x128] sm:$0xff]  ;;  %s11385_s25 = sld [smem:[#allocation47_spill]]  ;;  %s7293_s29 = sshll.u32 %s9829_s10, 4  ;;  %s7294_s29 = int_to_ptr.vmem [resolvable:$true] %s7293_s29 }
 0x3c6   : > { %v8987_v28 = vld [vmem:[#allocation9 + $0x178] sm:$0xff]  ;;  %5746 = vmatpush.bf16.msra.mxu2 %v8979_v9  ;;  %v8986_v54 = vld [vmem:[#allocation9 + $0x170] sm:$0xff]  ;;  %v8985_v55 = vld [vmem:[#allocation9 + $0x168] sm:$0xff]  ;;  %s7278_s13 = scalar_lea.sflag [#allocation6], %s289_s18 }
 0x3c7   : > { %5795 = vmatpush.bf16.msrb.mxu3 %v8987_v28  ;;  %v4433_v14 = vld [vmem:[#allocation2] sm:$0xf]  ;;  %v4434_v2 = vld [vmem:[#allocation2 + $0x4] sm:$0xf]  ;;  %v4467_v13 = vld [vmem:[#allocation2 + $0x8] sm:$0x1] }
 0x3c8   : > { %v8968_v25 = vld [vmem:[#allocation9 + $0xe0] sm:$0xff]  ;;  %4449 = vst [vmem:[#allocation3] sm:$0xf] %v4433_v14  ;;  %v8967_v29 = vld [vmem:[#allocation9 + $0xd8] sm:$0xff]  ;;  %v4929_v59 = vld [vmem:[#allocation2 + $0xc] sm:$0xf] }
 0x3c9   : > { %5698 = vmatpush.bf16.msra.mxu1 %v8970_v12  ;;  %v8976_v5 = vld [vmem:[#allocation9 + $0x120] sm:$0xff]  ;;  %4450 = vst [vmem:[#allocation3 + $0xc] sm:$0xf] %v4434_v2  ;;  %v8975_v61 = vld [vmem:[#allocation9 + $0x118] sm:$0xff]  ;;  %v4509_v31 = vshll.u32 %v4467_v13, 16  ;;  %v8966_v40 = vld [vmem:[#allocation9 + $0xd0] sm:$0xff] }
 0x3ca   : > { %5747 = vmatpush.bf16.msra.mxu2 %v8978_v33  ;;  %v8984_v16 = vld [vmem:[#allocation9 + $0x160] sm:$0xff]  ;;  %v4961_v60 = vld [vmem:[#allocation2 + $0xc] sm:$0xf]  ;;  %v4930_v3 = vld [vmem:[#allocation2 + $0x10] sm:$0xf]  ;;  %s8721_s26 = sshll.u32 %s11384_s15, 5 }
 0x3cb   : > { %5796 = vmatpush.bf16.msrb.mxu3 %v8986_v54  ;;  %v4465_v46 = vld [vmem:[#allocation2] sm:$0xf]  ;;  %v4466_v57 = vld [vmem:[#allocation2 + $0x4] sm:$0xf]  ;;  %v4962_v53 = vld [vmem:[#allocation2 + $0x10] sm:$0xf]  ;;  %s7290_s9 = sadd.s32 %s9036_s30, %s8721_s26  ;;  %s11386_s8 = smov %s11385_s25 }
 0x3cc   : > { %v4490_v36 = vshrl.u32 %v4465_v46, 16  ;;  %v4493_v15 = vshll.u32 %v4465_v46, 16  ;;  %v4499_v45 = vshll.u32 %v4466_v57, 16  ;;  %v4503_v52 = vshrl.u32 %v4466_v57, 16  ;;  %v4963_v37 = vld [vmem:[#allocation2 + $0x14] sm:$0x1] }
 0x3cd   : > { %5699 = vmatpush.bf16.msra.mxu1 %v8969_v41  ;;  %v4511_v39 = vrot.slane %v4509_v31, 5  ;;  %v4986_v22 = vshrl.u32 %v4961_v60, 16  ;;  %v6295_v62 = vld [vmem:[#allocation2 + $0x18] sm:$0xf]  ;;  %v4989_v10 = vshll.u32 %v4961_v60, 16  ;;  %v4995_v43 = vshll.u32 %v4962_v53, 16 }
 0x3ce   : > { %5748 = vmatpush.bf16.msra.mxu2 %v8977_v18  ;;  %v4492_v8 = vrot.slane %v4490_v36, 4  ;;  %v4495_v42 = vrot.slane %v4493_v15, 5  ;;  %v4501_v44 = vrot.slane %v4499_v45, 5  ;;  %v4505_v6 = vrot.slane %v4503_v52, 4  ;;  %v8983_v24 = vld [vmem:[#allocation9 + $0x158] sm:$0xff]  ;;  %v8974_v48 = vld [vmem:[#allocation9 + $0x110] sm:$0xff] }
 0x3cf   : > { %5797 = vmatpush.bf16.msrb.mxu3 %v8985_v55  ;;  %v4999_v38 = vshrl.u32 %v4962_v53, 16  ;;  %v6296_v56 = vld [vmem:[#allocation2 + $0x1c] sm:$0xf]  ;;  %v10687_v11 = vld [vmem:[#allocation3] sm:$0xf]  ;;  %v4988_v19 = vrot.slane %v4986_v22, 4 }
 0x3d0   : > { %v4496_v30 = vor.u32 %v4495_v42, %v4492_v8  ;;  %v4506_v17 = vor.u32 %v4505_v6, %v4501_v44  ;;  %v5005_v32 = vshll.u32 %v4963_v37, 16  ;;  %v10689_v49 = vld [vmem:[#allocation2 + $0x20] sm:$0x1]  ;;  %v8982_v21 = vld [vmem:[#allocation9 + $0x150] sm:$0xff]  ;;  %v10691_v0 = vld [vmem:[#allocation3 + $0x8] sm:$0xf0] }
 0x3d1   : > { %5700 = vmatpush.bf16.msra.mxu1 %v8968_v25  ;;  %4945 = vst [vmem:[#allocation3] sm:$0xf] %v4929_v59  ;;  %v4991_v58 = vrot.slane %v4989_v10, 5  ;;  %v4997_v7 = vrot.slane %v4995_v43, 5  ;;  %v5001_v47 = vrot.slane %v4999_v38, 4  ;;  %v6320_v50 = vshrl.u32 %v6295_v62, 16 }
 0x3d2   : > { %5749 = vmatpush.bf16.msra.mxu2 %v8976_v5  ;;  %v4497_v63 = vrot.slane %v4496_v30, 4  ;;  %4946 = vst [vmem:[#allocation3 + $0xc] sm:$0xf] %v4930_v3  ;;  %v4507_v27 = vrot.slane %v4506_v17, 4  ;;  %v10693_v26 = vrot.slane %v5005_v32, 5  ;;  %v6323_v51 = vshll.u32 %v6295_v62, 16 }
 0x3d3   : > { %5798 = vmatpush.bf16.msrb.mxu3 %v8984_v16  ;;  %v4992_v20 = vor.u32 %v4991_v58, %v4988_v19  ;;  %v4713_v23 = vld [vmem:[#allocation2] sm:$0xe]  ;;  %v4714_v1 = vld [vmem:[#allocation2 + $0x4] sm:$0xf]  ;;  %v8965_v4 = vld [vmem:[#allocation9 + $0xc8] sm:$0xff]  ;;  %v5002_v12 = vor.u32 %v5001_v47, %v4997_v7  ;;  %v6329_v33 = vshll.u32 %v6296_v56, 16 }
 0x3d4   : > { %v4502_v34 = vsel %vm9871_vm11, %v4497_v63, %v4501_v44  ;;  %v8973_v9 = vld [vmem:[#allocation9 + $0x108] sm:$0xff]  ;;  %v4512_v28 = vsel %vm9871_vm11, %v4507_v27, %v4511_v39  ;;  %v6333_v54 = vshrl.u32 %v6296_v56, 16  ;;  %v6322_v55 = vrot.slane %v6320_v50, 4  ;;  %v6263_v25 = vld [vmem:[#allocation2 + $0x18] sm:$0xf]  ;;  %v8972_v59 = vld [vmem:[#allocation9 + $0x100] sm:$0xff] }
 0x3d5   : > { %5701 = vmatpush.bf16.msra.mxu1 %v8967_v29  ;;  %4697 = vst [vmem:[#allocation3 + $0x4] sm:$0xf] %v4502_v34  ;;  %v4715_v41 = vld [vmem:[#allocation2 + $0x8] sm:$0x1]  ;;  %v4993_v18 = vrot.slane %v4992_v20, 4  ;;  %v6325_v14 = vrot.slane %v6323_v51, 5 }
 0x3d6   : > { %5750 = vmatpush.bf16.msra.mxu2 %v8975_v61  ;;  %4698 = vst [vmem:[#allocation3 + $0x10] sm:$0xf] %v4512_v28  ;;  %v6339_v2 = vshll.u32 %v10689_v49, 16  ;;  %v5003_v5 = vrot.slane %v5002_v12, 4  ;;  %v10700_v16 = vrot.slane %v6329_v33, 5  ;;  %v6335_v46 = vrot.slane %v6333_v54, 4 }
 0x3d7   : > { %5799 = vmatpush.bf16.msrb.mxu3 %v8983_v24  ;;  %v8118_v57 = vrot.slane %v4713_v23, 9  ;;  %v8981_v13 = vld [vmem:[#allocation9 + $0x148] sm:$0xff]  ;;  %v6264_v36 = vld [vmem:[#allocation2 + $0x1c] sm:$0xf]  ;;  %v4763_v15 = vrot.slane %v4714_v1, 5  ;;  %v8964_v61 = vld [vmem:[#allocation9 + $0xc0] sm:$0xff]  ;;  %v6326_v52 = vor.u32 %v6325_v14, %v6322_v55  ;;  %v4998_v42 = vsel %vm9871_vm11, %v4993_v18, %v4997_v7 }
 0x3d8   : > { %v5209_v29 = vld [vmem:[#allocation2 + $0xc] sm:$0xe]  ;;  %v8136_v45 = vld [vmem:[#allocation3] sm:$0xf]  ;;  %v4766_v31 = vrot.slane %v4715_v41, 5  ;;  %v8980_v3 = vld [vmem:[#allocation9 + $0x140] sm:$0xff]  ;;  %v6336_v53 = vor.u32 %v6335_v46, %v10700_v16  ;;  %v5008_v39 = vsel %vm9871_vm11, %v5003_v5, %v10693_v26 }
 0x3d9   : > { %5702 = vmatpush.bf16.msra.mxu1 %v8966_v40  ;;  %v5210_v60 = vld [vmem:[#allocation2 + $0x10] sm:$0xf]  ;;  %v8941_v8 = vld [vmem:[#allocation3 + $0x8] sm:$0xf0]  ;;  %6279 = vst [vmem:[#allocation3] sm:$0xf] %v6263_v25  ;;  %v4764_v44 = vsel %vm10014_vm14, %v8118_v57, %v4763_v15 }
 0x3da   : > { %5751 = vmatpush.bf16.msra.mxu2 %v8974_v48  ;;  %v4765_v6 = vrot.slane %v4763_v15, 4  ;;  %6280 = vst [vmem:[#allocation3 + $0xc] sm:$0xf] %v6264_v36  ;;  %v6341_v22 = vrot.slane %v6339_v2, 5  ;;  %v8931_v62 = vld [vmem:[#allocation9 + $0x78] sm:$0xff]  ;;  %v8126_v43 = vrot.slane %v5209_v29, 9  ;;  %v8137_v19 = vor.u32 %v8941_v8, %v8136_v45 }
 0x3db   : > { %5800 = vmatpush.bf16.msrb.mxu3 %v8982_v21  ;;  %v5211_v24 = vld [vmem:[#allocation2 + $0x14] sm:$0x1]  ;;  %4833 = vst [vmem:[#allocation3 + $0x8] sm:$0xf] %v4764_v44  ;;  %v5259_v38 = vrot.slane %v5210_v60, 5  ;;  %v6327_v40 = vrot.slane %v6326_v52, 4 }
 0x3dc   : > { %v10710_v30 = vld [vmem:[#allocation3 + $0x4] sm:$0xf]  ;;  %v4767_v10 = vsel %vm10014_vm14, %v4765_v6, %v4766_v31  ;;  %v6543_v48 = vld [vmem:[#allocation2 + $0x18] sm:$0xe]  ;;  %v6337_v32 = vrot.slane %v6336_v53, 4  ;;  %v5262_v49 = vrot.slane %v5211_v24, 5 }
 0x3dd   : > { %5703 = vmatpush.bf16.msra.mxu1 %v8965_v4  ;;  %v10714_v56 = vld [vmem:[#allocation3 + $0xc] sm:$0xf0]  ;;  %5193 = vst [vmem:[#allocation3 + $0x4] sm:$0xf] %v4998_v42  ;;  %v8923_v17 = vld [vmem:[#allocation9 + $0x38] sm:$0xff]  ;;  %v5261_v27 = vrot.slane %v5259_v38, 4  ;;  %v5260_v26 = vsel %vm10014_vm14, %v8126_v43, %v5259_v38  ;;  %v6332_v34 = vsel %vm9871_vm11, %v6327_v40, %v10700_v16 }
 0x3de   : > { %5752 = vmatpush.bf16.msra.mxu2 %v8973_v9  ;;  %5194 = vst [vmem:[#allocation3 + $0x10] sm:$0xf] %v5008_v39  ;;  %v6544_v21 = vld [vmem:[#allocation2 + $0x1c] sm:$0xf]  ;;  %v10716_v63 = vld [vmem:[#allocation2 + $0x20] sm:$0x1]  ;;  %v6342_v1 = vsel %vm9871_vm11, %v6337_v32, %v6341_v22 }
 0x3df   : > { %5801 = vmatpush.bf16.msrb.mxu3 %v8981_v13  ;;  %4834 = vst [vmem:[#allocation3 + $0x14] sm:$0xf] %v4767_v10  ;;  %v4435_v58 = vld [vmem:[#allocation2 + $0xc] sm:$0xf]  ;;  %v4436_v7 = vld [vmem:[#allocation2 + $0x10] sm:$0xf]  ;;  %v5263_v54 = vsel %vm10014_vm14, %v5261_v27, %v5262_v49 }
 0x3e0   : > { %4451 = vst [vmem:[#allocation3 + $0x18] sm:$0xf] %v4435_v58  ;;  %v8930_v47 = vld [vmem:[#allocation9 + $0x70] sm:$0xff]  ;;  %v8518_v20 = vrot.slane %v6543_v48, 9  ;;  %v6593_v50 = vrot.slane %v6544_v21, 5  ;;  %v6596_v51 = vrot.slane %v10716_v63, 5 }
 0x3e1   : > { %5704 = vmatpush.bf16.msra.mxu1 %v8964_v61  ;;  %4452 = vst [vmem:[#allocation3 + $0x24] sm:$0xf] %v4436_v7  ;;  %v4468_v23 = vld [vmem:[#allocation2 + $0xc] sm:$0xf]  ;;  %v4931_v9 = vld [vmem:[#allocation2 + $0x18] sm:$0xf] }
 0x3e2   : > { %5753 = vmatpush.bf16.msra.mxu2 %v8972_v59  ;;  %v10726_v4 = vld [vmem:[#allocation3 + $0x8] sm:$0xf]  ;;  %v4469_v28 = vld [vmem:[#allocation2 + $0x10] sm:$0xf]  ;;  %v4470_v12 = vld [vmem:[#allocation2 + $0x14] sm:$0x1]  ;;  %v6594_v52 = vsel %vm10014_vm14, %v8518_v20, %v6593_v50 }
 0x3e3   : > { %5802 = vmatpush.bf16.msrb.mxu3 %v8980_v3  ;;  %5329 = vst [vmem:[#allocation3 + $0x8] sm:$0xf] %v5260_v26  ;;  %v4932_v41 = vld [vmem:[#allocation2 + $0x1c] sm:$0xf]  ;;  %v4514_v18 = vshrl.u32 %v4468_v23, 16  ;;  %v4517_v55 = vshll.u32 %v4468_v23, 16 }
 0x3e4   : > { %5705 = vmatmul.bf16.vlgmr.msra.gmra.mxu1 %v8137_v19  ;;  %v8940_v33 = vld [vmem:[#allocation3 + $0x4] sm:$0xf]  ;;  %v4523_v2 = vshll.u32 %v4469_v28, 16  ;;  %v4527_v25 = vshrl.u32 %v4469_v28, 16  ;;  %v6595_v29 = vrot.slane %v6593_v50, 4  ;;  %v4533_v45 = vshll.u32 %v4470_v12, 16 }
 0x3e5   : > { %6116 = vmatpush.bf16.msrb.mxu1 %v8923_v17  ;;  %v8138_v14 = vld [vmem:[#allocation3 + $0xc] sm:$0xf0]  ;;  %6527 = vst [vmem:[#allocation3 + $0x4] sm:$0xf] %v6332_v34  ;;  %v4516_v46 = vrot.slane %v4514_v18, 4  ;;  %v4519_v57 = vrot.slane %v4517_v55, 5 }
 0x3e6   : > { %6165 = vmatpush.bf16.msrb.mxu2 %v8931_v62  ;;  %v8141_v5 = vor.u32 %v8940_v33, %v8138_v14  ;;  %6528 = vst [vmem:[#allocation3 + $0x10] sm:$0xf] %v6342_v1  ;;  %v10730_v16 = vld [vmem:[#allocation3 + $0x10] sm:$0xf0]  ;;  %v4525_v36 = vrot.slane %v4523_v2, 5  ;;  %v4529_v15 = vrot.slane %v4527_v25, 4  ;;  %v6597_v38 = vsel %vm10014_vm14, %v6595_v29, %v6596_v51 }
 0x3e7   : > { %5330 = vst [vmem:[#allocation3 + $0x14] sm:$0xf] %v5263_v54  ;;  %v10732_v13 = vld [vmem:[#allocation3 + $0x18] sm:$0xf]  ;;  %v4520_v59 = vor.u32 %v4519_v57, %v4516_v46  ;;  %v4964_v60 = vld [vmem:[#allocation2 + $0x18] sm:$0xf] }
 0x3e8   : > { %5754 = vmatmul.bf16.vlgmr.msra.gmra.mxu2 %v8141_v5  ;;  %v10734_v61 = vld [vmem:[#allocation3 + $0x20] sm:$0xf0]  ;;  %4947 = vst [vmem:[#allocation3 + $0x18] sm:$0xf] %v4931_v9  ;;  %v4530_v31 = vor.u32 %v4529_v15, %v4525_v36  ;;  %v4965_v3 = vld [vmem:[#allocation2 + $0x1c] sm:$0xf] }
 0x3e9   : > { %4948 = vst [vmem:[#allocation3 + $0x24] sm:$0xf] %v4932_v41  ;;  %v4521_v8 = vrot.slane %v4520_v59, 4  ;;  %v4535_v42 = vrot.slane %v4533_v45, 5  ;;  %v4966_v53 = vld [vmem:[#allocation2 + $0x20] sm:$0x1]  ;;  %v8341_v37 = vor.u32 %v10734_v61, %v10732_v13 }
 0x3ea   : > { %6166 = vmatpush.bf16.msrb.mxu2 %v8930_v47  ;;  %v5010_v44 = vshrl.u32 %v4964_v60, 16  ;;  %v5013_v6 = vshll.u32 %v4964_v60, 16  ;;  %v8144_v39 = vld [vmem:[#allocation3 + $0x8] sm:$0xf]  ;;  %v6265_v22 = vld [vmem:[#allocation2 + $0x24] sm:$0xf] }
 0x3eb   : > { %v4531_v62 = vrot.slane %v4530_v31, 4  ;;  %v5019_v24 = vshll.u32 %v4965_v3, 16  ;;  %v5023_v10 = vshrl.u32 %v4965_v3, 16  ;;  %v5029_v43 = vshll.u32 %v4966_v53, 16  ;;  %6663 = vst [vmem:[#allocation3 + $0x8] sm:$0xf] %v6594_v52 }
 0x3ec   : > { %v6266_v40 = vld [vmem:[#allocation2 + $0x28] sm:$0xf]  ;;  %v4526_v48 = vsel %vm9871_vm11, %v4521_v8, %v4525_v36  ;;  %v5012_v17 = vrot.slane %v5010_v44, 4  ;;  %v5015_v19 = vrot.slane %v5013_v6, 5  ;;  %v6298_v32 = vld [vmem:[#allocation2 + $0x24] sm:$0xf] }
 0x3ed   : > { %v4536_v49 = vsel %vm9871_vm11, %v4531_v62, %v4535_v42  ;;  %4699 = vst [vmem:[#allocation3 + $0x1c] sm:$0xf] %v4526_v48  ;;  %v5021_v21 = vrot.slane %v5019_v24, 5  ;;  %v5025_v63 = vrot.slane %v5023_v10, 4  ;;  %v5031_v58 = vrot.slane %v5029_v43, 5  ;;  %v8922_v27 = vld [vmem:[#allocation9 + $0x30] sm:$0xff] }
 0x3ee   : > { %v8942_v7 = vld [vmem:[#allocation3 + $0x10] sm:$0xf0]  ;;  %4700 = vst [vmem:[#allocation3 + $0x28] sm:$0xf] %v4536_v49  ;;  %v5016_v47 = vor.u32 %v5015_v19, %v5012_v17  ;;  %v6299_v26 = vld [vmem:[#allocation2 + $0x28] sm:$0xf]  ;;  %6117 = vmatpush.bf16.msrb.mxu1 %v8922_v27 }
 0x3ef   : > { %v8145_v34 = vor.u32 %v8942_v7, %v8144_v39  ;;  %6664 = vst [vmem:[#allocation3 + $0x14] sm:$0xf] %v6597_v38  ;;  %v8148_v20 = vld [vmem:[#allocation3 + $0x18] sm:$0xf]  ;;  %v5026_v50 = vor.u32 %v5025_v63, %v5021_v21  ;;  %v6300_v51 = vld [vmem:[#allocation2 + $0x2c] sm:$0x1] }
 0x3f0   : > { %v8944_v23 = vld [vmem:[#allocation3 + $0x20] sm:$0xf0]  ;;  %6281 = vst [vmem:[#allocation3 + $0x18] sm:$0xf] %v6265_v22  ;;  %v5017_v1 = vrot.slane %v5016_v47, 4  ;;  %v6344_v9 = vshrl.u32 %v6298_v32, 16 }
 0x3f1   : > { %5803 = vmatmul.bf16.vlgmr.msrb.gmra.mxu3 %v8145_v34  ;;  %v8149_v28 = vor.u32 %v8944_v23, %v8148_v20  ;;  %6282 = vst [vmem:[#allocation3 + $0x24] sm:$0xf] %v6266_v40  ;;  %v5027_v12 = vrot.slane %v5026_v50, 4  ;;  %v6347_v33 = vshll.u32 %v6298_v32, 16  ;;  %v6353_v54 = vshll.u32 %v6299_v26, 16  ;;  %s8722_s1 = sshll.u32 %s7290_s9, 2 }
 0x3f2   : > { %v5022_v41 = vsel %vm9871_vm11, %v5017_v1, %v5021_v21  ;;  %v6346_v18 = vrot.slane %v6344_v9, 4  ;;  %v6357_v55 = vshrl.u32 %v6299_v26, 16  ;;  %v6363_v14 = vshll.u32 %v6300_v51, 16  ;;  %v4716_v2 = vld [vmem:[#allocation2 + $0xc] sm:$0xe]  ;;  %s9381_s15 = scalar_lea.hbm %s11386_s8, 256 }
 0x3f3   : > { %v5032_v25 = vsel %vm9871_vm11, %v5027_v12, %v5031_v58  ;;  %v6349_v5 = vrot.slane %v6347_v33, 5  ;;  %v6355_v46 = vrot.slane %v6353_v54, 5  ;;  %v4717_v57 = vld [vmem:[#allocation2 + $0x10] sm:$0xf]  ;;  %v4718_v36 = vld [vmem:[#allocation2 + $0x14] sm:$0x1] }
 0x3f4   : > { %5710 = vmatmul.bf16.gmra.mxu1 %v8149_v28  ;;  %v10748_v15 = vld [vmem:[#allocation3 + $0x1c] sm:$0xf]  ;;  %v6359_v29 = vrot.slane %v6357_v55, 4  ;;  %v8119_v59 = vrot.slane %v4716_v2, 9  ;;  %v4770_v45 = vrot.slane %v4717_v57, 5  ;;  %v4773_v60 = vrot.slane %v4718_v36, 5 }
 0x3f5   : > { %v10750_v52 = vld [vmem:[#allocation3 + $0x24] sm:$0xf0]  ;;  %5195 = vst [vmem:[#allocation3 + $0x1c] sm:$0xf] %v5022_v41  ;;  %v6350_v31 = vor.u32 %v6349_v5, %v6346_v18  ;;  %v6365_v6 = vrot.slane %v6363_v14, 5  ;;  %v8929_v5 = vld [vmem:[#allocation9 + $0x68] sm:$0xff] }
 0x3f6   : > { %5196 = vst [vmem:[#allocation3 + $0x28] sm:$0xf] %v5032_v25  ;;  %v6360_v3 = vor.u32 %v6359_v29, %v6355_v46  ;;  %v4771_v8 = vsel %vm10014_vm14, %v8119_v59, %v4770_v45  ;;  %v4772_v42 = vrot.slane %v4770_v45, 4  ;;  %v5212_v53 = vld [vmem:[#allocation2 + $0x18] sm:$0xe]  ;;  %6167 = vmatpush.bf16.msrb.mxu2 %v8929_v5  ;;  %v8345_v13 = vor.u32 %v10748_v15, %v10750_v52  ;;  %v9024_v52 = vld [vmem:[#allocation9 + $0x1e0] sm:$0xff] }
 0x3f7   : > { %v6351_v44 = vrot.slane %v6350_v31, 4  ;;  %4835 = vst [vmem:[#allocation3 + $0x20] sm:$0xf] %v4771_v8  ;;  %v5213_v39 = vld [vmem:[#allocation2 + $0x1c] sm:$0xf]  ;;  %v8127_v10 = vrot.slane %v5212_v53, 9 }
 0x3f8   : > { %v6361_v22 = vrot.slane %v6360_v3, 4  ;;  %v4774_v62 = vsel %vm10014_vm14, %v4772_v42, %v4773_v60  ;;  %v5214_v24 = vld [vmem:[#allocation2 + $0x20] sm:$0x1]  ;;  %v5266_v43 = vrot.slane %v5213_v39, 5  ;;  %v6546_v38 = vld [vmem:[#allocation2 + $0x24] sm:$0xe] }
 0x3f9   : > { %4836 = vst [vmem:[#allocation3 + $0x2c] sm:$0xf] %v4774_v62  ;;  %v6547_v40 = vld [vmem:[#allocation2 + $0x28] sm:$0xf]  ;;  %v6356_v48 = vsel %vm9871_vm11, %v6351_v44, %v6355_v46  ;;  %v5269_v19 = vrot.slane %v5214_v24, 5  ;;  %v8519_v26 = vrot.slane %v6546_v38, 9 }
 0x3fa   : > { %v5268_v17 = vrot.slane %v5266_v43, 4  ;;  %v6600_v32 = vrot.slane %v6547_v40, 5  ;;  %v4437_v49 = vld [vmem:[#allocation2 + $0x18] sm:$0xf]  ;;  %v6366_v21 = vsel %vm9871_vm11, %v6361_v22, %v6365_v6  ;;  %v6548_v63 = vld [vmem:[#allocation2 + $0x2c] sm:$0x1]  ;;  %v5267_v7 = vsel %vm10014_vm14, %v8127_v10, %v5266_v43 }
 0x3fb   : > { %v4438_v58 = vld [vmem:[#allocation2 + $0x1c] sm:$0xf]  ;;  %4453 = vst [vmem:[#allocation3 + $0x30] sm:$0xf] %v4437_v49  ;;  %v6603_v23 = vrot.slane %v6548_v63, 5 }
 0x3fc   : > { %v8943_v27 = vld [vmem:[#allocation3 + $0x1c] sm:$0xf]  ;;  %4454 = vst [vmem:[#allocation3 + $0x3c] sm:$0xf] %v4438_v58  ;;  %v5270_v50 = vsel %vm10014_vm14, %v5268_v17, %v5269_v19  ;;  %v6602_v51 = vrot.slane %v6600_v32, 4  ;;  %v6601_v29 = vsel %vm10014_vm14, %v8519_v26, %v6600_v32 }
 0x3fd   : > { %v8150_v47 = vld [vmem:[#allocation3 + $0x24] sm:$0xf0]  ;;  %6529 = vst [vmem:[#allocation3 + $0x1c] sm:$0xf] %v6356_v48  ;;  %v4933_v1 = vld [vmem:[#allocation2 + $0x24] sm:$0xf] }
 0x3fe   : > { %v8153_v34 = vor.u32 %v8943_v27, %v8150_v47  ;;  %6530 = vst [vmem:[#allocation3 + $0x28] sm:$0xf] %v6366_v21  ;;  %v10762_v20 = vld [vmem:[#allocation3 + $0x20] sm:$0xf]  ;;  %v4934_v9 = vld [vmem:[#allocation2 + $0x28] sm:$0xf]  ;;  %v6604_v60 = vsel %vm10014_vm14, %v6602_v51, %v6603_v23 }
 0x3ff   : > { %5331 = vst [vmem:[#allocation3 + $0x20] sm:$0xf] %v5267_v7  ;;  %v4471_v12 = vld [vmem:[#allocation2 + $0x18] sm:$0xf]  ;;  %v4472_v33 = vld [vmem:[#allocation2 + $0x1c] sm:$0xf] }
 0x400   : > { %5759 = vmatmul.bf16.gmra.mxu2 %v8153_v34  ;;  %v10766_v28 = vld [vmem:[#allocation3 + $0x28] sm:$0xf0]  ;;  %v4473_v54 = vld [vmem:[#allocation2 + $0x20] sm:$0x1]  ;;  %v4538_v41 = vshrl.u32 %v4471_v12, 16  ;;  %v4541_v18 = vshll.u32 %v4471_v12, 16 }
 0x401   : > { %5332 = vst [vmem:[#allocation3 + $0x2c] sm:$0xf] %v5270_v50  ;;  %v4547_v14 = vshll.u32 %v4472_v33, 16  ;;  %v4551_v2 = vshrl.u32 %v4472_v33, 16  ;;  %v4557_v25 = vshll.u32 %v4473_v54, 16  ;;  %v8921_v54 = vld [vmem:[#allocation9 + $0x28] sm:$0xff] }
 0x402   : > { %v10768_v55 = vld [vmem:[#allocation3 + $0x30] sm:$0xf]  ;;  %v4540_v57 = vrot.slane %v4538_v41, 4  ;;  %v4543_v36 = vrot.slane %v4541_v18, 5  ;;  %v4967_v8 = vld [vmem:[#allocation2 + $0x24] sm:$0xf]  ;;  %6118 = vmatpush.bf16.msrb.mxu1 %v8921_v54 }
 0x403   : > { %v10770_v46 = vld [vmem:[#allocation3 + $0x38] sm:$0xf0]  ;;  %4949 = vst [vmem:[#allocation3 + $0x30] sm:$0xf] %v4933_v1  ;;  %v4549_v59 = vrot.slane %v4547_v14, 5  ;;  %v4553_v45 = vrot.slane %v4551_v2, 4 }
 0x404   : > { %4950 = vst [vmem:[#allocation3 + $0x3c] sm:$0xf] %v4934_v9  ;;  %v4559_v31 = vrot.slane %v4557_v25, 5  ;;  %v4544_v3 = vor.u32 %v4543_v36, %v4540_v57  ;;  %v4968_v42 = vld [vmem:[#allocation2 + $0x28] sm:$0xf]  ;;  %v5034_v22 = vshrl.u32 %v4967_v8, 16 }
 0x405   : > { %v4969_v53 = vld [vmem:[#allocation2 + $0x2c] sm:$0x1]  ;;  %v6267_v6 = vld [vmem:[#allocation2 + $0x30] sm:$0xf]  ;;  %v4554_v39 = vor.u32 %v4553_v45, %v4549_v59  ;;  %v5037_v62 = vshll.u32 %v4967_v8, 16  ;;  %v5043_v24 = vshll.u32 %v4968_v42, 16 }
 0x406   : > { %v8156_v44 = vld [vmem:[#allocation3 + $0x20] sm:$0xf]  ;;  %v6268_v10 = vld [vmem:[#allocation2 + $0x34] sm:$0xf]  ;;  %v4545_v43 = vrot.slane %v4544_v3, 4  ;;  %v5047_v38 = vshrl.u32 %v4968_v42, 16 }
 0x407   : > { %6665 = vst [vmem:[#allocation3 + $0x20] sm:$0xf] %v6601_v29  ;;  %v4555_v48 = vrot.slane %v4554_v39, 4  ;;  %v5036_v17 = vrot.slane %v5034_v22, 4  ;;  %v5039_v19 = vrot.slane %v5037_v62, 5  ;;  %v5045_v32 = vrot.slane %v5043_v24, 5 }
 0x408   : > { %v8945_v40 = vld [vmem:[#allocation3 + $0x28] sm:$0xf0]  ;;  %v4550_v21 = vsel %vm9871_vm11, %v4545_v43, %v4549_v59  ;;  %v5049_v63 = vrot.slane %v5047_v38, 4  ;;  %v5053_v58 = vshll.u32 %v4969_v53, 16  ;;  %v6301_v27 = vld [vmem:[#allocation2 + $0x30] sm:$0xf] }
 0x409   : > { %v8157_v49 = vor.u32 %v8945_v40, %v8156_v44  ;;  %6666 = vst [vmem:[#allocation3 + $0x2c] sm:$0xf] %v6604_v60  ;;  %v4560_v47 = vsel %vm9871_vm11, %v4555_v48, %v4559_v31  ;;  %v5040_v26 = vor.u32 %v5039_v19, %v5036_v17  ;;  %v6302_v34 = vld [vmem:[#allocation2 + $0x34] sm:$0xf]  ;;  %v6303_v23 = vld [vmem:[#allocation2 + $0x38] sm:$0x1] }
 0x40a   : > { %v8160_v7 = vld [vmem:[#allocation3 + $0x30] sm:$0xf]  ;;  %4701 = vst [vmem:[#allocation3 + $0x34] sm:$0xf] %v4550_v21  ;;  %v5050_v51 = vor.u32 %v5049_v63, %v5045_v32  ;;  %v6368_v12 = vshrl.u32 %v6301_v27, 16  ;;  %v6371_v33 = vshll.u32 %v6301_v27, 16 }
 0x40b   : > { %5808 = vmatmul.bf16.gmra.mxu3 %v8157_v49  ;;  %v8947_v50 = vld [vmem:[#allocation3 + $0x38] sm:$0xf0]  ;;  %6283 = vst [vmem:[#allocation3 + $0x30] sm:$0xf] %v6267_v6  ;;  %v5041_v9 = vrot.slane %v5040_v26, 4  ;;  %v5055_v18 = vrot.slane %v5053_v58, 5 }
 0x40c   : > { %v8161_v1 = vor.u32 %v8947_v50, %v8160_v7  ;;  %6284 = vst [vmem:[#allocation3 + $0x3c] sm:$0xf] %v6268_v10  ;;  %v5051_v41 = vrot.slane %v5050_v51, 4  ;;  %v6377_v14 = vshll.u32 %v6302_v34, 16  ;;  %v6381_v2 = vshrl.u32 %v6302_v34, 16 }
 0x40d   : > { %4702 = vst [vmem:[#allocation3 + $0x40] sm:$0xf] %v4560_v47  ;;  %v6370_v25 = vrot.slane %v6368_v12, 4  ;;  %v6373_v5 = vrot.slane %v6371_v33, 5  ;;  %v4719_v57 = vld [vmem:[#allocation2 + $0x18] sm:$0xe]  ;;  %v5046_v29 = vsel %vm9871_vm11, %v5041_v9, %v5045_v32 }
 0x40e   : > { %5715 = vmatmul.bf16.gmra.mxu1 %v8161_v1  ;;  %v4720_v36 = vld [vmem:[#allocation2 + $0x1c] sm:$0xf]  ;;  %v6379_v59 = vrot.slane %v6377_v14, 5  ;;  %v6383_v45 = vrot.slane %v6381_v2, 4  ;;  %v6387_v31 = vshll.u32 %v6303_v23, 16  ;;  %v8120_v8 = vrot.slane %v4719_v57, 9 }
 0x40f   : > { %v4721_v60 = vld [vmem:[#allocation2 + $0x20] sm:$0x1]  ;;  %v6374_v3 = vor.u32 %v6373_v5, %v6370_v25  ;;  %v4777_v42 = vrot.slane %v4720_v36, 5  ;;  %v5215_v6 = vld [vmem:[#allocation2 + $0x24] sm:$0xe]  ;;  %v5056_v22 = vsel %vm9871_vm11, %v5051_v41, %v5055_v18 }
 0x410   : > { %v4780_v53 = vrot.slane %v4721_v60, 5  ;;  %v5216_v39 = vld [vmem:[#allocation2 + $0x28] sm:$0xf]  ;;  %v6384_v62 = vor.u32 %v6383_v45, %v6379_v59  ;;  %v5217_v38 = vld [vmem:[#allocation2 + $0x2c] sm:$0x1]  ;;  %v6389_v17 = vrot.slane %v6387_v31, 5 }
 0x411   : > { %v10782_v44 = vld [vmem:[#allocation3 + $0x34] sm:$0xf]  ;;  %v4778_v24 = vsel %vm10014_vm14, %v8120_v8, %v4777_v42  ;;  %v4779_v10 = vrot.slane %v4777_v42, 4  ;;  %v6375_v43 = vrot.slane %v6374_v3, 4  ;;  %v5273_v40 = vrot.slane %v5216_v39, 5 }
 0x412   : > { %5197 = vst [vmem:[#allocation3 + $0x34] sm:$0xf] %v5046_v29  ;;  %v8128_v32 = vrot.slane %v5215_v6, 9  ;;  %v6550_v49 = vld [vmem:[#allocation2 + $0x34] sm:$0xf]  ;;  %v6385_v58 = vrot.slane %v6384_v62, 4 }
 0x413   : > { %4837 = vst [vmem:[#allocation3 + $0x38] sm:$0xf] %v4778_v24  ;;  %v4781_v19 = vsel %vm10014_vm14, %v4779_v10, %v4780_v53  ;;  %v6549_v21 = vld [vmem:[#allocation2 + $0x30] sm:$0xe]  ;;  %v10792_v63 = vld [vmem:[#allocation2 + $0x38] sm:$0x1]  ;;  %v6380_v47 = vsel %vm9871_vm11, %v6375_v43, %v6379_v59 }
 0x414   : > { %v10788_v48 = vld [vmem:[#allocation3 + $0x3c] sm:$0xf0]  ;;  %4838 = vst [vmem:[#allocation3 + $0x44] sm:$0xf] %v4781_v19  ;;  %v6607_v27 = vrot.slane %v6550_v49, 5  ;;  %v5275_v26 = vrot.slane %v5273_v40, 4  ;;  %v5274_v51 = vsel %vm10014_vm14, %v8128_v32, %v5273_v40  ;;  %v6390_v33 = vsel %vm9871_vm11, %v6385_v58, %v6389_v17 }
 0x415   : > { %5198 = vst [vmem:[#allocation3 + $0x40] sm:$0xf] %v5056_v22  ;;  %v4439_v7 = vld [vmem:[#allocation2 + $0x24] sm:$0xf]  ;;  %v5276_v34 = vrot.slane %v5217_v38, 5  ;;  %v8520_v1 = vrot.slane %v6549_v21, 9 }
 0x416   : > { %v4440_v50 = vld [vmem:[#allocation2 + $0x28] sm:$0xf]  ;;  %4455 = vst [vmem:[#allocation3 + $0x48] sm:$0xf] %v4439_v7  ;;  %v6609_v9 = vrot.slane %v6607_v27, 4  ;;  %v6610_v12 = vrot.slane %v10792_v63, 5 }
 0x417   : > { %4456 = vst [vmem:[#allocation3 + $0x54] sm:$0xf] %v4440_v50  ;;  %v4935_v41 = vld [vmem:[#allocation2 + $0x30] sm:$0xf]  ;;  %v4474_v18 = vld [vmem:[#allocation2 + $0x24] sm:$0xf]  ;;  %v5277_v14 = vsel %vm10014_vm14, %v5275_v26, %v5276_v34  ;;  %v6608_v24 = vsel %vm10014_vm14, %v8520_v1, %v6607_v27 }
 0x418   : > { %v4936_v2 = vld [vmem:[#allocation2 + $0x34] sm:$0xf]  ;;  %v4475_v25 = vld [vmem:[#allocation2 + $0x28] sm:$0xf]  ;;  %v4476_v5 = vld [vmem:[#allocation2 + $0x2c] sm:$0x1]  ;;  %v6611_v26 = vsel %vm10014_vm14, %v6609_v9, %v6610_v12 }
 0x419   : > { %v8946_v23 = vld [vmem:[#allocation3 + $0x34] sm:$0xf]  ;;  %v4562_v36 = vshrl.u32 %v4474_v18, 16  ;;  %v4565_v29 = vshll.u32 %v4474_v18, 16  ;;  %v4571_v59 = vshll.u32 %v4475_v25, 16  ;;  %v4575_v45 = vshrl.u32 %v4475_v25, 16 }
 0x41a   : > { %6531 = vst [vmem:[#allocation3 + $0x34] sm:$0xf] %v6380_v47  ;;  %v10801_v54 = vld [vmem:[#allocation3 + $0x38] sm:$0xf]  ;;  %v4581_v3 = vshll.u32 %v4476_v5, 16  ;;  %v8928_v8 = vld [vmem:[#allocation9 + $0x60] sm:$0xff] }
 0x41b   : > { %5333 = vst [vmem:[#allocation3 + $0x38] sm:$0xf] %v5274_v51  ;;  %v10805_v60 = vld [vmem:[#allocation3 + $0x40] sm:$0xf0]  ;;  %v4564_v53 = vrot.slane %v4562_v36, 4  ;;  %v4567_v6 = vrot.slane %v4565_v29, 5  ;;  %6168 = vmatpush.bf16.msrb.mxu2 %v8928_v8 }
 0x41c   : > { %v8162_v57 = vld [vmem:[#allocation3 + $0x3c] sm:$0xf0]  ;;  %5334 = vst [vmem:[#allocation3 + $0x44] sm:$0xf] %v5277_v14  ;;  %v4573_v22 = vrot.slane %v4571_v59, 5  ;;  %v4577_v62 = vrot.slane %v4575_v45, 4 }
 0x41d   : > { %v8165_v31 = vor.u32 %v8946_v23, %v8162_v57  ;;  %6532 = vst [vmem:[#allocation3 + $0x40] sm:$0xf] %v6390_v33  ;;  %v10807_v42 = vld [vmem:[#allocation3 + $0x48] sm:$0xf]  ;;  %v4568_v10 = vor.u32 %v4567_v6, %v4564_v53  ;;  %v4970_v43 = vld [vmem:[#allocation2 + $0x30] sm:$0xf] }
 0x41e   : > { %v10809_v39 = vld [vmem:[#allocation3 + $0x50] sm:$0xf0]  ;;  %4951 = vst [vmem:[#allocation3 + $0x48] sm:$0xf] %v4935_v41  ;;  %v4578_v38 = vor.u32 %v4577_v62, %v4573_v22  ;;  %v4971_v40 = vld [vmem:[#allocation2 + $0x34] sm:$0xf] }
 0x41f   : > { %5764 = vmatmul.bf16.gmra.mxu2 %v8165_v31  ;;  %4952 = vst [vmem:[#allocation3 + $0x54] sm:$0xf] %v4936_v2  ;;  %v4972_v17 = vld [vmem:[#allocation2 + $0x38] sm:$0x1]  ;;  %v5058_v19 = vshrl.u32 %v4970_v43, 16  ;;  %v5061_v32 = vshll.u32 %v4970_v43, 16 }
 0x420   : > { %v6269_v21 = vld [vmem:[#allocation2 + $0x3c] sm:$0xf]  ;;  %v4569_v63 = vrot.slane %v4568_v10, 4  ;;  %v4583_v58 = vrot.slane %v4581_v3, 5  ;;  %v5067_v7 = vshll.u32 %v4971_v40, 16  ;;  %v5071_v47 = vshrl.u32 %v4971_v40, 16 }
 0x421   : > { %v6270_v27 = vld [vmem:[#allocation2 + $0x40] sm:$0xf]  ;;  %v4579_v34 = vrot.slane %v4578_v38, 4  ;;  %v5060_v50 = vrot.slane %v5058_v19, 4  ;;  %v5063_v51 = vrot.slane %v5061_v32, 5  ;;  %v5077_v18 = vshll.u32 %v4972_v17, 16 }
 0x422   : > { %v8168_v49 = vld [vmem:[#allocation3 + $0x38] sm:$0xf]  ;;  %v8920_v23 = vld [vmem:[#allocation9 + $0x20] sm:$0xff]  ;;  %v4574_v1 = vsel %vm9871_vm11, %v4569_v63, %v4573_v22  ;;  %v5069_v33 = vrot.slane %v5067_v7, 5  ;;  %v5073_v41 = vrot.slane %v5071_v47, 4 }
 0x423   : > { %6667 = vst [vmem:[#allocation3 + $0x38] sm:$0xf] %v6608_v24  ;;  %v6304_v14 = vld [vmem:[#allocation2 + $0x3c] sm:$0xf]  ;;  %v8948_v2 = vld [vmem:[#allocation3 + $0x40] sm:$0xf0]  ;;  %v5064_v25 = vor.u32 %v5063_v51, %v5060_v50  ;;  %6119 = vmatpush.bf16.msrb.mxu1 %v8920_v23  ;;  %v4584_v12 = vsel %vm9871_vm11, %v4579_v34, %v4583_v58 }
 0x424   : > { %4703 = vst [vmem:[#allocation3 + $0x4c] sm:$0xf] %v4574_v1  ;;  %v6305_v5 = vld [vmem:[#allocation2 + $0x40] sm:$0xf]  ;;  %v8169_v57 = vor.u32 %v8948_v2, %v8168_v49  ;;  %v5074_v36 = vor.u32 %v5073_v41, %v5069_v33  ;;  %v6392_v45 = vshrl.u32 %v6304_v14, 16  ;;  %v6395_v8 = vshll.u32 %v6304_v14, 16 }
 0x425   : > { %6668 = vst [vmem:[#allocation3 + $0x44] sm:$0xf] %v6611_v26  ;;  %v8172_v9 = vld [vmem:[#allocation3 + $0x48] sm:$0xf]  ;;  %v5065_v59 = vrot.slane %v5064_v25, 4  ;;  %v6401_v53 = vshll.u32 %v6305_v5, 16 }
 0x426   : > { %v8950_v29 = vld [vmem:[#allocation3 + $0x50] sm:$0xf0]  ;;  %6285 = vst [vmem:[#allocation3 + $0x48] sm:$0xf] %v6269_v21  ;;  %5813 = vmatmul.bf16.gmra.mxu3 %v8169_v57  ;;  %v5075_v6 = vrot.slane %v5074_v36, 4  ;;  %v5079_v22 = vrot.slane %v5077_v18, 5 }
 0x427   : > { %v8173_v31 = vor.u32 %v8950_v29, %v8172_v9  ;;  %6286 = vst [vmem:[#allocation3 + $0x54] sm:$0xf] %v6270_v27  ;;  %v6306_v3 = vld [vmem:[#allocation2 + $0x44] sm:$0x1]  ;;  %v6394_v62 = vrot.slane %v6392_v45, 4  ;;  %v6405_v24 = vshrl.u32 %v6305_v5, 16  ;;  %v5070_v10 = vsel %vm9871_vm11, %v5065_v59, %v5069_v33 }
 0x428   : > { %4704 = vst [vmem:[#allocation3 + $0x58] sm:$0xf] %v4584_v12  ;;  %v6397_v43 = vrot.slane %v6395_v8, 5  ;;  %v6403_v38 = vrot.slane %v6401_v53, 5  ;;  %v4722_v40 = vld [vmem:[#allocation2 + $0x24] sm:$0xe]  ;;  %v5080_v23 = vsel %vm9871_vm11, %v5075_v6, %v5079_v22 }
 0x429   : > { %5720 = vmatmul.bf16.gmra.mxu1 %v8173_v31  ;;  %v4723_v17 = vld [vmem:[#allocation2 + $0x28] sm:$0xf]  ;;  %v6407_v19 = vrot.slane %v6405_v24, 4  ;;  %v6411_v32 = vshll.u32 %v6306_v3, 16  ;;  %v4724_v49 = vld [vmem:[#allocation2 + $0x2c] sm:$0x1] }
 0x42a   : > { %v8121_v21 = vrot.slane %v4722_v40, 9  ;;  %v4784_v63 = vrot.slane %v4723_v17, 5  ;;  %v6398_v7 = vor.u32 %v6397_v43, %v6394_v62  ;;  %v4787_v47 = vrot.slane %v4724_v49, 5  ;;  %v5218_v26 = vld [vmem:[#allocation2 + $0x30] sm:$0xe] }
 0x42b   : > { %v10821_v58 = vld [vmem:[#allocation3 + $0x4c] sm:$0xf]  ;;  %v6408_v27 = vor.u32 %v6407_v19, %v6403_v38  ;;  %v5219_v51 = vld [vmem:[#allocation2 + $0x34] sm:$0xf]  ;;  %v5220_v33 = vld [vmem:[#allocation2 + $0x38] sm:$0x1] }
 0x42c   : > { %5199 = vst [vmem:[#allocation3 + $0x4c] sm:$0xf] %v5070_v10  ;;  %v4785_v34 = vsel %vm10014_vm14, %v8121_v21, %v4784_v63  ;;  %v4786_v50 = vrot.slane %v4784_v63, 4  ;;  %v6399_v1 = vrot.slane %v6398_v7, 4  ;;  %v5280_v41 = vrot.slane %v5219_v51, 5 }
 0x42d   : > { %4839 = vst [vmem:[#allocation3 + $0x50] sm:$0xf] %v4785_v34  ;;  %v6413_v18 = vrot.slane %v6411_v32, 5  ;;  %v8129_v2 = vrot.slane %v5218_v26, 9  ;;  %v6553_v25 = vld [vmem:[#allocation2 + $0x40] sm:$0xf] }
 0x42e   : > { %v4788_v14 = vsel %vm10014_vm14, %v4786_v50, %v4787_v47  ;;  %v6409_v57 = vrot.slane %v6408_v27, 4  ;;  %v5283_v9 = vrot.slane %v5220_v33, 5  ;;  %v5282_v12 = vrot.slane %v5280_v41, 4  ;;  %v6552_v36 = vld [vmem:[#allocation2 + $0x3c] sm:$0xe] }
 0x42f   : > { %v10829_v5 = vld [vmem:[#allocation3 + $0x54] sm:$0xf0]  ;;  %4840 = vst [vmem:[#allocation3 + $0x5c] sm:$0xf] %v4788_v14  ;;  %v6614_v29 = vrot.slane %v6553_v25, 5  ;;  %v6404_v59 = vsel %vm9871_vm11, %v6399_v1, %v6403_v38  ;;  %v5281_v8 = vsel %vm10014_vm14, %v8129_v2, %v5280_v41  ;;  %v8521_v6 = vrot.slane %v6552_v36, 9 }
 0x430   : > { %5200 = vst [vmem:[#allocation3 + $0x58] sm:$0xf] %v5080_v23  ;;  %v6554_v45 = vld [vmem:[#allocation2 + $0x44] sm:$0x1]  ;;  %v4441_v31 = vld [vmem:[#allocation2 + $0x30] sm:$0xf]  ;;  %v5284_v62 = vsel %vm10014_vm14, %v5282_v12, %v5283_v9  ;;  %v6414_v43 = vsel %vm9871_vm11, %v6409_v57, %v6413_v18 }
 0x431   : > { %v4442_v3 = vld [vmem:[#allocation2 + $0x34] sm:$0xf]  ;;  %4457 = vst [vmem:[#allocation3 + $0x60] sm:$0xf] %v4441_v31  ;;  %v6616_v24 = vrot.slane %v6614_v29, 4  ;;  %v6617_v10 = vrot.slane %v6554_v45, 5  ;;  %v6615_v41 = vsel %vm10014_vm14, %v8521_v6, %v6614_v29 }
 0x432   : > { %4458 = vst [vmem:[#allocation3 + $0x6c] sm:$0xf] %v4442_v3  ;;  %v4937_v38 = vld [vmem:[#allocation2 + $0x3c] sm:$0xf]  ;;  %v4477_v40 = vld [vmem:[#allocation2 + $0x30] sm:$0xf] }
 0x433   : > { %v8949_v53 = vld [vmem:[#allocation3 + $0x4c] sm:$0xf]  ;;  %v4938_v19 = vld [vmem:[#allocation2 + $0x40] sm:$0xf]  ;;  %v4478_v32 = vld [vmem:[#allocation2 + $0x34] sm:$0xf] }
 0x434   : > { %6533 = vst [vmem:[#allocation3 + $0x4c] sm:$0xf] %v6404_v59  ;;  %v10835_v22 = vld [vmem:[#allocation3 + $0x50] sm:$0xf]  ;;  %v4479_v49 = vld [vmem:[#allocation2 + $0x38] sm:$0x1]  ;;  %v6618_v59 = vsel %vm10014_vm14, %v6616_v24, %v6617_v10 }
 0x435   : > { %5335 = vst [vmem:[#allocation3 + $0x50] sm:$0xf] %v5281_v8  ;;  %v4586_v63 = vshrl.u32 %v4477_v40, 16  ;;  %v4589_v7 = vshll.u32 %v4477_v40, 16  ;;  %v4595_v26 = vshll.u32 %v4478_v32, 16  ;;  %v4599_v27 = vshrl.u32 %v4478_v32, 16 }
 0x436   : > { %v10841_v17 = vld [vmem:[#allocation3 + $0x58] sm:$0xf0]  ;;  %v4605_v34 = vshll.u32 %v4479_v49, 16  ;;  %v8927_v50 = vld [vmem:[#allocation9 + $0x58] sm:$0xff]  ;;  %v4974_v9 = vld [vmem:[#allocation2 + $0x40] sm:$0xf] }
 0x437   : > { %v8174_v21 = vld [vmem:[#allocation3 + $0x54] sm:$0xf0]  ;;  %5336 = vst [vmem:[#allocation3 + $0x5c] sm:$0xf] %v5284_v62  ;;  %v4588_v23 = vrot.slane %v4586_v63, 4  ;;  %v4591_v1 = vrot.slane %v4589_v7, 5  ;;  %6169 = vmatpush.bf16.msrb.mxu2 %v8927_v50 }
 0x438   : > { %v8177_v47 = vor.u32 %v8949_v53, %v8174_v21  ;;  %6534 = vst [vmem:[#allocation3 + $0x58] sm:$0xf] %v6414_v43  ;;  %v10843_v51 = vld [vmem:[#allocation3 + $0x60] sm:$0xf]  ;;  %v4973_v33 = vld [vmem:[#allocation2 + $0x3c] sm:$0xf] }
 0x439   : > { %v10847_v18 = vld [vmem:[#allocation3 + $0x68] sm:$0xf0]  ;;  %4953 = vst [vmem:[#allocation3 + $0x60] sm:$0xf] %v4937_v38  ;;  %v4597_v14 = vrot.slane %v4595_v26, 5  ;;  %v4601_v2 = vrot.slane %v4599_v27, 4  ;;  %v4592_v25 = vor.u32 %v4591_v1, %v4588_v23 }
 0x43a   : > { %5769 = vmatmul.bf16.gmra.mxu2 %v8177_v47  ;;  %4954 = vst [vmem:[#allocation3 + $0x6c] sm:$0xf] %v4938_v19  ;;  %v4607_v57 = vrot.slane %v4605_v34, 5  ;;  %v5082_v12 = vshrl.u32 %v4973_v33, 16  ;;  %v4975_v31 = vld [vmem:[#allocation2 + $0x44] sm:$0x1] }
 0x43b   : > { %v4602_v45 = vor.u32 %v4601_v2, %v4597_v14  ;;  %v5085_v3 = vshll.u32 %v4973_v33, 16  ;;  %v5091_v8 = vshll.u32 %v4974_v9, 16  ;;  %v6271_v29 = vld [vmem:[#allocation2 + $0x48] sm:$0xf]  ;;  %v4593_v53 = vrot.slane %v4592_v25, 4  ;;  %v8919_v21 = vld [vmem:[#allocation9 + $0x18] sm:$0xff] }
 0x43c   : > { %v8180_v36 = vld [vmem:[#allocation3 + $0x50] sm:$0xf]  ;;  %v5084_v6 = vrot.slane %v5082_v12, 4  ;;  %v5095_v62 = vshrl.u32 %v4974_v9, 16  ;;  %v5101_v43 = vshll.u32 %v4975_v31, 16  ;;  %6120 = vmatpush.bf16.msrb.mxu1 %v8919_v21 }
 0x43d   : > { %6669 = vst [vmem:[#allocation3 + $0x50] sm:$0xf] %v6615_v41  ;;  %v6272_v40 = vld [vmem:[#allocation2 + $0x4c] sm:$0xf]  ;;  %v4603_v19 = vrot.slane %v4602_v45, 4  ;;  %v5087_v32 = vrot.slane %v5085_v3, 5  ;;  %v4598_v24 = vsel %vm9871_vm11, %v4593_v53, %v4597_v14 }
 0x43e   : > { %v8951_v38 = vld [vmem:[#allocation3 + $0x58] sm:$0xf0]  ;;  %v5093_v49 = vrot.slane %v5091_v8, 5  ;;  %v5097_v10 = vrot.slane %v5095_v62, 4  ;;  %v5103_v7 = vrot.slane %v5101_v43, 5 }
 0x43f   : > { %v8181_v63 = vor.u32 %v8951_v38, %v8180_v36  ;;  %6670 = vst [vmem:[#allocation3 + $0x5c] sm:$0xf] %v6618_v59  ;;  %v6307_v47 = vld [vmem:[#allocation2 + $0x48] sm:$0xf]  ;;  %v4608_v26 = vsel %vm9871_vm11, %v4603_v19, %v4607_v57  ;;  %v5088_v27 = vor.u32 %v5087_v32, %v5084_v6  ;;  %v6308_v34 = vld [vmem:[#allocation2 + $0x4c] sm:$0xf] }
 0x440   : > { %4705 = vst [vmem:[#allocation3 + $0x64] sm:$0xf] %v4598_v24  ;;  %v6309_v50 = vld [vmem:[#allocation2 + $0x50] sm:$0x1]  ;;  %v5098_v1 = vor.u32 %v5097_v10, %v5093_v49  ;;  %v6416_v33 = vshrl.u32 %v6307_v47, 16  ;;  %v6419_v41 = vshll.u32 %v6307_v47, 16 }
 0x441   : > { %5818 = vmatmul.bf16.gmra.mxu3 %v8181_v63  ;;  %v8184_v23 = vld [vmem:[#allocation3 + $0x60] sm:$0xf]  ;;  %4706 = vst [vmem:[#allocation3 + $0x70] sm:$0xf] %v4608_v26  ;;  %v8953_v2 = vld [vmem:[#allocation3 + $0x68] sm:$0xf0] }
 0x442   : > { %6287 = vst [vmem:[#allocation3 + $0x60] sm:$0xf] %v6271_v29  ;;  %v5089_v14 = vrot.slane %v5088_v27, 4  ;;  %v6425_v25 = vshll.u32 %v6308_v34, 16  ;;  %v8185_v9 = vor.u32 %v8953_v2, %v8184_v23  ;;  %v5099_v12 = vrot.slane %v5098_v1, 4 }
 0x443   : > { %6288 = vst [vmem:[#allocation3 + $0x6c] sm:$0xf] %v6272_v40  ;;  %v6418_v36 = vrot.slane %v6416_v33, 4  ;;  %v6421_v57 = vrot.slane %v6419_v41, 5  ;;  %v6429_v45 = vshrl.u32 %v6308_v34, 16  ;;  %v6435_v53 = vshll.u32 %v6309_v50, 16 }
 0x444   : > { %v6427_v59 = vrot.slane %v6425_v25, 5  ;;  %v4725_v31 = vld [vmem:[#allocation2 + $0x30] sm:$0xe]  ;;  %5725 = vmatmul.bf16.gmra.mxu1 %v8185_v9  ;;  %v5094_v3 = vsel %vm9871_vm11, %v5089_v14, %v5093_v49  ;;  %v4726_v6 = vld [vmem:[#allocation2 + $0x34] sm:$0xf]  ;;  %v5104_v29 = vsel %vm9871_vm11, %v5099_v12, %v5103_v7 }
 0x445   : > { %v6422_v8 = vor.u32 %v6421_v57, %v6418_v36  ;;  %v4727_v62 = vld [vmem:[#allocation2 + $0x38] sm:$0x1]  ;;  %v8122_v43 = vrot.slane %v4725_v31, 9  ;;  %v6431_v38 = vrot.slane %v6429_v45, 4  ;;  %v4791_v40 = vrot.slane %v4726_v6, 5 }
 0x446   : > { %v4794_v19 = vrot.slane %v4727_v62, 5  ;;  %v5221_v32 = vld [vmem:[#allocation2 + $0x3c] sm:$0xe]  ;;  %v5222_v24 = vld [vmem:[#allocation2 + $0x40] sm:$0xf]  ;;  %v6437_v23 = vrot.slane %v6435_v53, 5 }
 0x447   : > { %v10859_v21 = vld [vmem:[#allocation3 + $0x64] sm:$0xf]  ;;  %v6423_v63 = vrot.slane %v6422_v8, 4  ;;  %v6432_v49 = vor.u32 %v6431_v38, %v6427_v59  ;;  %v4792_v47 = vsel %vm10014_vm14, %v8122_v43, %v4791_v40  ;;  %v4793_v26 = vrot.slane %v4791_v40, 4  ;;  %v5223_v34 = vld [vmem:[#allocation2 + $0x44] sm:$0x1] }
 0x448   : > { %v10861_v10 = vld [vmem:[#allocation3 + $0x6c] sm:$0xf0]  ;;  %5201 = vst [vmem:[#allocation3 + $0x64] sm:$0xf] %v5094_v3  ;;  %v5287_v27 = vrot.slane %v5222_v24, 5  ;;  %v8130_v41 = vrot.slane %v5221_v32, 9 }
 0x449   : > { %5202 = vst [vmem:[#allocation3 + $0x70] sm:$0xf] %v5104_v29  ;;  %v6555_v7 = vld [vmem:[#allocation2 + $0x48] sm:$0xe]  ;;  %v6433_v50 = vrot.slane %v6432_v49, 4  ;;  %v4795_v1 = vsel %vm10014_vm14, %v4793_v26, %v4794_v19  ;;  %v5290_v25 = vrot.slane %v5223_v34, 5  ;;  %v6428_v57 = vsel %vm9871_vm11, %v6423_v63, %v6427_v59 }
 0x44a   : > { %4841 = vst [vmem:[#allocation3 + $0x68] sm:$0xf] %v4792_v47  ;;  %v6556_v33 = vld [vmem:[#allocation2 + $0x4c] sm:$0xf]  ;;  %v5289_v2 = vrot.slane %v5287_v27, 4  ;;  %v8522_v31 = vrot.slane %v6555_v7, 9  ;;  %v5288_v8 = vsel %vm10014_vm14, %v8130_v41, %v5287_v27 }
 0x44b   : > { %4842 = vst [vmem:[#allocation3 + $0x74] sm:$0xf] %v4795_v1  ;;  %v6557_v14 = vld [vmem:[#allocation2 + $0x50] sm:$0x1]  ;;  %v6621_v9 = vrot.slane %v6556_v33, 5  ;;  %v6438_v45 = vsel %vm9871_vm11, %v6433_v50, %v6437_v23 }
 0x44c   : > { %v4443_v12 = vld [vmem:[#allocation2 + $0x3c] sm:$0xf]  ;;  %v4444_v36 = vld [vmem:[#allocation2 + $0x40] sm:$0xf]  ;;  %v6624_v6 = vrot.slane %v6557_v14, 5  ;;  %v5291_v29 = vsel %vm10014_vm14, %v5289_v2, %v5290_v25  ;;  %v8926_v7 = vld [vmem:[#allocation9 + $0x50] sm:$0xff] }
 0x44d   : > { %4459 = vst [vmem:[#allocation3 + $0x78] sm:$0xf] %v4443_v12  ;;  %v6623_v53 = vrot.slane %v6621_v9, 4  ;;  %v4480_v62 = vld [vmem:[#allocation2 + $0x3c] sm:$0xf]  ;;  %6170 = vmatpush.bf16.msrb.mxu2 %v8926_v7  ;;  %v6622_v25 = vsel %vm10014_vm14, %v8522_v31, %v6621_v9 }
 0x44e   : > { %4460 = vst [vmem:[#allocation3 + $0x84] sm:$0xf] %v4444_v36  ;;  %v4939_v38 = vld [vmem:[#allocation2 + $0x48] sm:$0xf]  ;;  %v4481_v59 = vld [vmem:[#allocation2 + $0x40] sm:$0xf] }
 0x44f   : > { %v8952_v3 = vld [vmem:[#allocation3 + $0x64] sm:$0xf]  ;;  %v4940_v32 = vld [vmem:[#allocation2 + $0x4c] sm:$0xf]  ;;  %v4482_v63 = vld [vmem:[#allocation2 + $0x44] sm:$0x1] }
 0x450   : > { %v8186_v43 = vld [vmem:[#allocation3 + $0x6c] sm:$0xf0]  ;;  %6535 = vst [vmem:[#allocation3 + $0x64] sm:$0xf] %v6428_v57  ;;  %v4610_v49 = vshrl.u32 %v4480_v62, 16  ;;  %v4613_v47 = vshll.u32 %v4480_v62, 16 }
 0x451   : > { %v8189_v40 = vor.u32 %v8952_v3, %v8186_v43  ;;  %6536 = vst [vmem:[#allocation3 + $0x70] sm:$0xf] %v6438_v45  ;;  %v10875_v19 = vld [vmem:[#allocation3 + $0x68] sm:$0xf]  ;;  %v4619_v26 = vshll.u32 %v4481_v59, 16  ;;  %v4623_v27 = vshrl.u32 %v4481_v59, 16  ;;  %v6625_v59 = vsel %vm10014_vm14, %v6623_v53, %v6624_v6 }
 0x452   : > { %v10877_v24 = vld [vmem:[#allocation3 + $0x70] sm:$0xf0]  ;;  %5337 = vst [vmem:[#allocation3 + $0x68] sm:$0xf] %v5288_v8  ;;  %v4629_v34 = vshll.u32 %v4482_v63, 16  ;;  %v4612_v23 = vrot.slane %v4610_v49, 4 }
 0x453   : > { %5774 = vmatmul.bf16.gmra.mxu2 %v8189_v40  ;;  %5338 = vst [vmem:[#allocation3 + $0x74] sm:$0xf] %v5291_v29  ;;  %v4615_v1 = vrot.slane %v4613_v47, 5  ;;  %v4976_v33 = vld [vmem:[#allocation2 + $0x48] sm:$0xf]  ;;  %v4621_v2 = vrot.slane %v4619_v26, 5 }
 0x454   : > { %v10879_v50 = vld [vmem:[#allocation3 + $0x78] sm:$0xf]  ;;  %v4625_v14 = vrot.slane %v4623_v27, 4  ;;  %v4631_v36 = vrot.slane %v4629_v34, 5  ;;  %v4977_v57 = vld [vmem:[#allocation2 + $0x4c] sm:$0xf] }
 0x455   : > { %v10881_v41 = vld [vmem:[#allocation3 + $0x80] sm:$0xf0]  ;;  %4955 = vst [vmem:[#allocation3 + $0x78] sm:$0xf] %v4939_v38  ;;  %v4616_v12 = vor.u32 %v4615_v1, %v4612_v23  ;;  %v5106_v45 = vshrl.u32 %v4976_v33, 16  ;;  %v5109_v62 = vshll.u32 %v4976_v33, 16 }
 0x456   : > { %4956 = vst [vmem:[#allocation3 + $0x84] sm:$0xf] %v4940_v32  ;;  %v4626_v3 = vor.u32 %v4625_v14, %v4621_v2  ;;  %v4978_v8 = vld [vmem:[#allocation2 + $0x50] sm:$0x1]  ;;  %v5115_v43 = vshll.u32 %v4977_v57, 16  ;;  %v5119_v29 = vshrl.u32 %v4977_v57, 16 }
 0x457   : > { %v6273_v38 = vld [vmem:[#allocation2 + $0x54] sm:$0xf]  ;;  %v4617_v40 = vrot.slane %v4616_v12, 4  ;;  %v5108_v63 = vrot.slane %v5106_v45, 4  ;;  %v5125_v49 = vshll.u32 %v4978_v8, 16  ;;  %v5111_v27 = vrot.slane %v5109_v62, 5 }
 0x458   : > { %v6310_v47 = vld [vmem:[#allocation2 + $0x54] sm:$0xf]  ;;  %v6274_v31 = vld [vmem:[#allocation2 + $0x58] sm:$0xf]  ;;  %v4627_v32 = vrot.slane %v4626_v3, 4  ;;  %v5117_v34 = vrot.slane %v5115_v43, 5 }
 0x459   : > { %v8918_v26 = vld [vmem:[#allocation9 + $0x10] sm:$0xff]  ;;  %v8192_v9 = vld [vmem:[#allocation3 + $0x68] sm:$0xf]  ;;  %v5121_v7 = vrot.slane %v5119_v29, 4  ;;  %v4622_v1 = vsel %vm9871_vm11, %v4617_v40, %v4621_v2  ;;  %v6440_v33 = vshrl.u32 %v6310_v47, 16  ;;  %v5112_v6 = vor.u32 %v5111_v27, %v5108_v63 }
 0x45a   : > { %v8954_v23 = vld [vmem:[#allocation3 + $0x70] sm:$0xf0]  ;;  %6671 = vst [vmem:[#allocation3 + $0x68] sm:$0xf] %v6622_v25  ;;  %6121 = vmatpush.bf16.msrb.mxu1 %v8918_v26  ;;  %v5127_v12 = vrot.slane %v5125_v49, 5  ;;  %v4632_v3 = vsel %vm9871_vm11, %v4627_v32, %v4631_v36  ;;  %v6443_v62 = vshll.u32 %v6310_v47, 16 }
 0x45b   : > { %v8193_v53 = vor.u32 %v8954_v23, %v8192_v9  ;;  %6672 = vst [vmem:[#allocation3 + $0x74] sm:$0xf] %v6625_v59  ;;  %v5122_v14 = vor.u32 %v5121_v7, %v5117_v34  ;;  %v6311_v57 = vld [vmem:[#allocation2 + $0x58] sm:$0xf]  ;;  %v6442_v8 = vrot.slane %v6440_v33, 4  ;;  %v5113_v43 = vrot.slane %v5112_v6, 4 }
 0x45c   : > { %v8196_v45 = vld [vmem:[#allocation3 + $0x78] sm:$0xf]  ;;  %4707 = vst [vmem:[#allocation3 + $0x7c] sm:$0xf] %v4622_v1  ;;  %v6445_v40 = vrot.slane %v6443_v62, 5  ;;  %v6449_v59 = vshll.u32 %v6311_v57, 16 }
 0x45d   : > { %5823 = vmatmul.bf16.gmra.mxu3 %v8193_v53  ;;  %v8956_v25 = vld [vmem:[#allocation3 + $0x80] sm:$0xf0]  ;;  %6289 = vst [vmem:[#allocation3 + $0x78] sm:$0xf] %v6273_v38  ;;  %v5123_v2 = vrot.slane %v5122_v14, 4  ;;  %v6453_v63 = vshrl.u32 %v6311_v57, 16  ;;  %v5118_v47 = vsel %vm9871_vm11, %v5113_v43, %v5117_v34 }
 0x45e   : > { %v8197_v29 = vor.u32 %v8956_v25, %v8196_v45  ;;  %6290 = vst [vmem:[#allocation3 + $0x84] sm:$0xf] %v6274_v31  ;;  %v6312_v49 = vld [vmem:[#allocation2 + $0x5c] sm:$0x1]  ;;  %v4728_v26 = vld [vmem:[#allocation2 + $0x3c] sm:$0xe]  ;;  %v6446_v9 = vor.u32 %v6445_v40, %v6442_v8 }
 0x45f   : > { %4708 = vst [vmem:[#allocation3 + $0x88] sm:$0xf] %v4632_v3  ;;  %v6451_v27 = vrot.slane %v6449_v59, 5  ;;  %v6455_v36 = vrot.slane %v6453_v63, 4  ;;  %v4729_v32 = vld [vmem:[#allocation2 + $0x40] sm:$0xf]  ;;  %v5128_v31 = vsel %vm9871_vm11, %v5123_v2, %v5127_v12 }
 0x460   : > { %5730 = vmatmul.bf16.gmra.mxu1 %v8197_v29  ;;  %v4730_v7 = vld [vmem:[#allocation2 + $0x44] sm:$0x1]  ;;  %v8123_v38 = vrot.slane %v4728_v26, 9  ;;  %v4798_v23 = vrot.slane %v4729_v32, 5  ;;  %v5224_v33 = vld [vmem:[#allocation2 + $0x48] sm:$0xe] }
 0x461   : > { %v4801_v1 = vrot.slane %v4730_v7, 5  ;;  %v5225_v53 = vld [vmem:[#allocation2 + $0x4c] sm:$0xf]  ;;  %v5226_v6 = vld [vmem:[#allocation2 + $0x50] sm:$0x1]  ;;  %v6459_v57 = vshll.u32 %v6312_v49, 16  ;;  %v6456_v34 = vor.u32 %v6455_v36, %v6451_v27 }
 0x462   : > { %v4799_v45 = vsel %vm10014_vm14, %v8123_v38, %v4798_v23  ;;  %v4800_v3 = vrot.slane %v4798_v23, 4  ;;  %v5294_v8 = vrot.slane %v5225_v53, 5  ;;  %v6447_v62 = vrot.slane %v6446_v9, 4  ;;  %v6558_v12 = vld [vmem:[#allocation2 + $0x54] sm:$0xe] }
 0x463   : > { %v10895_v14 = vld [vmem:[#allocation3 + $0x7c] sm:$0xf]  ;;  %v8131_v25 = vrot.slane %v5224_v33, 9  ;;  %v5297_v43 = vrot.slane %v5226_v6, 5  ;;  %4843 = vst [vmem:[#allocation3 + $0x80] sm:$0xf] %v4799_v45 }
 0x464   : > { %11360 = vst [vmem:[#allocation35_spill] sm:$0xff] %v10895_v14  ;;  %v4802_v29 = vsel %vm10014_vm14, %v4800_v3, %v4801_v1  ;;  %v6559_v2 = vld [vmem:[#allocation2 + $0x58] sm:$0xf]  ;;  %v6560_v59 = vld [vmem:[#allocation2 + $0x5c] sm:$0x1]  ;;  %v5296_v63 = vrot.slane %v5294_v8, 4  ;;  %v6452_v36 = vsel %vm9871_vm11, %v6447_v62, %v6451_v27 }
 0x465   : > { %5203 = vst [vmem:[#allocation3 + $0x7c] sm:$0xf] %v5118_v47  ;;  %v6628_v49 = vrot.slane %v6559_v2, 5  ;;  %v4445_v26 = vld [vmem:[#allocation2 + $0x48] sm:$0xf]  ;;  %v6457_v32 = vrot.slane %v6456_v34, 4  ;;  %v5295_v47 = vsel %vm10014_vm14, %v8131_v25, %v5294_v8 }
 0x466   : > { %v10901_v40 = vld [vmem:[#allocation3 + $0x84] sm:$0xf0]  ;;  %4844 = vst [vmem:[#allocation3 + $0x8c] sm:$0xf] %v4802_v29  ;;  %v6461_v7 = vrot.slane %v6459_v57, 5  ;;  %v8523_v38 = vrot.slane %v6558_v12, 9 }
 0x467   : > { %11361 = vst [vmem:[#allocation26_spill] sm:$0xff] %v10901_v40  ;;  %v4446_v9 = vld [vmem:[#allocation2 + $0x4c] sm:$0xf]  ;;  %v6630_v23 = vrot.slane %v6628_v49, 4  ;;  %v6631_v1 = vrot.slane %v6560_v59, 5 }
 0x468   : > { %5204 = vst [vmem:[#allocation3 + $0x88] sm:$0xf] %v5128_v31  ;;  %v4483_v33 = vld [vmem:[#allocation2 + $0x48] sm:$0xf]  ;;  %v5298_v31 = vsel %vm10014_vm14, %v5296_v63, %v5297_v43  ;;  %v4941_v6 = vld [vmem:[#allocation2 + $0x54] sm:$0xf]  ;;  %v6462_v3 = vsel %vm9871_vm11, %v6457_v32, %v6461_v7 }
 0x469   : > { %4461 = vst [vmem:[#allocation3 + $0x90] sm:$0xf] %v4445_v26  ;;  %v4484_v45 = vld [vmem:[#allocation2 + $0x4c] sm:$0xf]  ;;  %v4485_v57 = vld [vmem:[#allocation2 + $0x50] sm:$0x1] }
 0x46a   : > { %4462 = vst [vmem:[#allocation3 + $0x9c] sm:$0xf] %v4446_v9  ;;  %v10911_v27 = vld [vmem:[#allocation3 + $0x80] sm:$0xf]  ;;  %v4942_v62 = vld [vmem:[#allocation2 + $0x58] sm:$0xf] }
 0x46b   : > { %11362 = vst [vmem:[#allocation25_spill] sm:$0xff] %v10911_v27  ;;  %v4634_v34 = vshrl.u32 %v4483_v33, 16  ;;  %v4637_v8 = vshll.u32 %v4483_v33, 16  ;;  %v4643_v29 = vshll.u32 %v4484_v45, 16  ;;  %v4647_v12 = vshrl.u32 %v4484_v45, 16  ;;  %v8925_v27 = vld [vmem:[#allocation9 + $0x48] sm:$0xff] }
 0x46c   : > { %v8955_v53 = vld [vmem:[#allocation3 + $0x7c] sm:$0xf]  ;;  %5339 = vst [vmem:[#allocation3 + $0x80] sm:$0xf] %v5295_v47  ;;  %v4653_v33 = vshll.u32 %v4485_v57, 16  ;;  %v6629_v47 = vsel %vm10014_vm14, %v8523_v38, %v6628_v49  ;;  %6171 = vmatpush.bf16.msrb.mxu2 %v8925_v27 }
 0x46d   : > { %6537 = vst [vmem:[#allocation3 + $0x7c] sm:$0xf] %v6452_v36  ;;  %v10913_v25 = vld [vmem:[#allocation3 + $0x88] sm:$0xf0]  ;;  %v4636_v43 = vrot.slane %v4634_v34, 4  ;;  %v4639_v59 = vrot.slane %v4637_v8, 5 }
 0x46e   : > { %11363 = vst [vmem:[#allocation39_spill] sm:$0xff] %v10913_v25  ;;  %v4645_v32 = vrot.slane %v4643_v29, 5  ;;  %v4649_v7 = vrot.slane %v4647_v12, 4  ;;  %v4979_v45 = vld [vmem:[#allocation2 + $0x54] sm:$0xf]  ;;  %v4655_v8 = vrot.slane %v4653_v33, 5 }
 0x46f   : > { %v8198_v2 = vld [vmem:[#allocation3 + $0x84] sm:$0xf0]  ;;  %5340 = vst [vmem:[#allocation3 + $0x8c] sm:$0xf] %v5298_v31  ;;  %v4640_v36 = vor.u32 %v4639_v59, %v4636_v43  ;;  %v6632_v31 = vsel %vm10014_vm14, %v6630_v23, %v6631_v1  ;;  %v4981_v29 = vld [vmem:[#allocation2 + $0x5c] sm:$0x1] }
 0x470   : > { %v8201_v63 = vor.u32 %v8955_v53, %v8198_v2  ;;  %6538 = vst [vmem:[#allocation3 + $0x88] sm:$0xf] %v6462_v3  ;;  %v10915_v26 = vld [vmem:[#allocation3 + $0x90] sm:$0xf]  ;;  %v4650_v53 = vor.u32 %v4649_v7, %v4645_v32  ;;  %v4980_v3 = vld [vmem:[#allocation2 + $0x58] sm:$0xf] }
 0x471   : > { %11364 = vst [vmem:[#allocation38_spill] sm:$0xff] %v10915_v26  ;;  %v10917_v9 = vld [vmem:[#allocation3 + $0x98] sm:$0xf0]  ;;  %v4641_v34 = vrot.slane %v4640_v36, 4  ;;  %v5130_v12 = vshrl.u32 %v4979_v45, 16  ;;  %v5133_v2 = vshll.u32 %v4979_v45, 16 }
 0x472   : > { %11365 = vst [vmem:[#allocation40_spill] sm:$0xff] %v10917_v9  ;;  %5779 = vmatmul.bf16.gmra.mxu2 %v8201_v63  ;;  %v4651_v57 = vrot.slane %v4650_v53, 4  ;;  %v5139_v43 = vshll.u32 %v4980_v3, 16  ;;  %v5143_v59 = vshrl.u32 %v4980_v3, 16  ;;  %v5149_v63 = vshll.u32 %v4981_v29, 16 }
 0x473   : > { %4957 = vst [vmem:[#allocation3 + $0x90] sm:$0xf] %v4941_v6  ;;  %v6275_v6 = vld [vmem:[#allocation2 + $0x60] sm:$0xf]  ;;  %v8204_v49 = vld [vmem:[#allocation3 + $0x80] sm:$0xf]  ;;  %v4646_v38 = vsel %vm9871_vm11, %v4641_v34, %v4645_v32 }
 0x474   : > { %4958 = vst [vmem:[#allocation3 + $0x9c] sm:$0xf] %v4942_v62  ;;  %v6313_v25 = vld [vmem:[#allocation2 + $0x60] sm:$0xf]  ;;  %v5132_v23 = vrot.slane %v5130_v12, 4  ;;  %v5135_v1 = vrot.slane %v5133_v2, 5  ;;  %v4656_v3 = vsel %vm9871_vm11, %v4651_v57, %v4655_v8 }
 0x475   : > { %v6314_v62 = vld [vmem:[#allocation2 + $0x64] sm:$0xf]  ;;  %6673 = vst [vmem:[#allocation3 + $0x80] sm:$0xf] %v6629_v47  ;;  %v5141_v36 = vrot.slane %v5139_v43, 5  ;;  %v5145_v33 = vrot.slane %v5143_v59, 4 }
 0x476   : > { %v8957_v7 = vld [vmem:[#allocation3 + $0x88] sm:$0xf0]  ;;  %v6276_v27 = vld [vmem:[#allocation2 + $0x64] sm:$0xf]  ;;  %v5136_v45 = vor.u32 %v5135_v1, %v5132_v23  ;;  %v6464_v53 = vshrl.u32 %v6313_v25, 16  ;;  %v6467_v14 = vshll.u32 %v6313_v25, 16 }
 0x477   : > { %v8205_v9 = vor.u32 %v8957_v7, %v8204_v49  ;;  %6674 = vst [vmem:[#allocation3 + $0x8c] sm:$0xf] %v6632_v31  ;;  %v5146_v29 = vor.u32 %v5145_v33, %v5141_v36  ;;  %v6473_v32 = vshll.u32 %v6314_v62, 16  ;;  %v5151_v31 = vrot.slane %v5149_v63, 5  ;;  %v8939_v49 = vld [vmem:[#allocation9 + $0xb8] sm:$0xff] }
 0x478   : > { %4709 = vst [vmem:[#allocation3 + $0x94] sm:$0xf] %v4646_v38  ;;  %v5137_v12 = vrot.slane %v5136_v45, 4  ;;  %v6466_v47 = vrot.slane %v6464_v53, 4  ;;  %v6469_v59 = vrot.slane %v6467_v14, 5  ;;  %v6477_v1 = vshrl.u32 %v6314_v62, 16  ;;  %6214 = vmatpush.bf16.msra.mxu3 %v8939_v49 }
 0x479   : > { %5828 = vmatmul.bf16.gmra.mxu3 %v8205_v9  ;;  %v5147_v43 = vrot.slane %v5146_v29, 4  ;;  %4710 = vst [vmem:[#allocation3 + $0xa0] sm:$0xf] %v4656_v3  ;;  %v6475_v23 = vrot.slane %v6473_v32, 5  ;;  %v4731_v7 = vld [vmem:[#allocation2 + $0x48] sm:$0xe] }
 0x47a   : > { %v8208_v26 = vld [vmem:[#allocation3 + $0x90] sm:$0xf]  ;;  %v5142_v25 = vsel %vm9871_vm11, %v5137_v12, %v5141_v36  ;;  %v4732_v8 = vld [vmem:[#allocation2 + $0x4c] sm:$0xf]  ;;  %v4733_v9 = vld [vmem:[#allocation2 + $0x50] sm:$0x1] }
 0x47b   : > { %v8959_v34 = vld [vmem:[#allocation3 + $0x98] sm:$0xf0]  ;;  %6291 = vst [vmem:[#allocation3 + $0x90] sm:$0xf] %v6275_v6  ;;  %v8124_v57 = vrot.slane %v4731_v7, 9  ;;  %v6479_v33 = vrot.slane %v6477_v1, 4  ;;  %v5152_v32 = vsel %vm9871_vm11, %v5147_v43, %v5151_v31 }
 0x47c   : > { %v8209_v2 = vor.u32 %v8959_v34, %v8208_v26  ;;  %6292 = vst [vmem:[#allocation3 + $0x9c] sm:$0xf] %v6276_v27  ;;  %v8917_v6 = vld [vmem:[#allocation9 + $0x8] sm:$0xff]  ;;  %v6470_v26 = vor.u32 %v6469_v59, %v6466_v47  ;;  %v4805_v27 = vrot.slane %v4732_v8, 5  ;;  %v4808_v63 = vrot.slane %v4733_v9, 5 }
 0x47d   : > { %v6315_v38 = vld [vmem:[#allocation2 + $0x68] sm:$0x1]  ;;  %v5227_v14 = vld [vmem:[#allocation2 + $0x54] sm:$0xe]  ;;  %v5228_v45 = vld [vmem:[#allocation2 + $0x58] sm:$0xf]  ;;  %6122 = vmatpush.bf16.msrb.mxu1 %v8917_v6  ;;  %v6480_v34 = vor.u32 %v6479_v33, %v6475_v23 }
 0x47e   : > { %5735 = vmatmul.bf16.gmra.mxu1 %v8209_v2  ;;  %v4806_v62 = vsel %vm10014_vm14, %v8124_v57, %v4805_v27  ;;  %v4807_v3 = vrot.slane %v4805_v27, 4  ;;  %v5229_v36 = vld [vmem:[#allocation2 + $0x5c] sm:$0x1]  ;;  %v5301_v29 = vrot.slane %v5228_v45, 5  ;;  %v6483_v12 = vshll.u32 %v6315_v38, 16  ;;  %v8937_v27 = vld [vmem:[#allocation9 + $0xa8] sm:$0xff] }
 0x47f   : > { %v10929_v53 = vld [vmem:[#allocation3 + $0x94] sm:$0xf]  ;;  %v6471_v2 = vrot.slane %v6470_v26, 4  ;;  %4845 = vst [vmem:[#allocation3 + $0x98] sm:$0xf] %v4806_v62  ;;  %v8132_v49 = vrot.slane %v5227_v14, 9 }
 0x480   : > { %11366 = vst [vmem:[#allocation28_spill] sm:$0xff] %v10929_v53  ;;  %v10935_v47 = vld [vmem:[#allocation2 + $0x64] sm:$0xf]  ;;  %v4809_v59 = vsel %vm10014_vm14, %v4807_v3, %v4808_v63  ;;  %v6561_v1 = vld [vmem:[#allocation2 + $0x60] sm:$0xe]  ;;  %v5304_v8 = vrot.slane %v5229_v36, 5 }
 0x481   : > { %5205 = vst [vmem:[#allocation3 + $0x94] sm:$0xf] %v5142_v25  ;;  %v10939_v7 = vld [vmem:[#allocation3 + $0x9c] sm:$0xf0]  ;;  %v6635_v9 = vrot.slane %v10935_v47, 5  ;;  %v5303_v43 = vrot.slane %v5301_v29, 4  ;;  %v6476_v33 = vsel %vm9871_vm11, %v6471_v2, %v6475_v23  ;;  %v5302_v63 = vsel %vm10014_vm14, %v8132_v49, %v5301_v29 }
 0x482   : > { %11367 = vst [vmem:[#allocation27_spill] sm:$0xff] %v10939_v7  ;;  %v6563_v31 = vld [vmem:[#allocation2 + $0x68] sm:$0x1]  ;;  %v8938_v25 = vld [vmem:[#allocation9 + $0xb0] sm:$0xff]  ;;  %v6481_v57 = vrot.slane %v6480_v34, 4  ;;  %v6485_v6 = vrot.slane %v6483_v12, 5 }
 0x483   : > { %4846 = vst [vmem:[#allocation3 + $0xa4] sm:$0xf] %v4809_v59  ;;  %v4447_v38 = vld [vmem:[#allocation2 + $0x54] sm:$0xf]  ;;  %v4448_v26 = vld [vmem:[#allocation2 + $0x58] sm:$0xf]  ;;  %6215 = vmatpush.bf16.msra.mxu3 %v8938_v25  ;;  %v5305_v36 = vsel %vm10014_vm14, %v5303_v43, %v5304_v8 }
 0x484   : > { %5206 = vst [vmem:[#allocation3 + $0xa0] sm:$0xf] %v5152_v32  ;;  %v8524_v14 = vrot.slane %v6561_v1, 9  ;;  %v6637_v45 = vrot.slane %v6635_v9, 4  ;;  %v6638_v62 = vrot.slane %v6563_v31, 5  ;;  %v8936_v32 = vld [vmem:[#allocation9 + $0xa0] sm:$0xff]  ;;  %v6486_v23 = vsel %vm9871_vm11, %v6481_v57, %v6485_v6 }
 0x485   : > { %4463 = vst [vmem:[#allocation3 + $0xa8] sm:$0xf] %v4447_v38  ;;  %v4486_v34 = vld [vmem:[#allocation2 + $0x54] sm:$0xf]  ;;  %v4487_v12 = vld [vmem:[#allocation2 + $0x58] sm:$0xf] }
 0x486   : > { %4464 = vst [vmem:[#allocation3 + $0xb4] sm:$0xf] %v4448_v26  ;;  %v10950_v47 = vld [vmem:[#allocation3 + $0x98] sm:$0xf]  ;;  %v4943_v2 = vld [vmem:[#allocation2 + $0x60] sm:$0xf] }
 0x487   : > { %11368 = vst [vmem:[#allocation32_spill] sm:$0xff] %v10950_v47  ;;  %v4488_v59 = vld [vmem:[#allocation2 + $0x5c] sm:$0x1]  ;;  %6216 = vmatpush.bf16.msra.mxu3 %v8937_v27  ;;  %v4944_v49 = vld [vmem:[#allocation2 + $0x64] sm:$0xf]  ;;  %v4658_v1 = vshrl.u32 %v4486_v34, 16 }
 0x488   : > { %v8958_v3 = vld [vmem:[#allocation3 + $0x94] sm:$0xf]  ;;  %5341 = vst [vmem:[#allocation3 + $0x98] sm:$0xf] %v5302_v63  ;;  %v4661_v31 = vshll.u32 %v4486_v34, 16  ;;  %v4667_v8 = vshll.u32 %v4487_v12, 16 }
 0x489   : > { %6539 = vst [vmem:[#allocation3 + $0x94] sm:$0xf] %v6476_v33  ;;  %v4671_v43 = vshrl.u32 %v4487_v12, 16  ;;  %v4660_v26 = vrot.slane %v4658_v1, 4  ;;  %v4677_v6 = vshll.u32 %v4488_v59, 16  ;;  %v8924_v33 = vld [vmem:[#allocation9 + $0x40] sm:$0xff]  ;;  %v6639_v12 = vsel %vm10014_vm14, %v6637_v45, %v6638_v62 }
 0x48a   : > { %v10952_v29 = vld [vmem:[#allocation3 + $0xa0] sm:$0xf0]  ;;  %v4663_v57 = vrot.slane %v4661_v31, 5  ;;  %v4669_v53 = vrot.slane %v4667_v8, 5  ;;  %v4983_v59 = vld [vmem:[#allocation2 + $0x64] sm:$0xf]  ;;  %6172 = vmatpush.bf16.msrb.mxu2 %v8924_v33 }
 0x48b   : > { %11369 = vst [vmem:[#allocation33_spill] sm:$0xff] %v10952_v29  ;;  %v8210_v25 = vld [vmem:[#allocation3 + $0x9c] sm:$0xf0]  ;;  %v4673_v7 = vrot.slane %v4671_v43, 4  ;;  %v4982_v29 = vld [vmem:[#allocation2 + $0x60] sm:$0xf]  ;;  %6217 = vmatpush.bf16.msra.mxu3 %v8936_v32 }
 0x48c   : > { %5342 = vst [vmem:[#allocation3 + $0xa4] sm:$0xf] %v5305_v36  ;;  %v8213_v38 = vor.u32 %v8958_v3, %v8210_v25  ;;  %v10954_v47 = vld [vmem:[#allocation3 + $0xa8] sm:$0xf]  ;;  %v4664_v63 = vor.u32 %v4663_v57, %v4660_v26  ;;  %v4679_v36 = vrot.slane %v4677_v6, 5  ;;  %v5154_v34 = vshrl.u32 %v4982_v29, 16 }
 0x48d   : > { %6540 = vst [vmem:[#allocation3 + $0xa0] sm:$0xf] %v6486_v23  ;;  %v10956_v27 = vld [vmem:[#allocation3 + $0xb0] sm:$0xf0]  ;;  %v6636_v3 = vsel %vm10014_vm14, %v8524_v14, %v6635_v9  ;;  %v4674_v23 = vor.u32 %v4673_v7, %v4669_v53  ;;  %v4984_v1 = vld [vmem:[#allocation2 + $0x68] sm:$0x1] }
 0x48e   : > { %11370 = vst [vmem:[#allocation31_spill] sm:$0xff] %v10954_v47  ;;  %5784 = vmatmul.bf16.gmra.mxu2 %v8213_v38  ;;  %v4665_v31 = vrot.slane %v4664_v63, 4  ;;  %v5156_v25 = vrot.slane %v5154_v34, 4  ;;  %v5157_v32 = vshll.u32 %v4982_v29, 16  ;;  %v5163_v8 = vshll.u32 %v4983_v59, 16 }
 0x48f   : > { %11371 = vst [vmem:[#allocation30_spill] sm:$0xff] %v10956_v27  ;;  %v6316_v43 = vld [vmem:[#allocation2 + $0x6c] sm:$0xf]  ;;  %v4675_v26 = vrot.slane %v4674_v23, 4  ;;  %v5167_v57 = vshrl.u32 %v4983_v59, 16  ;;  %v5173_v6 = vshll.u32 %v4984_v1, 16 }
 0x490   : > { %4959 = vst [vmem:[#allocation3 + $0xa8] sm:$0xf] %v4943_v2  ;;  %v8216_v2 = vld [vmem:[#allocation3 + $0x98] sm:$0xf]  ;;  %v6277_v38 = vld [vmem:[#allocation2 + $0x6c] sm:$0xf]  ;;  %v4670_v7 = vsel %vm9871_vm11, %v4665_v31, %v4669_v53 }
 0x491   : > { %4960 = vst [vmem:[#allocation3 + $0xb4] sm:$0xf] %v4944_v49  ;;  %v6488_v27 = vshrl.u32 %v6316_v43, 16  ;;  %v6278_v14 = vld [vmem:[#allocation2 + $0x70] sm:$0xf]  ;;  %v5159_v45 = vrot.slane %v5157_v32, 5  ;;  %v4680_v29 = vsel %vm9871_vm11, %v4675_v26, %v4679_v36 }
 0x492   : > { %6675 = vst [vmem:[#allocation3 + $0x98] sm:$0xf] %v6636_v3  ;;  %v5165_v62 = vrot.slane %v5163_v8, 5  ;;  %v5169_v33 = vrot.slane %v5167_v57, 4  ;;  %v6317_v63 = vld [vmem:[#allocation2 + $0x70] sm:$0xf] }
 0x493   : > { %v8960_v9 = vld [vmem:[#allocation3 + $0xa0] sm:$0xf0]  ;;  %4711 = vst [vmem:[#allocation3 + $0xac] sm:$0xf] %v4670_v7  ;;  %v5160_v34 = vor.u32 %v5159_v45, %v5156_v25  ;;  %v5175_v23 = vrot.slane %v5173_v6, 5  ;;  %v6490_v59 = vrot.slane %v6488_v27, 4  ;;  %v5706_v6 = vpop.f32.mrf.mxu1 }
 0x494   : > { %v8217_v49 = vor.u32 %v8960_v9, %v8216_v2  ;;  %6676 = vst [vmem:[#allocation3 + $0xa4] sm:$0xf] %v6639_v12  ;;  %v6491_v1 = vshll.u32 %v6316_v43, 16  ;;  %v5170_v47 = vor.u32 %v5169_v33, %v5165_v62  ;;  %v6318_v40 = vld [vmem:[#allocation2 + $0x74] sm:$0x1]  ;;  %v6497_v53 = vshll.u32 %v6317_v63, 16 }
 0x495   : > { %4712 = vst [vmem:[#allocation3 + $0xb8] sm:$0xf] %v4680_v29  ;;  %v6501_v31 = vshrl.u32 %v6317_v63, 16  ;;  %v5161_v12 = vrot.slane %v5160_v34, 4  ;;  %v8935_v25 = vld [vmem:[#allocation9 + $0x98] sm:$0xff]  ;;  %v8916_v9 = vld [vmem:[#allocation9] sm:$0xff] }
 0x496   : > { %5833 = vmatmul.bf16.gmra.mxu3 %v8217_v49  ;;  %v6493_v8 = vrot.slane %v6491_v1, 5  ;;  %v5171_v36 = vrot.slane %v5170_v47, 4  ;;  %v6499_v26 = vrot.slane %v6497_v53, 5  ;;  %v4734_v27 = vld [vmem:[#allocation2 + $0x54] sm:$0xe]  ;;  %v6507_v33 = vshll.u32 %v6318_v40, 16  ;;  %6123 = vmatpush.bf16.msrb.mxu1 %v8916_v9 }
 0x497   : > { %v8220_v3 = vld [vmem:[#allocation3 + $0xa8] sm:$0xf]  ;;  %v6503_v57 = vrot.slane %v6501_v31, 4  ;;  %v5166_v7 = vsel %vm9871_vm11, %v5161_v12, %v5165_v62  ;;  %v4736_v49 = vld [vmem:[#allocation2 + $0x5c] sm:$0x1]  ;;  %v8125_v29 = vrot.slane %v4734_v27, 9  ;;  %6218 = vmatpush.bf16.msra.mxu3 %v8935_v25 }
 0x498   : > { %v8962_v32 = vld [vmem:[#allocation3 + $0xb0] sm:$0xf0]  ;;  %6293 = vst [vmem:[#allocation3 + $0xa8] sm:$0xf] %v6277_v38  ;;  %v4735_v43 = vld [vmem:[#allocation2 + $0x58] sm:$0xf]  ;;  %v6494_v45 = vor.u32 %v6493_v8, %v6490_v59 }
 0x499   : > { %v8221_v2 = vor.u32 %v8962_v32, %v8220_v3  ;;  %6294 = vst [vmem:[#allocation3 + $0xb4] sm:$0xf] %v6278_v14  ;;  %v4812_v38 = vrot.slane %v4735_v43, 5  ;;  %v5176_v14 = vsel %vm9871_vm11, %v5171_v36, %v5175_v23  ;;  %v6504_v47 = vor.u32 %v6503_v57, %v6499_v26  ;;  %v5231_v34 = vld [vmem:[#allocation2 + $0x64] sm:$0xf]  ;;  %v8934_v36 = vld [vmem:[#allocation9 + $0x90] sm:$0xff] }
 0x49a   : > { %v4815_v63 = vrot.slane %v4736_v49, 5  ;;  %v10970_v1 = vld [vmem:[#allocation3 + $0xac] sm:$0xf]  ;;  %v5230_v62 = vld [vmem:[#allocation2 + $0x60] sm:$0xe]  ;;  %v5308_v31 = vrot.slane %v5231_v34, 5 }
 0x49b   : > { %5740 = vmatmul.bf16.gmra.mxu1 %v8221_v2  ;;  %v4813_v3 = vsel %vm10014_vm14, %v8125_v29, %v4812_v38  ;;  %v4814_v53 = vrot.slane %v4812_v38, 4  ;;  %5207 = vst [vmem:[#allocation3 + $0xac] sm:$0xf] %v5166_v7  ;;  %v6495_v32 = vrot.slane %v6494_v45, 4  ;;  %v5232_v40 = vld [vmem:[#allocation2 + $0x68] sm:$0x1]  ;;  %6219 = vmatpush.bf16.msra.mxu3 %v8934_v36  ;;  %v5755_v45 = vpop.f32.mrf.mxu2  ;;  %v10980_v29 = vpop.f32.mrf.mxu1 }
 0x49c   : > { %v10974_v59 = vld [vmem:[#allocation3 + $0xb4] sm:$0xf0]  ;;  %v6505_v12 = vrot.slane %v6504_v47, 4  ;;  %v6509_v8 = vrot.slane %v6507_v33, 5  ;;  %4847 = vst [vmem:[#allocation3 + $0xb0] sm:$0xf] %v4813_v3  ;;  %v5804_v47 = vpop.f32.mrf.mxu3 }
 0x49d   : > { %5208 = vst [vmem:[#allocation3 + $0xb8] sm:$0xf] %v5176_v14  ;;  %v4816_v23 = vsel %vm10014_vm14, %v4814_v53, %v4815_v63  ;;  %v8133_v2 = vrot.slane %v5230_v62, 9  ;;  %v5310_v57 = vrot.slane %v5308_v31, 4  ;;  %v5311_v25 = vrot.slane %v5232_v40, 5  ;;  %v9035_v27 = vld [vmem:[#allocation9 + $0x238] sm:$0xff] }
 0x49e   : > { %4848 = vst [vmem:[#allocation3 + $0xbc] sm:$0xf] %v4816_v23  ;;  %v6500_v43 = vsel %vm9871_vm11, %v6495_v32, %v6499_v26  ;;  %v6565_v9 = vld [vmem:[#allocation2 + $0x70] sm:$0xf]  ;;  %v8933_v7 = vld [vmem:[#allocation9 + $0x88] sm:$0xff]  ;;  %v9027_v49 = vld [vmem:[#allocation9 + $0x1f8] sm:$0xff]  ;;  %v6510_v38 = vsel %vm9871_vm11, %v6505_v12, %v6509_v8  ;;  %7129 = vmatpush.bf16.msra.mxu2 %v9035_v27  ;;  %v5756_v14 = vadd.f32 %v5755_v45, %v5706_v6 }
 0x49f   : > { %v5309_v63 = vsel %vm10014_vm14, %v8133_v2, %v5308_v31  ;;  %v6564_v34 = vld [vmem:[#allocation2 + $0x6c] sm:$0xe]  ;;  %v6566_v3 = vld [vmem:[#allocation2 + $0x74] sm:$0x1]  ;;  %7080 = vmatpush.bf16.msra.mxu1 %v9027_v49  ;;  %v5312_v53 = vsel %vm10014_vm14, %v5310_v57, %v5311_v25  ;;  %v6642_v62 = vrot.slane %v6565_v9, 5  ;;  %6220 = vmatpush.bf16.msra.mxu3 %v8933_v7  ;;  %v8932_v6 = vld [vmem:[#allocation9 + $0x80] sm:$0xff]  ;;  %v8329_v31 = vor.u32 %v10691_v0, %v10687_v11 }
 0x4a0   : > { %v10988_v32 = vadd.f32 %v5804_v47, %v5756_v14  ;;  %v8525_v12 = vrot.slane %v6564_v34, 9  ;;  %v9034_v8 = vld [vmem:[#allocation9 + $0x230] sm:$0xff]  ;;  %v6645_v36 = vrot.slane %v6566_v3, 5  ;;  %v9033_v34 = vld [vmem:[#allocation9 + $0x228] sm:$0xff] }
 0x4a1   : > { %v6644_v2 = vrot.slane %v6642_v62, 4  ;;  %v9026_v49 = vld [vmem:[#allocation9 + $0x1f0] sm:$0xff] }
 0x4a2   : > { %v8961_v33 = vld [vmem:[#allocation3 + $0xac] sm:$0xf]  ;;  %7130 = vmatpush.bf16.msra.mxu2 %v9034_v8  ;;  %v6643_v11 = vsel %vm10014_vm14, %v8525_v12, %v6642_v62  ;;  %v8337_v62 = vor.u32 %v10730_v16, %v10726_v4  ;;  %v8353_v12 = vor.u32 %v10770_v46, %v10768_v55  ;;  %v9032_v8 = vld [vmem:[#allocation9 + $0x220] sm:$0xff]  ;;  %v8357_v55 = vor.u32 %v10782_v44, %v10788_v48 }
 0x4a3   : > { %6541 = vst [vmem:[#allocation3 + $0xac] sm:$0xf] %v6500_v43  ;;  %v10990_v23 = vld [vmem:[#allocation3 + $0xb0] sm:$0xf]  ;;  %6221 = vmatpush.bf16.msra.mxu3 %v8932_v6  ;;  %v10996_v57 = vpop.f32.mrf.mxu2  ;;  %v5711_v25 = vpop.f32.mrf.mxu1  ;;  %v6646_v0 = vsel %vm10014_vm14, %v6644_v2, %v6645_v36  ;;  %7081 = vmatpush.bf16.msra.mxu1 %v9026_v49  ;;  %v8349_v36 = vor.u32 %v10766_v28, %v10762_v20  ;;  %v9023_v48 = vld [vmem:[#allocation9 + $0x1d8] sm:$0xff] }
 0x4a4   : > { %v8222_v26 = vld [vmem:[#allocation3 + $0xb4] sm:$0xf0]  ;;  %5343 = vst [vmem:[#allocation3 + $0xb0] sm:$0xf] %v5309_v63  ;;  %v10998_v27 = vpop.f32.mrf.mxu3 }
 0x4a5   : > { %v8225_v35 = vor.u32 %v8961_v33, %v8222_v26  ;;  %6542 = vst [vmem:[#allocation3 + $0xb8] sm:$0xf] %v6510_v38  ;;  %v10994_v40 = vld [vmem:[#allocation3 + $0xb8] sm:$0xf0]  ;;  %v8333_v33 = vor.u32 %v10710_v30, %v10714_v56 }
 0x4a6   : > { %5344 = vst [vmem:[#allocation3 + $0xbc] sm:$0xf] %v5312_v53  ;;  %7131 = vmatpush.bf16.msra.mxu2 %v9033_v34  ;;  %v9025_v56 = vld [vmem:[#allocation9 + $0x1e8] sm:$0xff] }
 0x4a7   : > { %5789 = vmatmul.bf16.gmra.mxu2 %v8225_v35  ;;  %7082 = vmatpush.bf16.msra.mxu1 %v9025_v56  ;;  %v8381_v56 = vor.u32 %v10859_v21, %v10861_v10  ;;  %v9021_v10 = vld [vmem:[#allocation9 + $0x1c8] sm:$0xff] }
 0x4aa   : > { %7132 = vmatpush.bf16.msra.mxu2 %v9032_v8 }
 0x4ab   : > { %6124 = vmatmul.bf16.vlgmr.msrb.gmra.mxu1 %v8329_v31  ;;  %v8228_v43 = vld [vmem:[#allocation3 + $0xb0] sm:$0xf]  ;;  %v5760_v45 = vpop.f32.mrf.mxu2  ;;  %v11004_v38 = vpop.f32.mrf.mxu1 }
 0x4ac   : > { %6677 = vst [vmem:[#allocation3 + $0xb0] sm:$0xf] %v6643_v11  ;;  %v5761_v14 = vadd.f32 %v5760_v45, %v5711_v25  ;;  %v5809_v47 = vpop.f32.mrf.mxu3  ;;  %7083 = vmatpush.bf16.msra.mxu1 %v9024_v52  ;;  %v8361_v45 = vor.u32 %v10805_v60, %v10801_v54 }
 0x4ad   : > { %v8963_v9 = vld [vmem:[#allocation3 + $0xb8] sm:$0xf0] }
 0x4ae   : > { %v8229_v7 = vor.u32 %v8963_v9, %v8228_v43  ;;  %6678 = vst [vmem:[#allocation3 + $0xbc] sm:$0xf] %v6646_v0  ;;  %v11008_v63 = vadd.f32 %v5809_v47, %v5761_v14  ;;  %v8365_v43 = vor.u32 %v10809_v39, %v10807_v42  ;;  %v9031_v9 = vld [vmem:[#allocation9 + $0x218] sm:$0xff]  ;;  %v8369_v42 = vor.u32 %v10821_v58, %v10829_v5  ;;  %v9022_v5 = vld [vmem:[#allocation9 + $0x1d0] sm:$0xff] }
 0x4af   : > { %7133 = vmatpush.bf16.msra.mxu2 %v9031_v9 }
 0x4b0   : > { %5838 = vmatmul.bf16.gmra.mxu3 %v8229_v7  ;;  %7084 = vmatpush.bf16.msra.mxu1 %v9023_v48  ;;  %v11376_v48 = vld [vmem:[#allocation25_spill] sm:$0xff] }
 0x4b3   : > { %v11012_v3 = vpop.f32.mrf.mxu2  ;;  %v5716_v26 = vpop.f32.mrf.mxu1 }
 0x4b4   : > { %v11014_v53 = vpop.f32.mrf.mxu3  ;;  %7085 = vmatpush.bf16.msra.mxu1 %v9022_v5 }
 0x4b7   : > { %6173 = vmatmul.bf16.vlgmr.msrb.gmra.mxu2 %v8333_v33  ;;  %v8377_v33 = vor.u32 %v10847_v18, %v10843_v51  ;;  %v8389_v51 = vor.u32 %v10881_v41, %v10879_v50 }
 0x4b8   : > { %7086 = vmatpush.bf16.msra.mxu1 %v9021_v10 }
 0x4bb   : > { %6129 = vmatmul.bf16.gmra.mxu1 %v8341_v37  ;;  %v5765_v30 = vpop.f32.mrf.mxu2  ;;  %v11018_v35 = vpop.f32.mrf.mxu1  ;;  %v9030_v37 = vld [vmem:[#allocation9 + $0x210] sm:$0xff] }
 0x4bc   : > { %v5766_v6 = vadd.f32 %v5765_v30, %v5716_v26  ;;  %v5814_v31 = vpop.f32.mrf.mxu3  ;;  %7134 = vmatpush.bf16.msra.mxu2 %v9030_v37  ;;  %v9019_v30 = vld [vmem:[#allocation9 + $0x1b8] sm:$0xff]  ;;  %v9013_v37 = vld [vmem:[#allocation9 + $0x188] sm:$0xff] }
 0x4bd   : > { %7031 = vmatpush.bf16.msra.mxu0 %v9019_v30  ;;  %v9012_v30 = vld [vmem:[#allocation9 + $0x180] sm:$0xff] }
 0x4be   : > { %v11022_v61 = vadd.f32 %v5814_v31, %v5766_v6  ;;  %v9029_v31 = vld [vmem:[#allocation9 + $0x208] sm:$0xff] }
 0x4c0   : > { %6222 = vmatmul.bf16.vlgmr.msra.gmra.mxu3 %v8337_v62  ;;  %v8373_v62 = vor.u32 %v10841_v17, %v10835_v22  ;;  %7135 = vmatpush.bf16.msra.mxu2 %v9029_v31  ;;  %v8385_v22 = vor.u32 %v10877_v24, %v10875_v19  ;;  %v9015_v24 = vld [vmem:[#allocation9 + $0x198] sm:$0xff] }
 0x4c3   : > { %v11026_v4 = vpop.f32.mrf.mxu2  ;;  %v5721_v16 = vpop.f32.mrf.mxu1 }
 0x4c4   : > { %v11028_v2 = vpop.f32.mrf.mxu3 }
 0x4c7   : > { %6178 = vmatmul.bf16.gmra.mxu2 %v8345_v13  ;;  %v9018_v13 = vld [vmem:[#allocation9 + $0x1b0] sm:$0xff] }
 0x4c8   : > { %7032 = vmatpush.bf16.msra.mxu0 %v9018_v13 }
 0x4cb   : > { %6134 = vmatmul.bf16.gmra.mxu1 %v8353_v12  ;;  %v5770_v15 = vpop.f32.mrf.mxu2  ;;  %v11032_v25 = vpop.f32.mrf.mxu1 }
 0x4cc   : > { %v5771_v11 = vadd.f32 %v5770_v15, %v5721_v16  ;;  %v5819_v0 = vpop.f32.mrf.mxu3  ;;  %v9017_v16 = vld [vmem:[#allocation9 + $0x1a8] sm:$0xff]  ;;  %v11373_v15 = vld [vmem:[#allocation35_spill] sm:$0xff] }
 0x4cd   : > { %7033 = vmatpush.bf16.msra.mxu0 %v9017_v16 }
 0x4ce   : > { %v11036_v46 = vadd.f32 %v5819_v0, %v5771_v11  ;;  %v9016_v11 = vld [vmem:[#allocation9 + $0x1a0] sm:$0xff] }
 0x4d0   : > { %6227 = vmatmul.bf16.gmra.mxu3 %v8349_v36  ;;  %v11372_v36 = vld [vmem:[#allocation26_spill] sm:$0xff] }
 0x4d1   : > { %v8393_v52 = vor.u32 %v11373_v15, %v11372_v36  ;;  %7034 = vmatpush.bf16.msra.mxu0 %v9016_v11  ;;  %v8988_v36 = vld [vmem:[#allocation3 + $0x4] sm:$0xf]  ;;  %v8530_v15 = vld [vmem:[#allocation3 + $0xc] sm:$0xf0] }
 0x4d2   : > { %v8533_v11 = vor.u32 %v8988_v36, %v8530_v15 }
 0x4d3   : > { %v11040_v20 = vpop.f32.mrf.mxu2  ;;  %v5726_v28 = vpop.f32.mrf.mxu1 }
 0x4d4   : > { %v11042_v7 = vpop.f32.mrf.mxu3 }
 0x4d5   : > { %7035 = vmatpush.bf16.msra.mxu0 %v9015_v24 }
 0x4d7   : > { %6183 = vmatmul.bf16.gmra.mxu2 %v8357_v55  ;;  %v11374_v55 = vld [vmem:[#allocation38_spill] sm:$0xff] }
 0x4db   : > { %6139 = vmatmul.bf16.gmra.mxu1 %v8365_v43  ;;  %v5775_v44 = vpop.f32.mrf.mxu2  ;;  %v5728_v39 = vpop.f32.mrf.mxu1  ;;  %v11375_v43 = vld [vmem:[#allocation40_spill] sm:$0xff] }
 0x4dc   : > { %v5776_v49 = vadd.f32 %v5775_v44, %v5726_v28  ;;  %v8401_v9 = vor.u32 %v11375_v43, %v11374_v55  ;;  %v9028_v28 = vld [vmem:[#allocation9 + $0x200] sm:$0xff]  ;;  %v8992_v55 = vld [vmem:[#allocation3 + $0x20] sm:$0xf0] }
 0x4dd   : > { %7136 = vmatpush.bf16.msra.mxu2 %v9028_v28  ;;  %v5758_v28 = vadd.f32 %v10996_v57, %v10980_v29 }
 0x4e0   : > { %6232 = vmatmul.bf16.gmra.mxu3 %v8361_v45  ;;  %v5824_v14 = vpop.f32.mrf.mxu3  ;;  %v9014_v45 = vld [vmem:[#allocation9 + $0x190] sm:$0xff] }
 0x4e1   : > { %v11048_v47 = vadd.f32 %v5824_v14, %v5776_v49  ;;  %v11377_v49 = vld [vmem:[#allocation39_spill] sm:$0xff]  ;;  %7036 = vmatpush.bf16.msra.mxu0 %v9014_v45 }
 0x4e2   : > { %v8397_v14 = vor.u32 %v11377_v49, %v11376_v48  ;;  %v5807_v48 = vadd.f32 %v10998_v27, %v5758_v28  ;;  %v8996_v28 = vld [vmem:[#allocation3 + $0x40] sm:$0xf0] }
 0x4e3   : > { %v5777_v34 = vpop.f32.mrf.mxu2  ;;  %v5731_v58 = vpop.f32.mrf.mxu1 }
 0x4e4   : > { %v5778_v54 = vadd.f32 %v5777_v34, %v5728_v39  ;;  %v9020_v39 = vld [vmem:[#allocation9 + $0x1c0] sm:$0xff]  ;;  %v11378_v34 = vld [vmem:[#allocation27_spill] sm:$0xff] }
 0x4e5   : > { %7087 = vmatpush.bf16.msra.mxu1 %v9020_v39  ;;  %7037 = vmatpush.bf16.msra.mxu0 %v9013_v37 }
 0x4e7   : > { %6188 = vmatmul.bf16.gmra.mxu2 %v8369_v42 }
 0x4e8   : > { %v5826_v60 = vpop.f32.mrf.mxu3 }
 0x4e9   : > { %v11052_v26 = vadd.f32 %v5826_v60, %v5778_v54  ;;  %v11379_v54 = vld [vmem:[#allocation28_spill] sm:$0xff]  ;;  %7038 = vmatpush.bf16.msra.mxu0 %v9012_v30 }
 0x4ea   : > { %v8405_v60 = vor.u32 %v11379_v54, %v11378_v34 }
 0x4eb   : > { %6144 = vmatmul.bf16.gmra.mxu1 %v8377_v33  ;;  %v5733_v12 = vpop.f32.mrf.mxu1 }
 0x4f0   : > { %6237 = vmatmul.bf16.gmra.mxu3 %v8373_v62  ;;  %v11380_v62 = vld [vmem:[#allocation31_spill] sm:$0xff] }
 0x4f5   : > { %v5780_v18 = vpop.f32.mrf.mxu2 }
 0x4f6   : > { %v5781_v6 = vadd.f32 %v5780_v18, %v5731_v58  ;;  %v11381_v58 = vld [vmem:[#allocation30_spill] sm:$0xff] }
 0x4f7   : > { %6193 = vmatmul.bf16.gmra.mxu2 %v8381_v56  ;;  %v8413_v5 = vor.u32 %v11381_v58, %v11380_v62  ;;  %v8528_v56 = vld [vmem:[#allocation3] sm:$0xf]  ;;  %v8995_v62 = vld [vmem:[#allocation3 + $0x38] sm:$0xf0]  ;;  %v5763_v58 = vadd.f32 %v11012_v3, %v11004_v38 }
 0x4fb   : > { %6149 = vmatmul.bf16.gmra.mxu1 %v8389_v51  ;;  %v5736_v41 = vpop.f32.mrf.mxu1  ;;  %v8989_v51 = vld [vmem:[#allocation3 + $0x8] sm:$0xf0] }
 0x4fc   : > { %v5829_v17 = vpop.f32.mrf.mxu3 }
 0x4fd   : > { %v11062_v8 = vadd.f32 %v5829_v17, %v5781_v6  ;;  %v5782_v21 = vpop.f32.mrf.mxu2  ;;  %v8529_v6 = vor.u32 %v8989_v51, %v8528_v56  ;;  %v11382_v17 = vld [vmem:[#allocation32_spill] sm:$0xff]  ;;  %v5812_v51 = vadd.f32 %v11014_v53, %v5763_v58  ;;  %v8588_v58 = vld [vmem:[#allocation3 + $0x78] sm:$0xf] }
 0x4fe   : > { %v5783_v50 = vadd.f32 %v5782_v21, %v5733_v12  ;;  %v11383_v21 = vld [vmem:[#allocation33_spill] sm:$0xff] }
 0x4ff   : > { %7039 = vmatmul.bf16.vlgmr.msra.gmra.mxu0 %v8529_v6  ;;  %v8409_v10 = vor.u32 %v11383_v21, %v11382_v17  ;;  %v8554_v21 = vld [vmem:[#allocation3 + $0x3c] sm:$0xf0] }
 0x500   : > { %6242 = vmatmul.bf16.gmra.mxu3 %v8385_v22 }
 0x503   : > { %v5738_v44 = vpop.f32.mrf.mxu1 }
 0x504   : > { %v5831_v0 = vpop.f32.mrf.mxu3 }
 0x505   : > { %v11068_v19 = vadd.f32 %v5831_v0, %v5783_v50  ;;  %v8540_v0 = vld [vmem:[#allocation3 + $0x18] sm:$0xf] }
 0x506   : > { %v8541_v24 = vor.u32 %v8992_v55, %v8540_v0 }
 0x507   : > { %6198 = vmatmul.bf16.gmra.mxu2 %v8393_v52  ;;  %v8417_v52 = vor.u32 %v10970_v1, %v10974_v59  ;;  %v8421_v1 = vor.u32 %v10994_v40, %v10990_v23 }
 0x50b   : > { %6154 = vmatmul.bf16.gmra.mxu1 %v8401_v9 }
 0x50f   : > { %7044 = vmatmul.bf16.gmra.mxu0 %v8541_v24  ;;  %v8560_v24 = vld [vmem:[#allocation3 + $0x38] sm:$0xf] }
 0x510   : > { %6247 = vmatmul.bf16.gmra.mxu3 %v8397_v14  ;;  %v8536_v14 = vld [vmem:[#allocation3 + $0x8] sm:$0xf] }
 0x511   : > { %v5785_v42 = vpop.f32.mrf.mxu2 }
 0x512   : > { %v5786_v33 = vadd.f32 %v5785_v42, %v5736_v41  ;;  %v8990_v42 = vld [vmem:[#allocation3 + $0x10] sm:$0xf0] }
 0x513   : > { %v8537_v34 = vor.u32 %v8990_v42, %v8536_v14 }
 0x517   : > { %6203 = vmatmul.bf16.gmra.mxu2 %v8405_v60  ;;  %v8552_v60 = vld [vmem:[#allocation3 + $0x30] sm:$0xf] }
 0x518   : > { %v5741_v18 = vpop.f32.mrf.mxu1  ;;  %v8553_v40 = vor.u32 %v8995_v62, %v8552_v60  ;;  %v9000_v62 = vld [vmem:[#allocation3 + $0x64] sm:$0xf] }
 0x519   : > { %v5834_v31 = vpop.f32.mrf.mxu3  ;;  %v5787_v12 = vpop.f32.mrf.mxu2 }
 0x51a   : > { %v11076_v13 = vadd.f32 %v5834_v31, %v5786_v33  ;;  %v5788_v22 = vadd.f32 %v5787_v12, %v5738_v44  ;;  %v8542_v33 = vld [vmem:[#allocation3 + $0x24] sm:$0xf0]  ;;  %v8548_v12 = vld [vmem:[#allocation3 + $0x20] sm:$0xf] }
 0x51b   : > { %6159 = vmatmul.bf16.gmra.mxu1 %v8413_v5 }
 0x51f   : > { %7049 = vmatmul.bf16.gmra.mxu0 %v8553_v40 }
 0x520   : > { %v5743_v16 = vpop.f32.mrf.mxu1  ;;  %6252 = vmatmul.bf16.gmra.mxu3 %v8409_v10 }
 0x521   : > { %v5836_v50 = vpop.f32.mrf.mxu3 }
 0x522   : > { %v11080_v41 = vadd.f32 %v5836_v50, %v5788_v22  ;;  %v8993_v22 = vld [vmem:[#allocation3 + $0x28] sm:$0xf0]  ;;  %v8998_v50 = vld [vmem:[#allocation3 + $0x50] sm:$0xf0] }
 0x523   : > { %v8549_v38 = vor.u32 %v8993_v22, %v8548_v12  ;;  %v8584_v12 = vld [vmem:[#allocation3 + $0x68] sm:$0xf]  ;;  %v9002_v22 = vld [vmem:[#allocation3 + $0x70] sm:$0xf0] }
 0x527   : > { %6208 = vmatmul.bf16.gmra.mxu2 %v8417_v52  ;;  %v5768_v52 = vadd.f32 %v11026_v4, %v11018_v35  ;;  %v9001_v35 = vld [vmem:[#allocation3 + $0x68] sm:$0xf0] }
 0x528   : > { %v6125_v43 = vpop.f32.mrf.mxu1 }
 0x529   : > { %v6126_v9 = vadd.f32 %v6125_v43, %v10988_v32  ;;  %v8991_v32 = vld [vmem:[#allocation3 + $0x1c] sm:$0xf]  ;;  %v5817_v55 = vadd.f32 %v11028_v2, %v5768_v52  ;;  %v5773_v2 = vadd.f32 %v11040_v20, %v11032_v25  ;;  %v9004_v25 = vld [vmem:[#allocation3 + $0x80] sm:$0xf0] }
 0x52a   : > { %v5790_v45 = vpop.f32.mrf.mxu2  ;;  %v8545_v54 = vor.u32 %v8991_v32, %v8542_v33 }
 0x52b   : > { %7088 = vmatmul.bf16.vlgmr.msra.gmra.mxu1 %v8533_v11  ;;  %v5791_v44 = vadd.f32 %v5790_v45, %v5741_v18  ;;  %v5822_v33 = vadd.f32 %v11042_v7, %v5773_v2 }
 0x530   : > { %v6127_v59 = vpop.f32.mrf.mxu1  ;;  %6257 = vmatmul.bf16.gmra.mxu3 %v8421_v1 }
 0x531   : > { %v6128_v49 = vadd.f32 %v6127_v59, %v5807_v48  ;;  %v8566_v48 = vld [vmem:[#allocation3 + $0x54] sm:$0xf0] }
 0x532   : > { %v5792_v39 = vpop.f32.mrf.mxu2 }
 0x533   : > { %v5793_v37 = vadd.f32 %v5792_v39, %v5743_v16  ;;  %v5839_v29 = vpop.f32.mrf.mxu3  ;;  %v8564_v16 = vld [vmem:[#allocation3 + $0x48] sm:$0xf] }
 0x534   : > { %v11090_v57 = vadd.f32 %v5839_v29, %v5791_v44  ;;  %v8565_v53 = vor.u32 %v8998_v50, %v8564_v16  ;;  %v8997_v44 = vld [vmem:[#allocation3 + $0x4c] sm:$0xf]  ;;  %v8572_v29 = vld [vmem:[#allocation3 + $0x50] sm:$0xf] }
 0x535   : > { %v8569_v59 = vor.u32 %v8997_v44, %v8566_v48  ;;  %v8600_v50 = vld [vmem:[#allocation3 + $0x90] sm:$0xf] }
 0x536   : > { %7054 = vmatmul.bf16.gmra.mxu0 %v8565_v53 }
 0x537   : > { %7137 = vmatmul.bf16.vlgmr.msra.gmra.mxu2 %v8537_v34 }
 0x538   : > { %v6130_v27 = vpop.f32.mrf.mxu1 }
 0x539   : > { %v6131_v23 = vadd.f32 %v6130_v27, %v11008_v63  ;;  %v8994_v63 = vld [vmem:[#allocation3 + $0x34] sm:$0xf]  ;;  %v8578_v27 = vld [vmem:[#allocation3 + $0x6c] sm:$0xf0] }
 0x53a   : > { %v6174_v5 = vpop.f32.mrf.mxu2  ;;  %v8557_v3 = vor.u32 %v8994_v63, %v8554_v21  ;;  %v8581_v40 = vor.u32 %v9000_v62, %v8578_v27  ;;  %v9003_v63 = vld [vmem:[#allocation3 + $0x7c] sm:$0xf]  ;;  %v8590_v21 = vld [vmem:[#allocation3 + $0x84] sm:$0xf0] }
 0x53b   : > { %7093 = vmatmul.bf16.gmra.mxu1 %v8545_v54  ;;  %v11095_v30 = vadd.f32 %v6174_v5, %v6126_v9  ;;  %v5841_v56 = vpop.f32.mrf.mxu3  ;;  %v8999_v54 = vld [vmem:[#allocation3 + $0x58] sm:$0xf0]  ;;  %v8593_v16 = vor.u32 %v9003_v63, %v8590_v21 }
 0x53c   : > { %v11098_v18 = vadd.f32 %v5841_v56, %v5793_v37  ;;  %v8589_v56 = vor.u32 %v9004_v25, %v8588_v58 }
 0x540   : > { %v6132_v6 = vpop.f32.mrf.mxu1 }
 0x541   : > { %v6133_v31 = vadd.f32 %v6132_v6, %v5812_v51 }
 0x542   : > { %v6176_v17 = vpop.f32.mrf.mxu2 }
 0x543   : > { %v11100_v10 = vadd.f32 %v6176_v17, %v6128_v49  ;;  %v8576_v49 = vld [vmem:[#allocation3 + $0x60] sm:$0xf] }
 0x544   : > { %v8577_v42 = vor.u32 %v9001_v35, %v8576_v49 }
 0x546   : > { %7059 = vmatmul.bf16.gmra.mxu0 %v8577_v42 }
 0x547   : > { %7142 = vmatmul.bf16.gmra.mxu2 %v8549_v38 }
 0x548   : > { %v6135_v36 = vpop.f32.mrf.mxu1 }
 0x549   : > { %v6136_v15 = vadd.f32 %v6135_v36, %v11022_v61  ;;  %v8561_v61 = vor.u32 %v8996_v28, %v8560_v24  ;;  %v9006_v28 = vld [vmem:[#allocation3 + $0x94] sm:$0xf] }
 0x54a   : > { %v6179_v11 = vpop.f32.mrf.mxu2 }
 0x54b   : > { %7098 = vmatmul.bf16.gmra.mxu1 %v8557_v3  ;;  %v11105_v0 = vadd.f32 %v6179_v11, %v6131_v23  ;;  %v8585_v3 = vor.u32 %v9002_v22, %v8584_v12 }
 0x550   : > { %v6137_v43 = vpop.f32.mrf.mxu1 }
 0x551   : > { %v6138_v9 = vadd.f32 %v6137_v43, %v5817_v55  ;;  %v8596_v43 = vld [vmem:[#allocation3 + $0x80] sm:$0xf] }
 0x552   : > { %v6181_v45 = vpop.f32.mrf.mxu2 }
 0x553   : > { %v11108_v1 = vadd.f32 %v6181_v45, %v6133_v31  ;;  %v8602_v45 = vld [vmem:[#allocation3 + $0x9c] sm:$0xf0] }
 0x556   : > { %7064 = vmatmul.bf16.gmra.mxu0 %v8589_v56  ;;  %v9011_v56 = vld [vmem:[#allocation3 + $0xb8] sm:$0xf0] }
 0x557   : > { %7147 = vmatmul.bf16.gmra.mxu2 %v8561_v61  ;;  %v8605_v61 = vor.u32 %v9006_v28, %v8602_v45  ;;  %v9038_v28 = vld [vmem:[%s9740_s7] sm:$0xff]  }
 0x558   : > { %v6140_v4 = vpop.f32.mrf.mxu1 }
 0x559   : > { %v6141_v14 = vadd.f32 %v6140_v4, %v11036_v46  ;;  %v8573_v46 = vor.u32 %v8999_v54, %v8572_v29  ;;  %v8614_v29 = vld [vmem:[#allocation3 + $0xb4] sm:$0xf0] }
 0x55a   : > { %v6184_v39 = vpop.f32.mrf.mxu2 }
 0x55b   : > { %7103 = vmatmul.bf16.gmra.mxu1 %v8569_v59  ;;  %v11113_v32 = vadd.f32 %v6184_v39, %v6136_v15  ;;  %v8612_v59 = vld [vmem:[#allocation3 + $0xa8] sm:$0xf]  ;;  %v8608_v39 = vld [vmem:[#allocation3 + $0x98] sm:$0xf] }
 0x560   : > { %v6142_v37 = vpop.f32.mrf.mxu1 }
 0x561   : > { %v6143_v34 = vadd.f32 %v6142_v37, %v5822_v33  ;;  %v9008_v33 = vld [vmem:[#allocation3 + $0xa0] sm:$0xf0] }
 0x562   : > { %v6186_v60 = vpop.f32.mrf.mxu2 }
 0x563   : > { %v11116_v23 = vadd.f32 %v6186_v60, %v6138_v9  ;;  %v9005_v9 = vld [vmem:[#allocation3 + $0x88] sm:$0xf0]  ;;  %v8609_v60 = vor.u32 %v9008_v33, %v8608_v39 }
 0x564   : > { %v8597_v48 = vor.u32 %v9005_v9, %v8596_v43 }
 0x567   : > { %7152 = vmatmul.bf16.gmra.mxu2 %v8573_v46  ;;  %v6223_v46 = vpop.f32.mrf.mxu3 }
 0x568   : > { %v6145_v20 = vpop.f32.mrf.mxu1 }
 0x569   : > { %v6146_v5 = vadd.f32 %v6145_v20, %v11048_v47  ;;  %v9007_v47 = vld [vmem:[#allocation3 + $0x98] sm:$0xf0] }
 0x56a   : > { %v6189_v7 = vpop.f32.mrf.mxu2  ;;  %v8601_v53 = vor.u32 %v9007_v47, %v8600_v50 }
 0x56b   : > { %7108 = vmatmul.bf16.gmra.mxu1 %v8581_v40  ;;  %v11119_v51 = vadd.f32 %v6189_v7, %v6141_v14 }
 0x56c   : > { %7069 = vmatmul.bf16.gmra.mxu0 %v8601_v53 }
 0x570   : > { %v6147_v6 = vpop.f32.mrf.mxu1 }
 0x571   : > { %v6148_v31 = vadd.f32 %v6147_v6, %v11052_v26  ;;  %v6225_v6 = vpop.f32.mrf.mxu3 }
 0x572   : > { %v6191_v17 = vpop.f32.mrf.mxu2 }
 0x573   : > { %v11122_v38 = vadd.f32 %v6191_v17, %v6143_v34  ;;  %v9009_v34 = vld [vmem:[#allocation3 + $0xac] sm:$0xf] }
 0x574   : > { %v8617_v62 = vor.u32 %v9009_v34, %v8614_v29 }
 0x577   : > { %7157 = vmatmul.bf16.gmra.mxu2 %v8585_v3 }
 0x578   : > { %v6150_v36 = vpop.f32.mrf.mxu1 }
 0x579   : > { %v6151_v15 = vadd.f32 %v6150_v36, %v11062_v8  ;;  %v9010_v8 = vld [vmem:[#allocation3 + $0xb0] sm:$0xf0]  ;;  %v6228_v21 = vpop.f32.mrf.mxu3 }
 0x57a   : > { %v6194_v52 = vpop.f32.mrf.mxu2  ;;  %v8613_v4 = vor.u32 %v9010_v8, %v8612_v59  ;;  %v6226_v8 = vadd.f32 %v6225_v6, %v11100_v10 }
 0x57b   : > { %7113 = vmatmul.bf16.gmra.mxu1 %v8593_v16  ;;  %v11125_v11 = vadd.f32 %v6194_v52, %v6146_v5  ;;  %v8620_v5 = vld [vmem:[#allocation3 + $0xb0] sm:$0xf] }
 0x57c   : > { %7074 = vmatmul.bf16.gmra.mxu0 %v8613_v4  ;;  %v7040_v58 = vpop.f32.mrf.mxu0  ;;  %v8621_v12 = vor.u32 %v9011_v56, %v8620_v5 }
 0x580   : > { %v6152_v26 = vpop.f32.mrf.mxu1 }
 0x581   : > { %v6153_v55 = vadd.f32 %v6152_v26, %v11068_v19  ;;  %v6230_v36 = vpop.f32.mrf.mxu3 }
 0x582   : > { %v6196_v24 = vpop.f32.mrf.mxu2  ;;  %v6231_v56 = vadd.f32 %v6230_v36, %v11108_v1 }
 0x583   : > { %v11128_v44 = vadd.f32 %v6196_v24, %v6148_v31  ;;  %v11150_v24 = vld [vmem:[%s11258_s4] ss:$0 sm:$0xff] }
 0x584   : > { %v7042_v22 = vpop.f32.mrf.mxu0 }
 0x587   : > { %7162 = vmatmul.bf16.gmra.mxu2 %v8597_v48 }
 0x588   : > { %v6155_v49 = vpop.f32.mrf.mxu1 }
 0x589   : > { %v6156_v35 = vadd.f32 %v6155_v49, %v11076_v13  ;;  %v6233_v45 = vpop.f32.mrf.mxu3  ;;  %v9039_v49 = vunpack.c.l.bf16 %v9038_v28 }
 0x58a   : > { %v6199_v14 = vpop.f32.mrf.mxu2  ;;  %v6234_v36 = vadd.f32 %v6233_v45, %v11113_v32 }
 0x58b   : > { %7118 = vmatmul.bf16.gmra.mxu1 %v8605_v61  ;;  %v11131_v42 = vadd.f32 %v6199_v14, %v6151_v15  ;;  %v9040_v14 = vunpack.c.h.bf16 %v9038_v28  ;;  %v9110_v28 = vld [vmem:[%s9740_s7 + $0x10] sm:$0xff]  }
 0x58c   : > { %v7045_v16 = vpop.f32.mrf.mxu0 }
 0x590   : > { %v6157_v19 = vpop.f32.mrf.mxu1 }
 0x591   : > { %v6158_v2 = vadd.f32 %v6157_v19, %v11080_v41  ;;  %v6235_v29 = vpop.f32.mrf.mxu3 }
 0x592   : > { %v6201_v37 = vpop.f32.mrf.mxu2 }
 0x593   : > { %v11134_v54 = vadd.f32 %v6201_v37, %v6153_v55  ;;  %v6224_v55 = vadd.f32 %v6223_v46, %v11095_v30 }
 0x594   : > { %v7047_v53 = vpop.f32.mrf.mxu0 }
 0x597   : > { %7167 = vmatmul.bf16.gmra.mxu2 %v8609_v60 }
 0x598   : > { %v6160_v27 = vpop.f32.mrf.mxu1 }
 0x599   : > { %v6161_v13 = vadd.f32 %v6160_v27, %v11090_v57 }
 0x59a   : > { %v6204_v40 = vpop.f32.mrf.mxu2 }
 0x59b   : > { %7123 = vmatmul.bf16.gmra.mxu1 %v8617_v62  ;;  %v11137_v25 = vadd.f32 %v6204_v40, %v6156_v35 }
 0x59c   : > { %v7050_v59 = vpop.f32.mrf.mxu0 }
 0x5a0   : > { %v6162_v41 = vpop.f32.mrf.mxu1 }
 0x5a1   : > { %v6163_v20 = vadd.f32 %v6162_v41, %v11098_v18  ;;  %v9109_v41 = vld [vmem:[%s9740_s7 + $0x8] sm:$0xff]  }
 0x5a2   : > { %v6206_v7 = vpop.f32.mrf.mxu2 }
 0x5a3   : > { %v11140_v31 = vadd.f32 %v6206_v7, %v6158_v2  ;;  %v9043_v7 = vunpack.c.l.bf16 %v9109_v41 }
 0x5a4   : > { %v7052_v10 = vpop.f32.mrf.mxu0 }
 0x5a7   : > { %7172 = vmatmul.bf16.gmra.mxu2 %v8621_v12 }
 0x5a8   : > { %v7089_v17 = vpop.f32.mrf.mxu1 }
 0x5a9   : > { %v7090_v15 = vadd.f32 %v7089_v17, %v7040_v58  ;;  %v9044_v17 = vunpack.c.h.bf16 %v9109_v41 }
 0x5aa   : > { %v6209_v57 = vpop.f32.mrf.mxu2 }
 0x5ab   : > { %v11142_v63 = vadd.f32 %v6209_v57, %v6161_v13  ;;  %v6229_v13 = vadd.f32 %v6228_v21, %v11105_v0 }
 0x5b0   : > { %v7091_v3 = vpop.f32.mrf.mxu1 }
 0x5b1   : > { %v7092_v48 = vadd.f32 %v7091_v3, %v7042_v22  ;;  %v6238_v22 = vpop.f32.mrf.mxu3 }
 0x5b2   : > { %v6211_v50 = vpop.f32.mrf.mxu2 }
 0x5b3   : > { %v11144_v47 = vadd.f32 %v6211_v50, %v6163_v20  ;;  %v7055_v3 = vpop.f32.mrf.mxu0 }
 0x5b8   : > { %v7094_v18 = vpop.f32.mrf.mxu1 }
 0x5b9   : > { %v7095_v33 = vadd.f32 %v7094_v18, %v7045_v16 }
 0x5ba   : > { %v7138_v52 = vpop.f32.mrf.mxu2 }
 0x5bb   : > { %v7139_v26 = vadd.f32 %v7138_v52, %v7090_v15 }
 0x5bd   : > { %v7178_v9 = vadd.f32 %v7139_v26, %v6224_v55 }
 0x5bf   : > { %v7197_v35 = vadd.f32 %v11150_v24, %v7178_v9 }
 0x5c0   : > { %v7096_v43 = vpop.f32.mrf.mxu1 }
 0x5c1   : > { %v7213_v2 = vadd.f32 %v9039_v49, %v7197_v35  ;;  %v7097_v20 = vadd.f32 %v7096_v43, %v7047_v53  ;;  %v6240_v43 = vpop.f32.mrf.mxu3  ;;  %v6236_v49 = vadd.f32 %v6235_v29, %v11116_v23  ;;  %v9047_v35 = vunpack.c.l.bf16 %v9110_v28 }
 0x5c2   : > { %v7140_v61 = vpop.f32.mrf.mxu2  ;;  %v6239_v29 = vadd.f32 %v6238_v22, %v11119_v51  ;;  %v6241_v41 = vadd.f32 %v6240_v43, %v11122_v38 }
 0x5c3   : > { %v7141_v4 = vadd.f32 %v7140_v61, %v7092_v48  ;;  %v7229_v60 = vmax.f32 %v7213_v2, 0.0  ;;  %v7057_v48 = vpop.f32.mrf.mxu0 }
 0x5c5   : > { %v7179_v30 = vadd.f32 %v7141_v4, %v6226_v8 }
 0x5c7   : > { %v7198_v39 = vadd.f32 %v11150_v24, %v7179_v30 }
 0x5c8   : > { %v7099_v19 = vpop.f32.mrf.mxu1 }
 0x5c9   : > { %v7214_v37 = vadd.f32 %v9040_v14, %v7198_v39  ;;  %v7100_v50 = vadd.f32 %v7099_v19, %v7050_v59  ;;  %v9048_v14 = vunpack.c.h.bf16 %v9110_v28  ;;  %v6243_v39 = vpop.f32.mrf.mxu3 }
 0x5ca   : > { %v7143_v34 = vpop.f32.mrf.mxu2 }
 0x5cb   : > { %v7230_v62 = vmax.f32 %v7214_v37, 0.0  ;;  %v7144_v27 = vadd.f32 %v7143_v34, %v7095_v33  ;;  %v7060_v34 = vpop.f32.mrf.mxu0 }
 0x5cd   : > { %v9072_v46 = vpack.c.bf16 %v7230_v62, %v7229_v60  ;;  %v7180_v58 = vadd.f32 %v7144_v27, %v6229_v13  ;;  %v9111_v13 = vld [vmem:[%s9740_s7 + $0x18] sm:$0xff]  }
 0x5cf   : > { %9073 = vst [vmem:[%s9829_s10] sm:$0xff] %v9072_v46   ;;  %v7199_v6 = vadd.f32 %v11150_v24, %v7180_v58 }
 0x5d0   : > { %v7101_v40 = vpop.f32.mrf.mxu1 }
 0x5d1   : > { %v7215_v21 = vadd.f32 %v9043_v7, %v7199_v6  ;;  %v7102_v61 = vadd.f32 %v7101_v40, %v7052_v10 }
 0x5d2   : > { %v7145_v5 = vpop.f32.mrf.mxu2 }
 0x5d3   : > { %v7146_v12 = vadd.f32 %v7145_v5, %v7097_v20  ;;  %v7231_v53 = vmax.f32 %v7215_v21, 0.0  ;;  %v6245_v20 = vpop.f32.mrf.mxu3  ;;  %v9051_v5 = vunpack.c.l.bf16 %v9111_v13  ;;  %v7062_v6 = vpop.f32.mrf.mxu0 }
 0x5d4   : > { %v6246_v43 = vadd.f32 %v6245_v20, %v11128_v44 }
 0x5d5   : > { %v7181_v57 = vadd.f32 %v7146_v12, %v6231_v56  ;;  %v9052_v12 = vunpack.c.h.bf16 %v9111_v13 }
 0x5d7   : > { %v7200_v16 = vadd.f32 %v11150_v24, %v7181_v57 }
 0x5d8   : > { %v7104_v0 = vpop.f32.mrf.mxu1 }
 0x5d9   : > { %v7216_v18 = vadd.f32 %v9044_v17, %v7200_v16  ;;  %v7105_v19 = vadd.f32 %v7104_v0, %v7055_v3 }
 0x5da   : > { %v7148_v15 = vpop.f32.mrf.mxu2 }
 0x5db   : > { %v7232_v52 = vmax.f32 %v7216_v18, 0.0  ;;  %v7149_v1 = vadd.f32 %v7148_v15, %v7100_v50  ;;  %v6244_v18 = vadd.f32 %v6243_v39, %v11125_v11  ;;  %v6248_v15 = vpop.f32.mrf.mxu3 }
 0x5dd   : > { %v9077_v26 = vpack.c.bf16 %v7232_v52, %v7231_v53  ;;  %v7182_v9 = vadd.f32 %v7149_v1, %v6234_v36  ;;  %v7065_v52 = vpop.f32.mrf.mxu0  ;;  %v9112_v36 = vld [vmem:[%s9740_s7 + $0x20] sm:$0xff]  }
 0x5df   : > { %9116 = vst [vmem:[%s9829_s10 + $0x8] sm:$0xff] %v9077_v26   ;;  %v7201_v59 = vadd.f32 %v11150_v24, %v7182_v9  ;;  %v9055_v9 = vunpack.c.l.bf16 %v9112_v36 }
 0x5e0   : > { %v7106_v55 = vpop.f32.mrf.mxu1 }
 0x5e1   : > { %v7217_v32 = vadd.f32 %v9047_v35, %v7201_v59  ;;  %v7107_v46 = vadd.f32 %v7106_v55, %v7057_v48 }
 0x5e2   : > { %v7150_v8 = vpop.f32.mrf.mxu2 }
 0x5e3   : > { %v7151_v4 = vadd.f32 %v7150_v8, %v7102_v61  ;;  %v7233_v60 = vmax.f32 %v7217_v32, 0.0  ;;  %v9056_v61 = vunpack.c.h.bf16 %v9112_v36  ;;  %v6250_v11 = vpop.f32.mrf.mxu3 }
 0x5e5   : > { %v7183_v30 = vadd.f32 %v7151_v4, %v6236_v49 }
 0x5e7   : > { %v7202_v45 = vadd.f32 %v11150_v24, %v7183_v30 }
 0x5e8   : > { %v7109_v2 = vpop.f32.mrf.mxu1 }
 0x5e9   : > { %v7218_v33 = vadd.f32 %v9048_v14, %v7202_v45  ;;  %v7110_v57 = vadd.f32 %v7109_v2, %v7060_v34  ;;  %v7067_v14 = vpop.f32.mrf.mxu0  ;;  %v6249_v2 = vadd.f32 %v6248_v15, %v11131_v42 }
 0x5ea   : > { %v7153_v37 = vpop.f32.mrf.mxu2 }
 0x5eb   : > { %v7234_v62 = vmax.f32 %v7218_v33, 0.0  ;;  %v7154_v23 = vadd.f32 %v7153_v37, %v7105_v19  ;;  %v9113_v37 = vld [vmem:[%s9740_s7 + $0x28] sm:$0xff]  }
 0x5ed   : > { %v9082_v27 = vpack.c.bf16 %v7234_v62, %v7233_v60  ;;  %v7184_v10 = vadd.f32 %v7154_v23, %v6239_v29  ;;  %v6253_v60 = vpop.f32.mrf.mxu3 }
 0x5ef   : > { %9117 = vst [vmem:[%s9829_s10 + $0x10] sm:$0xff] %v9082_v27   ;;  %v7203_v56 = vadd.f32 %v11150_v24, %v7184_v10  ;;  %v6251_v27 = vadd.f32 %v6250_v11, %v11134_v54  ;;  %v9059_v10 = vunpack.c.l.bf16 %v9113_v37 }
 0x5f0   : > { %v7111_v58 = vpop.f32.mrf.mxu1 }
 0x5f1   : > { %v7219_v51 = vadd.f32 %v9051_v5, %v7203_v56  ;;  %v7112_v26 = vadd.f32 %v7111_v58, %v7062_v6  ;;  %v7070_v23 = vpop.f32.mrf.mxu0 }
 0x5f2   : > { %v7155_v40 = vpop.f32.mrf.mxu2 }
 0x5f3   : > { %v7156_v7 = vadd.f32 %v7155_v40, %v7107_v46  ;;  %v7235_v21 = vmax.f32 %v7219_v51, 0.0  ;;  %v9060_v40 = vunpack.c.h.bf16 %v9113_v37 }
 0x5f5   : > { %v7185_v17 = vadd.f32 %v7156_v7, %v6241_v41  ;;  %v6255_v51 = vpop.f32.mrf.mxu3 }
 0x5f7   : > { %v7204_v22 = vadd.f32 %v11150_v24, %v7185_v17 }
 0x5f8   : > { %v7114_v38 = vpop.f32.mrf.mxu1 }
 0x5f9   : > { %v7220_v3 = vadd.f32 %v9052_v12, %v7204_v22  ;;  %v7115_v4 = vadd.f32 %v7114_v38, %v7065_v52  ;;  %v7072_v54 = vpop.f32.mrf.mxu0  ;;  %v6254_v22 = vadd.f32 %v6253_v60, %v11137_v25 }
 0x5fa   : > { %v7158_v0 = vpop.f32.mrf.mxu2 }
 0x5fb   : > { %v7236_v16 = vmax.f32 %v7220_v3, 0.0  ;;  %v7159_v50 = vadd.f32 %v7158_v0, %v7110_v57  ;;  %v9114_v0 = vld [vmem:[%s9740_s7 + $0x30] sm:$0xff]  }
 0x5fc   : > { %v9063_v38 = vunpack.c.l.bf16 %v9114_v0  ;;  %v9064_v52 = vunpack.c.h.bf16 %v9114_v0 }
 0x5fd   : > { %v9087_v53 = vpack.c.bf16 %v7236_v16, %v7235_v21  ;;  %v7186_v1 = vadd.f32 %v7159_v50, %v6244_v18  ;;  %v6256_v50 = vadd.f32 %v6255_v51, %v11140_v31  ;;  %v6258_v36 = vpop.f32.mrf.mxu3 }
 0x5ff   : > { %9118 = vst [vmem:[%s9829_s10 + $0x18] sm:$0xff] %v9087_v53   ;;  %v7205_v28 = vadd.f32 %v11150_v24, %v7186_v1 }
 0x600   : > { %v7116_v49 = vpop.f32.mrf.mxu1 }
 0x601   : > { %v7221_v35 = vadd.f32 %v9055_v9, %v7205_v28  ;;  %v7117_v62 = vadd.f32 %v7116_v49, %v7067_v14  ;;  %v7075_v25 = vpop.f32.mrf.mxu0  ;;  %v9115_v14 = vld [vmem:[%s9740_s7 + $0x38] sm:$0xff]   ;;  %s7292_s7 = scalar_lea.hbm %s11385_s25, %s8722_s1 }
 0x602   : > { %v7160_v55 = vpop.f32.mrf.mxu2  ;;  %s7295_s16 = sshll.u32 %s7292_s7, 4  ;;  %s7296_s16 = int_to_ptr.hbm [resolvable:$true] %s7295_s16 }
 0x603   : > { %v7161_v48 = vadd.f32 %v7160_v55, %v7112_v26  ;;  %v7237_v45 = vmax.f32 %v7221_v35, 0.0  ;;  %s9375_s17 = sshra.s32 %s7296_s16, 4  ;;  %s9376_s17 = int_to_ptr.hbm [resolvable:$true] %s9375_s17 }
 0x604   : > { %s9377_s21 = scalar_lea.hbm %s9376_s17, 64  ;;  %p9382_p7 = scmp.lt.s32.totalorder %s9376_s17, %s11386_s8 }
 0x605   : > { %v7187_v8 = vadd.f32 %v7161_v48, %v6246_v43  ;;  %p9378_p2 = scmp.ne.s32.totalorder %s9376_s17, %s9377_s21  ;;  %p9383_p8 = scmp.lt.s32.totalorder %s9381_s15, %s9377_s21 }
 0x607   : > { %v7206_v59 = vadd.f32 %v11150_v24, %v7187_v8  ;;  %v6259_v8 = vadd.f32 %v6258_v36, %v11142_v63  ;;  %p9379_p3 = pnand %p9378_p2, %p9598_p6  ;;  %p9384_p9 = por %p9383_p8, %p9382_p7 }
 0x608   : > { %v7119_v34 = vpop.f32.mrf.mxu1 }
 0x609   : > { %v7222_v30 = vadd.f32 %v9056_v61, %v7206_v59  ;;  %v7120_v20 = vadd.f32 %v7119_v34, %v7070_v23  ;;  %v6260_v59 = vpop.f32.mrf.mxu3  ;;  %p9380_p5 = pneg %p9379_p3 }
 0x60a   : > { %v7163_v32 = vpop.f32.mrf.mxu2 }
 0x60b   : > { %v7238_v19 = vmax.f32 %v7222_v30, 0.0  ;;  %v7164_v44 = vadd.f32 %v7163_v32, %v7115_v4  ;;  %v7077_v4 = vpop.f32.mrf.mxu0  ;;  %p9385_p12 = pnand %p9384_p9, %p9380_p5 }
 0x60d   : > { %v9092_v39 = vpack.c.bf16 %v7238_v19, %v7237_v45  ;;  %v7188_v33 = vadd.f32 %v7164_v44, %v6249_v2  ;;  %v6261_v45 = vadd.f32 %v6260_v59, %v11144_v47  ;;  %v9067_v19 = vunpack.c.l.bf16 %v9115_v14 }
 0x60e   : > { %v9068_v2 = vunpack.c.h.bf16 %v9115_v14 }
 0x60f   : > { %9119 = vst [vmem:[%s9829_s10 + $0x20] sm:$0xff] %v9092_v39   ;;  %v7207_v13 = vadd.f32 %v11150_v24, %v7188_v33 }
 0x610   : > { %v7121_v7 = vpop.f32.mrf.mxu1 }
 0x611   : > { %v7223_v42 = vadd.f32 %v9059_v10, %v7207_v13  ;;  %v7122_v21 = vadd.f32 %v7121_v7, %v7072_v54 }
 0x612   : > { %v7165_v29 = vpop.f32.mrf.mxu2 }
 0x613   : > { %v7166_v46 = vadd.f32 %v7165_v29, %v7117_v62  ;;  %v7239_v6 = vmax.f32 %v7223_v42, 0.0 }
 0x615   : > { %v7189_v58 = vadd.f32 %v7166_v46, %v6251_v27 }
 0x617   : > { %v7208_v41 = vadd.f32 %v11150_v24, %v7189_v58 }
 0x618   : > { %v7124_v53 = vpop.f32.mrf.mxu1 }
 0x619   : > { %v7224_v5 = vadd.f32 %v9060_v40, %v7208_v41  ;;  %v7125_v43 = vadd.f32 %v7124_v53, %v7075_v25 }
 0x61a   : > { %v7168_v56 = vpop.f32.mrf.mxu2 }
 0x61b   : > { %v7240_v12 = vmax.f32 %v7224_v5, 0.0  ;;  %v7169_v17 = vadd.f32 %v7168_v56, %v7120_v20 }
 0x61d   : > { %v9097_v57 = vpack.c.bf16 %v7240_v12, %v7239_v6  ;;  %v7190_v3 = vadd.f32 %v7169_v17, %v6254_v22 }
 0x61f   : > { %9120 = vst [vmem:[%s9829_s10 + $0x28] sm:$0xff] %v9097_v57   ;;  %v7209_v18 = vadd.f32 %v11150_v24, %v7190_v3 }
 0x620   : > { %v7126_v11 = vpop.f32.mrf.mxu1 }
 0x621   : > { %v7225_v26 = vadd.f32 %v9063_v38, %v7209_v18  ;;  %v7127_v30 = vadd.f32 %v7126_v11, %v7077_v4 }
 0x622   : > { %v7170_v16 = vpop.f32.mrf.mxu2 }
 0x623   : > { %v7171_v15 = vadd.f32 %v7170_v16, %v7122_v21  ;;  %v7241_v31 = vmax.f32 %v7225_v26, 0.0 }
 0x625   : > { %v7191_v1 = vadd.f32 %v7171_v15, %v6256_v50 }
 0x627   : > { %v7210_v55 = vadd.f32 %v11150_v24, %v7191_v1 }
 0x629   : > { %v7226_v9 = vadd.f32 %v9064_v52, %v7210_v55 }
 0x62a   : > { %v7173_v28 = vpop.f32.mrf.mxu2 }
 0x62b   : > { %v7242_v48 = vmax.f32 %v7226_v9, 0.0  ;;  %v7174_v61 = vadd.f32 %v7173_v28, %v7125_v43 }
 0x62d   : > { %v9102_v49 = vpack.c.bf16 %v7242_v48, %v7241_v31  ;;  %v7192_v35 = vadd.f32 %v7174_v61, %v6259_v8 }
 0x62f   : > { %9121 = vst [vmem:[%s9829_s10 + $0x30] sm:$0xff] %v9102_v49   ;;  %v7211_v44 = vadd.f32 %v11150_v24, %v7192_v35 }
 0x631   : > { %v7227_v33 = vadd.f32 %v9067_v19, %v7211_v44 }
 0x632   : > { %v7175_v32 = vpop.f32.mrf.mxu2 }
 0x633   : > { %v7176_v63 = vadd.f32 %v7175_v32, %v7127_v30  ;;  %v7243_v47 = vmax.f32 %v7227_v33, 0.0 }
 0x635   : > { %v7193_v39 = vadd.f32 %v7176_v63, %v6261_v45 }
 0x637   : > { %v7212_v37 = vadd.f32 %v11150_v24, %v7193_v39 }
 0x639   : > { %v7228_v34 = vadd.f32 %v9068_v2, %v7212_v37 }
 0x63b   : > { %v7244_v60 = vmax.f32 %v7228_v34, 0.0 }
 0x63d   : > { %v9107_v62 = vpack.c.bf16 %v7244_v60, %v7243_v47 }
 0x63f   : > { %9122 = vst [vmem:[%s9829_s10 + $0x38] sm:$0xff] %v9107_v62  }
 0x640   : > { %9388 = shalt.err (!%p9385_p12)
}
 0x641   : > { %s9496_s18 = smov 64   ;;  %s9497_s10 = smov 4  }
 0x642   : > { %9149 = dma.vmem_to_hbm [thread:$0]  (%p9598_p6), %s7294_s29, 1024, %s7296_s16, %s7278_s13, %s9496_s18, %s9496_s18, %s9497_s10  }
 0x643 PF: > { %s11388_s9 = sld [smem:[#allocation14_spill]]  ;;  %p9171_p13 = scmp.ge.s32.totalorder %s9487_s28, 2 }
 0x645   : > { %p9163_p1 = pnand %p9171_p13, %p9604_p10 }
 0x647   : > { %p9164_p4 = pneg %p9163_p1 }
 0x649   : > { %s7310_s24 = sand.u32 1, %s11388_s9  }
 0x64a   : > { %s7311_s5 = scalar_lea.sflag [#allocation6], %s7310_s24 }
 0x64b   : > { %9442 = dma.done.wait (%p9164_p4), %s7311_s5, 1024  }
 0x64c   : > { %9444 = vsyncadd (%p9164_p4), %s7311_s5, 4294966272  ;;  %s22_s28 = sadd.s32 1, %s9487_s28   ;;  %s11390_s24 = sld [smem:[#allocation16_spill]] }
 0x64d   : > { %p19_p11 = scmp.ge.s32.totalorder %s22_s28, 6   ;;  %s11391_s26 = sld [smem:[#allocation19_spill]] }
 0x64e   : > { %s11392_s6 = sld [smem:[#allocation20_spill]]  ;;  %s11393_s18 = smov %s9451_s19 }
 0x64f   : > { %s11394_s19 = smov %s9455_s20  ;;  %s11395_s20 = smov %s9655_s14 }
 0x650   : > { %s11396_s21 = smov %s9463_s22  ;;  %s11397_s22 = smov %s9467_s23 }
 0x651   : > { %s11398_s23 = smov %s9652_s3  ;;  %s11399_s25 = smov %s9483_s27 }
 0x652   :  { %21 = sbr.rel (!%p19_p11) target bundleno = 14 (0xe), region = 116 }
 0x654   : > { %s11400_s27 = smov %s11392_s6 }
 0x657   :  { %7317 = vsyncpa [#allocation5], 1 }
 0x658   :  { %7319 = vsyncpa [#allocation5 + $0x1], 1 }
 0x659   :  { %7320 = vsyncpa [#allocation8], 1 }
 0x65a   :  { %7321 = vsyncpa [#allocation6], 1 }
 0x65b   :  { %7323 = vsyncpa [#allocation6 + $0x1], 1 }

</bundles_post_ra>
